<compile_context>
chip_gen: v6e
topology: v6e:2x2x1
jax: 0.10.0
libtpu: 0.0.40
codegen_flags: <defaults>
</compile_context>

<pallas_src>
import functools

import jax
import jax.numpy as jnp
import numpy as np
from jax import lax
from jax.experimental import pallas as pl
from jax.experimental.pallas import tpu as pltpu


# ---------------------------------------------------------------------------
# In-kernel helpers
# ---------------------------------------------------------------------------
def _zero_halo(pad_ref, H, W, C):
    """Zero the 1-px halo of a (H+2, W+2, C) VMEM scratch (interior untouched)."""
    z_row = jnp.zeros((1, W + 2, C), pad_ref.dtype)
    pad_ref[0:1, :, :] = z_row
    pad_ref[H + 1:H + 2, :, :] = z_row
    z_col = jnp.zeros((H + 2, 1, C), pad_ref.dtype)
    pad_ref[:, 0:1, :] = z_col
    pad_ref[:, W + 1:W + 2, :] = z_col


def _conv3x3_bias_relu(pad_ref, w_ref, b_ref, *, H, W, C, Cout):
    """3x3 VALID conv over a zero-haloed (H+2, W+2, C) VMEM scratch, +bias, +ReLU.

    Weights are (9*C, Cout) bf16 with the BN scale pre-folded; accumulation f32.
      * small C : build one (H*W, 9*C) im2col matrix -> single deep-K matmul
      * large C : K=C is already MXU-deep -> accumulate 9 matmuls, skip the
                  materialization of the big patch matrix.
    """
    def tap(dh, dw):
        return pad_ref[dh:dh + H, dw:dw + W, :].reshape(H * W, C)

    if 9 * C <= 288:                                   # C <= 32: merge all taps
        patches = jnp.concatenate(
            [tap(dh, dw) for dh in range(3) for dw in range(3)], axis=-1)
        acc = jnp.dot(patches.astype(jnp.bfloat16), w_ref[...],
                      preferred_element_type=jnp.float32)
    else:                                              # per-tap K is already deep
        acc = jnp.zeros((H * W, Cout), jnp.float32)
        t = 0
        for dh in range(3):
            for dw in range(3):
                acc = acc + jnp.dot(tap(dh, dw).astype(jnp.bfloat16),
                                    w_ref[t * C:(t + 1) * C, :],
                                    preferred_element_type=jnp.float32)
                t += 1
    return jnp.maximum(acc + b_ref[...], 0.0)          # folded BN bias + ReLU (f32)


# ---------------------------------------------------------------------------
# Fused DownConv kernel: conv1+BN+ReLU -> conv2+BN+ReLU -> (+integrate) -> pool
# ---------------------------------------------------------------------------
def _down_conv_kernel(x_ref, w1_ref, b1_ref, w2_ref, b2_ref, *rest,
                      H, W, Cin, Cout, has_integrate):
    if has_integrate:
        add_ref, bp_ref, pool_ref, xpad, hpad = rest
    else:
        add_ref = None
        bp_ref, pool_ref, xpad, hpad = rest

    # Stage 0: un-padded input block -> zero-haloed VMEM scratch (no HBM pad op).
    _zero_halo(xpad, H, W, Cin)
    xpad[1:H + 1, 1:W + 1, :] = x_ref[0]

    # conv1 + folded BN + ReLU (bf16 MXU operands, f32 accumulation).
    h = _conv3x3_bias_relu(xpad, w1_ref, b1_ref, H=H, W=W, C=Cin, Cout=Cout)

    # Keep `h` on-chip: bf16 into the second zero-haloed scratch (never hits HBM).
    _zero_halo(hpad, H, W, Cout)
    hpad[1:H + 1, 1:W + 1, :] = h.reshape(H, W, Cout).astype(hpad.dtype)

    # conv2 + folded BN + ReLU.
    y = _conv3x3_bias_relu(hpad, w2_ref, b2_ref, H=H, W=W, C=Cout, Cout=Cout)
    y = y.reshape(H, W, Cout)

    if has_integrate:                                  # add AFTER the second ReLU
        y = y + add_ref[0]

    bp_ref[0] = y.astype(bp_ref.dtype)                 # before_pool (lane-dense C)

    # 2x2 / stride-2 max-pool as maxima of slices (VPU selects, no reductions).
    yr = y.reshape(H // 2, 2, W, Cout)
    rows = jnp.maximum(yr[:, 0], yr[:, 1])             # (H/2, W, C)
    rc = rows.reshape(H // 2, W // 2, 2, Cout)
    pooled = jnp.maximum(rc[:, :, 0], rc[:, :, 1])     # (H/2, W/2, C)
    pool_ref[0] = pooled.astype(pool_ref.dtype)


def down_conv_pallas(x_nhwc, w1, b1, w2, b2, integrate_nhwc=None):
    """Fused DownConv on NHWC inputs. Returns (before_pool, pooled) in NHWC."""
    N, H, W, Cin = x_nhwc.shape
    Cout = w1.shape[-1]
    assert H % 2 == 0 and W % 2 == 0, "2x2/stride-2 max-pool needs even H and W"
    has_integrate = integrate_nhwc is not None

    kernel = functools.partial(_down_conv_kernel, H=H, W=W, Cin=Cin, Cout=Cout,
                               has_integrate=has_integrate)

    in_specs = [
        pl.BlockSpec((1, H, W, Cin), lambda n: (n, 0, 0, 0)),      # x (tiny Cin)
        pl.BlockSpec((9 * Cin, Cout), lambda n: (0, 0)),           # folded w1 bf16
        pl.BlockSpec((1, Cout), lambda n: (0, 0)),                 # folded bias1
        pl.BlockSpec((9 * Cout, Cout), lambda n: (0, 0)),          # folded w2 bf16
        pl.BlockSpec((1, Cout), lambda n: (0, 0)),                 # folded bias2
    ]
    args = [x_nhwc, w1, b1, w2, b2]
    if has_integrate:
        in_specs.append(pl.BlockSpec((1, H, W, Cout), lambda n: (n, 0, 0, 0)))
        args.append(integrate_nhwc)

    out_shape = (
        jax.ShapeDtypeStruct((N, H, W, Cout), jnp.float32),            # before_pool
        jax.ShapeDtypeStruct((N, H // 2, W // 2, Cout), jnp.float32),  # pooled
    )
    out_specs = (
        pl.BlockSpec((1, H, W, Cout), lambda n: (n, 0, 0, 0)),
        pl.BlockSpec((1, H // 2, W // 2, Cout), lambda n: (n, 0, 0, 0)),
    )

    return pl.pallas_call(
        kernel,
        grid=(N,),
        in_specs=in_specs,
        out_specs=out_specs,
        out_shape=out_shape,
        scratch_shapes=[
            pltpu.VMEM((H + 2, W + 2, Cin), jnp.float32),    # padded input
            pltpu.VMEM((H + 2, W + 2, Cout), jnp.bfloat16),  # padded intermediate h
        ],
        compiler_params=pltpu.CompilerParams(
            dimension_semantics=("parallel",),               # batch items independent
            vmem_limit_bytes=64 * 1024 * 1024,               # <= physical on all gens
        ),
    )(*args)


# ---------------------------------------------------------------------------
# Parameters, BN folding, public NCHW wrapper
# ---------------------------------------------------------------------------
def init_down_conv_params(key, cin, cout):
    """Conv weights/bias + non-trivial eval-mode BatchNorm stats for both blocks."""
    ks = jax.random.split(key, 12)

    def conv_bn(kw, kb, kg, kbe, km, kv, c_in, c_out):
        w = jax.random.normal(kw, (3, 3, c_in, c_out), jnp.float32) * 0.1   # HWIO
        b = jax.random.normal(kb, (c_out,), jnp.float32) * 0.1
        gamma = 1.0 + 0.2 * jax.random.normal(kg, (c_out,), jnp.float32)
        beta = 0.1 * jax.random.normal(kbe, (c_out,), jnp.float32)
        mean = 0.1 * jax.random.normal(km, (c_out,), jnp.float32)
        var = 1.0 + 0.2 * jax.random.uniform(kv, (c_out,), jnp.float32)
        return (w, b, gamma, beta, mean, var)

    return {"conv1": conv_bn(*ks[0:6], cin, cout),
            "conv2": conv_bn(*ks[6:12], cout, cout)}


def fold_params(params, eps=1e-5):
    """Fold eval-mode BN into conv weights/bias: y = conv(x, w*s) + ((b-m)*s + beta)."""
    def fold(w, b, gamma, beta, mean, var):
        s = gamma / jnp.sqrt(var + eps)
        return (w * s).astype(jnp.float32), ((b - mean) * s + beta).astype(jnp.float32)
    w1f, b1f = fold(*params["conv1"])
    w2f, b2f = fold(*params["conv2"])
    return w1f, b1f, w2f, b2f


def pack_for_kernel(w1f, b1f, w2f, b2f):
    cin, cout = w1f.shape[2], w1f.shape[3]
    w1k = w1f.astype(jnp.bfloat16).reshape(9 * cin, cout)     # (kh,kw,ci) -> rows
    w2k = w2f.astype(jnp.bfloat16).reshape(9 * cout, cout)
    return w1k, b1f.reshape(1, cout), w2k, b2f.reshape(1, cout)


def down_conv(x_nchw, params, integrate=None, pooling=True):
    """Pallas DownConv.forward. NCHW in, (x, before_pool) NCHW out (like PyTorch)."""
    w1k, b1k, w2k, b2k = pack_for_kernel(*fold_params(params))
    x = jnp.transpose(x_nchw, (0, 2, 3, 1)).astype(jnp.float32)        # NCHW -> NHWC
    integ = None
    if integrate is not None:
        integ = jnp.transpose(integrate, (0, 2, 3, 1)).astype(jnp.float32)
    before_pool, pooled = down_conv_pallas(x, w1k, b1k, w2k, b2k, integ)
    bp_nchw = jnp.transpose(before_pool, (0, 3, 1, 2))
    if pooling:
        return jnp.transpose(pooled, (0, 3, 1, 2)), bp_nchw
    return bp_nchw, bp_nchw


down_conv_jit = jax.jit(down_conv, static_argnames=("pooling",))


# ---------------------------------------------------------------------------
# Pure-JAX references for verification
# ---------------------------------------------------------------------------
def _ref_pool_and_pack(h_nhwc, integrate_nchw, pooling):
    if integrate_nchw is not None:
        h_nhwc = h_nhwc + jnp.transpose(integrate_nchw, (0, 2, 3, 1)).astype(jnp.float32)
    bp = jnp.transpose(h_nhwc, (0, 3, 1, 2))
    if pooling:
        p = lax.reduce_window(h_nhwc, -jnp.inf, lax.max, (1, 2, 2, 1), (1, 2, 2, 1), "VALID")
        return jnp.transpose(p, (0, 3, 1, 2)), bp
    return bp, bp


def down_conv_ref_f32(x_nchw, params, integrate=None, pooling=True, eps=1e-5):
    """Exact module semantics in f32 (conv + eval BN + ReLU, twice)."""
    x = jnp.transpose(x_nchw, (0, 2, 3, 1)).astype(jnp.float32)

    def block(h, w, b, gamma, beta, mean, var):
        y = lax.conv_general_dilated(h, w, (1, 1), "SAME",
                                     dimension_numbers=("NHWC", "HWIO", "NHWC")) + b
        y = (y - mean) / jnp.sqrt(var + eps) * gamma + beta
        return jnp.maximum(y, 0.0)

    h = block(x, *params["conv1"])
    h = block(h, *params["conv2"])
    return _ref_pool_and_pack(h, integrate, pooling)


def down_conv_ref_bf16ops(x_nchw, folded, integrate=None, pooling=True):
    """Same math but with bf16 conv operands / f32 accumulation, mirroring the kernel."""
    w1f, b1f, w2f, b2f = folded
    x = jnp.transpose(x_nchw, (0, 2, 3, 1)).astype(jnp.float32)

    def block(h, w_hwio, bias):
        y = lax.conv_general_dilated(
            h.astype(jnp.bfloat16), w_hwio.astype(jnp.bfloat16), (1, 1), "SAME",
            dimension_numbers=("NHWC", "HWIO", "NHWC"),
            preferred_element_type=jnp.float32)
        return jnp.maximum(y + bias, 0.0)

    h = block(x, w1f, b1f)
    h = block(h, w2f, b2f)
    return _ref_pool_and_pack(h, integrate, pooling)


# ---------------------------------------------------------------------------
if __name__ == "__main__":
    # Small but representative shapes: Cin=4 input channels, Cout=128 so the
    # channel (lane) axis of every stored block is fully dense (128 lanes).
    N, Cin, Cout, H, W = 2, 4, 128, 16, 16
    key = jax.random.PRNGKey(0)
    k_x, k_p, k_i = jax.random.split(key, 3)

    x = jax.random.normal(k_x, (N, Cin, H, W), jnp.float32)            # NCHW
    params = init_down_conv_params(k_p, Cin, Cout)
    integrate = jax.random.normal(k_i, (N, Cout, H, W), jnp.float32)   # NCHW

    # General path: integrate + pooling.
    pooled, before_pool = down_conv_jit(x, params, integrate=integrate, pooling=True)
    jax.block_until_ready((pooled, before_pool))

    folded = fold_params(params)
    # Tight check vs a reference that mirrors the kernel numerics (bf16 MXU operands).
    p_ref, bp_ref = down_conv_ref_bf16ops(x, folded, integrate=integrate, pooling=True)
    np.testing.assert_allclose(np.asarray(before_pool), np.asarray(bp_ref),
                               rtol=2e-3, atol=2e-3)
    np.testing.assert_allclose(np.asarray(pooled), np.asarray(p_ref),
                               rtol=2e-3, atol=2e-3)
    # Loose sanity check vs the exact f32 module semantics (bf16 operand rounding).
    p_f32, bp_f32 = down_conv_ref_f32(x, params, integrate=integrate, pooling=True)
    np.testing.assert_allclose(np.asarray(before_pool), np.asarray(bp_f32),
                               rtol=1e-1, atol=1e-1)
    np.testing.assert_allclose(np.asarray(pooled), np.asarray(p_f32),
                               rtol=1e-1, atol=1e-1)

    # integrate=None path: specialized kernel variant, no zeros tensor in HBM.
    p2, bp2 = down_conv_jit(x, params, integrate=None, pooling=True)
    jax.block_until_ready((p2, bp2))
    p2_ref, bp2_ref = down_conv_ref_bf16ops(x, folded, integrate=None, pooling=True)
    np.testing.assert_allclose(np.asarray(bp2), np.asarray(bp2_ref), rtol=2e-3, atol=2e-3)
    np.testing.assert_allclose(np.asarray(p2), np.asarray(p2_ref), rtol=2e-3, atol=2e-3)

    assert pooled.shape == (N, Cout, H // 2, W // 2)
    assert before_pool.shape == (N, Cout, H, W)
    print("KERNEL_OK")
</pallas_src>

<mosaic_0001>
module attributes {stable_mosaic.version = 11 : i64} {
  func.func @_down_conv_kernel(%arg0: i32, %arg1: memref<1x16x16x4xf32, #tpu.memory_space<vmem>>, %arg2: memref<36x128xbf16, #tpu.memory_space<vmem>>, %arg3: memref<1x128xf32, #tpu.memory_space<vmem>>, %arg4: memref<1152x128xbf16, #tpu.memory_space<vmem>>, %arg5: memref<1x128xf32, #tpu.memory_space<vmem>>, %arg6: memref<1x16x16x128xf32, #tpu.memory_space<vmem>>, %arg7: memref<1x16x16x128xf32, #tpu.memory_space<vmem>>, %arg8: memref<1x8x8x128xf32, #tpu.memory_space<vmem>>, %arg9: memref<18x18x4xf32, #tpu.memory_space<vmem>>, %arg10: memref<18x18x128xbf16, #tpu.memory_space<vmem>>) attributes {dimension_semantics = [#tpu.dimension_semantics<parallel>], iteration_bounds = array<i64: 2>, scalar_prefetch = 0 : i64, scratch_operands = 2 : i64, tpu.core_type = #tpu.core_type<tc>, window_params = [{transform_indices = @transform_0, window_bounds = array<i64: 1, 16, 16, 4>}, {pipeline_mode = #tpu.pipeline_mode<synchronous>, transform_indices = @transform_1, window_bounds = array<i64: 36, 128>}, {pipeline_mode = #tpu.pipeline_mode<synchronous>, transform_indices = @transform_2, window_bounds = array<i64: 1, 128>}, {pipeline_mode = #tpu.pipeline_mode<synchronous>, transform_indices = @transform_3, window_bounds = array<i64: 1152, 128>}, {pipeline_mode = #tpu.pipeline_mode<synchronous>, transform_indices = @transform_4, window_bounds = array<i64: 1, 128>}, {transform_indices = @transform_5, window_bounds = array<i64: 1, 16, 16, 128>}, {transform_indices = @transform_6, window_bounds = array<i64: 1, 16, 16, 128>}, {transform_indices = @transform_7, window_bounds = array<i64: 1, 8, 8, 128>}]} {
    %cst = arith.constant 0.000000e+00 : f32
    %0 = vector.broadcast %cst : f32 to vector<1x18x4xf32>
    %c0 = arith.constant 0 : index
    %c0_0 = arith.constant 0 : index
    %c0_1 = arith.constant 0 : index
    %1 = vector.load %arg9[%c0, %c0_0, %c0_1] : memref<18x18x4xf32, #tpu.memory_space<vmem>>, vector<1x18x4xf32>
    tpu.vector_store %arg9[%c0, %c0_0, %c0_1], %0 {strides = array<i32>} : memref<18x18x4xf32, #tpu.memory_space<vmem>>, vector<1x18x4xf32>,
    %c17 = arith.constant 17 : index
    %c0_2 = arith.constant 0 : index
    %c0_3 = arith.constant 0 : index
    %2 = vector.load %arg9[%c17, %c0_2, %c0_3] : memref<18x18x4xf32, #tpu.memory_space<vmem>>, vector<1x18x4xf32>
    tpu.vector_store %arg9[%c17, %c0_2, %c0_3], %0 {strides = array<i32>} : memref<18x18x4xf32, #tpu.memory_space<vmem>>, vector<1x18x4xf32>,
    %cst_4 = arith.constant 0.000000e+00 : f32
    %3 = vector.broadcast %cst_4 : f32 to vector<18x1x4xf32>
    %c0_5 = arith.constant 0 : index
    %c0_6 = arith.constant 0 : index
    %c0_7 = arith.constant 0 : index
    %4 = vector.load %arg9[%c0_5, %c0_6, %c0_7] : memref<18x18x4xf32, #tpu.memory_space<vmem>>, vector<18x1x4xf32>
    tpu.vector_store %arg9[%c0_5, %c0_6, %c0_7], %3 {strides = array<i32>} : memref<18x18x4xf32, #tpu.memory_space<vmem>>, vector<18x1x4xf32>,
    %c0_8 = arith.constant 0 : index
    %c17_9 = arith.constant 17 : index
    %c0_10 = arith.constant 0 : index
    %5 = vector.load %arg9[%c0_8, %c17_9, %c0_10] : memref<18x18x4xf32, #tpu.memory_space<vmem>>, vector<18x1x4xf32>
    tpu.vector_store %arg9[%c0_8, %c17_9, %c0_10], %3 {strides = array<i32>} : memref<18x18x4xf32, #tpu.memory_space<vmem>>, vector<18x1x4xf32>,
    %c0_11 = arith.constant 0 : index
    %c0_12 = arith.constant 0 : index
    %c0_13 = arith.constant 0 : index
    %c0_14 = arith.constant 0 : index
    %6 = vector.load %arg1[%c0_11, %c0_12, %c0_13, %c0_14] : memref<1x16x16x4xf32, #tpu.memory_space<vmem>>, vector<1x16x16x4xf32>
    %7 = vector.shape_cast %6 : vector<1x16x16x4xf32> to vector<16x16x4xf32>
    %c1 = arith.constant 1 : index
    %c1_15 = arith.constant 1 : index
    %c0_16 = arith.constant 0 : index
    %8 = vector.load %arg9[%c1, %c1_15, %c0_16] : memref<18x18x4xf32, #tpu.memory_space<vmem>>, vector<16x16x4xf32>
    tpu.vector_store %arg9[%c1, %c1_15, %c0_16], %7 {strides = array<i32>} : memref<18x18x4xf32, #tpu.memory_space<vmem>>, vector<16x16x4xf32>,
    %c0_17 = arith.constant 0 : index
    %c0_18 = arith.constant 0 : index
    %c0_19 = arith.constant 0 : index
    %9 = vector.load %arg9[%c0_17, %c0_18, %c0_19] : memref<18x18x4xf32, #tpu.memory_space<vmem>>, vector<16x16x4xf32>
    %10 = vector.shape_cast %9 : vector<16x16x4xf32> to vector<256x4xf32>
    %c0_20 = arith.constant 0 : index
    %c1_21 = arith.constant 1 : index
    %c0_22 = arith.constant 0 : index
    %11 = vector.load %arg9[%c0_20, %c1_21, %c0_22] : memref<18x18x4xf32, #tpu.memory_space<vmem>>, vector<16x16x4xf32>
    %12 = vector.shape_cast %11 : vector<16x16x4xf32> to vector<256x4xf32>
    %c0_23 = arith.constant 0 : index
    %c2 = arith.constant 2 : index
    %c0_24 = arith.constant 0 : index
    %13 = vector.load %arg9[%c0_23, %c2, %c0_24] : memref<18x18x4xf32, #tpu.memory_space<vmem>>, vector<16x16x4xf32>
    %14 = vector.shape_cast %13 : vector<16x16x4xf32> to vector<256x4xf32>
    %c1_25 = arith.constant 1 : index
    %c0_26 = arith.constant 0 : index
    %c0_27 = arith.constant 0 : index
    %15 = vector.load %arg9[%c1_25, %c0_26, %c0_27] : memref<18x18x4xf32, #tpu.memory_space<vmem>>, vector<16x16x4xf32>
    %16 = vector.shape_cast %15 : vector<16x16x4xf32> to vector<256x4xf32>
    %c1_28 = arith.constant 1 : index
    %c1_29 = arith.constant 1 : index
    %c0_30 = arith.constant 0 : index
    %17 = vector.load %arg9[%c1_28, %c1_29, %c0_30] : memref<18x18x4xf32, #tpu.memory_space<vmem>>, vector<16x16x4xf32>
    %18 = vector.shape_cast %17 : vector<16x16x4xf32> to vector<256x4xf32>
    %c1_31 = arith.constant 1 : index
    %c2_32 = arith.constant 2 : index
    %c0_33 = arith.constant 0 : index
    %19 = vector.load %arg9[%c1_31, %c2_32, %c0_33] : memref<18x18x4xf32, #tpu.memory_space<vmem>>, vector<16x16x4xf32>
    %20 = vector.shape_cast %19 : vector<16x16x4xf32> to vector<256x4xf32>
    %c2_34 = arith.constant 2 : index
    %c0_35 = arith.constant 0 : index
    %c0_36 = arith.constant 0 : index
    %21 = vector.load %arg9[%c2_34, %c0_35, %c0_36] : memref<18x18x4xf32, #tpu.memory_space<vmem>>, vector<16x16x4xf32>
    %22 = vector.shape_cast %21 : vector<16x16x4xf32> to vector<256x4xf32>
    %c2_37 = arith.constant 2 : index
    %c1_38 = arith.constant 1 : index
    %c0_39 = arith.constant 0 : index
    %23 = vector.load %arg9[%c2_37, %c1_38, %c0_39] : memref<18x18x4xf32, #tpu.memory_space<vmem>>, vector<16x16x4xf32>
    %24 = vector.shape_cast %23 : vector<16x16x4xf32> to vector<256x4xf32>
    %c2_40 = arith.constant 2 : index
    %c2_41 = arith.constant 2 : index
    %c0_42 = arith.constant 0 : index
    %25 = vector.load %arg9[%c2_40, %c2_41, %c0_42] : memref<18x18x4xf32, #tpu.memory_space<vmem>>, vector<16x16x4xf32>
    %26 = vector.shape_cast %25 : vector<16x16x4xf32> to vector<256x4xf32>
    %27 = tpu.concatenate %10, %12, %14, %16, %18, %20, %22, %24, %26 in 1 : vector<256x4xf32>, vector<256x4xf32>, vector<256x4xf32>, vector<256x4xf32>, vector<256x4xf32>, vector<256x4xf32>, vector<256x4xf32>, vector<256x4xf32>, vector<256x4xf32> -> vector<256x36xf32>
    %28 = arith.truncf %27 : vector<256x36xf32> to vector<256x36xbf16>
    %c0_43 = arith.constant 0 : index
    %c0_44 = arith.constant 0 : index
    %29 = vector.load %arg2[%c0_43, %c0_44] : memref<36x128xbf16, #tpu.memory_space<vmem>>, vector<36x128xbf16>
    %cst_45 = arith.constant dense<0.000000e+00> : vector<256x128xf32>
    %30 = tpu.matmul %28, %29, %cst_45 {dimension_numbers = #tpu.dot_dimension_numbers<[1], [0], [0], [1], [0, 0, 1, 1], [], []>} : vector<256x36xbf16>, vector<36x128xbf16>, vector<256x128xf32> -> vector<256x128xf32>
    %c0_46 = arith.constant 0 : index
    %c0_47 = arith.constant 0 : index
    %31 = vector.load %arg3[%c0_46, %c0_47] : memref<1x128xf32, #tpu.memory_space<vmem>>, vector<1x128xf32>
    %32 = vector.broadcast %31 : vector<1x128xf32> to vector<256x128xf32>
    %33 = arith.addf %30, %32 : vector<256x128xf32>
    %cst_48 = arith.constant 0.000000e+00 : f32
    %34 = vector.broadcast %cst_48 : f32 to vector<256x128xf32>
    %35 = arith.maximumf %33, %34 : vector<256x128xf32>
    %cst_49 = arith.constant 0.000000e+00 : bf16
    %36 = vector.broadcast %cst_49 : bf16 to vector<1x18x128xbf16>
    %c0_50 = arith.constant 0 : index
    %c0_51 = arith.constant 0 : index
    %c0_52 = arith.constant 0 : index
    %37 = vector.load %arg10[%c0_50, %c0_51, %c0_52] : memref<18x18x128xbf16, #tpu.memory_space<vmem>>, vector<1x18x128xbf16>
    tpu.vector_store %arg10[%c0_50, %c0_51, %c0_52], %36 {strides = array<i32>} : memref<18x18x128xbf16, #tpu.memory_space<vmem>>, vector<1x18x128xbf16>,
    %c17_53 = arith.constant 17 : index
    %c0_54 = arith.constant 0 : index
    %c0_55 = arith.constant 0 : index
    %38 = vector.load %arg10[%c17_53, %c0_54, %c0_55] : memref<18x18x128xbf16, #tpu.memory_space<vmem>>, vector<1x18x128xbf16>
    tpu.vector_store %arg10[%c17_53, %c0_54, %c0_55], %36 {strides = array<i32>} : memref<18x18x128xbf16, #tpu.memory_space<vmem>>, vector<1x18x128xbf16>,
    %cst_56 = arith.constant 0.000000e+00 : bf16
    %39 = vector.broadcast %cst_56 : bf16 to vector<18x1x128xbf16>
    %c0_57 = arith.constant 0 : index
    %c0_58 = arith.constant 0 : index
    %c0_59 = arith.constant 0 : index
    %40 = vector.load %arg10[%c0_57, %c0_58, %c0_59] : memref<18x18x128xbf16, #tpu.memory_space<vmem>>, vector<18x1x128xbf16>
    tpu.vector_store %arg10[%c0_57, %c0_58, %c0_59], %39 {strides = array<i32>} : memref<18x18x128xbf16, #tpu.memory_space<vmem>>, vector<18x1x128xbf16>,
    %c0_60 = arith.constant 0 : index
    %c17_61 = arith.constant 17 : index
    %c0_62 = arith.constant 0 : index
    %41 = vector.load %arg10[%c0_60, %c17_61, %c0_62] : memref<18x18x128xbf16, #tpu.memory_space<vmem>>, vector<18x1x128xbf16>
    tpu.vector_store %arg10[%c0_60, %c17_61, %c0_62], %39 {strides = array<i32>} : memref<18x18x128xbf16, #tpu.memory_space<vmem>>, vector<18x1x128xbf16>,
    %42 = vector.shape_cast %35 : vector<256x128xf32> to vector<16x16x128xf32>
    %43 = arith.truncf %42 : vector<16x16x128xf32> to vector<16x16x128xbf16>
    %c1_63 = arith.constant 1 : index
    %c1_64 = arith.constant 1 : index
    %c0_65 = arith.constant 0 : index
    %44 = vector.load %arg10[%c1_63, %c1_64, %c0_65] : memref<18x18x128xbf16, #tpu.memory_space<vmem>>, vector<16x16x128xbf16>
    tpu.vector_store %arg10[%c1_63, %c1_64, %c0_65], %43 {strides = array<i32>} : memref<18x18x128xbf16, #tpu.memory_space<vmem>>, vector<16x16x128xbf16>,
    %cst_66 = arith.constant 0.000000e+00 : f32
    %45 = vector.broadcast %cst_66 : f32 to vector<256x128xf32>
    %c0_67 = arith.constant 0 : index
    %c0_68 = arith.constant 0 : index
    %c0_69 = arith.constant 0 : index
    %46 = vector.load %arg10[%c0_67, %c0_68, %c0_69] : memref<18x18x128xbf16, #tpu.memory_space<vmem>>, vector<16x16x128xbf16>
    %47 = vector.shape_cast %46 : vector<16x16x128xbf16> to vector<256x128xbf16>
    %c0_70 = arith.constant 0 : index
    %c0_71 = arith.constant 0 : index
    %48 = vector.load %arg4[%c0_70, %c0_71] : memref<1152x128xbf16, #tpu.memory_space<vmem>>, vector<128x128xbf16>
    %cst_72 = arith.constant dense<0.000000e+00> : vector<256x128xf32>
    %49 = tpu.matmul %47, %48, %cst_72 {dimension_numbers = #tpu.dot_dimension_numbers<[1], [0], [0], [1], [0, 0, 1, 1], [], []>} : vector<256x128xbf16>, vector<128x128xbf16>, vector<256x128xf32> -> vector<256x128xf32>
    %50 = arith.addf %45, %49 : vector<256x128xf32>
    %c0_73 = arith.constant 0 : index
    %c1_74 = arith.constant 1 : index
    %c0_75 = arith.constant 0 : index
    %51 = vector.load %arg10[%c0_73, %c1_74, %c0_75] : memref<18x18x128xbf16, #tpu.memory_space<vmem>>, vector<16x16x128xbf16>
    %52 = vector.shape_cast %51 : vector<16x16x128xbf16> to vector<256x128xbf16>
    %c128 = arith.constant 128 : index
    %c0_76 = arith.constant 0 : index
    %53 = vector.load %arg4[%c128, %c0_76] : memref<1152x128xbf16, #tpu.memory_space<vmem>>, vector<128x128xbf16>
    %cst_77 = arith.constant dense<0.000000e+00> : vector<256x128xf32>
    %54 = tpu.matmul %52, %53, %cst_77 {dimension_numbers = #tpu.dot_dimension_numbers<[1], [0], [0], [1], [0, 0, 1, 1], [], []>} : vector<256x128xbf16>, vector<128x128xbf16>, vector<256x128xf32> -> vector<256x128xf32>
    %55 = arith.addf %50, %54 : vector<256x128xf32>
    %c0_78 = arith.constant 0 : index
    %c2_79 = arith.constant 2 : index
    %c0_80 = arith.constant 0 : index
    %56 = vector.load %arg10[%c0_78, %c2_79, %c0_80] : memref<18x18x128xbf16, #tpu.memory_space<vmem>>, vector<16x16x128xbf16>
    %57 = vector.shape_cast %56 : vector<16x16x128xbf16> to vector<256x128xbf16>
    %c256 = arith.constant 256 : index
    %c0_81 = arith.constant 0 : index
    %58 = vector.load %arg4[%c256, %c0_81] : memref<1152x128xbf16, #tpu.memory_space<vmem>>, vector<128x128xbf16>
    %cst_82 = arith.constant dense<0.000000e+00> : vector<256x128xf32>
    %59 = tpu.matmul %57, %58, %cst_82 {dimension_numbers = #tpu.dot_dimension_numbers<[1], [0], [0], [1], [0, 0, 1, 1], [], []>} : vector<256x128xbf16>, vector<128x128xbf16>, vector<256x128xf32> -> vector<256x128xf32>
    %60 = arith.addf %55, %59 : vector<256x128xf32>
    %c1_83 = arith.constant 1 : index
    %c0_84 = arith.constant 0 : index
    %c0_85 = arith.constant 0 : index
    %61 = vector.load %arg10[%c1_83, %c0_84, %c0_85] : memref<18x18x128xbf16, #tpu.memory_space<vmem>>, vector<16x16x128xbf16>
    %62 = vector.shape_cast %61 : vector<16x16x128xbf16> to vector<256x128xbf16>
    %c384 = arith.constant 384 : index
    %c0_86 = arith.constant 0 : index
    %63 = vector.load %arg4[%c384, %c0_86] : memref<1152x128xbf16, #tpu.memory_space<vmem>>, vector<128x128xbf16>
    %cst_87 = arith.constant dense<0.000000e+00> : vector<256x128xf32>
    %64 = tpu.matmul %62, %63, %cst_87 {dimension_numbers = #tpu.dot_dimension_numbers<[1], [0], [0], [1], [0, 0, 1, 1], [], []>} : vector<256x128xbf16>, vector<128x128xbf16>, vector<256x128xf32> -> vector<256x128xf32>
    %65 = arith.addf %60, %64 : vector<256x128xf32>
    %c1_88 = arith.constant 1 : index
    %c1_89 = arith.constant 1 : index
    %c0_90 = arith.constant 0 : index
    %66 = vector.load %arg10[%c1_88, %c1_89, %c0_90] : memref<18x18x128xbf16, #tpu.memory_space<vmem>>, vector<16x16x128xbf16>
    %67 = vector.shape_cast %66 : vector<16x16x128xbf16> to vector<256x128xbf16>
    %c512 = arith.constant 512 : index
    %c0_91 = arith.constant 0 : index
    %68 = vector.load %arg4[%c512, %c0_91] : memref<1152x128xbf16, #tpu.memory_space<vmem>>, vector<128x128xbf16>
    %cst_92 = arith.constant dense<0.000000e+00> : vector<256x128xf32>
    %69 = tpu.matmul %67, %68, %cst_92 {dimension_numbers = #tpu.dot_dimension_numbers<[1], [0], [0], [1], [0, 0, 1, 1], [], []>} : vector<256x128xbf16>, vector<128x128xbf16>, vector<256x128xf32> -> vector<256x128xf32>
    %70 = arith.addf %65, %69 : vector<256x128xf32>
    %c1_93 = arith.constant 1 : index
    %c2_94 = arith.constant 2 : index
    %c0_95 = arith.constant 0 : index
    %71 = vector.load %arg10[%c1_93, %c2_94, %c0_95] : memref<18x18x128xbf16, #tpu.memory_space<vmem>>, vector<16x16x128xbf16>
    %72 = vector.shape_cast %71 : vector<16x16x128xbf16> to vector<256x128xbf16>
    %c640 = arith.constant 640 : index
    %c0_96 = arith.constant 0 : index
    %73 = vector.load %arg4[%c640, %c0_96] : memref<1152x128xbf16, #tpu.memory_space<vmem>>, vector<128x128xbf16>
    %cst_97 = arith.constant dense<0.000000e+00> : vector<256x128xf32>
    %74 = tpu.matmul %72, %73, %cst_97 {dimension_numbers = #tpu.dot_dimension_numbers<[1], [0], [0], [1], [0, 0, 1, 1], [], []>} : vector<256x128xbf16>, vector<128x128xbf16>, vector<256x128xf32> -> vector<256x128xf32>
    %75 = arith.addf %70, %74 : vector<256x128xf32>
    %c2_98 = arith.constant 2 : index
    %c0_99 = arith.constant 0 : index
    %c0_100 = arith.constant 0 : index
    %76 = vector.load %arg10[%c2_98, %c0_99, %c0_100] : memref<18x18x128xbf16, #tpu.memory_space<vmem>>, vector<16x16x128xbf16>
    %77 = vector.shape_cast %76 : vector<16x16x128xbf16> to vector<256x128xbf16>
    %c768 = arith.constant 768 : index
    %c0_101 = arith.constant 0 : index
    %78 = vector.load %arg4[%c768, %c0_101] : memref<1152x128xbf16, #tpu.memory_space<vmem>>, vector<128x128xbf16>
    %cst_102 = arith.constant dense<0.000000e+00> : vector<256x128xf32>
    %79 = tpu.matmul %77, %78, %cst_102 {dimension_numbers = #tpu.dot_dimension_numbers<[1], [0], [0], [1], [0, 0, 1, 1], [], []>} : vector<256x128xbf16>, vector<128x128xbf16>, vector<256x128xf32> -> vector<256x128xf32>
    %80 = arith.addf %75, %79 : vector<256x128xf32>
    %c2_103 = arith.constant 2 : index
    %c1_104 = arith.constant 1 : index
    %c0_105 = arith.constant 0 : index
    %81 = vector.load %arg10[%c2_103, %c1_104, %c0_105] : memref<18x18x128xbf16, #tpu.memory_space<vmem>>, vector<16x16x128xbf16>
    %82 = vector.shape_cast %81 : vector<16x16x128xbf16> to vector<256x128xbf16>
    %c896 = arith.constant 896 : index
    %c0_106 = arith.constant 0 : index
    %83 = vector.load %arg4[%c896, %c0_106] : memref<1152x128xbf16, #tpu.memory_space<vmem>>, vector<128x128xbf16>
    %cst_107 = arith.constant dense<0.000000e+00> : vector<256x128xf32>
    %84 = tpu.matmul %82, %83, %cst_107 {dimension_numbers = #tpu.dot_dimension_numbers<[1], [0], [0], [1], [0, 0, 1, 1], [], []>} : vector<256x128xbf16>, vector<128x128xbf16>, vector<256x128xf32> -> vector<256x128xf32>
    %85 = arith.addf %80, %84 : vector<256x128xf32>
    %c2_108 = arith.constant 2 : index
    %c2_109 = arith.constant 2 : index
    %c0_110 = arith.constant 0 : index
    %86 = vector.load %arg10[%c2_108, %c2_109, %c0_110] : memref<18x18x128xbf16, #tpu.memory_space<vmem>>, vector<16x16x128xbf16>
    %87 = vector.shape_cast %86 : vector<16x16x128xbf16> to vector<256x128xbf16>
    %c1024 = arith.constant 1024 : index
    %c0_111 = arith.constant 0 : index
    %88 = vector.load %arg4[%c1024, %c0_111] : memref<1152x128xbf16, #tpu.memory_space<vmem>>, vector<128x128xbf16>
    %cst_112 = arith.constant dense<0.000000e+00> : vector<256x128xf32>
    %89 = tpu.matmul %87, %88, %cst_112 {dimension_numbers = #tpu.dot_dimension_numbers<[1], [0], [0], [1], [0, 0, 1, 1], [], []>} : vector<256x128xbf16>, vector<128x128xbf16>, vector<256x128xf32> -> vector<256x128xf32>
    %90 = arith.addf %85, %89 : vector<256x128xf32>
    %c0_113 = arith.constant 0 : index
    %c0_114 = arith.constant 0 : index
    %91 = vector.load %arg5[%c0_113, %c0_114] : memref<1x128xf32, #tpu.memory_space<vmem>>, vector<1x128xf32>
    %92 = vector.broadcast %91 : vector<1x128xf32> to vector<256x128xf32>
    %93 = arith.addf %90, %92 : vector<256x128xf32>
    %cst_115 = arith.constant 0.000000e+00 : f32
    %94 = vector.broadcast %cst_115 : f32 to vector<256x128xf32>
    %95 = arith.maximumf %93, %94 : vector<256x128xf32>
    %96 = vector.shape_cast %95 : vector<256x128xf32> to vector<16x16x128xf32>
    %c0_116 = arith.constant 0 : index
    %c0_117 = arith.constant 0 : index
    %c0_118 = arith.constant 0 : index
    %c0_119 = arith.constant 0 : index
    %97 = vector.load %arg6[%c0_116, %c0_117, %c0_118, %c0_119] : memref<1x16x16x128xf32, #tpu.memory_space<vmem>>, vector<1x16x16x128xf32>
    %98 = vector.shape_cast %97 : vector<1x16x16x128xf32> to vector<16x16x128xf32>
    %99 = arith.addf %96, %98 : vector<16x16x128xf32>
    %c0_120 = arith.constant 0 : index
    %c0_121 = arith.constant 0 : index
    %c0_122 = arith.constant 0 : index
    %c0_123 = arith.constant 0 : index
    %100 = vector.load %arg7[%c0_120, %c0_121, %c0_122, %c0_123] : memref<1x16x16x128xf32, #tpu.memory_space<vmem>>, vector<1x16x16x128xf32>
    %101 = vector.shape_cast %100 : vector<1x16x16x128xf32> to vector<16x16x128xf32>
    %102 = vector.shape_cast %99 : vector<16x16x128xf32> to vector<1x16x16x128xf32>
    tpu.vector_store %arg7[%c0_120, %c0_121, %c0_122, %c0_123], %102 {strides = array<i32>} : memref<1x16x16x128xf32, #tpu.memory_space<vmem>>, vector<1x16x16x128xf32>,
    %103 = vector.shape_cast %99 : vector<16x16x128xf32> to vector<8x2x16x128xf32>
    %104 = vector.extract_strided_slice %103 {offsets = [0, 0, 0, 0], sizes = [8, 1, 16, 128], strides = [1, 1, 1, 1]} : vector<8x2x16x128xf32> to vector<8x1x16x128xf32>
    %105 = vector.shape_cast %104 : vector<8x1x16x128xf32> to vector<8x16x128xf32>
    %106 = vector.extract_strided_slice %103 {offsets = [0, 1, 0, 0], sizes = [8, 1, 16, 128], strides = [1, 1, 1, 1]} : vector<8x2x16x128xf32> to vector<8x1x16x128xf32>
    %107 = vector.shape_cast %106 : vector<8x1x16x128xf32> to vector<8x16x128xf32>
    %108 = arith.maximumf %105, %107 : vector<8x16x128xf32>
    %109 = vector.shape_cast %108 : vector<8x16x128xf32> to vector<8x8x2x128xf32>
    %110 = vector.extract_strided_slice %109 {offsets = [0, 0, 0, 0], sizes = [8, 8, 1, 128], strides = [1, 1, 1, 1]} : vector<8x8x2x128xf32> to vector<8x8x1x128xf32>
    %111 = vector.shape_cast %110 : vector<8x8x1x128xf32> to vector<8x8x128xf32>
    %112 = vector.extract_strided_slice %109 {offsets = [0, 0, 1, 0], sizes = [8, 8, 1, 128], strides = [1, 1, 1, 1]} : vector<8x8x2x128xf32> to vector<8x8x1x128xf32>
    %113 = vector.shape_cast %112 : vector<8x8x1x128xf32> to vector<8x8x128xf32>
    %114 = arith.maximumf %111, %113 : vector<8x8x128xf32>
    %c0_124 = arith.constant 0 : index
    %c0_125 = arith.constant 0 : index
    %c0_126 = arith.constant 0 : index
    %c0_127 = arith.constant 0 : index
    %115 = vector.load %arg8[%c0_124, %c0_125, %c0_126, %c0_127] : memref<1x8x8x128xf32, #tpu.memory_space<vmem>>, vector<1x8x8x128xf32>
    %116 = vector.shape_cast %115 : vector<1x8x8x128xf32> to vector<8x8x128xf32>
    %117 = vector.shape_cast %114 : vector<8x8x128xf32> to vector<1x8x8x128xf32>
    tpu.vector_store %arg8[%c0_124, %c0_125, %c0_126, %c0_127], %117 {strides = array<i32>} : memref<1x8x8x128xf32, #tpu.memory_space<vmem>>, vector<1x8x8x128xf32>,
    return
  }
  func.func @transform_0(%arg0: i32) -> (i32, i32, i32, i32) {
    %c0_i32 = arith.constant 0 : i32
    %c0_i32_0 = arith.constant 0 : i32
    %c0_i32_1 = arith.constant 0 : i32
    %c0_i32_2 = arith.constant 0 : i32
    return %arg0, %c0_i32, %c0_i32_0, %c0_i32_1 : i32, i32, i32, i32
  }
  func.func @transform_1(%arg0: i32) -> (i32, i32) {
    %c0_i32 = arith.constant 0 : i32
    %c0_i32_0 = arith.constant 0 : i32
    %c0_i32_1 = arith.constant 0 : i32
    return %c0_i32, %c0_i32_0 : i32, i32
  }
  func.func @transform_2(%arg0: i32) -> (i32, i32) {
    %c0_i32 = arith.constant 0 : i32
    %c0_i32_0 = arith.constant 0 : i32
    %c0_i32_1 = arith.constant 0 : i32
    return %c0_i32, %c0_i32_0 : i32, i32
  }
  func.func @transform_3(%arg0: i32) -> (i32, i32) {
    %c0_i32 = arith.constant 0 : i32
    %c0_i32_0 = arith.constant 0 : i32
    %c0_i32_1 = arith.constant 0 : i32
    return %c0_i32, %c0_i32_0 : i32, i32
  }
  func.func @transform_4(%arg0: i32) -> (i32, i32) {
    %c0_i32 = arith.constant 0 : i32
    %c0_i32_0 = arith.constant 0 : i32
    %c0_i32_1 = arith.constant 0 : i32
    return %c0_i32, %c0_i32_0 : i32, i32
  }
  func.func @transform_5(%arg0: i32) -> (i32, i32, i32, i32) {
    %c0_i32 = arith.constant 0 : i32
    %c0_i32_0 = arith.constant 0 : i32
    %c0_i32_1 = arith.constant 0 : i32
    %c0_i32_2 = arith.constant 0 : i32
    return %arg0, %c0_i32, %c0_i32_0, %c0_i32_1 : i32, i32, i32, i32
  }
  func.func @transform_6(%arg0: i32) -> (i32, i32, i32, i32) {
    %c0_i32 = arith.constant 0 : i32
    %c0_i32_0 = arith.constant 0 : i32
    %c0_i32_1 = arith.constant 0 : i32
    %c0_i32_2 = arith.constant 0 : i32
    return %arg0, %c0_i32, %c0_i32_0, %c0_i32_1 : i32, i32, i32, i32
  }
  func.func @transform_7(%arg0: i32) -> (i32, i32, i32, i32) {
    %c0_i32 = arith.constant 0 : i32
    %c0_i32_0 = arith.constant 0 : i32
    %c0_i32_1 = arith.constant 0 : i32
    %c0_i32_2 = arith.constant 0 : i32
    return %arg0, %c0_i32, %c0_i32_0, %c0_i32_1 : i32, i32, i32, i32
  }
}

</mosaic_0001>

<bundles_post_ra>
// kernel: down_conv.1
= control target key start
LH: loop header
LB: loop body
LE: loop exit
PB: predicated region body
PF: predicated region fallthrough
CT: control target
= control target key end

     0   :  { %13 = vsyncpa [#allocation5], 0  ;;  %s15071_s0 = inlined_call_operand.vmem [shape: f32[2,16,16,4], index: 0, kind: input, shape index: {}]   ;;  %s15072_s1 = inlined_call_operand.vmem [shape: bf16[36,128], index: 1, kind: input, shape index: {}]   ;;  %s15073_s2 = inlined_call_operand.vmem [shape: f32[1,128], index: 2, kind: input, shape index: {}]   ;;  %s15074_s3 = inlined_call_operand.vmem [shape: bf16[1152,128], index: 3, kind: input, shape index: {}]   ;;  %s15075_s4 = inlined_call_operand.vmem [shape: f32[1,128], index: 4, kind: input, shape index: {}]   ;;  %s15076_s5 = inlined_call_operand.vmem [shape: f32[2,16,16,128], index: 5, kind: input, shape index: {}]   ;;  %s15077_s6 = inlined_call_operand.hbm [shape: f32[2,16,16,128], index: 6, kind: output, shape index: {0}]   ;;  %s15078_s7 = inlined_call_operand.hbm [shape: f32[2,8,8,128], index: 7, kind: output, shape index: {1}]  }
   0x1   :  { %15 = vsyncpa [#allocation5 + $0x1], 0 }
   0x2   :  { %16 = vsyncpa [#allocation7], 0 }
   0x3   :  { %18 = vsyncpa [#allocation7 + $0x1], 0  ;;  %s11208_s24 = smov 0   ;;  %s11210_s25 = smov 0  }
   0x4   :  { %s11212_s26 = smov 0   ;;  %s11214_s27 = smov 0  }
   0x5 LB: > { %s11229_s28 = sadd.s32 4294967295, %s11152_s27   ;;  %s9069_s29 = sadd.s32 4294967294, %s11152_s27   ;;  %s11152_s27 = sphi %s11214_s27, %s15367_s27   ;;  %s11148_s26 = sphi %s11212_s26, %s15366_s26   ;;  %s11144_s25 = sphi %s11210_s25, %s15365_s25   ;;  %s11140_s24 = sphi %s11208_s24, %s15364_s24  }
   0x6   : > { %s11233_s30 = sadd.s32 1, %s11152_s27   ;;  %s167_s8 = sadd.s32 1, %s11148_s26 }
   0x7   : > { %s164_s9 = ssub.s32 %s11152_s27, %s11233_s30  ;;  %p177_p0 = scmp.ne.s32.totalorder %s11148_s26, %s11144_s25 }
   0x8   : > { %p165_p1 = scmp.eq.s32.totalorder %s164_s9, 0  ;;  %p178_p2 = scmp.eq.s32.totalorder %s11229_s28, 1 }
   0x9   : > { %p183_p3 = scmp.ne.s32.totalorder %s11144_s25, %s11140_s24  ;;  %p184_p4 = scmp.eq.s32.totalorder %s9069_s29, 1 }
   0xa   : > { %s11244_s10 = scalar_select %p165_p1, %s11148_s26, %s167_s8  }
   0xb   : > { %p11246_p5 = por %p178_p2, %p177_p0  ;;  %p11250_p6 = por %p184_p4, %p183_p3 }
   0xc   : > { %p9072_p7 = scmp.ge.s32.totalorder %s11152_s27, 1  ;;  %p256_p8 = scmp.lt.s32.totalorder %s11152_s27, 3 }
   0xe   : > { %p257_p9 = pnand %p9072_p7, %p256_p8 }
  0x10   : > { %260 = sbr.rel (%p257_p9) target bundleno = 1202 (0x4b2), region = 44 }
  0x15   : > { %vm309_vm0 = vcmask 31744   ;;  %vm312_vm1 = vcmask 25600   ;;  %vm318_vm2 = vcmask 24576   ;;  %v11154_v0 = vmov 0.0   ;;  %p298_p10 = scmp.lt.s32.totalorder %s11229_s28, 1  ;;  %s11155_s18 = smov 4  }
  0x16   : > { %310 = vst.msk [vmem:[#allocation2] sm:$0xff] %vm309_vm0, %v11154_v0  ;;  %311 = vst.msk [vmem:[#allocation2 + $0x8] sm:$0xff] %vm309_vm0, %v11154_v0  ;;  %s11156_s19 = smov 8   ;;  %s11157_s20 = smov 12   ;;  %vm2088_vm3 = vcmask 1041408   ;;  %v10923_v52 = vld [vmem:[%s15072_s1 + $0x8] sm:$0xff]  }
  0x17   : > { %313 = vst.msk [vmem:[#allocation2 + $0x10] sm:$0x3] %vm312_vm1, %v11154_v0  ;;  %317 = vst.msk [vmem:[#allocation2 + $0x1a8] sm:$0x3] %vm312_vm1, %v11154_v0  ;;  %s11298_s13 = scalar_select %p298_p10, %s11229_s28, 1  ;;  %v10924_v55 = vld [vmem:[%s15072_s1] sm:$0xff]  }
  0x18   : > { %315 = vst.msk [vmem:[#allocation2 + $0x198] sm:$0xff] %vm309_vm0, %v11154_v0  ;;  %316 = vst.msk [vmem:[#allocation2 + $0x1a0] sm:$0xff] %vm309_vm0, %v11154_v0  ;;  %s11158_s21 = smov 16   ;;  %s11159_s22 = smov 20   ;;  %vm1765_vm4 = vcmask 64512   ;;  %vm1798_vm5 = vcmask 97280  }
  0x19   : > { %320 = vst.msk [vmem:[#allocation2 + $0x18] sm:$0x1] %vm318_vm2, %v11154_v0  ;;  %321 = vst.msk [vmem:[#allocation2 + $0x30] sm:$0x1] %vm318_vm2, %v11154_v0  ;;  %s9468_s14 = sshll.u32 %s11298_s13, 8  ;;  %s11160_s8 = smov 24  }
  0x1a   : > { %322 = vst.msk [vmem:[#allocation2 + $0x48] sm:$0x1] %vm318_vm2, %v11154_v0  ;;  %323 = vst.msk [vmem:[#allocation2 + $0x60] sm:$0x1] %vm318_vm2, %v11154_v0  ;;  %s11306_s17 = scalar_lea.vmem %s15071_s0, %s9468_s14  ;;  %s11161_s29 = smov 28   ;;  %vm1831_vm6 = vcmask 130048  }
  0x1b   : > { %324 = vst.msk [vmem:[#allocation2 + $0x78] sm:$0x1] %vm318_vm2, %v11154_v0  ;;  %325 = vst.msk [vmem:[#allocation2 + $0x90] sm:$0x1] %vm318_vm2, %v11154_v0  ;;  %v355_v1 = vld [vmem:[%s11306_s17] sm:$0xff]  ;;  %v356_v2 = vld [vmem:[%s11306_s17 + $0x8] sm:$0xff] }
  0x1c   : > { %326 = vst.msk [vmem:[#allocation2 + $0xa8] sm:$0x1] %vm318_vm2, %v11154_v0  ;;  %327 = vst.msk [vmem:[#allocation2 + $0xc0] sm:$0x1] %vm318_vm2, %v11154_v0  ;;  %v357_v3 = vld [vmem:[%s11306_s17 + $0x10] sm:$0xff]  ;;  %v358_v9 = vld [vmem:[%s11306_s17 + $0x18] sm:$0xff] }
  0x1d   : > { %328 = vst.msk [vmem:[#allocation2 + $0xd8] sm:$0x1] %vm318_vm2, %v11154_v0  ;;  %329 = vst.msk [vmem:[#allocation2 + $0xf0] sm:$0x1] %vm318_vm2, %v11154_v0  ;;  %v484_v4 = vld [vmem:[#allocation2 + $0x2] sm:$0xff]  ;;  %v361_v13 = vld [vmem:[%s11306_s17 + $0x30] sm:$0xff] }
  0x1e   : > { %330 = vst.msk [vmem:[#allocation2 + $0x108] sm:$0x1] %vm318_vm2, %v11154_v0  ;;  %331 = vst.msk [vmem:[#allocation2 + $0x120] sm:$0x1] %vm318_vm2, %v11154_v0  ;;  %v452_v5 = vld [vmem:[#allocation2 + $0x1] sm:$0xff]  ;;  %v453_v6 = vld [vmem:[#allocation2 + $0x9] sm:$0xff] }
  0x1f   : > { %332 = vst.msk [vmem:[#allocation2 + $0x138] sm:$0x1] %vm318_vm2, %v11154_v0  ;;  %333 = vst.msk [vmem:[#allocation2 + $0x150] sm:$0x1] %vm318_vm2, %v11154_v0  ;;  %v10282_v8 = vpack.i.bf16 %v453_v6, %v452_v5  ;;  %v359_v10 = vld [vmem:[%s11306_s17 + $0x20] sm:$0xff]  ;;  %v360_v12 = vld [vmem:[%s11306_s17 + $0x28] sm:$0xff] }
  0x20   : > { %334 = vst.msk [vmem:[#allocation2 + $0x168] sm:$0x1] %vm318_vm2, %v11154_v0  ;;  %335 = vst.msk [vmem:[#allocation2 + $0x180] sm:$0x1] %vm318_vm2, %v11154_v0  ;;  %v362_v14 = vld [vmem:[%s11306_s17 + $0x38] sm:$0xff]  ;;  %v363_v15 = vld [vmem:[%s11306_s17 + $0x40] sm:$0xff] }
  0x21   : > { %338 = vst.msk [vmem:[#allocation2 + $0x29] sm:$0x1] %vm318_vm2, %v11154_v0  ;;  %339 = vst.msk [vmem:[#allocation2 + $0x41] sm:$0x1] %vm318_vm2, %v11154_v0  ;;  %10283 = vrot.lane.b32.xlu0 %v10282_v8, %s11155_s18  ;;  %v364_v16 = vld [vmem:[%s11306_s17 + $0x48] sm:$0xff]  ;;  %v365_v17 = vld [vmem:[%s11306_s17 + $0x50] sm:$0xff] }
  0x22   : > { %340 = vst.msk [vmem:[#allocation2 + $0x59] sm:$0x1] %vm318_vm2, %v11154_v0  ;;  %341 = vst.msk [vmem:[#allocation2 + $0x71] sm:$0x1] %vm318_vm2, %v11154_v0  ;;  %v366_v18 = vld [vmem:[%s11306_s17 + $0x58] sm:$0xff]  ;;  %v367_v19 = vld [vmem:[%s11306_s17 + $0x60] sm:$0xff] }
  0x23   : > { %342 = vst.msk [vmem:[#allocation2 + $0x89] sm:$0x1] %vm318_vm2, %v11154_v0  ;;  %343 = vst.msk [vmem:[#allocation2 + $0xa1] sm:$0x1] %vm318_vm2, %v11154_v0  ;;  %v368_v20 = vld [vmem:[%s11306_s17 + $0x68] sm:$0xff]  ;;  %v369_v21 = vld [vmem:[%s11306_s17 + $0x70] sm:$0xff] }
  0x24   : > { %344 = vst.msk [vmem:[#allocation2 + $0xb9] sm:$0x1] %vm318_vm2, %v11154_v0  ;;  %345 = vst.msk [vmem:[#allocation2 + $0xd1] sm:$0x1] %vm318_vm2, %v11154_v0  ;;  %v370_v22 = vld [vmem:[%s11306_s17 + $0x78] sm:$0xff]  ;;  %v371_v23 = vld [vmem:[%s11306_s17 + $0x80] sm:$0xff] }
  0x25   : > { %346 = vst.msk [vmem:[#allocation2 + $0xe9] sm:$0x1] %vm318_vm2, %v11154_v0  ;;  %347 = vst.msk [vmem:[#allocation2 + $0x101] sm:$0x1] %vm318_vm2, %v11154_v0  ;;  %v372_v24 = vld [vmem:[%s11306_s17 + $0x88] sm:$0xff]  ;;  %v373_v48 = vld [vmem:[%s11306_s17 + $0x90] sm:$0xff] }
  0x26   : > { %348 = vst.msk [vmem:[#allocation2 + $0x119] sm:$0x1] %vm318_vm2, %v11154_v0  ;;  %349 = vst.msk [vmem:[#allocation2 + $0x131] sm:$0x1] %vm318_vm2, %v11154_v0  ;;  %v374_v49 = vld [vmem:[%s11306_s17 + $0x98] sm:$0xff]  ;;  %v375_v53 = vld [vmem:[%s11306_s17 + $0xa0] sm:$0xff] }
  0x27   : > { %350 = vst.msk [vmem:[#allocation2 + $0x149] sm:$0x1] %vm318_vm2, %v11154_v0  ;;  %351 = vst.msk [vmem:[#allocation2 + $0x161] sm:$0x1] %vm318_vm2, %v11154_v0  ;;  %v376_v56 = vld [vmem:[%s11306_s17 + $0xa8] sm:$0xff]  ;;  %s11162_s9 = smov 32  }
  0x28   : > { %352 = vst.msk [vmem:[#allocation2 + $0x179] sm:$0x1] %vm318_vm2, %v11154_v0  ;;  %353 = vst.msk [vmem:[#allocation2 + $0x191] sm:$0x1] %vm318_vm2, %v11154_v0  ;;  %v377_v62 = vld [vmem:[%s11306_s17 + $0xb0] sm:$0xff]  ;;  %v378_v63 = vld [vmem:[%s11306_s17 + $0xb8] sm:$0xff] }
  0x29   : > { %337 = vst.msk [vmem:[#allocation2 + $0x11] sm:$0x1] %vm318_vm2, %v11154_v0  ;;  %354 = vst.msk [vmem:[#allocation2 + $0x1a9] sm:$0x1] %vm318_vm2, %v11154_v0  ;;  %v379_v6 = vld [vmem:[%s11306_s17 + $0xc0] sm:$0xff]  ;;  %vm1864_vm7 = vcmask 162816  }
  0x2a   : > { %319 = vst.msk [vmem:[#allocation2] sm:$0x1] %vm318_vm2, %v11154_v0  ;;  %336 = vst.msk [vmem:[#allocation2 + $0x198] sm:$0x1] %vm318_vm2, %v11154_v0  ;;  %vm1897_vm8 = vcmask 195584   ;;  %vm1930_vm9 = vcmask 228352  }
  0x2b   : > { %388 = vst.msk [vmem:[#allocation2 + $0x19] sm:$0xff] %vm309_vm0, %v355_v1  ;;  %389 = vst.msk [vmem:[#allocation2 + $0x21] sm:$0xff] %vm309_vm0, %v356_v2  ;;  %v10922_v50 = vld [vmem:[%s15072_s1 + $0x10] ss:$0 sps:$4 sm:$0x33]   ;;  %vm1963_vm10 = vcmask 261120  }
  0x2c   : > { %390 = vst.msk [vmem:[#allocation2 + $0x31] sm:$0xff] %vm309_vm0, %v357_v3  ;;  %391 = vst.msk [vmem:[#allocation2 + $0x39] sm:$0xff] %vm309_vm0, %v358_v9  ;;  %10225 = vmatprep.subr.msk.bf16.mxu0 %vm2088_vm3, %v10922_v50  ;;  %v2090_v54 = vsel %vm2088_vm3, %v10922_v50, 0  ;;  %v380_v9 = vld [vmem:[%s11306_s17 + $0xc8] sm:$0xff]  ;;  %vm2039_vm11 = vcmask 293888   ;;  %vm2292_vm12 = vcmask 1040384  }
  0x2d   : > { %392 = vst.msk [vmem:[#allocation2 + $0x49] sm:$0xff] %vm309_vm0, %v359_v10  ;;  %393 = vst.msk [vmem:[#allocation2 + $0x51] sm:$0xff] %vm309_vm0, %v360_v12  ;;  %9740 = vmatpush3.bf16.msra.mxu0 %v2090_v54  ;;  %vm2293_vm13 = vsmask.f32 256  ;;  %vm2349_vm15 = vsmask.f32 7938 }
  0x2e   : > { %394 = vst.msk [vmem:[#allocation2 + $0x61] sm:$0xff] %vm309_vm0, %v361_v13  ;;  %395 = vst.msk [vmem:[#allocation2 + $0x69] sm:$0xff] %vm309_vm0, %v362_v14  ;;  %9741 = vmatprep.subr.bf16.mxu0 %v10923_v52  ;;  %vm3002_vm2 = vsmask.f32 3328  ;;  %vm3003_vm3 = vsmask.f32 7440 }
  0x2f   : > { %396 = vst.msk [vmem:[#allocation2 + $0x79] sm:$0xff] %vm309_vm0, %v363_v15  ;;  %397 = vst.msk [vmem:[#allocation2 + $0x81] sm:$0xff] %vm309_vm0, %v364_v16 }
  0x30   : > { %v485_v7 = vld [vmem:[#allocation2 + $0xa] sm:$0xff]  ;;  %398 = vst.msk [vmem:[#allocation2 + $0x91] sm:$0xff] %vm309_vm0, %v365_v17  ;;  %399 = vst.msk [vmem:[#allocation2 + $0x99] sm:$0xff] %vm309_vm0, %v366_v18 }
  0x31   : > { %v10287_v11 = vpack.i.bf16 %v485_v7, %v484_v4  ;;  %400 = vst.msk [vmem:[#allocation2 + $0xa9] sm:$0xff] %vm309_vm0, %v367_v19  ;;  %401 = vst.msk [vmem:[#allocation2 + $0xb1] sm:$0xff] %vm309_vm0, %v368_v20  ;;  %9742 = vmatpush3.bf16.msra.mxu0 %v10923_v52  ;;  %v381_v18 = vld [vmem:[%s11306_s17 + $0xd0] sm:$0xff] }
  0x32   : > { %402 = vst.msk [vmem:[#allocation2 + $0xc1] sm:$0xff] %vm309_vm0, %v369_v21  ;;  %403 = vst.msk [vmem:[#allocation2 + $0xc9] sm:$0xff] %vm309_vm0, %v370_v22  ;;  %v486_v25 = vld [vmem:[#allocation2 + $0x1a] sm:$0xff]  ;;  %v487_v26 = vld [vmem:[#allocation2 + $0x22] sm:$0xff]  ;;  %9743 = vmatprep.subr.bf16.mxu0 %v10924_v55 }
  0x33   : > { %10288 = vrot.lane.b32.xlu1 %v10287_v11, %s11156_s19  ;;  %v454_v27 = vld [vmem:[#allocation2 + $0x19] sm:$0xff]  ;;  %404 = vst.msk [vmem:[#allocation2 + $0xd9] sm:$0xff] %vm309_vm0, %v371_v23  ;;  %405 = vst.msk [vmem:[#allocation2 + $0xe1] sm:$0xff] %vm309_vm0, %v372_v24  ;;  %v10297_v28 = vpack.i.bf16 %v487_v26, %v486_v25  ;;  %v455_v29 = vld [vmem:[#allocation2 + $0x21] sm:$0xff] }
  0x34   : > { %v11346_v30 = vld [vmem:[#allocation2 + $0x30] sm:$0xff]  ;;  %v11348_v31 = vld [vmem:[#allocation2 + $0x18] sm:$0xff]  ;;  %v10292_v32 = vpack.i.bf16 %v455_v29, %v454_v27  ;;  %v11352_v34 = vld [vmem:[#allocation2 + $0x20] sm:$0xff]  ;;  %406 = vst.msk [vmem:[#allocation2 + $0xf1] sm:$0xff] %vm309_vm0, %v373_v48 }
  0x35   : > { %v11350_v33 = vld [vmem:[#allocation2 + $0x38] sm:$0xff]  ;;  %v10302_v36 = vpack.i.bf16 %v11352_v34, %v11348_v31  ;;  %v11364_v43 = vld [vmem:[#allocation2 + $0x48] sm:$0xff]  ;;  %v11366_v44 = vld [vmem:[#allocation2 + $0x50] sm:$0xff]  ;;  %407 = vst.msk [vmem:[#allocation2 + $0xf9] sm:$0xff] %vm309_vm0, %v374_v49  ;;  %9744 = vmatpush3.bf16.msra.mxu0 %v10924_v55 }
  0x36   : > { %v10307_v35 = vpack.i.bf16 %v11350_v33, %v11346_v30  ;;  %10293 = vrot.lane.b32.xlu0 %v10292_v32, %s11155_s18  ;;  %v550_v37 = vld [vmem:[#allocation2 + $0x31] sm:$0xff]  ;;  %v551_v38 = vld [vmem:[#allocation2 + $0x39] sm:$0xff]  ;;  %v10337_v45 = vpack.i.bf16 %v11366_v44, %v11364_v43  ;;  %v647_v46 = vld [vmem:[#allocation2 + $0x49] sm:$0xff]  ;;  %408 = vst.msk [vmem:[#allocation2 + $0x109] sm:$0xff] %vm309_vm0, %v375_v53 }
  0x37   : > { %10298 = vrot.lane.b32.xlu1 %v10297_v28, %s11156_s19  ;;  %v10317_v39 = vpack.i.bf16 %v551_v38, %v550_v37  ;;  %v582_v40 = vld [vmem:[#allocation2 + $0x32] sm:$0xff]  ;;  %v583_v41 = vld [vmem:[#allocation2 + $0x3a] sm:$0xff]  ;;  %409 = vst.msk [vmem:[#allocation2 + $0x111] sm:$0xff] %vm309_vm0, %v376_v56  ;;  %v679_v57 = vld [vmem:[#allocation2 + $0x4a] sm:$0xff] }
  0x38   : > { %v10327_v42 = vpack.i.bf16 %v583_v41, %v582_v40  ;;  %v648_v47 = vld [vmem:[#allocation2 + $0x51] sm:$0xff]  ;;  %v522_v60 = vld [vmem:[#allocation2 + $0x60] sm:$0xff]  ;;  %v523_v61 = vld [vmem:[#allocation2 + $0x68] sm:$0xff]  ;;  %410 = vst.msk [vmem:[#allocation2 + $0x121] sm:$0xff] %vm309_vm0, %v377_v62 }
  0x39   : > { %v10347_v51 = vpack.i.bf16 %v648_v47, %v647_v46  ;;  %v680_v58 = vld [vmem:[#allocation2 + $0x52] sm:$0xff]  ;;  %411 = vst.msk [vmem:[#allocation2 + $0x129] sm:$0xff] %vm309_vm0, %v378_v63  ;;  %v554_v0 = vld [vmem:[#allocation2 + $0x61] sm:$0xff]  ;;  %v555_v1 = vld [vmem:[#allocation2 + $0x69] sm:$0xff]  ;;  %v10387_v2 = vpack.i.bf16 %v523_v61, %v522_v60 }
  0x3a   : > { %10303 = vrot.lane.b32.xlu0 %v10302_v36, %s11157_s20  ;;  %v10362_v59 = vpack.i.bf16 %v680_v58, %v679_v57  ;;  %v586_v3 = vld [vmem:[#allocation2 + $0x62] sm:$0xff]  ;;  %v587_v4 = vld [vmem:[#allocation2 + $0x6a] sm:$0xff]  ;;  %v10397_v5 = vpack.i.bf16 %v555_v1, %v554_v0  ;;  %v11406_v7 = vld [vmem:[#allocation2 + $0x78] sm:$0xff]  ;;  %412 = vst.msk [vmem:[#allocation2 + $0x139] sm:$0xff] %vm309_vm0, %v379_v6 }
  0x3b   : > { %10308 = vrot.lane.b32.xlu1 %v10307_v35, %s11157_s20  ;;  %v11408_v8 = vld [vmem:[#allocation2 + $0x80] sm:$0xff]  ;;  %v10407_v10 = vpack.i.bf16 %v587_v4, %v586_v3  ;;  %413 = vst.msk [vmem:[#allocation2 + $0x141] sm:$0xff] %vm309_vm0, %v380_v9  ;;  %v526_v19 = vld [vmem:[#allocation2 + $0x90] sm:$0xff]  ;;  %v527_v20 = vld [vmem:[#allocation2 + $0x98] sm:$0xff] }
  0x3c   : > { %v651_v11 = vld [vmem:[#allocation2 + $0x79] sm:$0xff]  ;;  %v652_v12 = vld [vmem:[#allocation2 + $0x81] sm:$0xff]  ;;  %v10417_v13 = vpack.i.bf16 %v11408_v8, %v11406_v7  ;;  %414 = vst.msk [vmem:[#allocation2 + $0x151] sm:$0xff] %vm309_vm0, %v381_v18  ;;  %v558_v22 = vld [vmem:[#allocation2 + $0x91] sm:$0xff]  ;;  %v10467_v24 = vpack.i.bf16 %v527_v20, %v526_v19 }
  0x3d   : > { %v10427_v14 = vpack.i.bf16 %v652_v12, %v651_v11  ;;  %v683_v15 = vld [vmem:[#allocation2 + $0x7a] sm:$0xff]  ;;  %v684_v16 = vld [vmem:[#allocation2 + $0x82] sm:$0xff]  ;;  %v590_v25 = vld [vmem:[#allocation2 + $0x92] sm:$0xff] }
  0x3e   : > { %10313 = vrot.lane.b32.xlu0 %v10292_v32, %s11158_s21  ;;  %v10442_v17 = vpack.i.bf16 %v684_v16, %v683_v15  ;;  %v382_v21 = vld [vmem:[%s11306_s17 + $0xd8] sm:$0xff]  ;;  %v623_v29 = vld [vmem:[#allocation2 + $0xa8] sm:$0xff]  ;;  %v624_v32 = vld [vmem:[#allocation2 + $0xb0] sm:$0xff] }
  0x3f   : > { %10318 = vrot.lane.b32.xlu1 %v10317_v39, %s11158_s21  ;;  %415 = vst.msk [vmem:[#allocation2 + $0x159] sm:$0xff] %vm309_vm0, %v382_v21  ;;  %v559_v23 = vld [vmem:[#allocation2 + $0x99] sm:$0xff]  ;;  %v10497_v37 = vpack.i.bf16 %v624_v32, %v623_v29  ;;  %v655_v38 = vld [vmem:[#allocation2 + $0xa9] sm:$0xff]  ;;  %v660_v63 = vld [vmem:[#allocation2 + $0xe1] sm:$0xff] }
  0x40   : > { %v591_v26 = vld [vmem:[#allocation2 + $0x9a] sm:$0xff]  ;;  %v10477_v27 = vpack.i.bf16 %v559_v23, %v558_v22  ;;  %v687_v41 = vld [vmem:[#allocation2 + $0xaa] sm:$0xff]  ;;  %v594_v54 = vld [vmem:[#allocation2 + $0xc2] sm:$0xff] }
  0x41   : > { %v10487_v36 = vpack.i.bf16 %v591_v26, %v590_v25  ;;  %v385_v46 = vld [vmem:[%s11306_s17 + $0xf0] sm:$0xff]  ;;  %v386_v47 = vld [vmem:[%s11306_s17 + $0xf8] sm:$0xff]  ;;  %v530_v48 = vld [vmem:[#allocation2 + $0xc0] sm:$0xff] }
  0x42   : > { %10323 = vrot.lane.b32.xlu0 %v10297_v28, %s11159_s22  ;;  %v383_v28 = vld [vmem:[%s11306_s17 + $0xe0] sm:$0xff]  ;;  %418 = vst.msk [vmem:[#allocation2 + $0x181] sm:$0xff] %vm309_vm0, %v385_v46  ;;  %419 = vst.msk [vmem:[#allocation2 + $0x189] sm:$0xff] %vm309_vm0, %v386_v47  ;;  %v531_v49 = vld [vmem:[#allocation2 + $0xc8] sm:$0xff] }
  0x43   : > { %10328 = vrot.lane.b32.xlu1 %v10327_v42, %s11159_s22  ;;  %416 = vst.msk [vmem:[#allocation2 + $0x169] sm:$0xff] %vm309_vm0, %v383_v28  ;;  %v10547_v50 = vpack.i.bf16 %v531_v49, %v530_v48  ;;  %v563_v52 = vld [vmem:[#allocation2 + $0xc9] sm:$0xff]  ;;  %v627_v57 = vld [vmem:[#allocation2 + $0xd8] sm:$0xff]  ;;  %v628_v58 = vld [vmem:[#allocation2 + $0xe0] sm:$0xff] }
  0x44   : > { %v595_v55 = vld [vmem:[#allocation2 + $0xca] sm:$0xff]  ;;  %v11464_v60 = vpack.i.bf16 %v628_v58, %v627_v57  ;;  %v659_v62 = vld [vmem:[#allocation2 + $0xd9] sm:$0xff]  ;;  %vm11820_vm14 = vmand %vm2292_vm12, %vm2293_vm13 }
  0x45   : > { %v10567_v56 = vpack.i.bf16 %v595_v55, %v594_v54  ;;  %v11469_v0 = vpack.i.bf16 %v660_v63, %v659_v62  ;;  %v691_v4 = vld [vmem:[#allocation2 + $0xda] sm:$0xff]  ;;  %v534_v12 = vld [vmem:[#allocation2 + $0xf0] sm:$0xff]  ;;  %vm11839_vm1 = vmand %vm2292_vm12, %vm2349_vm15 }
  0x46   : > { %10333 = vrot.lane.b32.xlu0 %v10307_v35, %s11160_s8  ;;  %v384_v35 = vld [vmem:[%s11306_s17 + $0xe8] sm:$0xff]  ;;  %v420_v18 = vld [vmem:[#allocation2] sm:$0xff]  ;;  %v566_v25 = vld [vmem:[#allocation2 + $0xf1] sm:$0xff] }
  0x47   : > { %10338 = vrot.lane.b32.xlu1 %v10337_v45, %s11160_s8  ;;  %417 = vst.msk [vmem:[#allocation2 + $0x171] sm:$0xff] %vm309_vm0, %v384_v35  ;;  %v567_v26 = vld [vmem:[#allocation2 + $0xf9] sm:$0xff]  ;;  %vm12048_vm12 = vmor %vm3002_vm2, %vm3003_vm3  ;;  %vm2824_vm2 = vcmask 1043456  }
  0x48   : > { %v11520_v49 = vpack.i.bf16 %v567_v26, %v566_v25  ;;  %v664_v25 = vld [vmem:[#allocation2 + $0x111] sm:$0xff] }
  0x4a   : > { %10343 = vrot.lane.b32.xlu0 %v10317_v39, %s11161_s29 }
  0x4b   : > { %10348 = vrot.lane.b32.xlu1 %v10347_v51, %s11161_s29 }
  0x4e   : > { %10353 = vrot.lane.b32.xlu0 %v10327_v42, %s11162_s9 }
  0x4f   : > { %10358 = vrot.lane.b32.xlu1 %v10317_v39, %s11155_s18  ;;  %v656_v39 = vld [vmem:[#allocation2 + $0xb1] sm:$0xff] }
  0x50   : > { %v10507_v40 = vpack.i.bf16 %v656_v39, %v655_v38  ;;  %v631_v38 = vld [vmem:[#allocation2 + $0x108] sm:$0xff]  ;;  %v632_v39 = vld [vmem:[#allocation2 + $0x110] sm:$0xff] }
  0x52   : > { %10363 = vrot.lane.b32.xlu0 %v10362_v59, %s11162_s9 }
  0x53   : > { %10368 = vrot.lane.b32.xlu1 %v10347_v51, %s11155_s18 }
  0x56   : > { %10373 = vrot.lane.b32.xlu0 %v10327_v42, %s11156_s19  ;;  %v688_v42 = vld [vmem:[#allocation2 + $0xb2] sm:$0xff] }
  0x57   : > { %10378 = vrot.lane.b32.xlu1 %v10362_v59, %s11156_s19 }
  0x5a   : > { %10383 = vrot.lane.b32.xlu0 %v10337_v45, %s11157_s20  ;;  %v10522_v45 = vpack.i.bf16 %v688_v42, %v687_v41 }
  0x5b   : > { %10388 = vrot.lane.b32.xlu1 %v10387_v2, %s11157_s20 }
  0x5e   : > { %10393 = vrot.lane.b32.xlu0 %v10347_v51, %s11158_s21  ;;  %v562_v51 = vld [vmem:[#allocation2 + $0xc1] sm:$0xff] }
  0x5f   : > { %10398 = vrot.lane.b32.xlu1 %v10397_v5, %s11158_s21  ;;  %v10557_v53 = vpack.i.bf16 %v563_v52, %v562_v51  ;;  %v11528_v51 = vpack.i.bf16 %v632_v39, %v631_v38 }
  0x62   : > { %10403 = vrot.lane.b32.xlu0 %v10362_v59, %s11159_s22 }
  0x63   : > { %10408 = vrot.lane.b32.xlu1 %v10407_v10, %s11159_s22 }
  0x66   : > { %10413 = vrot.lane.b32.xlu0 %v10387_v2, %s11160_s8 }
  0x67   : > { %10418 = vrot.lane.b32.xlu1 %v10417_v13, %s11160_s8 }
  0x6a   : > { %10423 = vrot.lane.b32.xlu0 %v10397_v5, %s11161_s29 }
  0x6b   : > { %10428 = vrot.lane.b32.xlu1 %v10427_v14, %s11161_s29 }
  0x6e   : > { %10433 = vrot.lane.b32.xlu0 %v10407_v10, %s11162_s9 }
  0x6f   : > { %10438 = vrot.lane.b32.xlu1 %v10397_v5, %s11155_s18  ;;  %v692_v5 = vld [vmem:[#allocation2 + $0xe2] sm:$0xff] }
  0x70   : > { %v11483_v9 = vpack.i.bf16 %v692_v5, %v691_v4 }
  0x72   : > { %10443 = vrot.lane.b32.xlu0 %v10442_v17, %s11162_s9 }
  0x73   : > { %10448 = vrot.lane.b32.xlu1 %v10427_v14, %s11155_s18 }
  0x76   : > { %10453 = vrot.lane.b32.xlu0 %v10407_v10, %s11156_s19 }
  0x77   : > { %10458 = vrot.lane.b32.xlu1 %v10442_v17, %s11156_s19 }
  0x7a   : > { %10463 = vrot.lane.b32.xlu0 %v10417_v13, %s11157_s20  ;;  %v535_v13 = vld [vmem:[#allocation2 + $0xf8] sm:$0xff] }
  0x7b   : > { %10468 = vrot.lane.b32.xlu1 %v10467_v24, %s11157_s20  ;;  %v11499_v22 = vpack.i.bf16 %v535_v13, %v534_v12 }
  0x7e   : > { %10473 = vrot.lane.b32.xlu0 %v10427_v14, %s11158_s21 }
  0x7f   : > { %10478 = vrot.lane.b32.xlu1 %v10477_v27, %s11158_s21 }
  0x82   : > { %10483 = vrot.lane.b32.xlu0 %v10442_v17, %s11159_s22  ;;  %v421_v17 = vld [vmem:[#allocation2 + $0x8] sm:$0xff] }
  0x83   : > { %10488 = vrot.lane.b32.xlu1 %v10487_v36, %s11159_s22 }
  0x86   : > { %10493 = vrot.lane.b32.xlu0 %v10467_v24, %s11160_s8 }
  0x87   : > { %10498 = vrot.lane.b32.xlu1 %v10497_v37, %s11160_s8 }
  0x8a   : > { %10503 = vrot.lane.b32.xlu0 %v10477_v27, %s11161_s29 }
  0x8b   : > { %10508 = vrot.lane.b32.xlu1 %v10507_v40, %s11161_s29 }
  0x8e   : > { %10513 = vrot.lane.b32.xlu0 %v10487_v36, %s11162_s9 }
  0x8f   : > { %10518 = vrot.lane.b32.xlu1 %v10477_v27, %s11155_s18  ;;  %v598_v27 = vld [vmem:[#allocation2 + $0xf2] sm:$0xff] }
  0x92   : > { %10523 = vrot.lane.b32.xlu0 %v10522_v45, %s11162_s9 }
  0x93   : > { %10528 = vrot.lane.b32.xlu1 %v10507_v40, %s11155_s18  ;;  %v10284_v61 = vpop.permute.xlu0 %10283 }
  0x94   : > { %v10286_v14 = vunpack.i.h.bf16 %v10284_v61  ;;  %v10285_v15 = vunpack.i.l.bf16 %v10284_v61 }
  0x96   : > { %10533 = vrot.lane.b32.xlu0 %v10487_v36, %s11156_s19  ;;  %v1734_v28 = vsel %vm309_vm0, %v421_v17, %v10286_v14  ;;  %v1733_v29 = vsel %vm309_vm0, %v420_v18, %v10285_v15 }
  0x97   : > { %10538 = vrot.lane.b32.xlu1 %v10522_v45, %s11156_s19 }
  0x9a   : > { %10543 = vrot.lane.b32.xlu0 %v10497_v37, %s11157_s20  ;;  %v599_v37 = vld [vmem:[#allocation2 + $0xfa] sm:$0xff] }
  0x9b   : > { %10548 = vrot.lane.b32.xlu1 %v10547_v50, %s11157_s20 }
  0x9e   : > { %10553 = vrot.lane.b32.xlu0 %v10507_v40, %s11158_s21 }
  0x9f   : > { %10558 = vrot.lane.b32.xlu1 %v10557_v53, %s11158_s21 }
  0xa2   : > { %10563 = vrot.lane.b32.xlu0 %v10522_v45, %s11159_s22 }
  0xa3   : > { %10568 = vrot.lane.b32.xlu1 %v10567_v56, %s11159_s22 }
  0xa5   : > { %v11462_v59 = vpop.permute.xlu1 %10288 }
  0xa6   : > { %10573 = vrot.lane.b32.xlu0 %v10547_v50, %s11160_s8  ;;  %v10291_v23 = vunpack.i.h.bf16 %v11462_v59  ;;  %v10290_v24 = vunpack.i.l.bf16 %v11462_v59 }
  0xa7   : > { %10578 = vrot.lane.b32.xlu1 %v11464_v60, %s11160_s8 }
  0xa8   : > { %v10294_v2 = vpop.permute.xlu0 %10293  ;;  %v1767_v50 = vsel %vm1765_vm4, %v1734_v28, %v10291_v23 }
  0xa9   : > { %v11472_v1 = vpop.permute.xlu1 %10298  ;;  %v10296_v19 = vunpack.i.h.bf16 %v10294_v2  ;;  %v10295_v20 = vunpack.i.l.bf16 %v10294_v2 }
  0xaa   : > { %10583 = vrot.lane.b32.xlu0 %v10557_v53, %s11161_s29  ;;  %v10301_v32 = vunpack.i.h.bf16 %v11472_v1  ;;  %v10300_v35 = vunpack.i.l.bf16 %v11472_v1 }
  0xab   : > { %10588 = vrot.lane.b32.xlu1 %v11469_v0, %s11161_s29  ;;  %v1735_v40 = vsel %vm309_vm0, %v11348_v31, %v10295_v20  ;;  %v1736_v41 = vsel %vm309_vm0, %v11352_v34, %v10296_v19  ;;  %v1766_v31 = vsel %vm1765_vm4, %v1733_v29, %v10290_v24  ;;  %v11526_v34 = vpack.i.bf16 %v599_v37, %v598_v27  ;;  %v663_v24 = vld [vmem:[#allocation2 + $0x109] sm:$0xff] }
  0xac   : > { %v11479_v6 = vpop.permute.xlu0 %10303  ;;  %v1768_v52 = vsel %vm1765_vm4, %v1735_v40, %v10300_v35 }
  0xad   : > { %v11477_v3 = vpop.permute.xlu1 %10308  ;;  %v10306_v47 = vunpack.i.h.bf16 %v11479_v6  ;;  %v10305_v48 = vunpack.i.l.bf16 %v11479_v6 }
  0xae   : > { %10593 = vrot.lane.b32.xlu0 %v10567_v56, %s11162_s9  ;;  %v10311_v42 = vunpack.i.h.bf16 %v11477_v3  ;;  %v10310_v45 = vunpack.i.l.bf16 %v11477_v3 }
  0xaf   : > { %10598 = vrot.lane.b32.xlu1 %v10557_v53, %s11155_s18  ;;  %v1769_v53 = vsel %vm1765_vm4, %v1736_v41, %v10301_v32  ;;  %v1800_v62 = vsel %vm1798_vm5, %v1767_v50, %v10306_v47  ;;  %v1799_v63 = vsel %vm1798_vm5, %v1766_v31, %v10305_v48 }
  0xb0   : > { %v11487_v11 = vpop.permute.xlu0 %10313  ;;  %v1801_v57 = vsel %vm1798_vm5, %v1768_v52, %v10310_v45  ;;  %v1802_v58 = vsel %vm1798_vm5, %v1769_v53, %v10311_v42  ;;  %v11572_v42 = vpack.i.bf16 %v664_v25, %v663_v24 }
  0xb1   : > { %v11485_v10 = vpop.permute.xlu1 %10318  ;;  %v10316_v54 = vunpack.i.h.bf16 %v11487_v11  ;;  %v10315_v55 = vunpack.i.l.bf16 %v11487_v11 }
  0xb2   : > { %10603 = vrot.lane.b32.xlu0 %v11483_v9, %s11162_s9  ;;  %v10321_v3 = vunpack.i.h.bf16 %v11485_v10  ;;  %v10320_v4 = vunpack.i.l.bf16 %v11485_v10 }
  0xb3   : > { %10608 = vrot.lane.b32.xlu1 %v11469_v0, %s11155_s18  ;;  %v1832_v11 = vsel %vm1831_vm6, %v1799_v63, %v10315_v55  ;;  %v1833_v12 = vsel %vm1831_vm6, %v1800_v62, %v10316_v54  ;;  %v538_v63 = vld [vmem:[#allocation2 + $0x120] sm:$0xff] }
  0xb4   : > { %v11495_v21 = vpop.permute.xlu0 %10323  ;;  %v1834_v32 = vsel %vm1831_vm6, %v1801_v57, %v10320_v4  ;;  %v1835_v35 = vsel %vm1831_vm6, %v1802_v58, %v10321_v3  ;;  %v695_v58 = vld [vmem:[#allocation2 + $0x10a] sm:$0xff]  ;;  %v570_v3 = vld [vmem:[#allocation2 + $0x121] sm:$0xff] }
  0xb5   : > { %v11493_v16 = vpop.permute.xlu1 %10328  ;;  %v10326_v59 = vunpack.i.h.bf16 %v11495_v21  ;;  %v571_v4 = vld [vmem:[#allocation2 + $0x129] sm:$0xff] }
  0xb6   : > { %10613 = vrot.lane.b32.xlu0 %v10567_v56, %s11156_s19  ;;  %v10331_v13 = vunpack.i.h.bf16 %v11493_v16  ;;  %v10330_v14 = vunpack.i.l.bf16 %v11493_v16 }
  0xb7   : > { %10618 = vrot.lane.b32.xlu1 %v11483_v9, %s11156_s19  ;;  %v1866_v18 = vsel %vm1864_vm7, %v1833_v12, %v10326_v59 }
  0xb8   : > { %v10334_v46 = vpop.permute.xlu0 %10333  ;;  %v1867_v39 = vsel %vm1864_vm7, %v1834_v32, %v10330_v14  ;;  %v1868_v40 = vsel %vm1864_vm7, %v1835_v35, %v10331_v13  ;;  %v603_v13 = vld [vmem:[#allocation2 + $0x12a] sm:$0xff]  ;;  %v635_v14 = vld [vmem:[#allocation2 + $0x138] sm:$0xff] }
  0xb9   : > { %v11508_v36 = vpop.permute.xlu1 %10338  ;;  %v10336_v1 = vunpack.i.h.bf16 %v10334_v46  ;;  %v10335_v2 = vunpack.i.l.bf16 %v10334_v46 }
  0xba   : > { %10623 = vrot.lane.b32.xlu0 %v11464_v60, %s11157_s20  ;;  %v10325_v60 = vunpack.i.l.bf16 %v11495_v21  ;;  %v10341_v10 = vunpack.i.h.bf16 %v11508_v36  ;;  %v10340_v19 = vunpack.i.l.bf16 %v11508_v36 }
  0xbb   : > { %10628 = vrot.lane.b32.xlu1 %v11499_v22, %s11157_s20  ;;  %v1899_v16 = vsel %vm1897_vm8, %v1866_v18, %v10336_v1  ;;  %v539_v1 = vld [vmem:[#allocation2 + $0x128] sm:$0xff] }
  0xbc   : > { %v10344_v61 = vpop.permute.xlu0 %10343  ;;  %v1865_v17 = vsel %vm1864_vm7, %v1832_v11, %v10325_v60  ;;  %v1900_v45 = vsel %vm1897_vm8, %v1867_v39, %v10340_v19  ;;  %v1901_v46 = vsel %vm1897_vm8, %v1868_v40, %v10341_v10  ;;  %v11612_v12 = vpack.i.bf16 %v539_v1, %v538_v63 }
  0xbd   : > { %v10349_v56 = vpop.permute.xlu1 %10348  ;;  %v10346_v5 = vunpack.i.h.bf16 %v10344_v61  ;;  %v10345_v6 = vunpack.i.l.bf16 %v10344_v61  ;;  %v1898_v23 = vsel %vm1897_vm8, %v1865_v17, %v10335_v2  ;;  %v636_v17 = vld [vmem:[#allocation2 + $0x140] sm:$0xff] }
  0xbe   : > { %10633 = vrot.lane.b32.xlu0 %v11469_v0, %s11158_s21  ;;  %v10351_v26 = vunpack.i.h.bf16 %v10349_v56  ;;  %v10350_v27 = vunpack.i.l.bf16 %v10349_v56 }
  0xbf   : > { %10638 = vrot.lane.b32.xlu1 %v11520_v49, %s11158_s21  ;;  %v1931_v28 = vsel %vm1930_vm9, %v1898_v23, %v10345_v6  ;;  %v1932_v29 = vsel %vm1930_vm9, %v1899_v16, %v10346_v5  ;;  %v602_v5 = vld [vmem:[#allocation2 + $0x122] sm:$0xff]  ;;  %v11620_v16 = vpack.i.bf16 %v571_v4, %v570_v3 }
  0xc0   : > { %v10354_v20 = vpop.permute.xlu0 %10353  ;;  %v1933_v31 = vsel %vm1930_vm9, %v1900_v45, %v10350_v27  ;;  %v1934_v50 = vsel %vm1930_vm9, %v1901_v46, %v10351_v26  ;;  %v11622_v27 = vpack.i.bf16 %v603_v13, %v602_v5  ;;  %v668_v5 = vld [vmem:[#allocation2 + $0x141] sm:$0xff] }
  0xc1   : > { %v11550_v15 = vpop.permute.xlu1 %10358  ;;  %v10356_v0 = vunpack.i.h.bf16 %v10354_v20  ;;  %v10355_v21 = vunpack.i.l.bf16 %v10354_v20 }
  0xc2   : > { %10643 = vrot.lane.b32.xlu0 %v11483_v9, %s11159_s22  ;;  %v10361_v18 = vunpack.i.h.bf16 %v11550_v15  ;;  %v10360_v10 = vunpack.i.l.bf16 %v11550_v15 }
  0xc3   : > { %10648 = vrot.lane.b32.xlu1 %v11526_v34, %s11159_s22  ;;  %v1964_v37 = vsel %vm1963_vm10, %v1931_v28, %v10355_v21  ;;  %v1965_v38 = vsel %vm1963_vm10, %v1932_v29, %v10356_v0  ;;  %v11624_v28 = vpack.i.bf16 %v636_v17, %v635_v14 }
  0xc4   : > { %v10364_v41 = vpop.permute.xlu0 %10363  ;;  %v1996_v9 = vpack.c.bf16 %v1965_v38, %v1964_v37  ;;  %v1738_v35 = vsel %vm309_vm0, %v11350_v33, %v10361_v18 }
  0xc5   : > { %v11566_v36 = vpop.permute.xlu1 %10368  ;;  %v10366_v47 = vunpack.i.h.bf16 %v10364_v41  ;;  %v10365_v48 = vunpack.i.l.bf16 %v10364_v41 }
  0xc6   : > { %10653 = vrot.lane.b32.xlu0 %v11499_v22, %s11160_s8  ;;  %9745 = vmatprep.mubr.msk.bf16.mxu0 %vm2039_vm11, %v1996_v9  ;;  %v696_v22 = vld [vmem:[#allocation2 + $0x112] sm:$0xff]  ;;  %v10371_v6 = vunpack.i.h.bf16 %v11566_v36  ;;  %v10370_v11 = vunpack.i.l.bf16 %v11566_v36  ;;  %v1737_v36 = vsel %vm309_vm0, %v11346_v30, %v10360_v10 }
  0xc7   : > { %10658 = vrot.lane.b32.xlu1 %v11528_v51, %s11160_s8  ;;  %v1966_v52 = vsel %vm1963_vm10, %v1933_v31, %v10365_v48  ;;  %v1967_v53 = vsel %vm1963_vm10, %v1934_v50, %v10366_v47  ;;  %v11594_v60 = vpack.i.bf16 %v696_v22, %v695_v58 }
  0xc8   : > { %v10374_v55 = vpop.permute.xlu0 %10373  ;;  %v1997_v56 = vpack.c.bf16 %v1967_v53, %v1966_v52  ;;  %v1740_v15 = vsel %vm309_vm0, %v11366_v44, %v10371_v6  ;;  %v1739_v29 = vsel %vm309_vm0, %v11364_v43, %v10370_v11 }
  0xc9   : > { %v10379_v54 = vpop.permute.xlu1 %10378  ;;  %v10376_v0 = vunpack.i.h.bf16 %v10374_v55  ;;  %v10375_v21 = vunpack.i.l.bf16 %v10374_v55 }
  0xca   : > { %10663 = vrot.lane.b32.xlu0 %v11520_v49, %s11161_s29  ;;  %9746 = vmatmul.mubr.msk.bf16.vlgmr.msra.gmra.mxu0 %vm2039_vm11, %v1997_v56  ;;  %v10381_v19 = vunpack.i.h.bf16 %v10379_v54  ;;  %v10380_v20 = vunpack.i.l.bf16 %v10379_v54 }
  0xcb   : > { %10668 = vrot.lane.b32.xlu1 %v11572_v42, %s11161_s29  ;;  %v1771_v43 = vsel %vm1765_vm4, %v1738_v35, %v10376_v0  ;;  %v1770_v44 = vsel %vm1765_vm4, %v1737_v36, %v10375_v21 }
  0xcc   : > { %v10384_v59 = vpop.permute.xlu0 %10383  ;;  %v1772_v37 = vsel %vm1765_vm4, %v1739_v29, %v10380_v20  ;;  %v1773_v38 = vsel %vm1765_vm4, %v1740_v15, %v10381_v19 }
  0xcd   : > { %v10389_v57 = vpop.permute.xlu1 %10388  ;;  %v10385_v32 = vunpack.i.l.bf16 %v10384_v59 }
  0xce   : > { %10673 = vrot.lane.b32.xlu0 %v11526_v34, %s11162_s9  ;;  %v10391_v24 = vunpack.i.h.bf16 %v10389_v57  ;;  %v10390_v25 = vunpack.i.l.bf16 %v10389_v57 }
  0xcf   : > { %10678 = vrot.lane.b32.xlu1 %v11520_v49, %s11155_s18 }
  0xd0   : > { %v11598_v62 = vpop.permute.xlu0 %10393  ;;  %v1805_v33 = vsel %vm1798_vm5, %v1772_v37, %v10390_v25  ;;  %v1806_v30 = vsel %vm1798_vm5, %v1773_v38, %v10391_v24 }
  0xd1   : > { %v11596_v61 = vpop.permute.xlu1 %10398  ;;  %v10396_v39 = vunpack.i.h.bf16 %v11598_v62  ;;  %v10395_v40 = vunpack.i.l.bf16 %v11598_v62 }
  0xd2   : > { %10683 = vrot.lane.b32.xlu0 %v11594_v60, %s11162_s9  ;;  %v10401_v50 = vunpack.i.h.bf16 %v11596_v61  ;;  %v10400_v52 = vunpack.i.l.bf16 %v11596_v61 }
  0xd3   : > { %10688 = vrot.lane.b32.xlu1 %v11572_v42, %s11155_s18 }
  0xd4   : > { %v11606_v49 = vpop.permute.xlu0 %10403  ;;  %v1838_v17 = vsel %vm1831_vm6, %v1805_v33, %v10400_v52  ;;  %v1839_v18 = vsel %vm1831_vm6, %v1806_v30, %v10401_v50 }
  0xd5   : > { %v11604_v2 = vpop.permute.xlu1 %10408  ;;  %v10406_v9 = vunpack.i.h.bf16 %v11606_v49  ;;  %v10405_v45 = vunpack.i.l.bf16 %v11606_v49 }
  0xd6   : > { %10693 = vrot.lane.b32.xlu0 %v11526_v34, %s11156_s19  ;;  %v10386_v34 = vunpack.i.h.bf16 %v10384_v59  ;;  %v10411_v57 = vunpack.i.h.bf16 %v11604_v2  ;;  %v10410_v58 = vunpack.i.l.bf16 %v11604_v2  ;;  %v667_v2 = vld [vmem:[#allocation2 + $0x139] sm:$0xff] }
  0xd7   : > { %10698 = vrot.lane.b32.xlu1 %v11594_v60, %s11156_s19  ;;  %v11682_v25 = vpack.i.bf16 %v668_v5, %v667_v2 }
  0xd8   : > { %v10414_v26 = vpop.permute.xlu0 %10413  ;;  %v1804_v47 = vsel %vm1798_vm5, %v1771_v43, %v10386_v34  ;;  %v1871_v0 = vsel %vm1864_vm7, %v1838_v17, %v10410_v58  ;;  %v1872_v21 = vsel %vm1864_vm7, %v1839_v18, %v10411_v57 }
  0xd9   : > { %v11618_v23 = vpop.permute.xlu1 %10418  ;;  %v10416_v48 = vunpack.i.h.bf16 %v10414_v26  ;;  %v10415_v31 = vunpack.i.l.bf16 %v10414_v26  ;;  %v1837_v56 = vsel %vm1831_vm6, %v1804_v47, %v10396_v39  ;;  %v699_v39 = vld [vmem:[#allocation2 + $0x13a] sm:$0xff] }
  0xda   : > { %10703 = vrot.lane.b32.xlu0 %v11528_v51, %s11157_s20  ;;  %v1803_v51 = vsel %vm1798_vm5, %v1770_v44, %v10385_v32  ;;  %v1870_v62 = vsel %vm1864_vm7, %v1837_v56, %v10406_v9  ;;  %v10421_v61 = vunpack.i.h.bf16 %v11618_v23  ;;  %v10420_v63 = vunpack.i.l.bf16 %v11618_v23  ;;  %v542_v9 = vld [vmem:[#allocation2 + $0x150] sm:$0xff]  ;;  %v575_v47 = vld [vmem:[#allocation2 + $0x159] sm:$0xff] }
  0xdb   : > { %10708 = vrot.lane.b32.xlu1 %v11612_v12, %s11157_s20  ;;  %v1836_v55 = vsel %vm1831_vm6, %v1803_v51, %v10395_v40  ;;  %v1903_v49 = vsel %vm1897_vm8, %v1870_v62, %v10416_v48  ;;  %v574_v51 = vld [vmem:[#allocation2 + $0x151] sm:$0xff] }
  0xdc   : > { %v10424_v46 = vpop.permute.xlu0 %10423  ;;  %v1869_v59 = vsel %vm1864_vm7, %v1836_v55, %v10405_v45  ;;  %v1905_v26 = vsel %vm1897_vm8, %v1872_v21, %v10421_v61  ;;  %v543_v45 = vld [vmem:[#allocation2 + $0x158] sm:$0xff]  ;;  %v640_v55 = vld [vmem:[#allocation2 + $0x170] sm:$0xff] }
  0xdd   : > { %v10429_v41 = vpop.permute.xlu1 %10428  ;;  %v10426_v53 = vunpack.i.h.bf16 %v10424_v46  ;;  %v10425_v54 = vunpack.i.l.bf16 %v10424_v46  ;;  %v606_v48 = vld [vmem:[#allocation2 + $0x152] sm:$0xff]  ;;  %v11722_v52 = vpack.i.bf16 %v543_v45, %v542_v9 }
  0xde   : > { %10713 = vrot.lane.b32.xlu0 %v11572_v42, %s11158_s21  ;;  %v1902_v42 = vsel %vm1897_vm8, %v1869_v59, %v10415_v31  ;;  %v10431_v6 = vunpack.i.h.bf16 %v10429_v41  ;;  %v10430_v11 = vunpack.i.l.bf16 %v10429_v41 }
  0xdf   : > { %10718 = vrot.lane.b32.xlu1 %v11620_v16, %s11158_s21  ;;  %v1935_v13 = vsel %vm1930_vm9, %v1902_v42, %v10425_v54  ;;  %v1936_v14 = vsel %vm1930_vm9, %v1903_v49, %v10426_v53  ;;  %v607_v53 = vld [vmem:[#allocation2 + $0x15a] sm:$0xff]  ;;  %v639_v54 = vld [vmem:[#allocation2 + $0x168] sm:$0xff] }
  0xe0   : > { %v10434_v1 = vpop.permute.xlu0 %10433  ;;  %v1938_v32 = vsel %vm1930_vm9, %v1905_v26, %v10431_v6  ;;  %v11734_v2 = vpack.i.bf16 %v640_v55, %v639_v54 }
  0xe1   : > { %v11660_v22 = vpop.permute.xlu1 %10438  ;;  %v10436_v3 = vunpack.i.h.bf16 %v10434_v1  ;;  %v10435_v4 = vunpack.i.l.bf16 %v10434_v1  ;;  %v11730_v1 = vpack.i.bf16 %v575_v47, %v574_v51 }
  0xe2   : > { %10723 = vrot.lane.b32.xlu0 %v11594_v60, %s11159_s22  ;;  %v1904_v60 = vsel %vm1897_vm8, %v1871_v0, %v10420_v63  ;;  %v10441_v56 = vunpack.i.h.bf16 %v11660_v22  ;;  %v10440_v57 = vunpack.i.l.bf16 %v11660_v22 }
  0xe3   : > { %10728 = vrot.lane.b32.xlu1 %v11622_v27, %s11159_s22  ;;  %v1968_v10 = vsel %vm1963_vm10, %v1935_v13, %v10435_v4  ;;  %v1969_v19 = vsel %vm1963_vm10, %v1936_v14, %v10436_v3  ;;  %v1937_v34 = vsel %vm1930_vm9, %v1904_v60, %v10430_v11  ;;  %v11732_v4 = vpack.i.bf16 %v607_v53, %v606_v48  ;;  %v11045_v11 = vld [vmem:[#allocation2 + $0x68] sm:$0xff]  ;;  %v11046_v14 = vld [vmem:[#allocation2 + $0x60] sm:$0xff]  ;;  %v672_v48 = vld [vmem:[#allocation2 + $0x171] sm:$0xff] }
  0xe4   : > { %v1998_v23 = vpack.c.bf16 %v1969_v19, %v1968_v10  ;;  %v10444_v24 = vpop.permute.xlu0 %10443  ;;  %v1742_v13 = vsel %vm309_vm0, %v11045_v11, %v10441_v56  ;;  %v1741_v17 = vsel %vm309_vm0, %v11046_v14, %v10440_v57 }
  0xe5   : > { %v11678_v20 = vpop.permute.xlu1 %10448  ;;  %v10446_v15 = vunpack.i.h.bf16 %v10444_v24  ;;  %v10445_v29 = vunpack.i.l.bf16 %v10444_v24 }
  0xe6   : > { %10733 = vrot.lane.b32.xlu0 %v11612_v12, %s11160_s8  ;;  %9749 = vmatprep.mubr.msk.bf16.mxu0 %vm2039_vm11, %v1998_v23  ;;  %v700_v12 = vld [vmem:[#allocation2 + $0x142] sm:$0xff]  ;;  %v10451_v31 = vunpack.i.h.bf16 %v11678_v20  ;;  %v10450_v50 = vunpack.i.l.bf16 %v11678_v20 }
  0xe7   : > { %10738 = vrot.lane.b32.xlu1 %v11624_v28, %s11160_s8  ;;  %v1971_v35 = vsel %vm1963_vm10, %v1938_v32, %v10446_v15  ;;  %v1970_v36 = vsel %vm1963_vm10, %v1937_v34, %v10445_v29  ;;  %v11704_v41 = vpack.i.bf16 %v700_v12, %v699_v39 }
  0xe8   : > { %v1999_v38 = vpack.c.bf16 %v1971_v35, %v1970_v36  ;;  %v10454_v43 = vpop.permute.xlu0 %10453  ;;  %v1744_v22 = vsel %vm309_vm0, %v11408_v8, %v10451_v31  ;;  %v1743_v5 = vsel %vm309_vm0, %v11406_v7, %v10450_v50 }
  0xe9   : > { %v10459_v37 = vpop.permute.xlu1 %10458  ;;  %v10456_v62 = vunpack.i.h.bf16 %v10454_v43  ;;  %v10455_v61 = vunpack.i.l.bf16 %v10454_v43 }
  0xea   : > { %10743 = vrot.lane.b32.xlu0 %v11620_v16, %s11161_s29  ;;  %9750 = vmatmul.mubr.msk.bf16.gmra.mxu0 %vm2039_vm11, %v1999_v38  ;;  %v10461_v58 = vunpack.i.h.bf16 %v10459_v37  ;;  %v10460_v59 = vunpack.i.l.bf16 %v10459_v37 }
  0xeb   : > { %10748 = vrot.lane.b32.xlu1 %v11682_v25, %s11161_s29  ;;  %v1775_v7 = vsel %vm1765_vm4, %v1742_v13, %v10456_v62  ;;  %v1774_v8 = vsel %vm1765_vm4, %v1741_v17, %v10455_v61 }
  0xec   : > { %v10464_v40 = vpop.permute.xlu0 %10463  ;;  %v1776_v18 = vsel %vm1765_vm4, %v1743_v5, %v10460_v59  ;;  %v1777_v10 = vsel %vm1765_vm4, %v1744_v22, %v10461_v58 }
  0xed   : > { %v10469_v44 = vpop.permute.xlu1 %10468  ;;  %v10465_v6 = vunpack.i.l.bf16 %v10464_v40 }
  0xee   : > { %10753 = vrot.lane.b32.xlu0 %v11622_v27, %s11162_s9  ;;  %v10471_v42 = vunpack.i.h.bf16 %v10469_v44  ;;  %v10470_v49 = vunpack.i.l.bf16 %v10469_v44 }
  0xef   : > { %10758 = vrot.lane.b32.xlu1 %v11620_v16, %s11155_s18 }
  0xf0   : > { %v11708_v30 = vpop.permute.xlu0 %10473  ;;  %v1809_v21 = vsel %vm1798_vm5, %v1776_v18, %v10470_v49  ;;  %v1810_v23 = vsel %vm1798_vm5, %v1777_v10, %v10471_v42  ;;  %v703_v10 = vld [vmem:[#allocation2 + $0x16a] sm:$0xff] }
  0xf1   : > { %v11706_v33 = vpop.permute.xlu1 %10478  ;;  %v10476_v19 = vunpack.i.h.bf16 %v11708_v30  ;;  %v10475_v20 = vunpack.i.l.bf16 %v11708_v30 }
  0xf2   : > { %10763 = vrot.lane.b32.xlu0 %v11704_v41, %s11162_s9  ;;  %v10481_v32 = vunpack.i.h.bf16 %v11706_v33  ;;  %v10480_v35 = vunpack.i.l.bf16 %v11706_v33 }
  0xf3   : > { %10768 = vrot.lane.b32.xlu1 %v11682_v25, %s11155_s18 }
  0xf4   : > { %v11716_v16 = vpop.permute.xlu0 %10483  ;;  %v1842_v55 = vsel %vm1831_vm6, %v1809_v21, %v10480_v35  ;;  %v1843_v56 = vsel %vm1831_vm6, %v1810_v23, %v10481_v32  ;;  %v579_v32 = vld [vmem:[#allocation2 + $0x189] sm:$0xff] }
  0xf5   : > { %v11714_v46 = vpop.permute.xlu1 %10488  ;;  %v10486_v24 = vunpack.i.h.bf16 %v11716_v16  ;;  %v10485_v60 = vunpack.i.l.bf16 %v11716_v16  ;;  %v610_v35 = vld [vmem:[#allocation2 + $0x182] sm:$0xff] }
  0xf6   : > { %10773 = vrot.lane.b32.xlu0 %v11622_v27, %s11156_s19  ;;  %v10466_v27 = vunpack.i.h.bf16 %v10464_v40  ;;  %v10491_v44 = vunpack.i.h.bf16 %v11714_v46  ;;  %v10490_v39 = vunpack.i.l.bf16 %v11714_v46  ;;  %v671_v46 = vld [vmem:[#allocation2 + $0x169] sm:$0xff] }
  0xf7   : > { %10778 = vrot.lane.b32.xlu1 %v11704_v41, %s11156_s19  ;;  %v11790_v49 = vpack.i.bf16 %v672_v48, %v671_v46  ;;  %v11876_v48 = vld [vmem:[#allocation2 + $0x199] sm:$0xff] }
  0xf8   : > { %v10494_v3 = vpop.permute.xlu0 %10493  ;;  %v1808_v15 = vsel %vm1798_vm5, %v1775_v7, %v10466_v27  ;;  %v1875_v62 = vsel %vm1864_vm7, %v1842_v55, %v10490_v39  ;;  %v1876_v61 = vsel %vm1864_vm7, %v1843_v56, %v10491_v44  ;;  %v704_v7 = vld [vmem:[#allocation2 + $0x172] sm:$0xff]  ;;  %v11856_v39 = vld [vmem:[#allocation2 + $0x1a0] sm:$0xff] }
  0xf9   : > { %v11728_v63 = vpop.permute.xlu1 %10498  ;;  %v10496_v29 = vunpack.i.h.bf16 %v10494_v3  ;;  %v10495_v34 = vunpack.i.l.bf16 %v10494_v3  ;;  %v1841_v43 = vsel %vm1831_vm6, %v1808_v15, %v10476_v19  ;;  %v15130_v19 = vmov 0  ;;  %v11854_v44 = vld [vmem:[#allocation2 + $0x198] sm:$0xff] }
  0xfa   : > { %10783 = vrot.lane.b32.xlu0 %v11624_v28, %s11157_s20  ;;  %v1807_v28 = vsel %vm1798_vm5, %v1774_v8, %v10465_v6  ;;  %v1874_v30 = vsel %vm1864_vm7, %v1841_v43, %v10486_v24  ;;  %v10501_v33 = vunpack.i.h.bf16 %v11728_v63  ;;  %v10500_v9 = vunpack.i.l.bf16 %v11728_v63  ;;  %v2298_v24 = vld [vmem:[#allocation3 + $0xc] sm:$0x1] }
  0xfb   : > { %10788 = vrot.lane.b32.xlu1 %v11722_v52, %s11157_s20  ;;  %v1840_v38 = vsel %vm1831_vm6, %v1807_v28, %v10475_v20  ;;  %v1907_v16 = vsel %vm1897_vm8, %v1874_v30, %v10496_v29  ;;  %v15131_v19 = vsel %vm11820_vm14, 4294967295, %v15130_v19  ;;  %v2301_v20 = vld [vmem:[#allocation3 + $0x18] sm:$0x1]  ;;  %v15133_v15 = vmov 0 }
  0xfc   : > { %v10504_v26 = vpop.permute.xlu0 %10503  ;;  %v1873_v40 = vsel %vm1864_vm7, %v1840_v38, %v10485_v60  ;;  %v1909_v3 = vsel %vm1897_vm8, %v1876_v61, %v10501_v33  ;;  %15132 = vst [vmem:[#allocation10_spill] sm:$0xff] %v15131_v19  ;;  %v2302_v21 = vsel %vm11820_vm14, 0, %v2301_v20  ;;  %v547_v28 = vld [vmem:[#allocation2 + $0x188] sm:$0xff]  ;;  %v15134_v15 = vsel %vm11839_vm1, 4294967295, %v15133_v15  ;;  %v10926_v38 = vld [vmem:[%s15074_s3 + $0x78] sm:$0xff]  }
  0xfd   : > { %v10509_v0 = vpop.permute.xlu1 %10508  ;;  %v10506_v36 = vunpack.i.h.bf16 %v10504_v26  ;;  %v10505_v37 = vunpack.i.l.bf16 %v10504_v26  ;;  %2303 = vst [vmem:[#allocation3 + $0x18] sm:$0x1] %v2302_v21  ;;  %v546_v26 = vld [vmem:[#allocation2 + $0x180] sm:$0xff]  ;;  %15135 = vst [vmem:[#allocation11_spill] sm:$0xff] %v15134_v15  ;;  %v2299_v29 = vsel %vm11820_vm14, 0, %v2298_v24  ;;  %9777 = vmatprep.subr.bf16.mxu1 %v10926_v38 }
  0xfe   : > { %10793 = vrot.lane.b32.xlu0 %v11682_v25, %s11158_s21  ;;  %v1906_v25 = vsel %vm1897_vm8, %v1873_v40, %v10495_v34  ;;  %v10511_v31 = vunpack.i.h.bf16 %v10509_v0  ;;  %v10510_v50 = vunpack.i.l.bf16 %v10509_v0  ;;  %v11826_v0 = vpack.i.bf16 %v704_v7, %v703_v10  ;;  %v578_v34 = vld [vmem:[#allocation2 + $0x181] sm:$0xff]  ;;  %2300 = vst [vmem:[#allocation3 + $0xc] sm:$0x1] %v2299_v29  ;;  %9778 = vmatpush3.bf16.msra.mxu1 %v10926_v38 }
  0xff   : > { %10798 = vrot.lane.b32.xlu1 %v11730_v1, %s11158_s21  ;;  %v1939_v53 = vsel %vm1930_vm9, %v1906_v25, %v10505_v37  ;;  %v1940_v54 = vsel %vm1930_vm9, %v1907_v16, %v10506_v36  ;;  %v611_v36 = vld [vmem:[#allocation2 + $0x18a] sm:$0xff]  ;;  %v11862_v33 = vpack.i.bf16 %v547_v28, %v546_v26  ;;  %v433_v25 = vld [vmem:[#allocation2 + $0x98] sm:$0xff]  ;;  %v10931_v38 = vld [vmem:[%s15074_s3 + $0x20] sm:$0xff]  }
 0x100   : > { %v10514_v45 = vpop.permute.xlu0 %10513  ;;  %v1942_v6 = vsel %vm1930_vm9, %v1909_v3, %v10511_v31  ;;  %v2357_v37 = vld [vmem:[#allocation3 + $0x20] sm:$0x1]  ;;  %v11874_v46 = vpack.i.bf16 %v611_v36, %v610_v35  ;;  %v11878_v31 = vld [vmem:[#allocation2 + $0x1a1] sm:$0xff] }
 0x101   : > { %v11768_v12 = vpop.permute.xlu1 %10518  ;;  %v10516_v51 = vunpack.i.h.bf16 %v10514_v45  ;;  %v10515_v47 = vunpack.i.l.bf16 %v10514_v45  ;;  %v2358_v40 = vsel %vm11839_vm1, 0, %v2357_v37  ;;  %v10927_v45 = vld [vmem:[%s15074_s3 + $0x30] sm:$0xff]   ;;  %v10930_v26 = vld [vmem:[%s15074_s3 + $0x68] sm:$0xff]  }
 0x102   : > { %10803 = vrot.lane.b32.xlu0 %v11704_v41, %s11159_s22  ;;  %v1908_v41 = vsel %vm1897_vm8, %v1875_v62, %v10500_v9  ;;  %v11864_v9 = vpack.i.bf16 %v579_v32, %v578_v34  ;;  %2359 = vst [vmem:[#allocation3 + $0x20] sm:$0x1] %v2358_v40  ;;  %v10521_v16 = vunpack.i.h.bf16 %v11768_v12 }
 0x103   : > { %10808 = vrot.lane.b32.xlu1 %v11732_v4, %s11159_s22  ;;  %v1972_v57 = vsel %vm1963_vm10, %v1939_v53, %v10515_v47  ;;  %v1973_v58 = vsel %vm1963_vm10, %v1940_v54, %v10516_v51  ;;  %v1941_v27 = vsel %vm1930_vm9, %v1908_v41, %v10510_v50  ;;  %v10520_v50 = vunpack.i.l.bf16 %v11768_v12  ;;  %v434_v53 = vld [vmem:[#allocation2 + $0xa8] sm:$0xff]  ;;  %v435_v54 = vld [vmem:[#allocation2 + $0xb0] sm:$0xff] }
 0x104   : > { %v2000_v63 = vpack.c.bf16 %v1973_v58, %v1972_v57  ;;  %v10524_v42 = vpop.permute.xlu0 %10523  ;;  %v10897_v57 = vpack.i.bf16 %v11856_v39, %v11854_v44  ;;  %v2354_v58 = vld [vmem:[#allocation3 + $0x14] sm:$0x1]  ;;  %v10937_v44 = vld [vmem:[%s15074_s3 + $0x8] sm:$0xff]  }
 0x105   : > { %v11786_v59 = vpop.permute.xlu1 %10528  ;;  %v10526_v22 = vunpack.i.h.bf16 %v10524_v42  ;;  %v10525_v5 = vunpack.i.l.bf16 %v10524_v42 }
 0x106   : > { %10813 = vrot.lane.b32.xlu0 %v11722_v52, %s11160_s8  ;;  %9753 = vmatprep.mubr.msk.bf16.mxu0 %vm2039_vm11, %v2000_v63  ;;  %v10531_v51 = vunpack.i.h.bf16 %v11786_v59  ;;  %v10530_v47 = vunpack.i.l.bf16 %v11786_v59  ;;  %v432_v59 = vld [vmem:[#allocation2 + $0x90] sm:$0xff]  ;;  %v2355_v63 = vsel %vm11839_vm1, 0, %v2354_v58 }
 0x107   : > { %10818 = vrot.lane.b32.xlu1 %v11734_v2, %s11160_s8  ;;  %v1975_v11 = vsel %vm1963_vm10, %v1942_v6, %v10526_v22  ;;  %v1974_v13 = vsel %vm1963_vm10, %v1941_v27, %v10525_v5  ;;  %v10907_v5 = vpack.i.bf16 %v11878_v31, %v11876_v48  ;;  %2356 = vst [vmem:[#allocation3 + $0x14] sm:$0x1] %v2355_v63  ;;  %v11163_v27 = vmov 0  }
 0x108   : > { %v2001_v17 = vpack.c.bf16 %v1975_v11, %v1974_v13  ;;  %v11805_v18 = vpop.permute.xlu0 %10533  ;;  %2285 = vst [vmem:[#allocation3] sm:$0xf] %v11163_v27  ;;  %2286 = vst [vmem:[#allocation3 + $0x4] sm:$0xf] %v11163_v27  ;;  %v1746_v6 = vsel %vm309_vm0, %v433_v25, %v10521_v16  ;;  %v1748_v11 = vsel %vm309_vm0, %v435_v54, %v10531_v51 }
 0x109   : > { %v11803_v14 = vpop.permute.xlu1 %10538  ;;  %v10536_v62 = vunpack.i.h.bf16 %v11805_v18  ;;  %v10535_v61 = vunpack.i.l.bf16 %v11805_v18  ;;  %2287 = vst [vmem:[#allocation3 + $0x8] sm:$0x1] %v11163_v27  ;;  %2289 = vst [vmem:[#allocation3 + $0xcc] sm:$0xf] %v11163_v27  ;;  %v1747_v13 = vsel %vm309_vm0, %v434_v53, %v10530_v47  ;;  %v1745_v18 = vsel %vm309_vm0, %v432_v59, %v10520_v50 }
 0x10a   : > { %10823 = vrot.lane.b32.xlu0 %v11730_v1, %s11161_s29  ;;  %9754 = vmatmul.mubr.msk.bf16.gmra.mxu0 %vm2039_vm11, %v2001_v17  ;;  %v10541_v55 = vunpack.i.h.bf16 %v11803_v14  ;;  %v10540_v56 = vunpack.i.l.bf16 %v11803_v14  ;;  %2290 = vst [vmem:[#allocation3 + $0xd0] sm:$0xf] %v11163_v27  ;;  %2291 = vst [vmem:[#allocation3 + $0xd4] sm:$0x1] %v11163_v27  ;;  %v10929_v17 = vld [vmem:[%s15074_s3 + $0x28] sm:$0xff]  }
 0x10b   : > { %10828 = vrot.lane.b32.xlu1 %v11790_v49, %s11161_s29  ;;  %v1778_v20 = vsel %vm1765_vm4, %v1745_v18, %v10535_v61 }
 0x10c   : > { %v11814_v8 = vpop.permute.xlu0 %10543  ;;  %v1781_v10 = vsel %vm1765_vm4, %v1748_v11, %v10541_v55 }
 0x10d   : > { %v11812_v52 = vpop.permute.xlu1 %10548  ;;  %v10545_v3 = vunpack.i.l.bf16 %v11814_v8  ;;  %v10546_v14 = vunpack.i.h.bf16 %v11814_v8  ;;  %v1779_v8 = vsel %vm1765_vm4, %v1746_v6, %v10536_v62 }
 0x10e   : > { %10833 = vrot.lane.b32.xlu0 %v11732_v4, %s11162_s9  ;;  %v10551_v42 = vunpack.i.h.bf16 %v11812_v52  ;;  %v10550_v41 = vunpack.i.l.bf16 %v11812_v52  ;;  %v1780_v52 = vsel %vm1765_vm4, %v1747_v13, %v10540_v56 }
 0x10f   : > { %10838 = vrot.lane.b32.xlu1 %v11730_v1, %s11155_s18  ;;  %v10925_v1 = vld [vmem:[%s15074_s3 + $0x38] sm:$0xff]   ;;  %v1811_v29 = vsel %vm1798_vm5, %v1778_v20, %v10545_v3  ;;  %v2295_v54 = vld [vmem:[#allocation3] sm:$0x1] }
 0x110   : > { %v11835_v60 = vpop.permute.xlu0 %10553  ;;  %9825 = vmatprep.subr.bf16.mxu0 %v10925_v1  ;;  %v1813_v28 = vsel %vm1798_vm5, %v1780_v52, %v10550_v41 }
 0x111   : > { %v11833_v23 = vpop.permute.xlu1 %10558  ;;  %9826 = vmatpush3.bf16.msra.mxu0 %v10925_v1  ;;  %v10555_v7 = vunpack.i.l.bf16 %v11835_v60  ;;  %v10556_v21 = vunpack.i.h.bf16 %v11835_v60  ;;  %v1812_v60 = vsel %vm1798_vm5, %v1779_v8, %v10546_v14  ;;  %v10934_v14 = vld [vmem:[%s15074_s3 + $0x58] sm:$0xff]   ;;  %v10936_v8 = vld [vmem:[%s15074_s3 + $0x50] sm:$0xff]  }
 0x112   : > { %10843 = vrot.lane.b32.xlu0 %v11826_v0, %s11162_s9  ;;  %9827 = vmatprep.subr.bf16.mxu0 %v10927_v45  ;;  %v10561_v35 = vunpack.i.h.bf16 %v11833_v23  ;;  %v10560_v40 = vunpack.i.l.bf16 %v11833_v23  ;;  %v10932_v23 = vld [vmem:[%s15074_s3 + $0x60] sm:$0xff]  }
 0x113   : > { %10848 = vrot.lane.b32.xlu1 %v11790_v49, %s11155_s18  ;;  %v1845_v16 = vsel %vm1831_vm6, %v1812_v60, %v10556_v21  ;;  %s14616_s18 = scalar_lea.vmem %s15076_s5, %s9468_s14 }
 0x114   : > { %v11860_v30 = vpop.permute.xlu0 %10563 }
 0x115   : > { %v11852_v43 = vpop.permute.xlu1 %10568  ;;  %9828 = vmatpush3.bf16.msra.mxu0 %v10927_v45  ;;  %v10565_v1 = vunpack.i.l.bf16 %v11860_v30  ;;  %v10566_v34 = vunpack.i.h.bf16 %v11860_v30  ;;  %v1844_v30 = vsel %vm1831_vm6, %v1811_v29, %v10555_v7  ;;  %v10935_v7 = vld [vmem:[%s15074_s3 + $0x10] sm:$0xff]   ;;  %v707_v29 = vld [vmem:[#allocation2 + $0x19a] sm:$0xff] }
 0x116   : > { %10853 = vrot.lane.b32.xlu0 %v11732_v4, %s11156_s19  ;;  %v10928_v4 = vld [vmem:[%s15074_s3 + $0x70] sm:$0xff]   ;;  %9829 = vmatprep.subr.bf16.mxu0 %v10929_v17  ;;  %v10571_v51 = vunpack.i.h.bf16 %v11852_v43  ;;  %v10570_v47 = vunpack.i.l.bf16 %v11852_v43  ;;  %v2296_v43 = vsel %vm11820_vm14, 0, %v2295_v54 }
 0x117   : > { %10858 = vrot.lane.b32.xlu1 %v11826_v0, %s11156_s19  ;;  %9779 = vmatprep.subr.bf16.mxu1 %v10928_v4  ;;  %v1877_v50 = vsel %vm1864_vm7, %v1844_v30, %v10565_v1  ;;  %v1878_v55 = vsel %vm1864_vm7, %v1845_v16, %v10566_v34  ;;  %2297 = vst [vmem:[#allocation3] sm:$0x1] %v2296_v43  ;;  %v708_v34 = vld [vmem:[#allocation2 + $0x1a2] sm:$0xff] }
 0x118   : > { %v11899_v22 = vpop.permute.xlu0 %10573  ;;  %9780 = vmatpush3.bf16.msra.mxu1 %v10928_v4  ;;  %v10933_v4 = vld [vmem:[%s15074_s3 + $0x18] sm:$0xff]  }
 0x119   : > { %v11889_v12 = vpop.permute.xlu1 %10578  ;;  %9830 = vmatpush3.bf16.msra.mxu0 %v10929_v17  ;;  %v10576_v36 = vunpack.i.h.bf16 %v11899_v22  ;;  %v10575_v37 = vunpack.i.l.bf16 %v11899_v22  ;;  %9781 = vmatprep.subr.bf16.mxu1 %v10930_v26  ;;  %v1846_v22 = vsel %vm1831_vm6, %v1813_v28, %v10560_v40  ;;  %v2351_v17 = vld [vmem:[#allocation3 + $0x8] sm:$0x1] }
 0x11a   : > { %10863 = vrot.lane.b32.xlu0 %v11734_v2, %s11157_s20  ;;  %v1814_v2 = vsel %vm1798_vm5, %v1781_v10, %v10551_v42  ;;  %9831 = vmatprep.subr.bf16.mxu0 %v10931_v38  ;;  %v10580_v56 = vunpack.i.l.bf16 %v11889_v12  ;;  %v1879_v18 = vsel %vm1864_vm7, %v1846_v22, %v10570_v47  ;;  %v2352_v20 = vsel %vm11839_vm1, 0, %v2351_v17  ;;  %v2307_v47 = vld [vmem:[#allocation3 + $0x30] sm:$0x1] }
 0x11b   : > { %10868 = vrot.lane.b32.xlu1 %v11862_v33, %s11157_s20  ;;  %v1910_v59 = vsel %vm1897_vm8, %v1877_v50, %v10575_v37  ;;  %v1911_v62 = vsel %vm1897_vm8, %v1878_v55, %v10576_v36  ;;  %v1847_v27 = vsel %vm1831_vm6, %v1814_v2, %v10561_v35  ;;  %2353 = vst [vmem:[#allocation3 + $0x8] sm:$0x1] %v2352_v20  ;;  %v2308_v54 = vsel %vm11820_vm14, 0, %v2307_v47  ;;  %v437_v20 = vld [vmem:[#allocation2 + $0xc8] sm:$0xff]  ;;  %s14600_s20 = sand.u32 1, %s11144_s25  }
 0x11c   : > { %v10584_v32 = vpop.permute.xlu0 %10583  ;;  %9782 = vmatpush3.bf16.msra.mxu1 %v10930_v26  ;;  %v1912_v21 = vsel %vm1897_vm8, %v1879_v18, %v10580_v56  ;;  %v10917_v37 = vpack.i.bf16 %v708_v34, %v707_v29  ;;  %2309 = vst [vmem:[#allocation3 + $0x30] sm:$0x1] %v2308_v54  ;;  %v10940_v56 = vld [vmem:[%s15074_s3 + $0x40] sm:$0xff]   ;;  %v438_v18 = vld [vmem:[#allocation2 + $0xd8] sm:$0xff]  ;;  %s9074_s14 = sshll.u32 %s14600_s20, 6 }
 0x11d   : > { %v11922_v24 = vpop.permute.xlu1 %10588  ;;  %v10586_v45 = vunpack.i.h.bf16 %v10584_v32  ;;  %v10585_v25 = vunpack.i.l.bf16 %v10584_v32  ;;  %9832 = vmatpush3.bf16.msra.mxu0 %v10931_v38  ;;  %9783 = vmatprep.subr.bf16.mxu1 %v10932_v23  ;;  %v12019_v38 = vld [vmem:[#allocation3 + $0x4] sm:$0xf]  ;;  %s14707_s17 = scalar_lea.vmem [#allocation6], %s9074_s14  ;;  %s11165_s14 = smov [#allocation4]  }
 0x11e   : > { %10873 = vrot.lane.b32.xlu0 %v11790_v49, %s11158_s21  ;;  %v10581_v49 = vunpack.i.h.bf16 %v11889_v12  ;;  %v10591_v12 = vunpack.i.h.bf16 %v11922_v24  ;;  %v10590_v42 = vunpack.i.l.bf16 %v11922_v24  ;;  %9833 = vmatprep.subr.bf16.mxu0 %v10933_v4  ;;  %v12013_v36 = vld [vmem:[#allocation3] sm:$0xf] }
 0x11f   : > { %10878 = vrot.lane.b32.xlu1 %v11864_v9, %s11158_s21  ;;  %v1943_v41 = vsel %vm1930_vm9, %v1910_v59, %v10585_v25  ;;  %v1944_v3 = vsel %vm1930_vm9, %v1911_v62, %v10586_v45  ;;  %v3006_v40 = vshrl.u32 %v12013_v36, 16  ;;  %v3009_v30 = vshll.u32 %v12013_v36, 16  ;;  %s9073_s21 = sshll.u32 %s14600_s20, 8 }
 0x120   : > { %v10594_v58 = vpop.permute.xlu0 %10593  ;;  %9784 = vmatpush3.bf16.msra.mxu1 %v10932_v23  ;;  %v1945_v28 = vsel %vm1930_vm9, %v1912_v21, %v10590_v42  ;;  %s14647_s13 = scalar_lea.vmem [#allocation4], %s9073_s21 }
 0x121   : > { %v11948_v53 = vpop.permute.xlu1 %10598  ;;  %v10596_v61 = vunpack.i.h.bf16 %v10594_v58  ;;  %v10595_v63 = vunpack.i.l.bf16 %v10594_v58  ;;  %9834 = vmatpush3.bf16.msra.mxu0 %v10933_v4  ;;  %9785 = vmatprep.subr.bf16.mxu1 %v10934_v14  ;;  %v3008_v25 = vrot.slane %v3006_v40, 4  ;;  %v3011_v16 = vrot.slane %v3009_v30, 5  ;;  %v2304_v4 = vld [vmem:[#allocation3 + $0x24] sm:$0x1] }
 0x122   : > { %10883 = vrot.lane.b32.xlu0 %v11826_v0, %s11159_s22  ;;  %v1880_v0 = vsel %vm1864_vm7, %v1847_v27, %v10571_v51  ;;  %9835 = vmatprep.subr.bf16.mxu0 %v10935_v7  ;;  %v2986_v31 = vld [vmem:[#allocation3 + $0x8] sm:$0x1]  ;;  %v3019_v51 = vshrl.u32 %v12019_v38, 16  ;;  %v2305_v22 = vsel %vm11820_vm14, 0, %v2304_v4  ;;  %v10600_v27 = vunpack.i.l.bf16 %v11948_v53 }
 0x123   : > { %10888 = vrot.lane.b32.xlu1 %v11874_v46, %s11159_s22  ;;  %v1976_v6 = vsel %vm1963_vm10, %v1943_v41, %v10595_v63  ;;  %v1977_v11 = vsel %vm1963_vm10, %v1944_v3, %v10596_v61  ;;  %v1913_v1 = vsel %vm1897_vm8, %v1880_v0, %v10581_v49  ;;  %v3012_v50 = vor.u32 %v3011_v16, %v3008_v25  ;;  %v439_v0 = vld [vmem:[#allocation2 + $0xe0] sm:$0xff]  ;;  %s8947_s22 = sshll.u32 %s14647_s13, 4  ;;  %s14961_s22 = int_to_ptr.vmem [resolvable:$true] %s8947_s22 }
 0x124   : > { %v2002_v52 = vpack.c.bf16 %v1977_v11, %v1976_v6  ;;  %v10604_v10 = vpop.permute.xlu0 %10603  ;;  %v1946_v2 = vsel %vm1930_vm9, %v1913_v1, %v10591_v12  ;;  %9786 = vmatpush3.bf16.msra.mxu1 %v10934_v14  ;;  %v3025_v23 = vshll.u32 %v2986_v31, 16  ;;  %v3021_v43 = vrot.slane %v3019_v51, 4  ;;  %2306 = vst [vmem:[#allocation3 + $0x24] sm:$0x1] %v2305_v22  ;;  %v2363_v14 = vld [vmem:[#allocation3 + $0x38] sm:$0x1] }
 0x125   : > { %v11975_v13 = vpop.permute.xlu1 %10608  ;;  %v10606_v24 = vunpack.i.h.bf16 %v10604_v10  ;;  %v10605_v26 = vunpack.i.l.bf16 %v10604_v10  ;;  %9836 = vmatpush3.bf16.msra.mxu0 %v10935_v7  ;;  %9787 = vmatprep.subr.bf16.mxu1 %v10936_v8  ;;  %v3013_v58 = vrot.slane %v3012_v50, 4  ;;  %v10601_v41 = vunpack.i.h.bf16 %v11948_v53  ;;  %v436_v53 = vld [vmem:[#allocation2 + $0xc0] sm:$0xff]  ;;  %s11062_s21 = scalar_lea.vmem %s14961_s22, 4096 }
 0x126   : > { %10893 = vrot.lane.b32.xlu0 %v11862_v33, %s11160_s8  ;;  %9757 = vmatprep.mubr.msk.bf16.mxu0 %vm2039_vm11, %v2002_v52  ;;  %v10938_v33 = vld [vmem:[%s15074_s3 + $0x48] sm:$0xff]   ;;  %v3027_v62 = vrot.slane %v3025_v23, 5  ;;  %v10611_v6 = vunpack.i.h.bf16 %v11975_v13  ;;  %v10610_v11 = vunpack.i.l.bf16 %v11975_v13  ;;  %v2364_v7 = vsel %vm11839_vm1, 0, %v2363_v14  ;;  %p11063_p11 = scmp.ne.s32.totalorder %s14961_s22, %s11062_s21 }
 0x127   : > { %10898 = vrot.lane.b32.xlu1 %v10897_v57, %s11160_s8  ;;  %v1979_v32 = vsel %vm1963_vm10, %v1946_v2, %v10606_v24  ;;  %v1978_v60 = vsel %vm1963_vm10, %v1945_v28, %v10605_v26  ;;  %9837 = vmatprep.subr.bf16.mxu0 %v10937_v44  ;;  %2365 = vst [vmem:[#allocation3 + $0x38] sm:$0x1] %v2364_v7  ;;  %v2360_v24 = vld [vmem:[#allocation3 + $0x2c] sm:$0x1]  ;;  %s11066_s8 = sshll.u32 %s11165_s14, 4  ;;  %s11067_s8 = int_to_ptr.vmem [resolvable:$false] %s11066_s8 }
 0x128   : > { %v2003_v39 = vpack.c.bf16 %v1979_v32, %v1978_v60  ;;  %v12008_v57 = vpop.permute.xlu0 %10613  ;;  %9788 = vmatpush3.bf16.msra.mxu1 %v10936_v8  ;;  %v2361_v29 = vsel %vm11839_vm1, 0, %v2360_v24  ;;  %v1752_v34 = vsel %vm309_vm0, %v439_v0, %v10611_v6  ;;  %v1751_v32 = vsel %vm309_vm0, %v438_v18, %v10610_v11  ;;  %p11064_p12 = pnand %p11063_p11, %p11246_p5  ;;  %s11068_s15 = scalar_lea.vmem %s11067_s8, 8192 }
 0x129   : > { %v12003_v35 = vpop.permute.xlu1 %10618  ;;  %9838 = vmatpush3.bf16.msra.mxu0 %v10937_v44  ;;  %9789 = vmatprep.subr.bf16.mxu1 %v10938_v33  ;;  %v10616_v21 = vunpack.i.h.bf16 %v12008_v57  ;;  %v10615_v13 = vunpack.i.l.bf16 %v12008_v57  ;;  %2362 = vst [vmem:[#allocation3 + $0x2c] sm:$0x1] %v2361_v29  ;;  %v1750_v44 = vsel %vm309_vm0, %v437_v20, %v10601_v41  ;;  %p11069_p0 = scmp.lt.s32.totalorder %s14961_s22, %s11067_s8  ;;  %p11070_p1 = scmp.lt.s32.totalorder %s11068_s15, %s11062_s21 }
 0x12a   : > { %10903 = vrot.lane.b32.xlu0 %v11864_v9, %s11161_s29  ;;  %9758 = vmatmul.mubr.msk.bf16.gmra.mxu0 %vm2039_vm11, %v2003_v39  ;;  %v10939_v9 = vld [vmem:[%s15074_s3] sm:$0xff]   ;;  %v10621_v52 = vunpack.i.h.bf16 %v12003_v35  ;;  %v10620_v10 = vunpack.i.l.bf16 %v12003_v35  ;;  %v1749_v39 = vsel %vm309_vm0, %v436_v53, %v10600_v27  ;;  %p11065_p13 = pneg %p11064_p12 }
 0x12b   : > { %10908 = vrot.lane.b32.xlu1 %v10907_v5, %s11161_s29  ;;  %v3015_v5 = vshll.u32 %v12019_v38, 16  ;;  %9839 = vmatprep.subr.bf16.mxu0 %v10939_v9  ;;  %v1782_v40 = vsel %vm1765_vm4, %v1749_v39, %v10615_v13  ;;  %s9502_s29 = sshll.u32 %s11229_s28, 12  ;;  %p11071_p2 = por %p11070_p1, %p11069_p0 }
 0x12c   : > { %v12028_v48 = vpop.permute.xlu0 %10623  ;;  %9790 = vmatpush3.bf16.msra.mxu1 %v10938_v33  ;;  %v1784_v57 = vsel %vm1765_vm4, %v1751_v32, %v10620_v10  ;;  %v1785_v33 = vsel %vm1765_vm4, %v1752_v34, %v10621_v52  ;;  %s14958_s23 = scalar_lea.hbm %s15077_s6, %s9502_s29 }
 0x12d   : > { %v12026_v45 = vpop.permute.xlu1 %10628  ;;  %v3017_v55 = vrot.slane %v3015_v5, 5  ;;  %9840 = vmatpush3.bf16.msra.mxu0 %v10939_v9  ;;  %9791 = vmatprep.subr.bf16.mxu1 %v10940_v56  ;;  %v10626_v60 = vunpack.i.h.bf16 %v12028_v48  ;;  %v10625_v35 = vunpack.i.l.bf16 %v12028_v48  ;;  %p11072_p3 = pnand %p11071_p2, %p11065_p13 }
 0x12e   : > { %10913 = vrot.lane.b32.xlu0 %v11874_v46, %s11162_s9  ;;  %v10631_v26 = vunpack.i.h.bf16 %v12026_v45  ;;  %v10630_v28 = vunpack.i.l.bf16 %v12026_v45 }
 0x12f   : > { %10918 = vrot.lane.b32.xlu1 %v10917_v37, %s11162_s9  ;;  %v3022_v46 = vor.u32 %v3021_v43, %v3017_v55  ;;  %v3018_v12 = vsel %vm12048_vm12, %v3013_v58, %v3017_v55  ;;  %v1783_v37 = vsel %vm1765_vm4, %v1750_v44, %v10616_v21  ;;  %v1815_v47 = vsel %vm1798_vm5, %v1782_v40, %v10625_v35 }
 0x130   : > { %v12045_v59 = vpop.permute.xlu0 %10633  ;;  %9792 = vmatpush3.bf16.msra.mxu1 %v10940_v56  ;;  %v1817_v16 = vsel %vm1798_vm5, %v1784_v57, %v10630_v28  ;;  %v1818_v48 = vsel %vm1798_vm5, %v1785_v33, %v10631_v26  ;;  %v1816_v9 = vsel %vm1798_vm5, %v1783_v37, %v10626_v60  ;;  %v2313_v33 = vld [vmem:[#allocation3 + $0x48] sm:$0x1] }
 0x131   : > { %v12040_v49 = vpop.permute.xlu1 %10638  ;;  %v3023_v42 = vrot.slane %v3022_v46, 4  ;;  %v10636_v30 = vunpack.i.h.bf16 %v12045_v59  ;;  %v10635_v45 = vunpack.i.l.bf16 %v12045_v59  ;;  %v2314_v37 = vsel %vm11820_vm14, 0, %v2313_v33 }
 0x132   : > { %v10641_v54 = vunpack.i.h.bf16 %v12040_v49  ;;  %v10640_v55 = vunpack.i.l.bf16 %v12040_v49  ;;  %2315 = vst [vmem:[#allocation3 + $0x48] sm:$0x1] %v2314_v37 }
 0x133   : > { %v3028_v17 = vsel %vm12048_vm12, %v3023_v42, %v3027_v62  ;;  %v1848_v43 = vsel %vm1831_vm6, %v1815_v47, %v10635_v45  ;;  %v1849_v59 = vsel %vm1831_vm6, %v1816_v9, %v10636_v30 }
 0x134   : > { %v10644_v3 = vpop.permute.xlu0 %10643  ;;  %v9131_v8 = vcombine.low %v3018_v12, %v3028_v17  ;;  %v1850_v0 = vsel %vm1831_vm6, %v1817_v16, %v10640_v55  ;;  %v1851_v52 = vsel %vm1831_vm6, %v1818_v48, %v10641_v54  ;;  %v2310_v48 = vld [vmem:[#allocation3 + $0x3c] sm:$0x1]  ;;  %v2369_v55 = vld [vmem:[#allocation3 + $0x50] sm:$0x1] }
 0x135   : > { %v12052_v63 = vpop.permute.xlu1 %10648  ;;  %v10646_v31 = vunpack.i.h.bf16 %v10644_v3  ;;  %v10645_v5 = vunpack.i.l.bf16 %v10644_v3 }
 0x136   : > { %9793 = vmatprep.mubr.bf16.mxu1 %v9131_v8  ;;  %v10651_v46 = vunpack.i.h.bf16 %v12052_v63  ;;  %v10650_v62 = vunpack.i.l.bf16 %v12052_v63 }
 0x137   : > { %v1881_v12 = vsel %vm1864_vm7, %v1848_v43, %v10645_v5  ;;  %v1882_v42 = vsel %vm1864_vm7, %v1849_v59, %v10646_v31  ;;  %v443_v31 = vld [vmem:[#allocation2 + $0x110] sm:$0xff] }
 0x138   : > { %v10654_v2 = vpop.permute.xlu0 %10653  ;;  %v1883_v53 = vsel %vm1864_vm7, %v1850_v0, %v10650_v62  ;;  %v1884_v20 = vsel %vm1864_vm7, %v1851_v52, %v10651_v46  ;;  %v2370_v62 = vsel %vm11839_vm1, 0, %v2369_v55 }
 0x139   : > { %v12070_v1 = vpop.permute.xlu1 %10658  ;;  %v10656_v50 = vunpack.i.h.bf16 %v10654_v2  ;;  %v10655_v23 = vunpack.i.l.bf16 %v10654_v2  ;;  %2371 = vst [vmem:[#allocation3 + $0x50] sm:$0x1] %v2370_v62 }
 0x13a   : > { %v10661_v41 = vunpack.i.h.bf16 %v12070_v1  ;;  %v10660_v49 = vunpack.i.l.bf16 %v12070_v1 }
 0x13b   : > { %v1914_v22 = vsel %vm1897_vm8, %v1881_v12, %v10655_v23  ;;  %v1915_v27 = vsel %vm1897_vm8, %v1882_v42, %v10656_v50  ;;  %v442_v50 = vld [vmem:[#allocation2 + $0x108] sm:$0xff] }
 0x13c   : > { %v10664_v51 = vpop.permute.xlu0 %10663  ;;  %v1916_v1 = vsel %vm1897_vm8, %v1883_v53, %v10660_v49  ;;  %v1917_v24 = vsel %vm1897_vm8, %v1884_v20, %v10661_v41 }
 0x13d   : > { %v10669_v25 = vpop.permute.xlu1 %10668  ;;  %v10666_v56 = vunpack.i.h.bf16 %v10664_v51  ;;  %v10665_v58 = vunpack.i.l.bf16 %v10664_v51  ;;  %v2311_v51 = vsel %vm11820_vm14, 0, %v2310_v48 }
 0x13e   : > { %v10671_v14 = vunpack.i.h.bf16 %v10669_v25  ;;  %v10670_v17 = vunpack.i.l.bf16 %v10669_v25  ;;  %2312 = vst [vmem:[#allocation3 + $0x3c] sm:$0x1] %v2311_v51 }
 0x13f   : > { %v1947_v63 = vsel %vm1930_vm9, %v1914_v22, %v10665_v58  ;;  %v1948_v18 = vsel %vm1930_vm9, %v1915_v27, %v10666_v56  ;;  %v440_v56 = vld [vmem:[#allocation2 + $0xf0] sm:$0xff]  ;;  %v441_v58 = vld [vmem:[#allocation2 + $0xf8] sm:$0xff] }
 0x140   : > { %v10674_v3 = vpop.permute.xlu0 %10673  ;;  %v1949_v2 = vsel %vm1930_vm9, %v1916_v1, %v10670_v17  ;;  %v1950_v29 = vsel %vm1930_vm9, %v1917_v24, %v10671_v14 }
 0x141   : > { %v12098_v4 = vpop.permute.xlu1 %10678  ;;  %v10676_v6 = vunpack.i.h.bf16 %v10674_v3  ;;  %v10675_v11 = vunpack.i.l.bf16 %v10674_v3 }
 0x142   : > { %v10681_v47 = vunpack.i.h.bf16 %v12098_v4  ;;  %v10680_v9 = vunpack.i.l.bf16 %v12098_v4  ;;  %v2366_v4 = vld [vmem:[#allocation3 + $0x44] sm:$0x1] }
 0x143   : > { %v1980_v10 = vsel %vm1963_vm10, %v1947_v63, %v10675_v11  ;;  %v1981_v7 = vsel %vm1963_vm10, %v1948_v18, %v10676_v6  ;;  %v2367_v6 = vsel %vm11839_vm1, 0, %v2366_v4 }
 0x144   : > { %v2004_v21 = vpack.c.bf16 %v1981_v7, %v1980_v10  ;;  %v10684_v13 = vpop.permute.xlu0 %10683  ;;  %v1754_v11 = vsel %vm309_vm0, %v441_v58, %v10681_v47  ;;  %v1753_v14 = vsel %vm309_vm0, %v440_v56, %v10680_v9  ;;  %2368 = vst [vmem:[#allocation3 + $0x44] sm:$0x1] %v2367_v6 }
 0x145   : > { %v10689_v8 = vpop.permute.xlu1 %10688  ;;  %v10686_v26 = vunpack.i.h.bf16 %v10684_v13  ;;  %v10685_v28 = vunpack.i.l.bf16 %v10684_v13 }
 0x146   : > { %9761 = vmatprep.mubr.msk.bf16.mxu0 %vm2039_vm11, %v2004_v21  ;;  %v10691_v25 = vunpack.i.h.bf16 %v10689_v8  ;;  %v10690_v5 = vunpack.i.l.bf16 %v10689_v8 }
 0x147   : > { %v1983_v34 = vsel %vm1963_vm10, %v1950_v29, %v10686_v26  ;;  %v1982_v32 = vsel %vm1963_vm10, %v1949_v2, %v10685_v28 }
 0x148   : > { %v2005_v35 = vpack.c.bf16 %v1983_v34, %v1982_v32  ;;  %v10694_v44 = vpop.permute.xlu0 %10693  ;;  %v1756_v12 = vsel %vm309_vm0, %v443_v31, %v10691_v25  ;;  %v1755_v3 = vsel %vm309_vm0, %v442_v50, %v10690_v5 }
 0x149   : > { %v10699_v60 = vpop.permute.xlu1 %10698  ;;  %v10696_v43 = vunpack.i.h.bf16 %v10694_v44  ;;  %v10695_v59 = vunpack.i.l.bf16 %v10694_v44 }
 0x14a   : > { %9762 = vmatmul.mubr.msk.bf16.gmra.mxu0 %vm2039_vm11, %v2005_v35  ;;  %v10701_v23 = vunpack.i.h.bf16 %v10699_v60  ;;  %v10700_v54 = vunpack.i.l.bf16 %v10699_v60 }
 0x14b   : > { %v1787_v18 = vsel %vm1765_vm4, %v1754_v11, %v10696_v43  ;;  %v1786_v0 = vsel %vm1765_vm4, %v1753_v14, %v10695_v59 }
 0x14c   : > { %v10704_v57 = vpop.permute.xlu0 %10703  ;;  %v1788_v17 = vsel %vm1765_vm4, %v1755_v3, %v10700_v54  ;;  %v1789_v63 = vsel %vm1765_vm4, %v1756_v12, %v10701_v23 }
 0x14d   : > { %v10709_v39 = vpop.permute.xlu1 %10708  ;;  %v10706_v22 = vunpack.i.h.bf16 %v10704_v57  ;;  %v10705_v27 = vunpack.i.l.bf16 %v10704_v57 }
 0x14e   : > { %v10711_v42 = vunpack.i.h.bf16 %v10709_v39  ;;  %v10710_v41 = vunpack.i.l.bf16 %v10709_v39 }
 0x14f   : > { %v1819_v1 = vsel %vm1798_vm5, %v1786_v0, %v10705_v27  ;;  %v1820_v24 = vsel %vm1798_vm5, %v1787_v18, %v10706_v22 }
 0x150   : > { %v10714_v30 = vpop.permute.xlu0 %10713  ;;  %v1821_v8 = vsel %vm1798_vm5, %v1788_v17, %v10710_v41  ;;  %v1822_v53 = vsel %vm1798_vm5, %v1789_v63, %v10711_v42  ;;  %v2319_v63 = vld [vmem:[#allocation3 + $0x60] sm:$0x1] }
 0x151   : > { %v12124_v40 = vpop.permute.xlu1 %10718  ;;  %v10716_v52 = vunpack.i.h.bf16 %v10714_v30  ;;  %v10715_v10 = vunpack.i.l.bf16 %v10714_v30  ;;  %v2320_v18 = vsel %vm11820_vm14, 0, %v2319_v63 }
 0x152   : > { %v10721_v2 = vunpack.i.h.bf16 %v12124_v40  ;;  %v10720_v29 = vunpack.i.l.bf16 %v12124_v40  ;;  %2321 = vst [vmem:[#allocation3 + $0x60] sm:$0x1] %v2320_v18 }
 0x153   : > { %v1852_v60 = vsel %vm1831_vm6, %v1819_v1, %v10715_v10  ;;  %v1853_v35 = vsel %vm1831_vm6, %v1820_v24, %v10716_v52 }
 0x154   : > { %v10724_v16 = vpop.permute.xlu0 %10723  ;;  %v1854_v50 = vsel %vm1831_vm6, %v1821_v8, %v10720_v29  ;;  %v1855_v23 = vsel %vm1831_vm6, %v1822_v53, %v10721_v2  ;;  %v2316_v53 = vld [vmem:[#allocation3 + $0x54] sm:$0x1]  ;;  %v445_v29 = vld [vmem:[#allocation2 + $0x128] sm:$0xff] }
 0x155   : > { %v12126_v45 = vpop.permute.xlu1 %10728  ;;  %v10726_v20 = vunpack.i.h.bf16 %v10724_v16  ;;  %v10725_v21 = vunpack.i.l.bf16 %v10724_v16  ;;  %v444_v2 = vld [vmem:[#allocation2 + $0x120] sm:$0xff] }
 0x156   : > { %v10731_v44 = vunpack.i.h.bf16 %v12126_v45  ;;  %v10730_v39 = vunpack.i.l.bf16 %v12126_v45 }
 0x157   : > { %v1885_v33 = vsel %vm1864_vm7, %v1852_v60, %v10725_v21  ;;  %v1886_v37 = vsel %vm1864_vm7, %v1853_v35, %v10726_v20  ;;  %v2317_v21 = vsel %vm11820_vm14, 0, %v2316_v53 }
 0x158   : > { %v10734_v49 = vpop.permute.xlu0 %10733  ;;  %v1887_v58 = vsel %vm1864_vm7, %v1854_v50, %v10730_v39  ;;  %v1888_v43 = vsel %vm1864_vm7, %v1855_v23, %v10731_v44  ;;  %2318 = vst [vmem:[#allocation3 + $0x54] sm:$0x1] %v2317_v21  ;;  %v11047_v44 = vld [vmem:[#allocation2 + $0x140] sm:$0xff] }
 0x159   : > { %v12132_v46 = vpop.permute.xlu1 %10738  ;;  %v10736_v26 = vunpack.i.h.bf16 %v10734_v49  ;;  %v10735_v28 = vunpack.i.l.bf16 %v10734_v49 }
 0x15a   : > { %v10741_v30 = vunpack.i.h.bf16 %v12132_v46  ;;  %v10740_v40 = vunpack.i.l.bf16 %v12132_v46 }
 0x15b   : > { %v1918_v16 = vsel %vm1897_vm8, %v1885_v33, %v10735_v28  ;;  %v1919_v48 = vsel %vm1897_vm8, %v1886_v37, %v10736_v26  ;;  %v2375_v28 = vld [vmem:[#allocation3 + $0x68] sm:$0x1] }
 0x15c   : > { %v10744_v13 = vpop.permute.xlu0 %10743  ;;  %v1920_v62 = vsel %vm1897_vm8, %v1887_v58, %v10740_v40  ;;  %v1921_v12 = vsel %vm1897_vm8, %v1888_v43, %v10741_v30  ;;  %v2376_v35 = vsel %vm11839_vm1, 0, %v2375_v28  ;;  %v11048_v40 = vld [vmem:[#allocation2 + $0x138] sm:$0xff] }
 0x15d   : > { %v10749_v7 = vpop.permute.xlu1 %10748  ;;  %v10746_v34 = vunpack.i.h.bf16 %v10744_v13  ;;  %v10745_v32 = vunpack.i.l.bf16 %v10744_v13  ;;  %2377 = vst [vmem:[#allocation3 + $0x68] sm:$0x1] %v2376_v35 }
 0x15e   : > { %v10751_v51 = vunpack.i.h.bf16 %v10749_v7  ;;  %v10750_v47 = vunpack.i.l.bf16 %v10749_v7 }
 0x15f   : > { %v1951_v45 = vsel %vm1930_vm9, %v1918_v16, %v10745_v32  ;;  %v1952_v9 = vsel %vm1930_vm9, %v1919_v48, %v10746_v34 }
 0x160   : > { %v10754_v25 = vpop.permute.xlu0 %10753  ;;  %v1953_v49 = vsel %vm1930_vm9, %v1920_v62, %v10750_v47  ;;  %v1954_v4 = vsel %vm1930_vm9, %v1921_v12, %v10751_v51 }
 0x161   : > { %v12156_v57 = vpop.permute.xlu1 %10758  ;;  %v10756_v31 = vunpack.i.h.bf16 %v10754_v25  ;;  %v10755_v5 = vunpack.i.l.bf16 %v10754_v25 }
 0x162   : > { %v10761_v13 = vunpack.i.h.bf16 %v12156_v57  ;;  %v10760_v1 = vunpack.i.l.bf16 %v12156_v57  ;;  %v2372_v57 = vld [vmem:[#allocation3 + $0x5c] sm:$0x1] }
 0x163   : > { %v1984_v54 = vsel %vm1963_vm10, %v1951_v45, %v10755_v5  ;;  %v1985_v55 = vsel %vm1963_vm10, %v1952_v9, %v10756_v31  ;;  %v2373_v31 = vsel %vm11839_vm1, 0, %v2372_v57 }
 0x164   : > { %v2006_v59 = vpack.c.bf16 %v1985_v55, %v1984_v54  ;;  %v10764_v46 = vpop.permute.xlu0 %10763  ;;  %v1758_v5 = vsel %vm309_vm0, %v445_v29, %v10761_v13  ;;  %v1757_v51 = vsel %vm309_vm0, %v444_v2, %v10760_v1  ;;  %2374 = vst [vmem:[#allocation3 + $0x5c] sm:$0x1] %v2373_v31 }
 0x165   : > { %v10769_v56 = vpop.permute.xlu1 %10768  ;;  %v10766_v42 = vunpack.i.h.bf16 %v10764_v46  ;;  %v10765_v41 = vunpack.i.l.bf16 %v10764_v46 }
 0x166   : > { %9765 = vmatprep.mubr.msk.bf16.mxu0 %vm2039_vm11, %v2006_v59  ;;  %v10771_v7 = vunpack.i.h.bf16 %v10769_v56  ;;  %v10770_v20 = vunpack.i.l.bf16 %v10769_v56 }
 0x167   : > { %v1987_v3 = vsel %vm1963_vm10, %v1954_v4, %v10766_v42  ;;  %v1986_v22 = vsel %vm1963_vm10, %v1953_v49, %v10765_v41 }
 0x168   : > { %v2007_v6 = vpack.c.bf16 %v1987_v3, %v1986_v22  ;;  %v10774_v11 = vpop.permute.xlu0 %10773  ;;  %v1760_v39 = vsel %vm309_vm0, %v11047_v44, %v10771_v7  ;;  %v1759_v25 = vsel %vm309_vm0, %v11048_v40, %v10770_v20 }
 0x169   : > { %v10779_v27 = vpop.permute.xlu1 %10778  ;;  %v10776_v34 = vunpack.i.h.bf16 %v10774_v11  ;;  %v10775_v32 = vunpack.i.l.bf16 %v10774_v11 }
 0x16a   : > { %9766 = vmatmul.mubr.msk.bf16.gmra.mxu0 %vm2039_vm11, %v2007_v6  ;;  %v10781_v24 = vunpack.i.h.bf16 %v10779_v27  ;;  %v10780_v26 = vunpack.i.l.bf16 %v10779_v27 }
 0x16b   : > { %v1791_v9 = vsel %vm1765_vm4, %v1758_v5, %v10776_v34  ;;  %v1790_v50 = vsel %vm1765_vm4, %v1757_v51, %v10775_v32 }
 0x16c   : > { %v10784_v17 = vpop.permute.xlu0 %10783  ;;  %v1792_v47 = vsel %vm1765_vm4, %v1759_v25, %v10780_v26  ;;  %v1793_v45 = vsel %vm1765_vm4, %v1760_v39, %v10781_v24 }
 0x16d   : > { %v10789_v14 = vpop.permute.xlu1 %10788  ;;  %v10786_v16 = vunpack.i.h.bf16 %v10784_v17  ;;  %v10785_v48 = vunpack.i.l.bf16 %v10784_v17 }
 0x16e   : > { %v10791_v33 = vunpack.i.h.bf16 %v10789_v14  ;;  %v10790_v37 = vunpack.i.l.bf16 %v10789_v14 }
 0x16f   : > { %v1823_v62 = vsel %vm1798_vm5, %v1790_v50, %v10785_v48  ;;  %v1824_v12 = vsel %vm1798_vm5, %v1791_v9, %v10786_v16 }
 0x170   : > { %v10794_v52 = vpop.permute.xlu0 %10793  ;;  %v1825_v56 = vsel %vm1798_vm5, %v1792_v47, %v10790_v37  ;;  %v1826_v58 = vsel %vm1798_vm5, %v1793_v45, %v10791_v33 }
 0x171   : > { %v12182_v0 = vpop.permute.xlu1 %10798  ;;  %v10796_v23 = vunpack.i.h.bf16 %v10794_v52  ;;  %v10795_v54 = vunpack.i.l.bf16 %v10794_v52 }
 0x172   : > { %v10801_v49 = vunpack.i.h.bf16 %v12182_v0  ;;  %v10800_v4 = vunpack.i.l.bf16 %v12182_v0 }
 0x173   : > { %v1856_v27 = vsel %vm1831_vm6, %v1823_v62, %v10795_v54  ;;  %v1857_v6 = vsel %vm1831_vm6, %v1824_v12, %v10796_v23  ;;  %v12238_v54 = vld [vmem:[%s15073_s2] ss:$0 sm:$0xff]  ;;  %v11050_v62 = vld [vmem:[#allocation2 + $0x150] sm:$0xff] }
 0x174   : > { %v10804_v8 = vpop.permute.xlu0 %10803  ;;  %v1858_v26 = vsel %vm1831_vm6, %v1825_v56, %v10800_v4  ;;  %v1859_v28 = vsel %vm1831_vm6, %v1826_v58, %v10801_v49  ;;  %v11052_v49 = vld [vmem:[#allocation2 + $0x168] sm:$0xff] }
 0x175   : > { %v12184_v10 = vpop.permute.xlu1 %10808  ;;  %v10806_v43 = vunpack.i.h.bf16 %v10804_v8  ;;  %v10805_v59 = vunpack.i.l.bf16 %v10804_v8 }
 0x176   : > { %v10811_v11 = vunpack.i.h.bf16 %v12184_v10  ;;  %v10810_v14 = vunpack.i.l.bf16 %v12184_v10 }
 0x177   : > { %v1889_v63 = vsel %vm1864_vm7, %v1856_v27, %v10805_v59  ;;  %v1890_v18 = vsel %vm1864_vm7, %v1857_v6, %v10806_v43 }
 0x178   : > { %v10814_v30 = vpop.permute.xlu0 %10813  ;;  %v1891_v32 = vsel %vm1864_vm7, %v1858_v26, %v10810_v14 }
 0x179   : > { %v12190_v60 = vpop.permute.xlu1 %10818  ;;  %v10816_v42 = vunpack.i.h.bf16 %v10814_v30  ;;  %v10815_v41 = vunpack.i.l.bf16 %v10814_v30 }
 0x17a   : > { %v10821_v52 = vunpack.i.h.bf16 %v12190_v60  ;;  %v10820_v7 = vunpack.i.l.bf16 %v12190_v60  ;;  %v1892_v60 = vsel %vm1864_vm7, %v1859_v28, %v10811_v11 }
 0x17b   : > { %v1922_v8 = vsel %vm1897_vm8, %v1889_v63, %v10815_v41  ;;  %v1923_v53 = vsel %vm1897_vm8, %v1890_v18, %v10816_v42  ;;  %v11051_v42 = vld [vmem:[#allocation2 + $0x170] sm:$0xff] }
 0x17c   : > { %v10824_v46 = vpop.permute.xlu0 %10823  ;;  %v1924_v39 = vsel %vm1897_vm8, %v1891_v32, %v10820_v7  ;;  %v1925_v33 = vsel %vm1897_vm8, %v1892_v60, %v10821_v52 }
 0x17d   : > { %v10829_v55 = vpop.permute.xlu1 %10828  ;;  %v10826_v3 = vunpack.i.h.bf16 %v10824_v46  ;;  %v10825_v22 = vunpack.i.l.bf16 %v10824_v46  ;;  %v9155_v46 = vcombine.low %v12013_v36, %v12019_v38 }
 0x17e   : > { %v10831_v13 = vunpack.i.h.bf16 %v10829_v55  ;;  %v10830_v1 = vunpack.i.l.bf16 %v10829_v55  ;;  %v11049_v55 = vld [vmem:[#allocation2 + $0x158] sm:$0xff] }
 0x17f   : > { %v1955_v10 = vsel %vm1930_vm9, %v1922_v8, %v10825_v22  ;;  %v1956_v24 = vsel %vm1930_vm9, %v1923_v53, %v10826_v3  ;;  %v2325_v8 = vld [vmem:[#allocation3 + $0x78] sm:$0x1] }
 0x180   : > { %v10834_v0 = vpop.permute.xlu0 %10833  ;;  %v1957_v57 = vsel %vm1930_vm9, %v1924_v39, %v10830_v1  ;;  %v1958_v40 = vsel %vm1930_vm9, %v1925_v33, %v10831_v13  ;;  %v2326_v1 = vsel %vm11820_vm14, 0, %v2325_v8 }
 0x181   : > { %v10839_v17 = vpop.permute.xlu1 %10838  ;;  %v10836_v20 = vunpack.i.h.bf16 %v10834_v0  ;;  %v10835_v21 = vunpack.i.l.bf16 %v10834_v0  ;;  %2327 = vst [vmem:[#allocation3 + $0x78] sm:$0x1] %v2326_v1 }
 0x182   : > { %v10841_v25 = vunpack.i.h.bf16 %v10839_v17  ;;  %v10840_v16 = vunpack.i.l.bf16 %v10839_v17 }
 0x183   : > { %v1988_v2 = vsel %vm1963_vm10, %v1955_v10, %v10835_v21  ;;  %v1989_v29 = vsel %vm1963_vm10, %v1956_v24, %v10836_v20 }
 0x184   : > { %v2008_v35 = vpack.c.bf16 %v1989_v29, %v1988_v2  ;;  %v10844_v44 = vpop.permute.xlu0 %10843  ;;  %v1762_v56 = vsel %vm309_vm0, %v11049_v55, %v10841_v25  ;;  %v1761_v12 = vsel %vm309_vm0, %v11050_v62, %v10840_v16 }
 0x185   : > { %v10849_v34 = vpop.permute.xlu1 %10848  ;;  %v10846_v37 = vunpack.i.h.bf16 %v10844_v44  ;;  %v10845_v30 = vunpack.i.l.bf16 %v10844_v44 }
 0x186   : > { %9769 = vmatprep.mubr.msk.bf16.mxu0 %vm2039_vm11, %v2008_v35  ;;  %v10851_v48 = vunpack.i.h.bf16 %v10849_v34  ;;  %v10850_v31 = vunpack.i.l.bf16 %v10849_v34 }
 0x187   : > { %v1991_v5 = vsel %vm1963_vm10, %v1958_v40, %v10846_v37  ;;  %v1990_v51 = vsel %vm1963_vm10, %v1957_v57, %v10845_v30 }
 0x188   : > { %v2009_v45 = vpack.c.bf16 %v1991_v5, %v1990_v51  ;;  %v10854_v23 = vpop.permute.xlu0 %10853  ;;  %v1764_v41 = vsel %vm309_vm0, %v11051_v42, %v10851_v48  ;;  %v1763_v4 = vsel %vm309_vm0, %v11052_v49, %v10850_v31  ;;  %vm2501_vm0 = vsmask.f32 4368  ;;  %v2826_v42 = vld [vmem:[#allocation3 + $0xc] sm:$0xf] }
 0x189   : > { %v10859_v47 = vpop.permute.xlu1 %10858  ;;  %v10856_v58 = vunpack.i.h.bf16 %v10854_v23  ;;  %v10855_v43 = vunpack.i.l.bf16 %v10854_v23 }
 0x18a   : > { %v10861_v9 = vunpack.i.h.bf16 %v10859_v47  ;;  %v10860_v50 = vunpack.i.l.bf16 %v10859_v47  ;;  %v9747_v59 = vpop.f32.mrf.mxu0  ;;  %9770 = vmatmul.mubr.msk.bf16.gmra.mxu0 %vm2039_vm11, %v2009_v45 }
 0x18b   : > { %v2135_v3 = vadd.f32 %v9747_v59, %v12238_v54  ;;  %v1795_v53 = vsel %vm1765_vm4, %v1762_v56, %v10856_v58  ;;  %v1794_v20 = vsel %vm1765_vm4, %v1761_v12, %v10855_v43 }
 0x18c   : > { %v1796_v27 = vsel %vm1765_vm4, %v1763_v4, %v10860_v50  ;;  %v1797_v6 = vsel %vm1765_vm4, %v1764_v41, %v10861_v9  ;;  %v10864_v17 = vpop.permute.xlu0 %10863  ;;  %v2126_v63 = vpop.f32.mrf.mxu0  ;;  %vm12265_vm4 = vmand %vm2824_vm2, %vm2349_vm15  ;;  %v2833_v9 = vld [vmem:[#allocation3 + $0x18] sm:$0xf]  ;;  %vm8859_vm15 = vcmask 1046534  }
 0x18d   : > { %v10869_v22 = vpop.permute.xlu1 %10868  ;;  %v2255_v18 = vmax.f32 %v2135_v3, 0.0  ;;  %v10866_v52 = vunpack.i.h.bf16 %v10864_v17  ;;  %v10865_v7 = vunpack.i.l.bf16 %v10864_v17  ;;  %v2127_v0 = vadd.f32 %v12238_v54, %v2126_v63 }
 0x18e   : > { %v10871_v11 = vunpack.i.h.bf16 %v10869_v22  ;;  %v10870_v14 = vunpack.i.l.bf16 %v10869_v22  ;;  %v9748_v13 = vpop.f32.mrf.mxu0 }
 0x18f   : > { %v9472_v10 = vpack.c.bf16 %v2255_v18, %v2255_v18  ;;  %v1827_v26 = vsel %vm1798_vm5, %v1794_v20, %v10865_v7  ;;  %v2253_v28 = vmax.f32 %v2127_v0, 0.0  ;;  %v1828_v29 = vsel %vm1798_vm5, %v1795_v53, %v10866_v52  ;;  %v2837_v53 = vld [vmem:[#allocation3 + $0x20] sm:$0x1] }
 0x190   : > { %v1829_v21 = vsel %vm1798_vm5, %v1796_v27, %v10870_v14  ;;  %v1830_v24 = vsel %vm1798_vm5, %v1797_v6, %v10871_v11  ;;  %v2138_v34 = vadd.f32 %v9748_v13, %v12238_v54  ;;  %v10874_v35 = vpop.permute.xlu0 %10873  ;;  %v2129_v30 = vpop.f32.mrf.mxu0  ;;  %vm12279_vm5 = vmor %vm2293_vm13, %vm2501_vm0  ;;  %vm8855_vm13 = vcmask 1044484  }
 0x191   : > { %v10879_v2 = vpop.permute.xlu1 %10878  ;;  %v2521_v44 = vshrl.u32 %v9472_v10, 16  ;;  %v2524_v39 = vshll.u32 %v9472_v10, 16  ;;  %v9470_v33 = vpack.c.bf16 %v2253_v28, %v2253_v28  ;;  %v10876_v37 = vunpack.i.h.bf16 %v10874_v35 }
 0x192   : > { %v10881_v32 = vunpack.i.h.bf16 %v10879_v2  ;;  %v10880_v60 = vunpack.i.l.bf16 %v10879_v2  ;;  %v2256_v57 = vmax.f32 %v2138_v34, 0.0  ;;  %v10875_v16 = vunpack.i.l.bf16 %v10874_v35 }
 0x193   : > { %v2523_v48 = vrot.slane %v2521_v44, 7  ;;  %v2504_v31 = vshrl.u32 %v9470_v33, 16  ;;  %v2507_v5 = vshll.u32 %v9470_v33, 16  ;;  %v1861_v51 = vsel %vm1831_vm6, %v1828_v29, %v10876_v37  ;;  %v2322_v37 = vld [vmem:[#allocation3 + $0x6c] sm:$0x1] }
 0x194   : > { %v1862_v40 = vsel %vm1831_vm6, %v1829_v21, %v10880_v60  ;;  %v1863_v25 = vsel %vm1831_vm6, %v1830_v24, %v10881_v32  ;;  %v9473_v50 = vpack.c.bf16 %v2256_v57, %v2256_v57  ;;  %v1860_v23 = vsel %vm1831_vm6, %v1827_v26, %v10875_v16  ;;  %v10884_v58 = vpop.permute.xlu0 %10883 }
 0x195   : > { %v10889_v47 = vpop.permute.xlu1 %10888  ;;  %v2130_v55 = vadd.f32 %v12238_v54, %v2129_v30  ;;  %v2526_v43 = vor.u32 %v2524_v39, %v2523_v48  ;;  %v2527_v59 = vrot.slane %v2523_v48, 4  ;;  %v2506_v62 = vrot.slane %v2504_v31, 7  ;;  %v2830_v30 = vld [vmem:[#allocation3 + $0x14] sm:$0x1] }
 0x196   : > { %v10891_v56 = vunpack.i.h.bf16 %v10889_v47  ;;  %v10890_v12 = vunpack.i.l.bf16 %v10889_v47  ;;  %v2529_v41 = vshrl.u32 %v9473_v50, 16  ;;  %v2532_v49 = vshll.u32 %v9473_v50, 16 }
 0x197   : > { %v2254_v4 = vmax.f32 %v2130_v55, 0.0  ;;  %v2834_v22 = vsel %vm12265_vm4, %v2526_v43, %v2833_v9  ;;  %v2509_v27 = vor.u32 %v2507_v5, %v2506_v62  ;;  %v2510_v6 = vrot.slane %v2506_v62, 4 }
 0x198   : > { %v1896_v3 = vsel %vm1864_vm7, %v1863_v25, %v10891_v56  ;;  %v1895_v11 = vsel %vm1864_vm7, %v1862_v40, %v10890_v12  ;;  %2835 = vst [vmem:[#allocation3 + $0x18] sm:$0xf] %v2834_v22  ;;  %v2531_v17 = vrot.slane %v2529_v41, 7  ;;  %v10886_v18 = vunpack.i.h.bf16 %v10884_v58  ;;  %v10894_v7 = vpop.permute.xlu0 %10893 }
 0x199   : > { %v10899_v14 = vpop.permute.xlu1 %10898  ;;  %v9471_v63 = vpack.c.bf16 %v2254_v4, %v2254_v4  ;;  %v10885_v52 = vunpack.i.l.bf16 %v10884_v58  ;;  %v2827_v0 = vsel %vm12265_vm4, %v2509_v27, %v2826_v42  ;;  %v10896_v13 = vunpack.i.h.bf16 %v10894_v7 }
 0x19a   : > { %v10901_v20 = vunpack.i.h.bf16 %v10899_v14  ;;  %v10900_v21 = vunpack.i.l.bf16 %v10899_v14  ;;  %2828 = vst [vmem:[#allocation3 + $0xc] sm:$0xf] %v2827_v0  ;;  %v2534_v1 = vor.u32 %v2532_v49, %v2531_v17  ;;  %v2536_v10 = vrot.slane %v2531_v17, 4 }
 0x19b   : > { %v2512_v24 = vshrl.u32 %v9471_v63, 16  ;;  %v2515_v26 = vshll.u32 %v9471_v63, 16  ;;  %v1893_v28 = vsel %vm1864_vm7, %v1860_v23, %v10885_v52  ;;  %v1894_v2 = vsel %vm1864_vm7, %v1861_v51, %v10886_v18  ;;  %v2381_v52 = vld [vmem:[#allocation3 + $0x80] sm:$0x1] }
 0x19c   : > { %v1928_v29 = vsel %vm1897_vm8, %v1895_v11, %v10900_v21  ;;  %v1929_v34 = vsel %vm1897_vm8, %v1896_v3, %v10901_v20  ;;  %v2535_v60 = vsel %vm12279_vm5, %v2527_v59, %v2534_v1  ;;  %v2838_v35 = vsel %vm11820_vm14, %v2536_v10, %v2837_v53  ;;  %v10904_v33 = vpop.permute.xlu0 %10903 }
 0x19d   : > { %v10909_v32 = vpop.permute.xlu1 %10908  ;;  %v2514_v44 = vrot.slane %v2512_v24, 7  ;;  %v10895_v39 = vunpack.i.l.bf16 %v10894_v7  ;;  %2836 = vst [vmem:[#allocation3 + $0x1c] sm:$0xf] %v2535_v60  ;;  %2839 = vst [vmem:[#allocation3 + $0x20] sm:$0x1] %v2838_v35  ;;  %v1927_v57 = vsel %vm1897_vm8, %v1894_v2, %v10896_v13  ;;  %v10906_v16 = vunpack.i.h.bf16 %v10904_v33 }
 0x19e   : > { %v10911_v40 = vunpack.i.h.bf16 %v10909_v32  ;;  %v10910_v25 = vunpack.i.l.bf16 %v10909_v32  ;;  %v10905_v51 = vunpack.i.l.bf16 %v10904_v33  ;;  %v2323_v56 = vsel %vm11820_vm14, 0, %v2322_v37  ;;  %v2378_v7 = vld [vmem:[#allocation3 + $0x74] sm:$0x1] }
 0x19f   : > { %v2517_v48 = vor.u32 %v2515_v26, %v2514_v44  ;;  %v2519_v31 = vrot.slane %v2514_v44, 4  ;;  %v1926_v5 = vsel %vm1897_vm8, %v1893_v28, %v10895_v39  ;;  %v1960_v50 = vsel %vm1930_vm9, %v1927_v57, %v10906_v16  ;;  %v12296_v55 = vld [vmem:[#allocation3 + $0x18] sm:$0xf]  ;;  %2324 = vst [vmem:[#allocation3 + $0x6c] sm:$0x1] %v2323_v56 }
 0x1a0   : > { %v1961_v47 = vsel %vm1930_vm9, %v1928_v29, %v10910_v25  ;;  %v1962_v9 = vsel %vm1930_vm9, %v1929_v34, %v10911_v40  ;;  %v1959_v59 = vsel %vm1930_vm9, %v1926_v5, %v10905_v51  ;;  %v10914_v12 = vpop.permute.xlu0 %10913  ;;  %v3054_v3 = vshrl.u32 %v12296_v55, 16 }
 0x1a1   : > { %v10919_v23 = vpop.permute.xlu1 %10918  ;;  %v2518_v58 = vsel %vm12279_vm5, %v2510_v6, %v2517_v48  ;;  %v2831_v43 = vsel %vm11820_vm14, %v2519_v31, %v2830_v30  ;;  %v10916_v41 = vunpack.i.h.bf16 %v10914_v12  ;;  %v10915_v49 = vunpack.i.l.bf16 %v10914_v12  ;;  %v12305_v4 = vld [vmem:[#allocation3 + $0xc] sm:$0xf] }
 0x1a2   : > { %v10921_v62 = vunpack.i.h.bf16 %v10919_v23  ;;  %2829 = vst [vmem:[#allocation3 + $0x10] sm:$0xf] %v2518_v58  ;;  %2832 = vst [vmem:[#allocation3 + $0x14] sm:$0x1] %v2831_v43  ;;  %v10920_v42 = vunpack.i.l.bf16 %v10919_v23  ;;  %v3057_v27 = vshll.u32 %v12296_v55, 16  ;;  %v3030_v6 = vshrl.u32 %v12305_v4, 16 }
 0x1a3   : > { %v3033_v11 = vshll.u32 %v12305_v4, 16  ;;  %v1992_v17 = vsel %vm1963_vm10, %v1959_v59, %v10915_v49  ;;  %v1993_v63 = vsel %vm1963_vm10, %v1960_v50, %v10916_v41  ;;  %v3056_v18 = vrot.slane %v3054_v3, 4  ;;  %v3984_v32 = vld [vmem:[#allocation3 + $0xc] sm:$0xe]  ;;  %v3985_v50 = vld [vmem:[#allocation3 + $0x18] sm:$0xe] }
 0x1a4   : > { %v1995_v22 = vsel %vm1963_vm10, %v1962_v9, %v10921_v62  ;;  %v1994_v14 = vsel %vm1963_vm10, %v1961_v47, %v10920_v42  ;;  %v2010_v53 = vpack.c.bf16 %v1993_v63, %v1992_v17  ;;  %v12315_v20 = vld [vmem:[#allocation3 + $0x1c] sm:$0xf]  ;;  %v3059_v21 = vrot.slane %v3057_v27, 5  ;;  %v12317_v1 = vld [vmem:[#allocation3 + $0x20] sm:$0x1] }
 0x1a5   : > { %v2011_v0 = vpack.c.bf16 %v1995_v22, %v1994_v14  ;;  %v3032_v13 = vrot.slane %v3030_v6, 4  ;;  %v3067_v10 = vshrl.u32 %v12315_v20, 16  ;;  %v3035_v24 = vrot.slane %v3033_v11, 5  ;;  %v2331_v41 = vld [vmem:[#allocation3 + $0x90] sm:$0x1] }
 0x1a6   : > { %v3063_v26 = vshll.u32 %v12315_v20, 16  ;;  %9773 = vmatprep.mubr.msk.bf16.mxu0 %vm2039_vm11, %v2010_v53  ;;  %v3060_v28 = vor.u32 %v3059_v21, %v3056_v18  ;;  %v3073_v2 = vshll.u32 %v12317_v1, 16  ;;  %v2382_v29 = vsel %vm11839_vm1, 0, %v2381_v52 }
 0x1a7   : > { %v2379_v34 = vsel %vm11839_vm1, 0, %v2378_v7  ;;  %9774 = vmatmul.mubr.msk.bf16.gmra.mxu0 %vm2039_vm11, %v2011_v0  ;;  %v3036_v60 = vor.u32 %v3035_v24, %v3032_v13  ;;  %v3069_v44 = vrot.slane %v3067_v10, 4  ;;  %2383 = vst [vmem:[#allocation3 + $0x80] sm:$0x1] %v2382_v29  ;;  %vm4031_vm6 = vcmask 1042432  }
 0x1a8   : > { %v3065_v35 = vrot.slane %v3063_v26, 5  ;;  %2380 = vst [vmem:[#allocation3 + $0x74] sm:$0x1] %v2379_v34  ;;  %9841 = vmatprep.mubr.bf16.mxu0 %v9155_v46  ;;  %v9157_v33 = vcombine.low %v12296_v55, %v12315_v20  ;;  %v3061_v30 = vrot.slane %v3060_v28, 4  ;;  %vm4032_vm7 = vcmask 1046532  }
 0x1a9   : > { %v2941_v39 = vld [vmem:[#allocation3 + $0x10] sm:$0xf]  ;;  %v2987_v37 = vld [vmem:[#allocation3 + $0x14] sm:$0x1]  ;;  %v3075_v25 = vrot.slane %v3073_v2, 5  ;;  %v9180_v16 = vrot.slane %v3984_v32, 9  ;;  %vm12346_vm8 = vmor %vm4031_vm6, %vm4032_vm7 }
 0x1aa   : > { %v3039_v57 = vshll.u32 %v2941_v39, 16  ;;  %v3043_v40 = vshrl.u32 %v2941_v39, 16  ;;  %v9751_v48 = vpop.f32.mrf.mxu0  ;;  %v9156_v31 = vcombine.low %v12305_v4, %v2941_v39  ;;  %v3037_v5 = vrot.slane %v3036_v60, 4 }
 0x1ab   : > { %v3049_v51 = vshll.u32 %v2987_v37, 16  ;;  %v3070_v47 = vor.u32 %v3069_v44, %v3065_v35  ;;  %v2151_v36 = vadd.f32 %v9751_v48, %v12238_v54  ;;  %v4043_v9 = vrot.slane %v2941_v39, 5 }
 0x1ac   : > { %v3041_v38 = vrot.slane %v3039_v57, 5  ;;  %v3045_v46 = vrot.slane %v3043_v40, 4  ;;  %v2142_v23 = vpop.f32.mrf.mxu0  ;;  %v4046_v55 = vrot.slane %v2987_v37, 5  ;;  %v3066_v56 = vsel %vm12048_vm12, %v3061_v30, %v3065_v35  ;;  %v2847_v35 = vld [vmem:[#allocation3 + $0x30] sm:$0xf] }
 0x1ad   : > { %v3071_v58 = vrot.slane %v3070_v47, 4  ;;  %v4050_v43 = vrot.slane %v12315_v20, 5  ;;  %v2259_v59 = vmax.f32 %v2151_v36, 0.0  ;;  %v2143_v62 = vadd.f32 %v12238_v54, %v2142_v23 }
 0x1ae   : > { %v3046_v12 = vor.u32 %v3045_v46, %v3041_v38  ;;  %v3051_v42 = vrot.slane %v3049_v51, 5  ;;  %v9752_v49 = vpop.f32.mrf.mxu0  ;;  %v2332_v3 = vsel %vm11820_vm14, 0, %v2331_v41  ;;  %v4045_v22 = vrot.slane %v4043_v9, 4 }
 0x1af   : > { %v3076_v4 = vsel %vm12048_vm12, %v3071_v58, %v3075_v25  ;;  %v9181_v27 = vrot.slane %v3985_v50, 9  ;;  %v9476_v6 = vpack.c.bf16 %v2259_v59, %v2259_v59  ;;  %v2257_v11 = vmax.f32 %v2143_v62, 0.0  ;;  %9842 = vmatmul.mubr.bf16.vlgmr.msra.gmra.mxu0 %v9156_v31  ;;  %2333 = vst [vmem:[#allocation3 + $0x90] sm:$0x1] %v2332_v3 }
 0x1b0   : > { %v2154_v14 = vadd.f32 %v9752_v49, %v12238_v54  ;;  %v3047_v17 = vrot.slane %v3046_v12, 4  ;;  %v2145_v18 = vpop.f32.mrf.mxu0  ;;  %9845 = vmatprep.mubr.bf16.mxu0 %v9157_v33  ;;  %v3042_v52 = vsel %vm12048_vm12, %v3037_v5, %v3041_v38  ;;  %v12354_v7 = vsel %vm12346_vm8, %v9180_v16, %v4043_v9  ;;  %v2328_v33 = vld [vmem:[#allocation3 + $0x84] sm:$0x1]  ;;  %v2387_v5 = vld [vmem:[#allocation3 + $0x98] sm:$0x1] }
 0x1b1   : > { %v12358_v0 = vsel %vm12346_vm8, %v4045_v22, %v4046_v55  ;;  %v4052_v53 = vrot.slane %v4050_v43, 4  ;;  %v2555_v20 = vshrl.u32 %v9476_v6, 16  ;;  %v9474_v21 = vpack.c.bf16 %v2257_v11, %v2257_v11  ;;  %v2840_v16 = vld [vmem:[#allocation3 + $0x24] sm:$0xf]  ;;  %v2851_v9 = vld [vmem:[#allocation3 + $0x38] sm:$0x1] }
 0x1b2   : > { %v2260_v13 = vmax.f32 %v2154_v14, 0.0  ;;  %v9133_v10 = vcombine.low %v3066_v56, %v3076_v4  ;;  %v2146_v24 = vadd.f32 %v12238_v54, %v2145_v18  ;;  %v3052_v26 = vsel %vm12048_vm12, %v3047_v17, %v3051_v42  ;;  %v2384_v56 = vld [vmem:[#allocation3 + $0x8c] sm:$0x1] }
 0x1b3   : > { %v4053_v2 = vrot.slane %v12317_v1, 5  ;;  %v2557_v29 = vrot.slane %v2555_v20, 7  ;;  %v2558_v34 = vshll.u32 %v9476_v6, 16  ;;  %v2538_v32 = vshrl.u32 %v9474_v21, 16  ;;  %v2844_v4 = vld [vmem:[#allocation3 + $0x2c] sm:$0x1] }
 0x1b4   : > { %v9477_v60 = vpack.c.bf16 %v2260_v13, %v2260_v13  ;;  %v2258_v44 = vmax.f32 %v2146_v24, 0.0  ;;  %v9132_v39 = vcombine.low %v3042_v52, %v3052_v26  ;;  %v12368_v37 = vsel %vm12346_vm8, %v9181_v27, %v4050_v43 }
 0x1b5   : > { %v12372_v30 = vsel %vm12346_vm8, %v4052_v53, %v4053_v2  ;;  %v2560_v57 = vor.u32 %v2558_v34, %v2557_v29  ;;  %v2540_v40 = vrot.slane %v2538_v32, 7  ;;  %v2541_v25 = vshll.u32 %v9474_v21, 16 }
 0x1b6   : > { %v2563_v1 = vshrl.u32 %v9477_v60, 16  ;;  %v9475_v48 = vpack.c.bf16 %v2258_v44, %v2258_v44  ;;  %9794 = vmatmul.mubr.bf16.vlgmr.msra.gmra.mxu1 %v9132_v39  ;;  %v2329_v31 = vsel %vm11820_vm14, 0, %v2328_v33  ;;  %v2566_v46 = vshll.u32 %v9477_v60, 16 }
 0x1b7   : > { %v2848_v47 = vsel %vm12265_vm4, %v2560_v57, %v2847_v35  ;;  %v2543_v36 = vor.u32 %v2541_v25, %v2540_v40  ;;  %9797 = vmatprep.mubr.bf16.mxu1 %v9133_v10  ;;  %2330 = vst [vmem:[#allocation3 + $0x84] sm:$0x1] %v2329_v31  ;;  %v2561_v50 = vrot.slane %v2557_v29, 4  ;;  %v2388_v55 = vsel %vm11839_vm1, 0, %v2387_v5 }
 0x1b8   : > { %v2565_v38 = vrot.slane %v2563_v1, 7  ;;  %2849 = vst [vmem:[#allocation3 + $0x30] sm:$0xf] %v2848_v47  ;;  %v2546_v23 = vshrl.u32 %v9475_v48, 16  ;;  %2389 = vst [vmem:[#allocation3 + $0x98] sm:$0x1] %v2388_v55 }
 0x1b9   : > { %v2841_v58 = vsel %vm12265_vm4, %v2543_v36, %v2840_v16  ;;  %v2385_v62 = vsel %vm11839_vm1, 0, %v2384_v56  ;;  %v2549_v42 = vshll.u32 %v9475_v48, 16  ;;  %v2544_v3 = vrot.slane %v2540_v40, 4 }
 0x1ba   : > { %v2568_v43 = vor.u32 %v2566_v46, %v2565_v38  ;;  %v2570_v59 = vrot.slane %v2565_v38, 4  ;;  %2842 = vst [vmem:[#allocation3 + $0x24] sm:$0xf] %v2841_v58  ;;  %v2548_v12 = vrot.slane %v2546_v23, 7  ;;  %2386 = vst [vmem:[#allocation3 + $0x8c] sm:$0x1] %v2385_v62 }
 0x1bb   : > { %vm8849_vm9 = vcmask 1041409   ;;  %vm8851_vm10 = vcmask 1042434   ;;  %vm8853_vm11 = vcmask 1043459  }
 0x1bc   : > { %v2569_v41 = vsel %vm12279_vm5, %v2561_v50, %v2568_v43  ;;  %v2852_v49 = vsel %vm11820_vm14, %v2570_v59, %v2851_v9  ;;  %v2551_v22 = vor.u32 %v2549_v42, %v2548_v12  ;;  %v2553_v27 = vrot.slane %v2548_v12, 4 }
 0x1bd   : > { %2850 = vst [vmem:[#allocation3 + $0x34] sm:$0xf] %v2569_v41  ;;  %2853 = vst [vmem:[#allocation3 + $0x38] sm:$0x1] %v2852_v49 }
 0x1be   : > { %v2552_v6 = vsel %vm12279_vm5, %v2544_v3, %v2551_v22  ;;  %v2845_v11 = vsel %vm11820_vm14, %v2553_v27, %v2844_v4 }
 0x1bf   : > { %2843 = vst [vmem:[#allocation3 + $0x28] sm:$0xf] %v2552_v6  ;;  %2846 = vst [vmem:[#allocation3 + $0x2c] sm:$0x1] %v2845_v11  ;;  %v2946_v14 = vld [vmem:[#allocation3 + $0x30] sm:$0xf] }
 0x1c0   : > { %v3102_v17 = vshrl.u32 %v2946_v14, 16  ;;  %v3105_v18 = vshll.u32 %v2946_v14, 16  ;;  %v12394_v10 = vld [vmem:[#allocation3 + $0x30] sm:$0xe] }
 0x1c1   : > { %v2944_v52 = vld [vmem:[#allocation3 + $0x24] sm:$0xf]  ;;  %v9183_v44 = vrot.slane %v12394_v10, 9 }
 0x1c2   : > { %v3078_v53 = vshrl.u32 %v2944_v52, 16  ;;  %v3081_v20 = vshll.u32 %v2944_v52, 16  ;;  %v3104_v21 = vrot.slane %v3102_v17, 4  ;;  %v3107_v13 = vrot.slane %v3105_v18, 5  ;;  %v3986_v35 = vld [vmem:[#allocation3 + $0x24] sm:$0xe] }
 0x1c3   : > { %v9182_v50 = vrot.slane %v3986_v35, 9  ;;  %v2337_v17 = vld [vmem:[#allocation3 + $0xa8] sm:$0x1] }
 0x1c4   : > { %v2947_v24 = vld [vmem:[#allocation3 + $0x34] sm:$0xf]  ;;  %v2990_v26 = vld [vmem:[#allocation3 + $0x38] sm:$0x1]  ;;  %v3080_v2 = vrot.slane %v3078_v53, 4  ;;  %v3083_v29 = vrot.slane %v3081_v20, 5  ;;  %v3108_v32 = vor.u32 %v3107_v13, %v3104_v21 }
 0x1c5   : > { %v3115_v34 = vshrl.u32 %v2947_v24, 16  ;;  %v3111_v60 = vshll.u32 %v2947_v24, 16  ;;  %v3121_v25 = vshll.u32 %v2990_v26, 16  ;;  %v9159_v5 = vcombine.low %v2946_v14, %v2947_v24 }
 0x1c6   : > { %v2945_v39 = vld [vmem:[#allocation3 + $0x28] sm:$0xf]  ;;  %v2989_v33 = vld [vmem:[#allocation3 + $0x2c] sm:$0x1]  ;;  %v3084_v57 = vor.u32 %v3083_v29, %v3080_v2  ;;  %v3109_v36 = vrot.slane %v3108_v32, 4  ;;  %v4064_v59 = vrot.slane %v2947_v24, 5 }
 0x1c7   : > { %v3117_v40 = vrot.slane %v3115_v34, 4  ;;  %v3091_v1 = vshrl.u32 %v2945_v39, 16  ;;  %v9158_v16 = vcombine.low %v2944_v52, %v2945_v39  ;;  %v3087_v48 = vshll.u32 %v2945_v39, 16 }
 0x1c8   : > { %v3097_v31 = vshll.u32 %v2989_v33, 16  ;;  %v3085_v47 = vrot.slane %v3084_v57, 4  ;;  %v3113_v38 = vrot.slane %v3111_v60, 5  ;;  %v4057_v23 = vrot.slane %v2945_v39, 5 }
 0x1c9   : > { %9846 = vmatmul.mubr.bf16.gmra.mxu0 %v9158_v16  ;;  %v3089_v46 = vrot.slane %v3087_v48, 5  ;;  %v3093_v9 = vrot.slane %v3091_v1, 4  ;;  %v3123_v43 = vrot.slane %v3121_v25, 5  ;;  %v4060_v41 = vrot.slane %v2989_v33, 5 }
 0x1ca   : > { %9849 = vmatprep.mubr.bf16.mxu0 %v9159_v5  ;;  %v9755_v55 = vpop.f32.mrf.mxu0  ;;  %v3099_v56 = vrot.slane %v3097_v31, 5  ;;  %v3118_v58 = vor.u32 %v3117_v40, %v3113_v38  ;;  %v3114_v42 = vsel %vm12048_vm12, %v3109_v36, %v3113_v38  ;;  %v4059_v22 = vrot.slane %v4057_v23, 4  ;;  %v2334_v36 = vld [vmem:[#allocation3 + $0x9c] sm:$0x1] }
 0x1cb   : > { %v2167_v62 = vadd.f32 %v9755_v55, %v12238_v54  ;;  %v3094_v12 = vor.u32 %v3093_v9, %v3089_v46  ;;  %v3090_v4 = vsel %vm12048_vm12, %v3085_v47, %v3089_v46  ;;  %v4066_v27 = vrot.slane %v4064_v59, 4 }
 0x1cc   : > { %v2158_v49 = vpop.f32.mrf.mxu0  ;;  %v3119_v3 = vrot.slane %v3118_v58, 4  ;;  %v12405_v18 = vsel %vm12346_vm8, %v9182_v50, %v4057_v23  ;;  %v2338_v20 = vsel %vm11820_vm14, 0, %v2337_v17  ;;  %v12413_v21 = vsel %vm12346_vm8, %v4059_v22, %v4060_v41  ;;  %v2854_v23 = vld [vmem:[#allocation3 + $0x3c] sm:$0xf]  ;;  %v2393_v58 = vld [vmem:[#allocation3 + $0xb0] sm:$0x1] }
 0x1cd   : > { %v2263_v6 = vmax.f32 %v2167_v62, 0.0  ;;  %v2159_v11 = vadd.f32 %v12238_v54, %v2158_v49  ;;  %v3095_v14 = vrot.slane %v3094_v12, 4  ;;  %v4067_v13 = vrot.slane %v2990_v26, 5  ;;  %2339 = vst [vmem:[#allocation3 + $0xa8] sm:$0x1] %v2338_v20 }
 0x1ce   : > { %v9756_v52 = vpop.f32.mrf.mxu0  ;;  %v3124_v53 = vsel %vm12048_vm12, %v3119_v3, %v3123_v43  ;;  %v12422_v35 = vsel %vm12346_vm8, %v9183_v44, %v4064_v59  ;;  %v2861_v44 = vld [vmem:[#allocation3 + $0x48] sm:$0xf]  ;;  %v2390_v3 = vld [vmem:[#allocation3 + $0xa4] sm:$0x1] }
 0x1cf   : > { %v9480_v10 = vpack.c.bf16 %v2263_v6, %v2263_v6  ;;  %v2261_v24 = vmax.f32 %v2159_v11, 0.0  ;;  %v2170_v2 = vadd.f32 %v9756_v52, %v12238_v54  ;;  %v3100_v29 = vsel %vm12048_vm12, %v3095_v14, %v3099_v56  ;;  %v2858_v20 = vld [vmem:[#allocation3 + $0x44] sm:$0x1] }
 0x1d0   : > { %v2161_v34 = vpop.f32.mrf.mxu0  ;;  %v9134_v32 = vcombine.low %v3090_v4, %v3100_v29  ;;  %v12426_v26 = vsel %vm12346_vm8, %v4066_v27, %v4067_v13  ;;  %v9135_v40 = vcombine.low %v3114_v42, %v3124_v53  ;;  %v2335_v56 = vsel %vm11820_vm14, 0, %v2334_v36  ;;  %v2865_v42 = vld [vmem:[#allocation3 + $0x50] sm:$0x1] }
 0x1d1   : > { %v2589_v39 = vshrl.u32 %v9480_v10, 16  ;;  %v9478_v33 = vpack.c.bf16 %v2261_v24, %v2261_v24  ;;  %v2264_v57 = vmax.f32 %v2170_v2, 0.0  ;;  %v2162_v25 = vadd.f32 %v12238_v54, %v2161_v34  ;;  %2336 = vst [vmem:[#allocation3 + $0x9c] sm:$0x1] %v2335_v56 }
 0x1d2   : > { %9798 = vmatmul.mubr.bf16.gmra.mxu1 %v9134_v32  ;;  %v2592_v48 = vshll.u32 %v9480_v10, 16  ;;  %v2394_v4 = vsel %vm11839_vm1, 0, %v2393_v58  ;;  %v2391_v11 = vsel %vm11839_vm1, 0, %v2390_v3  ;;  %v10954_v32 = vld [vmem:[%s15074_s3 + $0xb8] sm:$0xff]  }
 0x1d3   : > { %v2591_v16 = vrot.slane %v2589_v39, 7  ;;  %v2572_v31 = vshrl.u32 %v9478_v33, 16  ;;  %v9481_v5 = vpack.c.bf16 %v2264_v57, %v2264_v57  ;;  %9801 = vmatprep.mubr.bf16.mxu1 %v9135_v40  ;;  %v2262_v47 = vmax.f32 %v2162_v25, 0.0  ;;  %2395 = vst [vmem:[#allocation3 + $0xb0] sm:$0x1] %v2394_v4  ;;  %v10955_v39 = vld [vmem:[%s15074_s3 + $0xb0] sm:$0xff]   ;;  %9873 = vmatprep.subr.bf16.mxu1 %v10954_v32 }
 0x1d4   : > { %v2575_v9 = vshll.u32 %v9478_v33, 16  ;;  %2392 = vst [vmem:[#allocation3 + $0xa4] sm:$0x1] %v2391_v11  ;;  %v10956_v25 = vld [vmem:[%s15074_s3 + $0xa8] sm:$0xff]   ;;  %9874 = vmatpush3.bf16.msra.mxu1 %v10954_v32 }
 0x1d5   : > { %v2594_v38 = vor.u32 %v2592_v48, %v2591_v16  ;;  %v2574_v46 = vrot.slane %v2572_v31, 7  ;;  %v2597_v50 = vshrl.u32 %v9481_v5, 16  ;;  %v9479_v55 = vpack.c.bf16 %v2262_v47, %v2262_v47  ;;  %9875 = vmatprep.subr.bf16.mxu1 %v10955_v39 }
 0x1d6   : > { %v2600_v12 = vshll.u32 %v9481_v5, 16  ;;  %v2595_v41 = vrot.slane %v2591_v16, 4 }
 0x1d7   : > { %v2862_v43 = vsel %vm12265_vm4, %v2594_v38, %v2861_v44  ;;  %v2577_v59 = vor.u32 %v2575_v9, %v2574_v46  ;;  %v2599_v62 = vrot.slane %v2597_v50, 7  ;;  %v2580_v49 = vshrl.u32 %v9479_v55, 16 }
 0x1d8   : > { %2863 = vst [vmem:[#allocation3 + $0x48] sm:$0xf] %v2862_v43  ;;  %v2583_v17 = vshll.u32 %v9479_v55, 16  ;;  %v2578_v13 = vrot.slane %v2574_v46, 4  ;;  %9876 = vmatpush3.bf16.msra.mxu1 %v10955_v39 }
 0x1d9   : > { %v2855_v22 = vsel %vm12265_vm4, %v2577_v59, %v2854_v23  ;;  %v2602_v27 = vor.u32 %v2600_v12, %v2599_v62  ;;  %v2604_v6 = vrot.slane %v2599_v62, 4  ;;  %v2582_v14 = vrot.slane %v2580_v49, 7  ;;  %9877 = vmatprep.subr.bf16.mxu1 %v10956_v25 }
 0x1da   : > { %2856 = vst [vmem:[#allocation3 + $0x3c] sm:$0xf] %v2855_v22 }
 0x1db   : > { %v2603_v52 = vsel %vm12279_vm5, %v2595_v41, %v2602_v27  ;;  %v2866_v53 = vsel %vm11820_vm14, %v2604_v6, %v2865_v42  ;;  %v2585_v10 = vor.u32 %v2583_v17, %v2582_v14  ;;  %v2587_v24 = vrot.slane %v2582_v14, 4 }
 0x1dc   : > { %2864 = vst [vmem:[#allocation3 + $0x4c] sm:$0xf] %v2603_v52  ;;  %2867 = vst [vmem:[#allocation3 + $0x50] sm:$0x1] %v2866_v53  ;;  %9878 = vmatpush3.bf16.msra.mxu1 %v10956_v25 }
 0x1dd   : > { %v2586_v2 = vsel %vm12279_vm5, %v2578_v13, %v2585_v10  ;;  %v2859_v29 = vsel %vm11820_vm14, %v2587_v24, %v2858_v20  ;;  %v2343_v24 = vld [vmem:[#allocation3 + $0xc0] sm:$0x1] }
 0x1de   : > { %2857 = vst [vmem:[#allocation3 + $0x40] sm:$0xf] %v2586_v2  ;;  %2860 = vst [vmem:[#allocation3 + $0x44] sm:$0x1] %v2859_v29  ;;  %v2344_v32 = vsel %vm11820_vm14, 0, %v2343_v24 }
 0x1df   : > { %v2950_v34 = vld [vmem:[#allocation3 + $0x48] sm:$0xf]  ;;  %2345 = vst [vmem:[#allocation3 + $0xc0] sm:$0x1] %v2344_v32  ;;  %v2396_v32 = vld [vmem:[#allocation3 + $0xbc] sm:$0x1] }
 0x1e0   : > { %v3150_v33 = vshrl.u32 %v2950_v34, 16  ;;  %v3153_v57 = vshll.u32 %v2950_v34, 16  ;;  %v3989_v6 = vld [vmem:[#allocation3 + $0x48] sm:$0xe] }
 0x1e1   : > { %v2948_v40 = vld [vmem:[#allocation3 + $0x3c] sm:$0xf]  ;;  %v9185_v39 = vrot.slane %v3989_v6, 9 }
 0x1e2   : > { %v3126_v16 = vshrl.u32 %v2948_v40, 16  ;;  %v3129_v48 = vshll.u32 %v2948_v40, 16  ;;  %v3152_v31 = vrot.slane %v3150_v33, 4  ;;  %v3155_v5 = vrot.slane %v3153_v57, 5  ;;  %v3988_v55 = vld [vmem:[#allocation3 + $0x3c] sm:$0xe] }
 0x1e3   : > { %v12458_v44 = vld [vmem:[#allocation3 + $0x4c] sm:$0xf]  ;;  %v12460_v47 = vld [vmem:[#allocation3 + $0x50] sm:$0x1]  ;;  %v9184_v27 = vrot.slane %v3988_v55, 9 }
 0x1e4   : > { %v3128_v36 = vrot.slane %v3126_v16, 4  ;;  %v3131_v38 = vrot.slane %v3129_v48, 5  ;;  %v3163_v46 = vshrl.u32 %v12458_v44, 16  ;;  %v3156_v9 = vor.u32 %v3155_v5, %v3152_v31 }
 0x1e5   : > { %v3159_v50 = vshll.u32 %v12458_v44, 16  ;;  %v3169_v23 = vshll.u32 %v12460_v47, 16  ;;  %v2949_v56 = vld [vmem:[#allocation3 + $0x40] sm:$0xf]  ;;  %v9161_v58 = vcombine.low %v2950_v34, %v12458_v44  ;;  %v2991_v43 = vld [vmem:[#allocation3 + $0x44] sm:$0x1] }
 0x1e6   : > { %v3132_v59 = vor.u32 %v3131_v38, %v3128_v36  ;;  %v3165_v62 = vrot.slane %v3163_v46, 4  ;;  %v3139_v12 = vshrl.u32 %v2949_v56, 16  ;;  %v9160_v42 = vcombine.low %v2948_v40, %v2949_v56 }
 0x1e7   : > { %v3135_v41 = vshll.u32 %v2949_v56, 16  ;;  %v3145_v49 = vshll.u32 %v2991_v43, 16  ;;  %v3157_v3 = vrot.slane %v3156_v9, 4  ;;  %v3161_v22 = vrot.slane %v3159_v50, 5 }
 0x1e8   : > { %v3133_v4 = vrot.slane %v3132_v59, 4  ;;  %9850 = vmatmul.mubr.bf16.gmra.mxu0 %v9160_v42  ;;  %v3141_v14 = vrot.slane %v3139_v12, 4  ;;  %v3171_v17 = vrot.slane %v3169_v23, 5  ;;  %v4071_v52 = vrot.slane %v2949_v56, 5 }
 0x1e9   : > { %v3137_v11 = vrot.slane %v3135_v41, 5  ;;  %9853 = vmatprep.mubr.bf16.mxu0 %v9161_v58  ;;  %v3147_v20 = vrot.slane %v3145_v49, 5  ;;  %v3162_v13 = vsel %vm12048_vm12, %v3157_v3, %v3161_v22  ;;  %v3166_v10 = vor.u32 %v3165_v62, %v3161_v22  ;;  %v10960_v62 = vld [vmem:[%s15074_s3 + $0xf8] sm:$0xff]   ;;  %v2340_v22 = vld [vmem:[#allocation3 + $0xb4] sm:$0x1] }
 0x1ea   : > { %v9759_v53 = vpop.f32.mrf.mxu0  ;;  %v4074_v2 = vrot.slane %v2991_v43, 5  ;;  %v4073_v16 = vrot.slane %v4071_v52, 4  ;;  %v4078_v48 = vrot.slane %v12458_v44, 5  ;;  %v12477_v36 = vsel %vm12346_vm8, %v9184_v27, %v4071_v52  ;;  %9921 = vmatprep.subr.bf16.mxu0 %v10960_v62 }
 0x1eb   : > { %v2183_v29 = vadd.f32 %v9759_v53, %v12238_v54  ;;  %v3142_v34 = vor.u32 %v3141_v14, %v3137_v11  ;;  %v3138_v57 = vsel %vm12048_vm12, %v3133_v4, %v3137_v11  ;;  %v3167_v40 = vrot.slane %v3166_v10, 4  ;;  %9922 = vmatpush3.bf16.msra.mxu0 %v10960_v62  ;;  %v2399_v10 = vld [vmem:[#allocation3 + $0xc8] sm:$0x1]  ;;  %v2872_v62 = vld [vmem:[#allocation3 + $0x5c] sm:$0x1] }
 0x1ec   : > { %v2174_v33 = vpop.f32.mrf.mxu0  ;;  %v12483_v9 = vsel %vm12346_vm8, %v4073_v16, %v4074_v2  ;;  %v4080_v50 = vrot.slane %v4078_v48, 4  ;;  %v4081_v23 = vrot.slane %v12460_v47, 5  ;;  %v12496_v42 = vsel %vm12346_vm8, %v9185_v39, %v4078_v48  ;;  %v2868_v39 = vld [vmem:[#allocation3 + $0x54] sm:$0xf] }
 0x1ed   : > { %v2267_v31 = vmax.f32 %v2183_v29, 0.0  ;;  %v2175_v25 = vadd.f32 %v12238_v54, %v2174_v33  ;;  %v3143_v5 = vrot.slane %v3142_v34, 4  ;;  %v3172_v46 = vsel %vm12048_vm12, %v3167_v40, %v3171_v17  ;;  %15144 = vst [vmem:[#allocation12_spill] sm:$0xff] %v12496_v42 }
 0x1ee   : > { %v9760_v38 = vpop.f32.mrf.mxu0  ;;  %v12500_v47 = vsel %vm12346_vm8, %v4080_v50, %v4081_v23  ;;  %v9137_v3 = vcombine.low %v3162_v13, %v3172_v46  ;;  %v2341_v6 = vsel %vm11820_vm14, 0, %v2340_v22  ;;  %v2397_v40 = vsel %vm11839_vm1, 0, %v2396_v32  ;;  %v10963_v46 = vld [vmem:[%s15074_s3 + $0xe8] sm:$0xff]   ;;  %v10962_v22 = vld [vmem:[%s15074_s3 + $0x98] sm:$0xff]  }
 0x1ef   : > { %v9484_v44 = vpack.c.bf16 %v2267_v31, %v2267_v31  ;;  %v2265_v55 = vmax.f32 %v2175_v25, 0.0  ;;  %v2186_v56 = vadd.f32 %v9760_v38, %v12238_v54  ;;  %v3148_v58 = vsel %vm12048_vm12, %v3143_v5, %v3147_v20  ;;  %15145 = vst [vmem:[#allocation13_spill] sm:$0xff] %v12500_v47  ;;  %2342 = vst [vmem:[#allocation3 + $0xb4] sm:$0x1] %v2341_v6  ;;  %v2875_v20 = vld [vmem:[#allocation3 + $0x60] sm:$0xf] }
 0x1f0   : > { %v2177_v43 = vpop.f32.mrf.mxu0  ;;  %v9136_v59 = vcombine.low %v3138_v57, %v3148_v58  ;;  %v2400_v57 = vsel %vm11839_vm1, 0, %v2399_v10  ;;  %2398 = vst [vmem:[#allocation3 + $0xbc] sm:$0x1] %v2397_v40  ;;  %v2879_v5 = vld [vmem:[#allocation3 + $0x68] sm:$0x1]  ;;  %v10967_v10 = vld [vmem:[%s15074_s3 + $0xd0] sm:$0xff]  }
 0x1f1   : > { %v2623_v41 = vshrl.u32 %v9484_v44, 16  ;;  %v9482_v49 = vpack.c.bf16 %v2265_v55, %v2265_v55  ;;  %v2268_v4 = vmax.f32 %v2186_v56, 0.0  ;;  %v2178_v27 = vadd.f32 %v12238_v54, %v2177_v43  ;;  %v10961_v54 = vld [vmem:[%s15074_s3 + $0xf0] sm:$0xff]   ;;  %2401 = vst [vmem:[#allocation3 + $0xc8] sm:$0x1] %v2400_v57  ;;  %v10966_v6 = vld [vmem:[%s15074_s3 + $0xd8] sm:$0xff]  }
 0x1f2   : > { %9802 = vmatmul.mubr.bf16.gmra.mxu1 %v9136_v59  ;;  %v2626_v17 = vshll.u32 %v9484_v44, 16  ;;  %9923 = vmatprep.subr.bf16.mxu0 %v10961_v54 }
 0x1f3   : > { %v2625_v14 = vrot.slane %v2623_v41, 7  ;;  %v2606_v52 = vshrl.u32 %v9482_v49, 16  ;;  %v9485_v53 = vpack.c.bf16 %v2268_v4, %v2268_v4  ;;  %9805 = vmatprep.mubr.bf16.mxu1 %v9137_v3  ;;  %v2266_v13 = vmax.f32 %v2178_v27, 0.0  ;;  %9924 = vmatpush3.bf16.msra.mxu0 %v10961_v54  ;;  %v10959_v3 = vld [vmem:[%s15074_s3 + $0xa0] sm:$0xff]  }
 0x1f4   : > { %v2609_v29 = vshll.u32 %v9482_v49, 16  ;;  %9925 = vmatprep.subr.bf16.mxu0 %v10963_v46  ;;  %v10964_v27 = vld [vmem:[%s15074_s3 + $0xe0] sm:$0xff]   ;;  %9879 = vmatprep.subr.bf16.mxu1 %v10959_v3 }
 0x1f5   : > { %v2628_v24 = vor.u32 %v2626_v17, %v2625_v14  ;;  %v2608_v2 = vrot.slane %v2606_v52, 7  ;;  %v2631_v34 = vshrl.u32 %v9485_v53, 16  ;;  %v9483_v33 = vpack.c.bf16 %v2266_v13, %v2266_v13  ;;  %9880 = vmatpush3.bf16.msra.mxu1 %v10959_v3  ;;  %v10965_v13 = vld [vmem:[%s15074_s3 + $0x90] sm:$0xff]  }
 0x1f6   : > { %v2634_v25 = vshll.u32 %v9485_v53, 16  ;;  %v2629_v50 = vrot.slane %v2625_v14, 4  ;;  %9881 = vmatprep.subr.bf16.mxu1 %v10962_v22 }
 0x1f7   : > { %v2876_v16 = vsel %vm12265_vm4, %v2628_v24, %v2875_v20  ;;  %v2611_v48 = vor.u32 %v2609_v29, %v2608_v2  ;;  %v2633_v31 = vrot.slane %v2631_v34, 7  ;;  %v2614_v38 = vshrl.u32 %v9483_v33, 16  ;;  %9926 = vmatpush3.bf16.msra.mxu0 %v10963_v46 }
 0x1f8   : > { %2877 = vst [vmem:[#allocation3 + $0x60] sm:$0xf] %v2876_v16  ;;  %v2617_v58 = vshll.u32 %v9483_v33, 16  ;;  %v2612_v41 = vrot.slane %v2608_v2, 4  ;;  %9927 = vmatprep.subr.bf16.mxu0 %v10964_v27 }
 0x1f9   : > { %v2869_v23 = vsel %vm12265_vm4, %v2611_v48, %v2868_v39  ;;  %v2636_v44 = vor.u32 %v2634_v25, %v2633_v31  ;;  %v2638_v55 = vrot.slane %v2633_v31, 4  ;;  %v2616_v56 = vrot.slane %v2614_v38, 7  ;;  %9882 = vmatpush3.bf16.msra.mxu1 %v10962_v22 }
 0x1fa   : > { %2870 = vst [vmem:[#allocation3 + $0x54] sm:$0xf] %v2869_v23  ;;  %9883 = vmatprep.subr.bf16.mxu1 %v10965_v13 }
 0x1fb   : > { %v2637_v43 = vsel %vm12279_vm5, %v2629_v50, %v2636_v44  ;;  %v2880_v59 = vsel %vm11820_vm14, %v2638_v55, %v2879_v5  ;;  %v2619_v49 = vor.u32 %v2617_v58, %v2616_v56  ;;  %v2621_v4 = vrot.slane %v2616_v56, 4  ;;  %9928 = vmatpush3.bf16.msra.mxu0 %v10964_v27  ;;  %v10969_v55 = vld [vmem:[%s15074_s3 + $0x88] sm:$0xff]  }
 0x1fc   : > { %2878 = vst [vmem:[#allocation3 + $0x64] sm:$0xf] %v2637_v43  ;;  %2881 = vst [vmem:[#allocation3 + $0x68] sm:$0x1] %v2880_v59  ;;  %9929 = vmatprep.subr.bf16.mxu0 %v10966_v6 }
 0x1fd   : > { %v2620_v14 = vsel %vm12279_vm5, %v2612_v41, %v2619_v49  ;;  %v2873_v17 = vsel %vm11820_vm14, %v2621_v4, %v2872_v62  ;;  %9884 = vmatpush3.bf16.msra.mxu1 %v10965_v13  ;;  %v10970_v62 = vld [vmem:[%s15074_s3 + $0xc8] sm:$0xff]  }
 0x1fe   : > { %2871 = vst [vmem:[#allocation3 + $0x58] sm:$0xf] %v2620_v14  ;;  %2874 = vst [vmem:[#allocation3 + $0x5c] sm:$0x1] %v2873_v17  ;;  %9885 = vmatprep.subr.bf16.mxu1 %v10969_v55  ;;  %v10972_v14 = vld [vmem:[%s15074_s3 + $0xc0] sm:$0xff]  }
 0x1ff   : > { %v2954_v52 = vld [vmem:[#allocation3 + $0x60] sm:$0xf]  ;;  %9930 = vmatpush3.bf16.msra.mxu0 %v10966_v6 }
 0x200   : > { %v3198_v53 = vshrl.u32 %v2954_v52, 16  ;;  %v3201_v20 = vshll.u32 %v2954_v52, 16  ;;  %v12547_v32 = vld [vmem:[#allocation3 + $0x60] sm:$0xe]  ;;  %9931 = vmatprep.subr.bf16.mxu0 %v10967_v10 }
 0x201   : > { %v2952_v54 = vld [vmem:[#allocation3 + $0x54] sm:$0xf]  ;;  %v9187_v38 = vrot.slane %v12547_v32, 9  ;;  %9886 = vmatpush3.bf16.msra.mxu1 %v10969_v55 }
 0x202   : > { %v3174_v24 = vshrl.u32 %v2952_v54, 16  ;;  %v3177_v2 = vshll.u32 %v2952_v54, 16  ;;  %v3200_v29 = vrot.slane %v3198_v53, 4  ;;  %v3203_v34 = vrot.slane %v3201_v20, 5  ;;  %v3990_v5 = vld [vmem:[#allocation3 + $0x54] sm:$0xe] }
 0x203   : > { %v12549_v39 = vld [vmem:[#allocation3 + $0x64] sm:$0xf]  ;;  %v12551_v33 = vld [vmem:[#allocation3 + $0x68] sm:$0x1]  ;;  %9932 = vmatpush3.bf16.msra.mxu0 %v10967_v10  ;;  %v9186_v3 = vrot.slane %v3990_v5, 9  ;;  %v10973_v5 = vld [vmem:[%s15074_s3 + $0x80] sm:$0xff]  }
 0x204   : > { %v3176_v57 = vrot.slane %v3174_v24, 4  ;;  %v3179_v40 = vrot.slane %v3177_v2, 5  ;;  %v3211_v16 = vshrl.u32 %v12549_v39, 16  ;;  %v3204_v48 = vor.u32 %v3203_v34, %v3200_v29  ;;  %9933 = vmatprep.subr.bf16.mxu0 %v10970_v62  ;;  %9887 = vmatprep.subr.bf16.mxu1 %v10973_v5 }
 0x205   : > { %v3207_v31 = vshll.u32 %v12549_v39, 16  ;;  %v3217_v25 = vshll.u32 %v12551_v33, 16  ;;  %v2953_v46 = vld [vmem:[#allocation3 + $0x58] sm:$0xf]  ;;  %v2993_v50 = vld [vmem:[#allocation3 + $0x5c] sm:$0x1]  ;;  %v9163_v41 = vcombine.low %v2954_v52, %v12549_v39  ;;  %9888 = vmatpush3.bf16.msra.mxu1 %v10973_v5 }
 0x206   : > { %v3180_v23 = vor.u32 %v3179_v40, %v3176_v57  ;;  %v3213_v44 = vrot.slane %v3211_v16, 4  ;;  %v3187_v56 = vshrl.u32 %v2953_v46, 16  ;;  %v9162_v58 = vcombine.low %v2952_v54, %v2953_v46  ;;  %v12571_v54 = vld [vmem:[%s15073_s2] ss:$0 sm:$0xff]  ;;  %v10977_v5 = vld [vmem:[%s15074_s3 + $0x138] sm:$0xff]  }
 0x207   : > { %v3183_v43 = vshll.u32 %v2953_v46, 16  ;;  %v3193_v59 = vshll.u32 %v2993_v50, 16  ;;  %v3209_v4 = vrot.slane %v3207_v31, 5  ;;  %v3205_v6 = vrot.slane %v3204_v48, 4  ;;  %9934 = vmatpush3.bf16.msra.mxu0 %v10970_v62  ;;  %9969 = vmatprep.subr.bf16.mxu1 %v10977_v5 }
 0x208   : > { %v3181_v49 = vrot.slane %v3180_v23, 4  ;;  %9854 = vmatmul.mubr.bf16.gmra.mxu0 %v9162_v58  ;;  %v3189_v27 = vrot.slane %v3187_v56, 4  ;;  %v4085_v17 = vrot.slane %v2953_v46, 5  ;;  %v3219_v10 = vrot.slane %v3217_v25, 5  ;;  %9935 = vmatprep.subr.bf16.mxu0 %v10972_v14 }
 0x209   : > { %v3185_v22 = vrot.slane %v3183_v43, 5  ;;  %9857 = vmatprep.mubr.bf16.mxu0 %v9163_v41  ;;  %v3195_v20 = vrot.slane %v3193_v59, 5  ;;  %v3214_v13 = vor.u32 %v3213_v44, %v3209_v4  ;;  %v4092_v52 = vrot.slane %v12549_v39, 5 }
 0x20a   : > { %v9763_v53 = vpop.f32.mrf.mxu0  ;;  %v4087_v29 = vrot.slane %v4085_v17, 4  ;;  %v4088_v34 = vrot.slane %v2993_v50, 5  ;;  %v12576_v16 = vsel %vm12346_vm8, %v9186_v3, %v4085_v17  ;;  %v4095_v56 = vrot.slane %v12551_v33, 5 }
 0x20b   : > { %v2199_v24 = vadd.f32 %v12571_v54, %v9763_v53  ;;  %v3190_v2 = vor.u32 %v3189_v27, %v3185_v22  ;;  %v3215_v40 = vrot.slane %v3214_v13, 4  ;;  %15146 = vst [vmem:[#allocation14_spill] sm:$0xff] %v12576_v16  ;;  %v4094_v39 = vrot.slane %v4092_v52, 4  ;;  %9936 = vmatpush3.bf16.msra.mxu0 %v10972_v14 }
 0x20c   : > { %v2190_v57 = vpop.f32.mrf.mxu0  ;;  %v12584_v46 = vsel %vm12346_vm8, %v4087_v29, %v4088_v34  ;;  %v3186_v23 = vsel %vm12048_vm12, %v3181_v49, %v3185_v22  ;;  %v3210_v49 = vsel %vm12048_vm12, %v3205_v6, %v3209_v4  ;;  %v12602_v33 = vsel %vm12346_vm8, %v9187_v38, %v4092_v52  ;;  %v2889_v38 = vld [vmem:[#allocation3 + $0x78] sm:$0xf] }
 0x20d   : > { %v2271_v48 = vmax.f32 %v2199_v24, 0.0  ;;  %v2191_v31 = vadd.f32 %v12571_v54, %v2190_v57  ;;  %v3191_v25 = vrot.slane %v3190_v2, 4  ;;  %15147 = vst [vmem:[#allocation15_spill] sm:$0xff] %v12584_v46  ;;  %v3220_v44 = vsel %vm12048_vm12, %v3215_v40, %v3219_v10  ;;  %15148 = vst [vmem:[#allocation16_spill] sm:$0xff] %v12602_v33  ;;  %v2882_v57 = vld [vmem:[#allocation3 + $0x6c] sm:$0xf] }
 0x20e   : > { %v9764_v50 = vpop.f32.mrf.mxu0  ;;  %v12606_v22 = vsel %vm12346_vm8, %v4094_v39, %v4095_v56  ;;  %v9139_v53 = vcombine.low %v3210_v49, %v3220_v44  ;;  %v2886_v49 = vld [vmem:[#allocation3 + $0x74] sm:$0x1] }
 0x20f   : > { %v9488_v58 = vpack.c.bf16 %v2271_v48, %v2271_v48  ;;  %v2269_v43 = vmax.f32 %v2191_v31, 0.0  ;;  %v2202_v59 = vadd.f32 %v12571_v54, %v9764_v50  ;;  %v3196_v62 = vsel %vm12048_vm12, %v3191_v25, %v3195_v20  ;;  %15149 = vst [vmem:[#allocation17_spill] sm:$0xff] %v12606_v22  ;;  %v2893_v50 = vld [vmem:[#allocation3 + $0x80] sm:$0x1] }
 0x210   : > { %v2193_v41 = vpop.f32.mrf.mxu0  ;;  %v9138_v3 = vcombine.low %v3186_v23, %v3196_v62 }
 0x211   : > { %v2657_v27 = vshrl.u32 %v9488_v58, 16  ;;  %v9486_v17 = vpack.c.bf16 %v2269_v43, %v2269_v43  ;;  %v2272_v14 = vmax.f32 %v2202_v59, 0.0  ;;  %v2194_v20 = vadd.f32 %v12571_v54, %v2193_v41 }
 0x212   : > { %9806 = vmatmul.mubr.bf16.gmra.mxu1 %v9138_v3  ;;  %v2660_v32 = vshll.u32 %v9488_v58, 16 }
 0x213   : > { %v2659_v6 = vrot.slane %v2657_v27, 7  ;;  %v2640_v13 = vshrl.u32 %v9486_v17, 16  ;;  %v9489_v10 = vpack.c.bf16 %v2272_v14, %v2272_v14  ;;  %9809 = vmatprep.mubr.bf16.mxu1 %v9139_v53  ;;  %v2270_v52 = vmax.f32 %v2194_v20, 0.0 }
 0x214   : > { %v2643_v29 = vshll.u32 %v9486_v17, 16 }
 0x215   : > { %v2662_v24 = vor.u32 %v2660_v32, %v2659_v6  ;;  %v2642_v2 = vrot.slane %v2640_v13, 7  ;;  %v2665_v34 = vshrl.u32 %v9489_v10, 16  ;;  %v9487_v40 = vpack.c.bf16 %v2270_v52, %v2270_v52 }
 0x216   : > { %v2668_v25 = vshll.u32 %v9489_v10, 16  ;;  %v2663_v44 = vrot.slane %v2659_v6, 4 }
 0x217   : > { %v2890_v39 = vsel %vm12265_vm4, %v2662_v24, %v2889_v38  ;;  %v2645_v48 = vor.u32 %v2643_v29, %v2642_v2  ;;  %v2667_v31 = vrot.slane %v2665_v34, 7  ;;  %v2648_v23 = vshrl.u32 %v9487_v40, 16 }
 0x218   : > { %2891 = vst [vmem:[#allocation3 + $0x78] sm:$0xf] %v2890_v39  ;;  %v2651_v62 = vshll.u32 %v9487_v40, 16  ;;  %v2646_v27 = vrot.slane %v2642_v2, 4 }
 0x219   : > { %v2883_v56 = vsel %vm12265_vm4, %v2645_v48, %v2882_v57  ;;  %v2670_v58 = vor.u32 %v2668_v25, %v2667_v31  ;;  %v2672_v43 = vrot.slane %v2667_v31, 4  ;;  %v2650_v59 = vrot.slane %v2648_v23, 7 }
 0x21a   : > { %2884 = vst [vmem:[#allocation3 + $0x6c] sm:$0xf] %v2883_v56 }
 0x21b   : > { %v2671_v41 = vsel %vm12279_vm5, %v2663_v44, %v2670_v58  ;;  %v2894_v3 = vsel %vm11820_vm14, %v2672_v43, %v2893_v50  ;;  %v2653_v17 = vor.u32 %v2651_v62, %v2650_v59  ;;  %v2655_v14 = vrot.slane %v2650_v59, 4 }
 0x21c   : > { %2892 = vst [vmem:[#allocation3 + $0x7c] sm:$0xf] %v2671_v41  ;;  %2895 = vst [vmem:[#allocation3 + $0x80] sm:$0x1] %v2894_v3 }
 0x21d   : > { %v2654_v53 = vsel %vm12279_vm5, %v2646_v27, %v2653_v17  ;;  %v2887_v20 = vsel %vm11820_vm14, %v2655_v14, %v2886_v49 }
 0x21e   : > { %2885 = vst [vmem:[#allocation3 + $0x70] sm:$0xf] %v2654_v53  ;;  %2888 = vst [vmem:[#allocation3 + $0x74] sm:$0x1] %v2887_v20 }
 0x21f   : > { %v2958_v6 = vld [vmem:[#allocation3 + $0x78] sm:$0xf] }
 0x220   : > { %v3246_v32 = vshrl.u32 %v2958_v6, 16  ;;  %v3249_v13 = vshll.u32 %v2958_v6, 16  ;;  %v3993_v5 = vld [vmem:[#allocation3 + $0x78] sm:$0xe] }
 0x221   : > { %v2956_v10 = vld [vmem:[#allocation3 + $0x6c] sm:$0xf]  ;;  %v9189_v17 = vrot.slane %v3993_v5, 9 }
 0x222   : > { %v3222_v38 = vshrl.u32 %v2956_v10, 16  ;;  %v3225_v52 = vshll.u32 %v2956_v10, 16  ;;  %v3248_v24 = vrot.slane %v3246_v32, 4  ;;  %v3251_v2 = vrot.slane %v3249_v13, 5  ;;  %v3992_v25 = vld [vmem:[#allocation3 + $0x6c] sm:$0xe] }
 0x223   : > { %v2959_v29 = vld [vmem:[#allocation3 + $0x7c] sm:$0xf]  ;;  %v2996_v34 = vld [vmem:[#allocation3 + $0x80] sm:$0x1] }
 0x224   : > { %v3224_v57 = vrot.slane %v3222_v38, 4  ;;  %v3227_v40 = vrot.slane %v3225_v52, 5  ;;  %v3259_v39 = vshrl.u32 %v2959_v29, 16  ;;  %v3252_v48 = vor.u32 %v3251_v2, %v3248_v24 }
 0x225   : > { %v3255_v31 = vshll.u32 %v2959_v29, 16  ;;  %v2957_v50 = vld [vmem:[#allocation3 + $0x70] sm:$0xf]  ;;  %v2995_v23 = vld [vmem:[#allocation3 + $0x74] sm:$0x1]  ;;  %v3265_v58 = vshll.u32 %v2996_v34, 16  ;;  %v9165_v3 = vcombine.low %v2958_v6, %v2959_v29 }
 0x226   : > { %v3228_v44 = vor.u32 %v3227_v40, %v3224_v57  ;;  %v3261_v56 = vrot.slane %v3259_v39, 4  ;;  %v3235_v43 = vshrl.u32 %v2957_v50, 16  ;;  %v9164_v59 = vcombine.low %v2956_v10, %v2957_v50 }
 0x227   : > { %v3231_v62 = vshll.u32 %v2957_v50, 16  ;;  %v3241_v41 = vshll.u32 %v2995_v23, 16  ;;  %v3253_v49 = vrot.slane %v3252_v48, 4  ;;  %v3257_v27 = vrot.slane %v3255_v31, 5 }
 0x228   : > { %9858 = vmatmul.mubr.bf16.gmra.mxu0 %v9164_v59  ;;  %v3229_v14 = vrot.slane %v3228_v44, 4  ;;  %v3237_v20 = vrot.slane %v3235_v43, 4  ;;  %v4099_v32 = vrot.slane %v2957_v50, 5  ;;  %v3267_v52 = vrot.slane %v3265_v58, 5  ;;  %v12637_v59 = vld [vmem:[%s15074_s3 + $0x178] sm:$0xff]  }
 0x229   : > { %v3233_v53 = vrot.slane %v3231_v62, 5  ;;  %9861 = vmatprep.mubr.bf16.mxu0 %v9165_v3  ;;  %v3262_v38 = vor.u32 %v3261_v56, %v3257_v27  ;;  %v9188_v24 = vrot.slane %v3992_v25, 9  ;;  %v4106_v2 = vrot.slane %v2959_v29, 5  ;;  %10017 = vmatprep.subr.bf16.mxu0 %v12637_v59 }
 0x22a   : > { %v9767_v13 = vpop.f32.mrf.mxu0  ;;  %v3243_v40 = vrot.slane %v3241_v41, 5  ;;  %v3258_v6 = vsel %vm12048_vm12, %v3253_v49, %v3257_v27  ;;  %v4101_v31 = vrot.slane %v4099_v32, 4  ;;  %v4102_v5 = vrot.slane %v2995_v23, 5 }
 0x22b   : > { %v2215_v57 = vadd.f32 %v12571_v54, %v9767_v13  ;;  %v3238_v10 = vor.u32 %v3237_v20, %v3233_v53  ;;  %v3263_v48 = vrot.slane %v3262_v38, 4  ;;  %v4108_v44 = vrot.slane %v4106_v2, 4 }
 0x22c   : > { %v2206_v39 = vpop.f32.mrf.mxu0  ;;  %v3234_v56 = vsel %vm12048_vm12, %v3229_v14, %v3233_v53  ;;  %v12641_v23 = vsel %vm12346_vm8, %v9188_v24, %v4099_v32  ;;  %v12645_v62 = vsel %vm12346_vm8, %v4101_v31, %v4102_v5  ;;  %v4109_v41 = vrot.slane %v2996_v34, 5 }
 0x22d   : > { %v2275_v43 = vmax.f32 %v2215_v57, 0.0  ;;  %v2207_v50 = vadd.f32 %v12571_v54, %v2206_v39  ;;  %v3239_v25 = vrot.slane %v3238_v10, 4  ;;  %v3268_v58 = vsel %vm12048_vm12, %v3263_v48, %v3267_v52  ;;  %15150 = vst [vmem:[#allocation18_spill] sm:$0xff] %v12641_v23  ;;  %15151 = vst [vmem:[#allocation19_spill] sm:$0xff] %v12645_v62 }
 0x22e   : > { %v9768_v29 = vpop.f32.mrf.mxu0  ;;  %v12655_v13 = vsel %vm12346_vm8, %v9189_v17, %v4106_v2  ;;  %v12659_v34 = vsel %vm12346_vm8, %v4108_v44, %v4109_v41  ;;  %v9141_v57 = vcombine.low %v3258_v6, %v3268_v58  ;;  %v2903_v17 = vld [vmem:[#allocation3 + $0x90] sm:$0xf] }
 0x22f   : > { %v9492_v3 = vpack.c.bf16 %v2275_v43, %v2275_v43  ;;  %v2273_v49 = vmax.f32 %v2207_v50, 0.0  ;;  %v2218_v27 = vadd.f32 %v12571_v54, %v9768_v29  ;;  %v3244_v14 = vsel %vm12048_vm12, %v3239_v25, %v3243_v40  ;;  %15152 = vst [vmem:[#allocation20_spill] sm:$0xff] %v12655_v13  ;;  %15153 = vst [vmem:[#allocation21_spill] sm:$0xff] %v12659_v34  ;;  %v2896_v25 = vld [vmem:[#allocation3 + $0x84] sm:$0xf] }
 0x230   : > { %v2209_v53 = vpop.f32.mrf.mxu0  ;;  %v9140_v20 = vcombine.low %v3234_v56, %v3244_v14  ;;  %v12761_v34 = vld [vmem:[#allocation3 + $0x34] sm:$0xf] }
 0x231   : > { %v2691_v38 = vshrl.u32 %v9492_v3, 16  ;;  %v9490_v52 = vpack.c.bf16 %v2273_v49, %v2273_v49  ;;  %v2276_v24 = vmax.f32 %v2218_v27, 0.0  ;;  %v2210_v10 = vadd.f32 %v12571_v54, %v2209_v53  ;;  %v2907_v27 = vld [vmem:[#allocation3 + $0x98] sm:$0x1] }
 0x232   : > { %9810 = vmatmul.mubr.bf16.gmra.mxu1 %v9140_v20  ;;  %v2694_v48 = vshll.u32 %v9492_v3, 16 }
 0x233   : > { %v2693_v39 = vrot.slane %v2691_v38, 7  ;;  %v2674_v31 = vshrl.u32 %v9490_v52, 16  ;;  %v9493_v5 = vpack.c.bf16 %v2276_v24, %v2276_v24  ;;  %9813 = vmatprep.mubr.bf16.mxu1 %v9141_v57  ;;  %v2274_v2 = vmax.f32 %v2210_v10, 0.0 }
 0x234   : > { %v2677_v50 = vshll.u32 %v9490_v52, 16 }
 0x235   : > { %v2696_v43 = vor.u32 %v2694_v48, %v2693_v39  ;;  %v2676_v44 = vrot.slane %v2674_v31, 7  ;;  %v2699_v56 = vshrl.u32 %v9493_v5, 16  ;;  %v9491_v29 = vpack.c.bf16 %v2274_v2, %v2274_v2  ;;  %v2900_v48 = vld [vmem:[#allocation3 + $0x8c] sm:$0x1] }
 0x236   : > { %v2702_v49 = vshll.u32 %v9493_v5, 16  ;;  %v2697_v14 = vrot.slane %v2693_v39, 4 }
 0x237   : > { %v2904_v6 = vsel %vm12265_vm4, %v2696_v43, %v2903_v17  ;;  %v2679_v58 = vor.u32 %v2677_v50, %v2676_v44  ;;  %v2701_v41 = vrot.slane %v2699_v56, 7  ;;  %v2682_v3 = vshrl.u32 %v9491_v29, 16 }
 0x238   : > { %2905 = vst [vmem:[#allocation3 + $0x90] sm:$0xf] %v2904_v6  ;;  %v2685_v24 = vshll.u32 %v9491_v29, 16  ;;  %v2680_v31 = vrot.slane %v2676_v44, 4  ;;  %v12676_v29 = vld [vmem:[#allocation3 + $0x10] sm:$0xf] }
 0x239   : > { %v2897_v53 = vsel %vm12265_vm4, %v2679_v58, %v2896_v25  ;;  %v2704_v20 = vor.u32 %v2702_v49, %v2701_v41  ;;  %v2706_v38 = vrot.slane %v2701_v41, 4  ;;  %v2684_v52 = vrot.slane %v2682_v3, 7  ;;  %v12682_v3 = vld [vmem:[#allocation3 + $0x8] sm:$0x1] }
 0x23a   : > { %2898 = vst [vmem:[#allocation3 + $0x84] sm:$0xf] %v2897_v53 }
 0x23b   : > { %v2705_v57 = vsel %vm12279_vm5, %v2697_v14, %v2704_v20  ;;  %v2908_v10 = vsel %vm11820_vm14, %v2706_v38, %v2907_v27  ;;  %v2687_v5 = vor.u32 %v2685_v24, %v2684_v52  ;;  %v2689_v39 = vrot.slane %v2684_v52, 4 }
 0x23c   : > { %2906 = vst [vmem:[#allocation3 + $0x94] sm:$0xf] %v2705_v57  ;;  %2909 = vst [vmem:[#allocation3 + $0x98] sm:$0x1] %v2908_v10 }
 0x23d   : > { %v2688_v17 = vsel %vm12279_vm5, %v2680_v31, %v2687_v5  ;;  %v2901_v2 = vsel %vm11820_vm14, %v2689_v39, %v2900_v48  ;;  %v15079_v48 = vrot.slane %v12676_v29, 5 }
 0x23e   : > { %2899 = vst [vmem:[#allocation3 + $0x88] sm:$0xf] %v2688_v17  ;;  %2902 = vst [vmem:[#allocation3 + $0x8c] sm:$0x1] %v2901_v2 }
 0x23f   : > { %v2962_v43 = vld [vmem:[#allocation3 + $0x90] sm:$0xf] }
 0x240   : > { %v3294_v50 = vshrl.u32 %v2962_v43, 16  ;;  %v3297_v56 = vshll.u32 %v2962_v43, 16  ;;  %v3995_v10 = vld [vmem:[#allocation3 + $0x90] sm:$0xe] }
 0x241   : > { %v2960_v25 = vld [vmem:[#allocation3 + $0x84] sm:$0xf] }
 0x242   : > { %v3270_v6 = vshrl.u32 %v2960_v25, 16  ;;  %v3273_v44 = vshll.u32 %v2960_v25, 16  ;;  %v3296_v58 = vrot.slane %v3294_v50, 4  ;;  %v3299_v41 = vrot.slane %v3297_v56, 5  ;;  %v3994_v57 = vld [vmem:[#allocation3 + $0x84] sm:$0xe] }
 0x243   : > { %v12678_v49 = vld [vmem:[#allocation3 + $0x94] sm:$0xf]  ;;  %v12680_v27 = vld [vmem:[#allocation3 + $0x98] sm:$0x1] }
 0x244   : > { %v3272_v53 = vrot.slane %v3270_v6, 4  ;;  %v3275_v20 = vrot.slane %v3273_v44, 5  ;;  %v3307_v38 = vshrl.u32 %v12678_v49, 16  ;;  %v3300_v52 = vor.u32 %v3299_v41, %v3296_v58 }
 0x245   : > { %v3303_v24 = vshll.u32 %v12678_v49, 16  ;;  %v2961_v31 = vld [vmem:[#allocation3 + $0x88] sm:$0xf]  ;;  %v2997_v5 = vld [vmem:[#allocation3 + $0x8c] sm:$0x1]  ;;  %v3313_v2 = vshll.u32 %v12680_v27, 16  ;;  %v9167_v44 = vcombine.low %v2962_v43, %v12678_v49 }
 0x246   : > { %v3276_v39 = vor.u32 %v3275_v20, %v3272_v53  ;;  %v3309_v17 = vrot.slane %v3307_v38, 4  ;;  %v3283_v50 = vshrl.u32 %v2961_v31, 16  ;;  %v9166_v56 = vcombine.low %v2960_v25, %v2961_v31 }
 0x247   : > { %v3279_v40 = vshll.u32 %v2961_v31, 16  ;;  %v3289_v6 = vshll.u32 %v2997_v5, 16  ;;  %v3301_v32 = vrot.slane %v3300_v52, 4  ;;  %v3305_v58 = vrot.slane %v3303_v24, 5 }
 0x248   : > { %v9191_v41 = vrot.slane %v3995_v10, 9  ;;  %9862 = vmatmul.mubr.bf16.gmra.mxu0 %v9166_v56  ;;  %v3277_v4 = vrot.slane %v3276_v39, 4  ;;  %v3285_v11 = vrot.slane %v3283_v50, 4  ;;  %v4113_v12 = vrot.slane %v2961_v31, 5 }
 0x249   : > { %v3281_v55 = vrot.slane %v3279_v40, 5  ;;  %9865 = vmatprep.mubr.bf16.mxu0 %v9167_v44  ;;  %v3310_v53 = vor.u32 %v3309_v17, %v3305_v58  ;;  %v3315_v20 = vrot.slane %v3313_v2, 5  ;;  %v9190_v38 = vrot.slane %v3994_v57, 9 }
 0x24a   : > { %v9771_v1 = vpop.f32.mrf.mxu0  ;;  %v4120_v60 = vrot.slane %v12678_v49, 5  ;;  %v3291_v28 = vrot.slane %v3289_v6, 5  ;;  %v3306_v43 = vsel %vm12048_vm12, %v3301_v32, %v3305_v58  ;;  %v4115_v10 = vrot.slane %v4113_v12, 4 }
 0x24b   : > { %v2231_v25 = vadd.f32 %v12571_v54, %v9771_v1  ;;  %v3286_v51 = vor.u32 %v3285_v11, %v3281_v55  ;;  %v3311_v24 = vrot.slane %v3310_v53, 4  ;;  %v4116_v40 = vrot.slane %v2997_v5, 5 }
 0x24c   : > { %v2222_v52 = vpop.f32.mrf.mxu0  ;;  %v4122_v39 = vrot.slane %v4120_v60, 4  ;;  %v3282_v57 = vsel %vm12048_vm12, %v3277_v4, %v3281_v55  ;;  %v12701_v11 = vsel %vm12346_vm8, %v9190_v38, %v4113_v12  ;;  %v4123_v5 = vrot.slane %v12680_v27, 5  ;;  %v12711_v55 = vld [vmem:[#allocation3 + $0xc] sm:$0xe]  ;;  %v2910_v12 = vld [vmem:[#allocation3 + $0x9c] sm:$0xf] }
 0x24d   : > { %v2279_v31 = vmax.f32 %v2231_v25, 0.0  ;;  %v2223_v50 = vadd.f32 %v12571_v54, %v2222_v52  ;;  %v3287_v17 = vrot.slane %v3286_v51, 4  ;;  %v3316_v1 = vsel %vm12048_vm12, %v3311_v24, %v3315_v20  ;;  %15154 = vst [vmem:[#allocation22_spill] sm:$0xff] %v12701_v11  ;;  %v4852_v52 = vld [vmem:[#allocation3 + $0xc] sm:$0xf] }
 0x24e   : > { %v9772_v49 = vpop.f32.mrf.mxu0  ;;  %v12705_v32 = vsel %vm12346_vm8, %v4115_v10, %v4116_v40  ;;  %v12717_v58 = vsel %vm12346_vm8, %v9191_v41, %v4120_v60  ;;  %v12721_v27 = vsel %vm12346_vm8, %v4122_v39, %v4123_v5  ;;  %v9143_v25 = vcombine.low %v3306_v43, %v3316_v1  ;;  %v12733_v40 = vld [vmem:[#allocation3 + $0x18] sm:$0xe]  ;;  %v12738_v10 = vld [vmem:[#allocation3 + $0x28] sm:$0xf]  ;;  %v5607_v11 = vld [vmem:[#allocation3 + $0x24] sm:$0xe] }
 0x24f   : > { %15155 = vst [vmem:[#allocation23_spill] sm:$0xff] %v12705_v32  ;;  %v9496_v2 = vpack.c.bf16 %v2279_v31, %v2279_v31  ;;  %v2277_v56 = vmax.f32 %v2223_v50, 0.0  ;;  %v2234_v6 = vadd.f32 %v12571_v54, %v9772_v49  ;;  %v3292_v51 = vsel %vm12048_vm12, %v3287_v17, %v3291_v28  ;;  %15156 = vst [vmem:[#allocation24_spill] sm:$0xff] %v12717_v58  ;;  %v12723_v28 = vld [vmem:[#allocation3 + $0x14] sm:$0x1] }
 0x250   : > { %v2225_v4 = vpop.f32.mrf.mxu0  ;;  %v9142_v44 = vcombine.low %v3282_v57, %v3292_v51  ;;  %15157 = vst [vmem:[#allocation25_spill] sm:$0xff] %v12721_v27  ;;  %v12731_v41 = vrot.slane %v15079_v48, 4  ;;  %v12735_v57 = vld [vmem:[#allocation3 + $0x1c] sm:$0xf]  ;;  %v2917_v17 = vld [vmem:[#allocation3 + $0xa8] sm:$0xf] }
 0x251   : > { %v2725_v53 = vshrl.u32 %v9496_v2, 16  ;;  %v9494_v20 = vpack.c.bf16 %v2277_v56, %v2277_v56  ;;  %v2280_v38 = vmax.f32 %v2234_v6, 0.0  ;;  %v2226_v24 = vadd.f32 %v12571_v54, %v2225_v4 }
 0x252   : > { %9814 = vmatmul.mubr.bf16.gmra.mxu1 %v9142_v44  ;;  %v2728_v31 = vshll.u32 %v9496_v2, 16  ;;  %v5674_v1 = vrot.slane %v12723_v28, 5  ;;  %v4901_v5 = vshrl.u32 %v4852_v52, 16  ;;  %v4904_v56 = vshll.u32 %v4852_v52, 16 }
 0x253   : > { %v2727_v39 = vrot.slane %v2725_v53, 7  ;;  %v2708_v43 = vshrl.u32 %v9494_v20, 16  ;;  %v9497_v50 = vpack.c.bf16 %v2280_v38, %v2280_v38  ;;  %9817 = vmatprep.mubr.bf16.mxu1 %v9143_v25  ;;  %v2278_v49 = vmax.f32 %v2226_v24, 0.0 }
 0x254   : > { %v2711_v4 = vshll.u32 %v9494_v20, 16  ;;  %v9268_v2 = vrot.slane %v12733_v40, 9  ;;  %v5678_v38 = vrot.slane %v12735_v57, 5  ;;  %v4910_v25 = vshll.u32 %v12676_v29, 16  ;;  %v2921_v20 = vld [vmem:[#allocation3 + $0xb0] sm:$0x1] }
 0x255   : > { %v2730_v6 = vor.u32 %v2728_v31, %v2727_v39  ;;  %v2710_v51 = vrot.slane %v2708_v43, 7  ;;  %v2733_v44 = vshrl.u32 %v9497_v50, 16  ;;  %v9495_v53 = vpack.c.bf16 %v2278_v49, %v2278_v49  ;;  %v12745_v31 = vld [vmem:[#allocation3 + $0x20] sm:$0x1] }
 0x256   : > { %v2736_v52 = vshll.u32 %v9497_v50, 16  ;;  %v5685_v48 = vrot.slane %v12738_v10, 5  ;;  %v4903_v49 = vrot.slane %v4901_v5, 4  ;;  %v4906_v15 = vrot.slane %v4904_v56, 5  ;;  %v2914_v56 = vld [vmem:[#allocation3 + $0xa4] sm:$0x1] }
 0x257   : > { %v2918_v24 = vsel %vm12265_vm4, %v2730_v6, %v2917_v17  ;;  %v2713_v14 = vor.u32 %v2711_v4, %v2710_v51  ;;  %v2735_v60 = vrot.slane %v2733_v44, 7  ;;  %v2716_v43 = vshrl.u32 %v9495_v53, 16  ;;  %v12751_v4 = vld [vmem:[#allocation3 + $0x2c] sm:$0x1] }
 0x258   : > { %2919 = vst [vmem:[#allocation3 + $0xa8] sm:$0xf] %v2918_v24  ;;  %v2731_v40 = vrot.slane %v2727_v39, 4  ;;  %v2719_v6 = vshll.u32 %v9495_v53, 16  ;;  %v5681_v50 = vrot.slane %v12745_v31, 5  ;;  %v4914_v44 = vshrl.u32 %v12676_v29, 16 }
 0x259   : > { %v2911_v27 = vsel %vm12265_vm4, %v2713_v14, %v2910_v12  ;;  %v2738_v58 = vor.u32 %v2736_v52, %v2735_v60  ;;  %v2740_v32 = vrot.slane %v2735_v60, 4  ;;  %v2718_v17 = vrot.slane %v2716_v43, 7  ;;  %v12759_v60 = vld [vmem:[#allocation3 + $0x30] sm:$0xe] }
 0x25a   : > { %2912 = vst [vmem:[#allocation3 + $0x9c] sm:$0xf] %v2911_v27  ;;  %v5680_v14 = vrot.slane %v5678_v38, 4  ;;  %v4920_v12 = vshll.u32 %v12723_v28, 16  ;;  %v4855_v27 = vld [vmem:[#allocation3 + $0x18] sm:$0xf] }
 0x25b   : > { %v2739_v5 = vsel %vm12279_vm5, %v2731_v40, %v2738_v58  ;;  %v2922_v39 = vsel %vm11820_vm14, %v2740_v32, %v2921_v20  ;;  %v2714_v53 = vrot.slane %v2710_v51, 4  ;;  %v2721_v24 = vor.u32 %v2719_v6, %v2718_v17  ;;  %v12766_v20 = vld [vmem:[#allocation3 + $0x38] sm:$0x1] }
 0x25c   : > { %2920 = vst [vmem:[#allocation3 + $0xac] sm:$0xf] %v2739_v5  ;;  %2923 = vst [vmem:[#allocation3 + $0xb0] sm:$0x1] %v2922_v39  ;;  %v2723_v52 = vrot.slane %v2718_v17, 4  ;;  %v9269_v43 = vrot.slane %v5607_v11, 9  ;;  %v4907_v40 = vor.u32 %v4906_v15, %v4903_v49  ;;  %v12778_v15 = vsel %vm12346_vm8, %v12731_v41, %v5674_v1 }
 0x25d   : > { %v5687_v13 = vrot.slane %v5685_v48, 4  ;;  %v5688_v58 = vrot.slane %v12751_v4, 5  ;;  %v12764_v32 = vrot.slane %v4910_v25, 5  ;;  %v2722_v28 = vsel %vm12279_vm5, %v2714_v53, %v2721_v24  ;;  %15158 = vst [vmem:[#allocation26_spill] sm:$0xff] %v12778_v15 }
 0x25e   : > { %v2915_v51 = vsel %vm11820_vm14, %v2723_v52, %v2914_v56  ;;  %v12772_v5 = vrot.slane %v4914_v44, 4  ;;  %2913 = vst [vmem:[#allocation3 + $0xa0] sm:$0xf] %v2722_v28  ;;  %v12782_v25 = vsel %vm12346_vm8, %v5680_v14, %v5681_v50  ;;  %v12784_v49 = vrot.slane %v4920_v12, 5 }
 0x25f   : > { %2916 = vst [vmem:[#allocation3 + $0xa4] sm:$0x1] %v2915_v51  ;;  %v2966_v17 = vld [vmem:[#allocation3 + $0xa8] sm:$0xf]  ;;  %15159 = vst [vmem:[#allocation27_spill] sm:$0xff] %v12782_v25  ;;  %v4925_v53 = vshrl.u32 %v4855_v27, 16  ;;  %v12798_v1 = vsel %vm12346_vm8, %v9268_v2, %v5678_v38  ;;  %v12812_v2 = vsel %vm12346_vm8, %v9269_v43, %v5685_v48  ;;  %v12816_v38 = vsel %vm12346_vm8, %v5687_v13, %v5688_v58 }
 0x260   : > { %v3342_v44 = vshrl.u32 %v2966_v17, 16  ;;  %v3345_v39 = vshll.u32 %v2966_v17, 16  ;;  %v15160_v52 = vrot.slane %v12676_v29, 5  ;;  %v15161_v28 = vrot.slane %v12711_v55, 9  ;;  %15163 = vst [vmem:[#allocation29_spill] sm:$0xff] %v12798_v1 }
 0x261   : > { %v2964_v24 = vld [vmem:[#allocation3 + $0x9c] sm:$0xf]  ;;  %v12800_v50 = vrot.slane %v4907_v40, 4  ;;  %v4928_v14 = vshll.u32 %v4855_v27, 16 }
 0x262   : > { %v12794_v41 = vsel %vm12346_vm8, %v15161_v28, %v15160_v52  ;;  %v3318_v12 = vshrl.u32 %v2964_v24, 16  ;;  %v3321_v51 = vshll.u32 %v2964_v24, 16  ;;  %v3344_v56 = vrot.slane %v3342_v44, 4  ;;  %v3996_v15 = vld [vmem:[#allocation3 + $0x9c] sm:$0xe] }
 0x263   : > { %15162 = vst [vmem:[#allocation28_spill] sm:$0xff] %v12794_v41  ;;  %v3347_v11 = vrot.slane %v3345_v39, 5  ;;  %v12802_v6 = vld [vmem:[#allocation3 + $0xac] sm:$0xf]  ;;  %v12804_v29 = vld [vmem:[#allocation3 + $0xb0] sm:$0x1] }
 0x264   : > { %v3320_v27 = vrot.slane %v3318_v12, 4  ;;  %v3323_v40 = vrot.slane %v3321_v51, 5  ;;  %v3355_v44 = vshrl.u32 %v12802_v6, 16  ;;  %v3351_v55 = vshll.u32 %v12802_v6, 16 }
 0x265   : > { %v3348_v28 = vor.u32 %v3347_v11, %v3344_v56  ;;  %v12822_v52 = vrot.slane %v4925_v53, 4  ;;  %v12824_v25 = vrot.slane %v4928_v14, 5  ;;  %v2965_v48 = vld [vmem:[#allocation3 + $0xa0] sm:$0xf]  ;;  %v9169_v43 = vcombine.low %v2966_v17, %v12802_v6 }
 0x266   : > { %v2999_v13 = vld [vmem:[#allocation3 + $0xa4] sm:$0x1]  ;;  %v3324_v58 = vor.u32 %v3323_v40, %v3320_v27  ;;  %v3357_v12 = vrot.slane %v3355_v44, 4  ;;  %v3361_v51 = vshll.u32 %v12804_v29, 16  ;;  %v3331_v41 = vshrl.u32 %v2965_v48, 16 }
 0x267   : > { %v9775_v1 = vpop.f32.mrf.mxu0  ;;  %v9168_v62 = vcombine.low %v2964_v24, %v2965_v48  ;;  %v3327_v39 = vshll.u32 %v2965_v48, 16  ;;  %v3337_v11 = vshll.u32 %v2999_v13, 16  ;;  %v3349_v53 = vrot.slane %v3348_v28, 4 }
 0x268   : > { %v2247_v56 = vadd.f32 %v12571_v54, %v9775_v1  ;;  %v3325_v23 = vrot.slane %v3324_v58, 4  ;;  %v3353_v22 = vrot.slane %v3351_v55, 5  ;;  %v3333_v46 = vrot.slane %v3331_v41, 4 }
 0x269   : > { %9866 = vmatmul.mubr.bf16.gmra.mxu0 %v9168_v62  ;;  %v2238_v14 = vpop.f32.mrf.mxu0  ;;  %v3329_v33 = vrot.slane %v3327_v39, 5  ;;  %v3339_v17 = vrot.slane %v3337_v11, 5  ;;  %v9192_v16 = vrot.slane %v3996_v15, 9  ;;  %v3363_v47 = vrot.slane %v3361_v51, 5 }
 0x26a   : > { %v2283_v27 = vmax.f32 %v2247_v56, 0.0  ;;  %v2239_v40 = vadd.f32 %v12571_v54, %v2238_v14  ;;  %9869 = vmatprep.mubr.bf16.mxu0 %v9169_v43  ;;  %v3358_v44 = vor.u32 %v3357_v12, %v3353_v22  ;;  %v3354_v55 = vsel %vm12048_vm12, %v3349_v53, %v3353_v22 }
 0x26b   : > { %v9776_v24 = vpop.f32.mrf.mxu0  ;;  %v3330_v42 = vsel %vm12048_vm12, %v3325_v23, %v3329_v33  ;;  %v3334_v1 = vor.u32 %v3333_v46, %v3329_v33  ;;  %v4127_v62 = vrot.slane %v2965_v48, 5  ;;  %v4130_v51 = vrot.slane %v2999_v13, 5 }
 0x26c   : > { %v9500_v28 = vpack.c.bf16 %v2283_v27, %v2283_v27  ;;  %v2281_v39 = vmax.f32 %v2239_v40, 0.0  ;;  %v2250_v41 = vadd.f32 %v12571_v54, %v9776_v24  ;;  %v3359_v15 = vrot.slane %v3358_v44, 4  ;;  %v3997_v44 = vld [vmem:[#allocation3 + $0xa8] sm:$0xe]  ;;  %v2931_v24 = vld [vmem:[#allocation3 + $0xc0] sm:$0xf] }
 0x26d   : > { %v2241_v58 = vpop.f32.mrf.mxu0  ;;  %v3335_v11 = vrot.slane %v3334_v1, 4  ;;  %v12837_v43 = vsel %vm12346_vm8, %v9192_v16, %v4127_v62  ;;  %v4129_v12 = vrot.slane %v4127_v62, 4  ;;  %v4134_v33 = vrot.slane %v12802_v6, 5 }
 0x26e   : > { %v2759_v56 = vshrl.u32 %v9500_v28, 16  ;;  %v9498_v23 = vpack.c.bf16 %v2281_v39, %v2281_v39  ;;  %v2284_v46 = vmax.f32 %v2250_v41, 0.0  ;;  %v2242_v22 = vadd.f32 %v12571_v54, %v2241_v58  ;;  %v2924_v58 = vld [vmem:[#allocation3 + $0xb4] sm:$0xf] }
 0x26f   : > { %v3340_v48 = vsel %vm12048_vm12, %v3335_v11, %v3339_v17  ;;  %v3364_v53 = vsel %vm12048_vm12, %v3359_v15, %v3363_v47  ;;  %v12847_v14 = vsel %vm12346_vm8, %v4129_v12, %v4130_v51  ;;  %v2762_v27 = vshll.u32 %v9500_v28, 16  ;;  %v9843_v47 = vpop.f32.mrf.mxu0 }
 0x270   : > { %v2761_v16 = vrot.slane %v2759_v56, 7  ;;  %v2742_v13 = vshrl.u32 %v9498_v23, 16  ;;  %v9501_v40 = vpack.c.bf16 %v2284_v46, %v2284_v46  ;;  %v2745_v1 = vshll.u32 %v9498_v23, 16 }
 0x271   : > { %v2282_v6 = vmax.f32 %v2242_v22, 0.0  ;;  %v9144_v62 = vcombine.low %v3330_v42, %v3340_v48  ;;  %v9145_v15 = vcombine.low %v3354_v55, %v3364_v53  ;;  %v9193_v12 = vrot.slane %v3997_v44, 9  ;;  %v2935_v48 = vld [vmem:[#allocation3 + $0xc8] sm:$0x1]  ;;  %v3856_v54 = vpop.f32.mrf.mxu0 }
 0x272   : > { %v2764_v17 = vor.u32 %v2762_v27, %v2761_v16  ;;  %v2744_v39 = vrot.slane %v2742_v13, 7  ;;  %v2767_v41 = vshrl.u32 %v9501_v40, 16  ;;  %v4136_v28 = vrot.slane %v4134_v33, 4 }
 0x273   : > { %v9499_v11 = vpack.c.bf16 %v2282_v6, %v2282_v6  ;;  %9818 = vmatmul.mubr.bf16.gmra.mxu1 %v9144_v62  ;;  %v4934_v51 = vshll.u32 %v12735_v57, 16  ;;  %v2770_v46 = vshll.u32 %v9501_v40, 16  ;;  %v2765_v22 = vrot.slane %v2761_v16, 4 }
 0x274   : > { %v2932_v56 = vsel %vm12265_vm4, %v2764_v17, %v2931_v24  ;;  %v2747_v23 = vor.u32 %v2745_v1, %v2744_v39  ;;  %v2769_v42 = vrot.slane %v2767_v41, 7  ;;  %9821 = vmatprep.mubr.bf16.mxu1 %v9145_v15  ;;  %v4137_v55 = vrot.slane %v12804_v29, 5  ;;  %v2928_v17 = vld [vmem:[#allocation3 + $0xbc] sm:$0x1] }
 0x275   : > { %2933 = vst [vmem:[#allocation3 + $0xc0] sm:$0xf] %v2932_v56  ;;  %v2750_v27 = vshrl.u32 %v9499_v11, 16  ;;  %v4938_v53 = vshrl.u32 %v12735_v57, 16  ;;  %v12860_v24 = vsel %vm12346_vm8, %v9193_v12, %v4134_v33  ;;  %v2753_v40 = vshll.u32 %v9499_v11, 16 }
 0x276   : > { %v2925_v13 = vsel %vm12265_vm4, %v2747_v23, %v2924_v58  ;;  %v2772_v44 = vor.u32 %v2770_v46, %v2769_v42  ;;  %v2774_v6 = vrot.slane %v2769_v42, 4  ;;  %v9795_v62 = vpop.f32.mrf.mxu1  ;;  %v12866_v29 = vsel %vm12346_vm8, %v4136_v28, %v4137_v55  ;;  %v4858_v23 = vld [vmem:[#allocation3 + $0x24] sm:$0xf]  ;;  %v9844_v42 = vpop.f32.mrf.mxu0 }
 0x277   : > { %2926 = vst [vmem:[#allocation3 + $0xb4] sm:$0xf] %v2925_v13  ;;  %v2752_v16 = vrot.slane %v2750_v27, 7  ;;  %v12862_v1 = vadd.f32 %v9843_v47, %v9795_v62  ;;  %v15165_v15 = vrot.slane %v12761_v34, 5  ;;  %v12876_v47 = vld [vmem:[#allocation3 + $0x40] sm:$0xf]  ;;  %v4931_v27 = vor.u32 %v12824_v25, %v12822_v52 }
 0x278   : > { %v2773_v45 = vsel %vm12279_vm5, %v2765_v22, %v2772_v44  ;;  %v2936_v57 = vsel %vm11820_vm14, %v2774_v6, %v2935_v48  ;;  %v3551_v41 = vpop.f32.mrf.mxu1  ;;  %v2748_v11 = vrot.slane %v2744_v39, 4  ;;  %v15167_v22 = vor.u32 %v12772_v5, %v12764_v32  ;;  %v12893_v6 = vld [vmem:[#allocation3 + $0x44] sm:$0x1]  ;;  %v12932_v5 = vld [vmem:[#allocation3 + $0x4c] sm:$0xf] }
 0x279   : > { %15164 = vst [vmem:[#allocation30_spill] sm:$0xff] %v12862_v1  ;;  %v5694_v58 = vrot.slane %v15165_v15, 4  ;;  %2934 = vst [vmem:[#allocation3 + $0xc4] sm:$0xf] %v2773_v45  ;;  %v2755_v12 = vor.u32 %v2753_v40, %v2752_v16  ;;  %v2757_v28 = vrot.slane %v2752_v16, 4  ;;  %v12878_v56 = vadd.f32 %v3856_v54, %v3551_v41 }
 0x27a   : > { %2937 = vst [vmem:[#allocation3 + $0xc8] sm:$0x1] %v2936_v57  ;;  %v9796_v46 = vpop.f32.mrf.mxu1  ;;  %v4918_v48 = vrot.slane %v15167_v22, 4  ;;  %v12885_v55 = vrot.slane %v4934_v51, 5  ;;  %v4940_v13 = vrot.slane %v4938_v53, 4  ;;  %v5699_v62 = vrot.slane %v12876_v47, 5 }
 0x27b   : > { %15166 = vst [vmem:[#allocation31_spill] sm:$0xff] %v12878_v56  ;;  %v2756_v39 = vsel %vm12279_vm5, %v2748_v11, %v2755_v12  ;;  %v2929_v54 = vsel %vm11820_vm14, %v2757_v28, %v2928_v17  ;;  %v12891_v44 = vadd.f32 %v9844_v42, %v9796_v46  ;;  %v15169_v25 = vmov %v15165_v15  ;;  %v5609_v51 = vld [vmem:[#allocation3 + $0x3c] sm:$0xe]  ;;  %v3983_v40 = vld [vmem:[#allocation3] sm:$0xe] }
 0x27c   : > { %2927 = vst [vmem:[#allocation3 + $0xb8] sm:$0xf] %v2756_v39  ;;  %2930 = vst [vmem:[#allocation3 + $0xbc] sm:$0x1] %v2929_v54  ;;  %v15170_v52 = vrot.slane %v12759_v60, 9  ;;  %v4949_v53 = vshrl.u32 %v4858_v23, 16  ;;  %v4913_v17 = vsel %vm12048_vm12, %v12800_v50, %v12764_v32  ;;  %v4923_v12 = vsel %vm12048_vm12, %v4918_v48, %v12784_v49 }
 0x27d   : > { %15168 = vst [vmem:[#allocation32_spill] sm:$0xff] %v12891_v44  ;;  %v4952_v16 = vshll.u32 %v4858_v23, 16  ;;  %v11055_v45 = vld [vmem:[#allocation3 + $0x4] sm:$0xf]  ;;  %v15171_v41 = vrot.slane %v12766_v20, 5  ;;  %v4944_v15 = vshll.u32 %v12745_v31, 16  ;;  %v4941_v28 = vor.u32 %v4940_v13, %v12885_v55 }
 0x27e   : > { %v12904_v8 = vsel %vm12346_vm8, %v15170_v52, %v15169_v25  ;;  %v4036_v57 = vrot.slane %v11055_v45, 5  ;;  %v2968_v11 = vld [vmem:[#allocation3 + $0xb4] sm:$0xf]  ;;  %v4958_v23 = vshll.u32 %v12738_v10, 16  ;;  %v4962_v42 = vshrl.u32 %v12738_v10, 16  ;;  %v10971_v44 = vld [vmem:[#allocation3 + $0xc] sm:$0xff]  }
 0x27f   : > { %v12914_v60 = vsel %vm12346_vm8, %v5694_v58, %v15171_v41  ;;  %v3366_v32 = vshrl.u32 %v2968_v11, 16  ;;  %v3369_v50 = vshll.u32 %v2968_v11, 16  ;;  %v12923_v46 = vrot.slane %v4931_v27, 4 }
 0x280   : > { %15172 = vst [vmem:[#allocation33_spill] sm:$0xff] %v12914_v60  ;;  %v5701_v22 = vrot.slane %v5699_v62, 4  ;;  %v9271_v58 = vrot.slane %v5609_v51, 9  ;;  %v5702_v39 = vrot.slane %v12893_v6, 5  ;;  %v4951_v31 = vrot.slane %v4949_v53, 4  ;;  %v11042_v61 = vld [vmem:[#allocation3 + $0xc0] sm:$0xff]  }
 0x281   : > { %v4954_v54 = vrot.slane %v4952_v16, 5  ;;  %v3368_v25 = vrot.slane %v3366_v32, 4  ;;  %v3371_v52 = vrot.slane %v3369_v50, 5  ;;  %v9179_v45 = vrot.slane %v3983_v40, 9  ;;  %v3998_v32 = vld [vmem:[#allocation3 + $0xb4] sm:$0xe] }
 0x282   : > { %v4038_v49 = vrot.slane %v4036_v57, 4  ;;  %v12926_v48 = vrot.slane %v4941_v28, 4  ;;  %v12928_v13 = vrot.slane %v4944_v15, 5  ;;  %v12930_v41 = vrot.slane %v4958_v23, 5  ;;  %v4861_v50 = vld [vmem:[#allocation3 + $0x30] sm:$0xf] }
 0x283   : > { %v4964_v10 = vrot.slane %v4962_v42, 4  ;;  %v2969_v27 = vld [vmem:[#allocation3 + $0xb8] sm:$0xf]  ;;  %v3001_v33 = vld [vmem:[#allocation3 + $0xbc] sm:$0x1]  ;;  %v12934_v51 = vcombine.low %v4913_v17, %v4923_v12  ;;  %v12940_v16 = vsel %vm12346_vm8, %v9271_v58, %v5699_v62  ;;  %v12944_v40 = vsel %vm12346_vm8, %v5701_v22, %v5702_v39 }
 0x284   : > { %v3379_v15 = vshrl.u32 %v2969_v27, 16  ;;  %v9170_v28 = vcombine.low %v2968_v11, %v2969_v27  ;;  %v3372_v23 = vor.u32 %v3371_v52, %v3368_v25  ;;  %v3375_v42 = vshll.u32 %v2969_v27, 16 }
 0x285   : > { %v4037_v17 = vsel %vm12346_vm8, %v9179_v45, %v4036_v57  ;;  %v15173_v12 = vrot.slane %v12682_v3, 5  ;;  %v4141_v58 = vrot.slane %v2969_v27, 5  ;;  %v4955_v53 = vor.u32 %v4954_v54, %v4951_v31 }
 0x286   : > { %9870 = vmatmul.mubr.bf16.gmra.mxu0 %v9170_v28  ;;  %v3377_v22 = vrot.slane %v3375_v42, 5  ;;  %v3381_v39 = vrot.slane %v3379_v15, 4  ;;  %v3385_v56 = vshll.u32 %v3001_v33, 16  ;;  %v5706_v11 = vrot.slane %v12932_v5, 5 }
 0x287   : > { %v4040_v62 = vsel %vm12346_vm8, %v4038_v49, %v15173_v12  ;;  %9937 = vmatprep.mubr.bf16.mxu0 %v10971_v44  ;;  %v9194_v25 = vrot.slane %v3998_v32, 9  ;;  %v4143_v52 = vrot.slane %v4141_v58, 4  ;;  %v4144_v1 = vrot.slane %v3001_v33, 5  ;;  %v4864_v32 = vld [vmem:[#allocation3 + $0x3c] sm:$0xf] }
 0x288   : > { %v4973_v19 = vshrl.u32 %v4861_v50, 16  ;;  %v3373_v60 = vrot.slane %v3372_v23, 4  ;;  %v3382_v57 = vor.u32 %v3381_v39, %v3377_v22  ;;  %v4965_v3 = vor.u32 %v4964_v10, %v12930_v41  ;;  %v5610_v39 = vld [vmem:[#allocation3 + $0x48] sm:$0xe] }
 0x289   : > { %v4976_v45 = vshll.u32 %v4861_v50, 16  ;;  %v12956_v49 = vsel %vm12346_vm8, %v9194_v25, %v4141_v58  ;;  %v12960_v31 = vsel %vm12346_vm8, %v4143_v52, %v4144_v1  ;;  %v4982_v54 = vshll.u32 %v12761_v34, 16  ;;  %v10975_v58 = vld [vmem:[#allocation3 + $0x24] sm:$0xff]  }
 0x28a   : > { %v4986_v44 = vshrl.u32 %v12761_v34, 16  ;;  %v3383_v27 = vrot.slane %v3382_v57, 4  ;;  %v3387_v33 = vrot.slane %v3385_v56, 5  ;;  %v4947_v10 = vsel %vm12048_vm12, %v12926_v48, %v12928_v13  ;;  %v12975_v34 = vpop.f32.mrf.mxu0  ;;  %v10974_v56 = vld [vmem:[#allocation3 + $0x18] sm:$0xff]   ;;  %v12981_v48 = vld [vmem:[#allocation3 + $0x50] sm:$0x1] }
 0x28b   : > { %v9195_v28 = vcombine.low %v4037_v17, %v4040_v62  ;;  %v12970_v23 = vrot.slane %v4955_v53, 4  ;;  %v4968_v1 = vshll.u32 %v12751_v4, 16  ;;  %v5708_v42 = vrot.slane %v5706_v11, 4  ;;  %15174 = vst [vmem:[#allocation34_spill] sm:$0xff] %v12975_v34  ;;  %v10989_v4 = vld [vmem:[%s15074_s3 + $0x170] sm:$0xff]  }
 0x28c   : > { %v3378_v50 = vsel %vm12048_vm12, %v3373_v60, %v3377_v22  ;;  %v3388_v12 = vsel %vm12048_vm12, %v3383_v27, %v3387_v33  ;;  %v4975_v13 = vrot.slane %v4973_v19, 4  ;;  %v4978_v53 = vrot.slane %v4976_v45, 5  ;;  %v9847_v57 = vpop.f32.mrf.mxu0 }
 0x28d   : > { %v9146_v17 = vcombine.low %v3378_v50, %v3388_v12  ;;  %v4966_v62 = vrot.slane %v4965_v3, 4  ;;  %v12986_v25 = vrot.slane %v4982_v54, 5  ;;  %v4988_v52 = vrot.slane %v4986_v44, 4  ;;  %v12997_v44 = vpop.f32.mrf.mxu1 }
 0x28e   : > { %9938 = vmatmul.mubr.bf16.vlgmr.msra.gmra.mxu0 %v10974_v56  ;;  %v4997_v60 = vshrl.u32 %v4864_v32, 16  ;;  %v5000_v22 = vshll.u32 %v4864_v32, 16  ;;  %v5006_v27 = vshll.u32 %v12876_v47, 16  ;;  %v5010_v33 = vshrl.u32 %v12876_v47, 16  ;;  %15175 = vst [vmem:[#allocation35_spill] sm:$0xff] %v12997_v44 }
 0x28f   : > { %9822 = vmatmul.mubr.bf16.gmra.mxu1 %v9146_v17  ;;  %9941 = vmatprep.mubr.bf16.mxu0 %v10975_v58  ;;  %v4937_v19 = vsel %vm12048_vm12, %v12923_v46, %v12885_v55  ;;  %v4970_v45 = vrot.slane %v4968_v1, 5  ;;  %v5709_v54 = vrot.slane %v12981_v48, 5  ;;  %v4961_v47 = vsel %vm12048_vm12, %v12970_v23, %v12930_v41  ;;  %v4867_v46 = vld [vmem:[#allocation3 + $0x48] sm:$0xf]  ;;  %v10992_v1 = vld [vmem:[%s15074_s3 + $0x168] sm:$0xff]   ;;  %v3872_v41 = vpop.f32.mrf.mxu0 }
 0x290   : > { %9889 = vmatprep.mubr.bf16.mxu1 %v9195_v28  ;;  %10018 = vmatpush3.bf16.msra.mxu0 %v12637_v59  ;;  %v13000_v32 = vcombine.low %v4937_v19, %v4947_v10  ;;  %v9272_v56 = vrot.slane %v5610_v39, 9  ;;  %v4979_v55 = vor.u32 %v4978_v53, %v4975_v13  ;;  %v4989_v10 = vor.u32 %v4988_v52, %v12986_v25  ;;  %v5611_v39 = vld [vmem:[#allocation3 + $0x54] sm:$0xe] }
 0x291   : > { %10019 = vmatprep.subr.bf16.mxu0 %v10989_v4  ;;  %v4971_v28 = vsel %vm12048_vm12, %v4966_v62, %v4970_v45  ;;  %v13013_v59 = vsel %vm12346_vm8, %v5708_v42, %v5709_v54  ;;  %v4992_v50 = vshll.u32 %v12766_v20, 16  ;;  %v4999_v12 = vrot.slane %v4997_v60, 4  ;;  %v13027_v42 = vld [vmem:[#allocation3 + $0x58] sm:$0xf]  ;;  %v10976_v45 = vld [vmem:[#allocation3 + $0x30] sm:$0xff]   ;;  %v10978_v54 = vld [vmem:[#allocation3 + $0x3c] sm:$0xff]   ;;  %v9848_v60 = vpop.f32.mrf.mxu0 }
 0x292   : > { %v9799_v23 = vpop.f32.mrf.mxu1  ;;  %v5002_v58 = vrot.slane %v5000_v22, 5  ;;  %v13017_v13 = vrot.slane %v5006_v27, 5  ;;  %v5012_v53 = vrot.slane %v5010_v33, 4  ;;  %v13025_v62 = vsel %vm12346_vm8, %v9272_v56, %v5706_v11  ;;  %v10980_v56 = vld [vmem:[%s15074_s3 + $0x130] sm:$0xff]  }
 0x293   : > { %v13019_v17 = vadd.f32 %v9847_v57, %v9799_v23  ;;  %v5021_v52 = vshrl.u32 %v4867_v46, 16  ;;  %v5024_v20 = vshll.u32 %v4867_v46, 16  ;;  %v13031_v22 = vrot.slane %v4979_v55, 4  ;;  %v13033_v57 = vld [vmem:[#allocation3 + $0x64] sm:$0xf] }
 0x294   : > { %v3567_v19 = vpop.f32.mrf.mxu1  ;;  %10020 = vmatpush3.bf16.msra.mxu0 %v10989_v4  ;;  %v5030_v27 = vshll.u32 %v12932_v5, 16  ;;  %v5034_v11 = vshrl.u32 %v12932_v5, 16  ;;  %v13042_v4 = vcombine.low %v4961_v47, %v4971_v28  ;;  %v13044_v46 = vrot.slane %v4989_v10, 4  ;;  %v13048_v23 = vld [vmem:[#allocation3 + $0x5c] sm:$0x1]  ;;  %v10994_v5 = vld [vmem:[%s15074_s3 + $0x160] sm:$0xff]  }
 0x295   : > { %15176 = vst [vmem:[#allocation36_spill] sm:$0xff] %v13019_v17  ;;  %v13037_v33 = vadd.f32 %v3872_v41, %v3567_v19  ;;  %10021 = vmatprep.subr.bf16.mxu0 %v10992_v1  ;;  %v13046_v55 = vrot.slane %v4992_v50, 5  ;;  %v5713_v41 = vrot.slane %v13027_v42, 5  ;;  %v5003_v19 = vor.u32 %v5002_v58, %v4999_v12  ;;  %v4870_v28 = vld [vmem:[#allocation3 + $0x54] sm:$0xf]  ;;  %v11056_v12 = vld [vmem:[%s15074_s3 + $0x138] sm:$0xff]  }
 0x296   : > { %v9800_v3 = vpop.f32.mrf.mxu1  ;;  %9942 = vmatmul.mubr.bf16.gmra.mxu0 %v10976_v45  ;;  %v5013_v15 = vor.u32 %v5012_v53, %v13017_v13  ;;  %v5016_v47 = vshll.u32 %v12893_v6, 16  ;;  %v15179_v50 = vcombine.low %v12354_v7, %v12358_v0  ;;  %v5612_v45 = vld [vmem:[#allocation3 + $0x60] sm:$0xe]  ;;  %v5023_v17 = vrot.slane %v5021_v52, 4  ;;  %v10983_v52 = vld [vmem:[%s15074_s3 + $0x128] sm:$0xff]  }
 0x297   : > { %15177 = vst [vmem:[#allocation37_spill] sm:$0xff] %v13037_v33  ;;  %v13056_v10 = vadd.f32 %v9848_v60, %v9800_v3  ;;  %9945 = vmatprep.mubr.bf16.mxu0 %v10978_v54  ;;  %v5720_v33 = vrot.slane %v13033_v57, 5  ;;  %v5026_v34 = vrot.slane %v5024_v20, 5  ;;  %v15180_v6 = vcombine.low %v12368_v37, %v12372_v30  ;;  %v13072_v3 = vld [vmem:[#allocation3 + $0x68] sm:$0x1] }
 0x298   : > { %9890 = vmatmul.mubr.bf16.vlgmr.msra.gmra.mxu1 %v15179_v50  ;;  %v4985_v7 = vsel %vm12048_vm12, %v13031_v22, %v12986_v25  ;;  %v9273_v0 = vrot.slane %v5611_v39, 9  ;;  %v13074_v58 = vrot.slane %v5030_v27, 5  ;;  %v5036_v53 = vrot.slane %v5034_v11, 4  ;;  %10022 = vmatpush3.bf16.msra.mxu0 %v10992_v1  ;;  %v13084_v25 = vld [vmem:[#allocation3 + $0x70] sm:$0xf]  ;;  %v10997_v60 = vld [vmem:[%s15074_s3 + $0x158] sm:$0xff]  }
 0x299   : > { %15178 = vst [vmem:[#allocation38_spill] sm:$0xff] %v13056_v10  ;;  %9970 = vmatpush3.bf16.msra.mxu1 %v11056_v12  ;;  %9893 = vmatprep.mubr.bf16.mxu1 %v15180_v6  ;;  %v4995_v37 = vsel %vm12048_vm12, %v13044_v46, %v13046_v55  ;;  %v5716_v30 = vrot.slane %v13048_v23, 5  ;;  %v5045_v39 = vshrl.u32 %v4870_v28, 16  ;;  %v5048_v20 = vshll.u32 %v4870_v28, 16  ;;  %v10979_v12 = vld [vmem:[#allocation3 + $0x48] sm:$0xff]   ;;  %v10981_v6 = vld [vmem:[#allocation3 + $0x54] sm:$0xff]  }
 0x29a   : > { %9971 = vmatprep.subr.bf16.mxu1 %v10980_v56  ;;  %10023 = vmatprep.subr.bf16.mxu0 %v10994_v5  ;;  %v13091_v22 = vsel %vm12346_vm8, %v9273_v0, %v5713_v41  ;;  %v5715_v1 = vrot.slane %v5713_v41, 4  ;;  %v5004_v27 = vrot.slane %v5003_v19, 4  ;;  %v5014_v11 = vrot.slane %v5013_v15, 4  ;;  %v10986_v28 = vld [vmem:[%s15074_s3 + $0x120] sm:$0xff]   ;;  %v5613_v15 = vld [vmem:[#allocation3 + $0x6c] sm:$0xe] }
 0x29b   : > { %v5018_v54 = vrot.slane %v5016_v47, 5  ;;  %v9274_v46 = vrot.slane %v5612_v45, 9  ;;  %v5722_v55 = vrot.slane %v5720_v33, 4  ;;  %v5027_v50 = vor.u32 %v5026_v34, %v5023_v17  ;;  %v10999_v47 = vld [vmem:[%s15074_s3 + $0x150] sm:$0xff]  }
 0x29c   : > { %v5723_v10 = vrot.slane %v13072_v3, 5  ;;  %v5037_v44 = vor.u32 %v5036_v53, %v13074_v58  ;;  %v5040_v0 = vshll.u32 %v12981_v48, 16  ;;  %v5727_v41 = vrot.slane %v13084_v25, 5  ;;  %10024 = vmatpush3.bf16.msra.mxu0 %v10994_v5  ;;  %v4873_v53 = vld [vmem:[#allocation3 + $0x60] sm:$0xf] }
 0x29d   : > { %9972 = vmatpush3.bf16.msra.mxu1 %v10980_v56  ;;  %v5047_v19 = vrot.slane %v5045_v39, 4  ;;  %v5050_v34 = vrot.slane %v5048_v20, 5  ;;  %v5054_v17 = vshll.u32 %v13027_v42, 16  ;;  %v5058_v56 = vshrl.u32 %v13027_v42, 16  ;;  %10025 = vmatprep.subr.bf16.mxu0 %v10997_v60  ;;  %v13127_v20 = vld [vmem:[#allocation3 + $0x74] sm:$0x1] }
 0x29e   : > { %9973 = vmatprep.subr.bf16.mxu1 %v10983_v52  ;;  %9946 = vmatmul.mubr.bf16.gmra.mxu0 %v10979_v12  ;;  %v13105_v45 = vcombine.low %v4985_v7, %v4995_v37  ;;  %v13109_v48 = vsel %vm12346_vm8, %v5715_v1, %v5716_v30  ;;  %v5009_v5 = vsel %vm12048_vm12, %v5004_v27, %v13017_v13  ;;  %v5028_v30 = vrot.slane %v5027_v50, 4 }
 0x29f   : > { %v15181_v42 = vcombine.low %v12405_v18, %v12413_v21  ;;  %9949 = vmatprep.mubr.bf16.mxu0 %v10981_v6  ;;  %v5019_v39 = vsel %vm12048_vm12, %v5014_v11, %v5018_v54  ;;  %v13121_v7 = vsel %vm12346_vm8, %v9274_v46, %v5720_v33  ;;  %v13125_v37 = vsel %vm12346_vm8, %v5722_v55, %v5723_v10  ;;  %v10991_v33 = vld [vmem:[%s15074_s3 + $0x118] sm:$0xff]   ;;  %v13137_v46 = vld [vmem:[#allocation3 + $0x7c] sm:$0xf] }
 0x2a0   : > { %15182 = vst [vmem:[#allocation39_spill] sm:$0xff] %v13121_v7  ;;  %15183 = vst [vmem:[#allocation40_spill] sm:$0xff] %v13125_v37  ;;  %v15184_v13 = vcombine.low %v12422_v35, %v12426_v26  ;;  %v5038_v18 = vrot.slane %v5037_v44, 4  ;;  %v5042_v21 = vrot.slane %v5040_v0, 5  ;;  %v9275_v1 = vrot.slane %v5613_v15, 9  ;;  %10026 = vmatpush3.bf16.msra.mxu0 %v10997_v60  ;;  %v11002_v35 = vld [vmem:[%s15074_s3 + $0x148] sm:$0xff]  }
 0x2a1   : > { %9894 = vmatmul.mubr.bf16.gmra.mxu1 %v15181_v42  ;;  %v5729_v27 = vrot.slane %v5727_v41, 4  ;;  %v5051_v10 = vor.u32 %v5050_v34, %v5047_v19  ;;  %v13135_v11 = vrot.slane %v5054_v17, 5  ;;  %v5060_v54 = vrot.slane %v5058_v56, 4  ;;  %10027 = vmatprep.subr.bf16.mxu0 %v10999_v47  ;;  %v10982_v60 = vld [vmem:[#allocation3 + $0x60] sm:$0xff]   ;;  %v13154_v19 = vld [vmem:[#allocation3 + $0x88] sm:$0xf] }
 0x2a2   : > { %9897 = vmatprep.mubr.bf16.mxu1 %v15184_v13  ;;  %9974 = vmatpush3.bf16.msra.mxu1 %v10983_v52  ;;  %v5069_v55 = vshrl.u32 %v4873_v53, 16  ;;  %v5730_v26 = vrot.slane %v13127_v20, 5  ;;  %v5072_v44 = vshll.u32 %v4873_v53, 16  ;;  %v5078_v52 = vshll.u32 %v13033_v57, 16  ;;  %v10984_v34 = vld [vmem:[#allocation3 + $0x6c] sm:$0xff]  }
 0x2a3   : > { %9975 = vmatprep.subr.bf16.mxu1 %v10986_v28  ;;  %v5082_v50 = vshrl.u32 %v13033_v57, 16  ;;  %v13147_v6 = vcombine.low %v5009_v5, %v5019_v39  ;;  %v5033_v15 = vsel %vm12048_vm12, %v5028_v30, %v13074_v58  ;;  %v5043_v57 = vsel %vm12048_vm12, %v5038_v18, %v5042_v21  ;;  %v13167_v53 = vld [vmem:[#allocation3 + $0x78] sm:$0xe]  ;;  %v4876_v58 = vld [vmem:[#allocation3 + $0x6c] sm:$0xf]  ;;  %v15200_v7 = vld [vmem:[#allocation17_spill] sm:$0xff] }
 0x2a4   : > { %v13160_v17 = vsel %vm12346_vm8, %v9275_v1, %v5727_v41  ;;  %v13164_v56 = vsel %vm12346_vm8, %v5729_v27, %v5730_v26  ;;  %v5064_v5 = vshll.u32 %v13048_v23, 16  ;;  %10028 = vmatpush3.bf16.msra.mxu0 %v10999_v47  ;;  %v13172_v42 = vrot.slane %v5051_v10, 4  ;;  %v13175_v39 = vld [vmem:[#allocation3 + $0x80] sm:$0x1]  ;;  %v11003_v23 = vld [vmem:[%s15074_s3 + $0x140] sm:$0xff]   ;;  %v15189_v0 = vld [vmem:[#allocation12_spill] sm:$0xff] }
 0x2a5   : > { %15185 = vst [vmem:[#allocation41_spill] sm:$0xff] %v13147_v6  ;;  %15186 = vst [vmem:[#allocation42_spill] sm:$0xff] %v13160_v17  ;;  %v5061_v41 = vor.u32 %v5060_v54, %v13135_v11  ;;  %v5734_v30 = vrot.slane %v13137_v46, 5  ;;  %v5071_v13 = vrot.slane %v5069_v55, 4  ;;  %10029 = vmatprep.subr.bf16.mxu0 %v11002_v35  ;;  %v5074_v18 = vrot.slane %v5072_v44, 5  ;;  %v15190_v44 = vld [vmem:[#allocation13_spill] sm:$0xff] }
 0x2a6   : > { %9976 = vmatpush3.bf16.msra.mxu1 %v10986_v28  ;;  %15187 = vst [vmem:[#allocation43_spill] sm:$0xff] %v13164_v56  ;;  %v10996_v28 = vld [vmem:[%s15074_s3 + $0x110] sm:$0xff]   ;;  %9950 = vmatmul.mubr.bf16.gmra.mxu0 %v10982_v60  ;;  %v13181_v21 = vrot.slane %v5078_v52, 5  ;;  %v5084_v1 = vrot.slane %v5082_v50, 4  ;;  %v15103_v47 = vrot.slane %v13154_v19, 5  ;;  %v15188_v27 = vcombine.low %v12477_v36, %v12483_v9  ;;  %v13218_v56 = vpop.f32.mrf.mxu0 }
 0x2a7   : > { %9977 = vmatprep.subr.bf16.mxu1 %v10991_v33  ;;  %9953 = vmatprep.mubr.bf16.mxu0 %v10984_v34  ;;  %v13187_v10 = vld [vmem:[#allocation3 + $0x8c] sm:$0x1]  ;;  %v5093_v54 = vshrl.u32 %v4876_v58, 16  ;;  %v5096_v55 = vshll.u32 %v4876_v58, 16  ;;  %v5102_v26 = vshll.u32 %v13084_v25, 16  ;;  %v5106_v60 = vshrl.u32 %v13084_v25, 16 }
 0x2a8   : > { %v15191_v52 = vcombine.low %v15189_v0, %v15190_v44  ;;  %v13194_v50 = vcombine.low %v5033_v15, %v5043_v57  ;;  %v9276_v9 = vrot.slane %v13167_v53, 9  ;;  %v5737_v34 = vrot.slane %v13175_v39, 5  ;;  %v11001_v58 = vld [vmem:[%s15074_s3 + $0x108] sm:$0xff]   ;;  %10030 = vmatpush3.bf16.msra.mxu0 %v11002_v35  ;;  %v13210_v53 = vld [vmem:[%s15074_s3 + $0x1f8] sm:$0xff]   ;;  %15193 = vst [vmem:[#allocation13_spill] sm:$0xff] %v13218_v56 }
 0x2a9   : > { %9898 = vmatmul.mubr.bf16.gmra.mxu1 %v15188_v27  ;;  %v5057_v25 = vsel %vm12048_vm12, %v13172_v42, %v13135_v11  ;;  %v5066_v0 = vrot.slane %v5064_v5, 5  ;;  %v5736_v15 = vrot.slane %v5734_v30, 4  ;;  %v4879_v57 = vld [vmem:[#allocation3 + $0x78] sm:$0xf]  ;;  %10031 = vmatprep.subr.bf16.mxu0 %v11003_v23  ;;  %v5075_v44 = vor.u32 %v5074_v18, %v5071_v13  ;;  %v5615_v11 = vld [vmem:[#allocation3 + $0x84] sm:$0xe] }
 0x2aa   : > { %9901 = vmatprep.mubr.bf16.mxu1 %v15191_v52  ;;  %9978 = vmatpush3.bf16.msra.mxu1 %v10991_v33  ;;  %15192 = vst [vmem:[#allocation12_spill] sm:$0xff] %v13194_v50  ;;  %v5062_v33 = vrot.slane %v5061_v41, 4  ;;  %v10985_v27 = vld [vmem:[#allocation3 + $0x78] sm:$0xff]   ;;  %v5085_v52 = vor.u32 %v5084_v1, %v13181_v21  ;;  %v5743_v35 = vrot.slane %v15103_v47, 4  ;;  %v5744_v36 = vrot.slane %v13187_v10, 5  ;;  %v10988_v47 = vld [vmem:[#allocation3 + $0x84] sm:$0xff]  }
 0x2ab   : > { %9979 = vmatprep.subr.bf16.mxu1 %v10996_v28  ;;  %v5095_v42 = vrot.slane %v5093_v54, 4  ;;  %v5098_v5 = vrot.slane %v5096_v55, 5  ;;  %v13216_v41 = vrot.slane %v5102_v26, 5  ;;  %v5108_v12 = vrot.slane %v5106_v60, 4  ;;  %v13220_v17 = vld [vmem:[#allocation3 + $0x94] sm:$0xf]  ;;  %v9851_v60 = vpop.f32.mrf.mxu0 }
 0x2ac   : > { %v5117_v50 = vshrl.u32 %v4879_v57, 16  ;;  %v5120_v13 = vshll.u32 %v4879_v57, 16  ;;  %v5126_v18 = vshll.u32 %v13137_v46, 16  ;;  %v5130_v1 = vshrl.u32 %v13137_v46, 16  ;;  %10032 = vmatpush3.bf16.msra.mxu0 %v11003_v23  ;;  %v11004_v54 = vld [vmem:[%s15074_s3 + $0x100] sm:$0xff]  }
 0x2ad   : > { %v5067_v55 = vsel %vm12048_vm12, %v5062_v33, %v5066_v0  ;;  %v13235_v26 = vsel %vm12346_vm8, %v5736_v15, %v5737_v34  ;;  %v5088_v46 = vshll.u32 %v13072_v3, 16  ;;  %10113 = vmatprep.subr.bf16.mxu0 %v13210_v53  ;;  %v5076_v23 = vrot.slane %v5075_v44, 4  ;;  %v13249_v44 = vpop.f32.mrf.mxu1 }
 0x2ae   : > { %9980 = vmatpush3.bf16.msra.mxu1 %v10996_v28  ;;  %v13231_v28 = vsel %vm12346_vm8, %v9276_v9, %v5734_v30  ;;  %9954 = vmatmul.mubr.bf16.gmra.mxu0 %v10985_v27  ;;  %v9277_v57 = vrot.slane %v5615_v11, 9  ;;  %v13241_v56 = vsel %vm12346_vm8, %v5743_v35, %v5744_v36  ;;  %v5112_v33 = vshll.u32 %v13127_v20, 16  ;;  %v15195_v30 = vld [vmem:[#allocation14_spill] sm:$0xff]  ;;  %v15196_v9 = vld [vmem:[#allocation15_spill] sm:$0xff]  ;;  %v5616_v27 = vld [vmem:[#allocation3 + $0x90] sm:$0xe] }
 0x2af   : > { %9981 = vmatprep.subr.bf16.mxu1 %v11001_v58  ;;  %15194 = vst [vmem:[#allocation44_spill] sm:$0xff] %v13241_v56  ;;  %v15197_v0 = vcombine.low %v15195_v30, %v15196_v9  ;;  %9957 = vmatprep.mubr.bf16.mxu0 %v10988_v47  ;;  %v5086_v34 = vrot.slane %v5085_v52, 4  ;;  %v5099_v15 = vor.u32 %v5098_v5, %v5095_v42  ;;  %v5748_v37 = vrot.slane %v13220_v17, 5  ;;  %v15199_v11 = vld [vmem:[#allocation16_spill] sm:$0xff]  ;;  %v13256_v47 = vld [vmem:[#allocation3 + $0xa0] sm:$0xf]  ;;  %v3888_v5 = vpop.f32.mrf.mxu0 }
 0x2b0   : > { %v5109_v3 = vor.u32 %v5108_v12, %v13216_v41  ;;  %15198 = vst [vmem:[#allocation14_spill] sm:$0xff] %v13249_v44  ;;  %v15201_v36 = vcombine.low %v15199_v11, %v15200_v7  ;;  %v5119_v20 = vrot.slane %v5117_v50, 4  ;;  %v5122_v35 = vrot.slane %v5120_v13, 5  ;;  %v13261_v12 = vld [vmem:[%s15074_s3 + $0x1b8] sm:$0xff]   ;;  %v10990_v7 = vld [vmem:[#allocation3 + $0x90] sm:$0xff]  }
 0x2b1   : > { %9902 = vmatmul.mubr.bf16.gmra.mxu1 %v15197_v0  ;;  %v13254_v6 = vrot.slane %v5126_v18, 5  ;;  %v5132_v30 = vrot.slane %v5130_v1, 4  ;;  %v13263_v52 = vcombine.low %v5057_v25, %v5067_v55  ;;  %v5090_v42 = vrot.slane %v5088_v46, 5  ;;  %v13278_v55 = vld [vmem:[#allocation3 + $0x98] sm:$0x1] }
 0x2b2   : > { %9905 = vmatprep.mubr.bf16.mxu1 %v15201_v36  ;;  %9982 = vmatpush3.bf16.msra.mxu1 %v11001_v58  ;;  %v15202_v50 = vrot.slane %v13154_v19, 5  ;;  %v9803_v13 = vpop.f32.mrf.mxu1  ;;  %v5081_v18 = vsel %vm12048_vm12, %v5076_v23, %v13181_v21  ;;  %v5114_v1 = vrot.slane %v5112_v33, 5  ;;  %v9278_v9 = vrot.slane %v5616_v27, 9  ;;  %v4882_v46 = vld [vmem:[#allocation3 + $0x84] sm:$0xf]  ;;  %v10993_v27 = vld [vmem:[#allocation3 + $0x9c] sm:$0xff]  }
 0x2b3   : > { %9983 = vmatprep.subr.bf16.mxu1 %v11004_v54  ;;  %v13280_v0 = vadd.f32 %v9851_v60, %v9803_v13  ;;  %v5100_v11 = vrot.slane %v5099_v15, 4  ;;  %v5755_v36 = vrot.slane %v13256_v47, 5  ;;  %v5110_v21 = vrot.slane %v5109_v3, 4  ;;  %v5617_v13 = vld [vmem:[#allocation3 + $0x9c] sm:$0xe] }
 0x2b4   : > { %v13271_v58 = vsel %vm12346_vm8, %v9277_v57, %v15202_v50  ;;  %v5091_v57 = vsel %vm12048_vm12, %v5086_v34, %v5090_v42  ;;  %v3583_v50 = vpop.f32.mrf.mxu1  ;;  %v5750_v23 = vrot.slane %v5748_v37, 4  ;;  %v5123_v44 = vor.u32 %v5122_v35, %v5119_v20  ;;  %v9852_v42 = vpop.f32.mrf.mxu0  ;;  %v13293_v3 = vld [vmem:[#allocation3 + $0xa4] sm:$0x1] }
 0x2b5   : > { %15203 = vst [vmem:[#allocation15_spill] sm:$0xff] %v13271_v58  ;;  %15204 = vst [vmem:[#allocation16_spill] sm:$0xff] %v13280_v0  ;;  %v5133_v33 = vor.u32 %v5132_v30, %v13254_v6  ;;  %v13286_v25 = vadd.f32 %v3888_v5, %v3583_v50  ;;  %v5751_v60 = vrot.slane %v13278_v55, 5  ;;  %v5141_v34 = vshrl.u32 %v4882_v46, 16  ;;  %v15207_v5 = vld [vmem:[#allocation18_spill] sm:$0xff]  ;;  %v15208_v50 = vld [vmem:[#allocation19_spill] sm:$0xff] }
 0x2b6   : > { %9984 = vmatpush3.bf16.msra.mxu1 %v11004_v54  ;;  %v5144_v15 = vshll.u32 %v4882_v46, 16  ;;  %v9804_v0 = vpop.f32.mrf.mxu1  ;;  %9958 = vmatmul.mubr.bf16.gmra.mxu0 %v10990_v7  ;;  %v13290_v56 = vcombine.low %v5081_v18, %v5091_v57  ;;  %v5136_v54 = vshll.u32 %v13175_v39, 16  ;;  %v5150_v20 = vshll.u32 %v13154_v19, 16  ;;  %v13309_v46 = vld [vmem:[#allocation3 + $0xac] sm:$0xf] }
 0x2b7   : > { %15205 = vst [vmem:[#allocation17_spill] sm:$0xff] %v13286_v25  ;;  %10065 = vmatprep.subr.bf16.mxu1 %v13261_v12  ;;  %v5154_v35 = vshrl.u32 %v13154_v19, 16  ;;  %v13297_v30 = vadd.f32 %v9852_v42, %v9804_v0  ;;  %v15209_v25 = vcombine.low %v15207_v5, %v15208_v50  ;;  %9961 = vmatprep.mubr.bf16.mxu0 %v10993_v27  ;;  %v5757_v18 = vrot.slane %v5755_v36, 4  ;;  %v15211_v57 = vld [vmem:[#allocation20_spill] sm:$0xff]  ;;  %v15212_v19 = vld [vmem:[#allocation21_spill] sm:$0xff] }
 0x2b8   : > { %v5105_v7 = vsel %vm12048_vm12, %v5100_v11, %v13216_v41  ;;  %v13307_v39 = vsel %vm12346_vm8, %v9278_v9, %v5748_v37  ;;  %v15213_v0 = vcombine.low %v15211_v57, %v15212_v19  ;;  %v5115_v42 = vsel %vm12048_vm12, %v5110_v21, %v5114_v1 }
 0x2b9   : > { %15206 = vst [vmem:[#allocation45_spill] sm:$0xff] %v13297_v30  ;;  %9906 = vmatmul.mubr.bf16.gmra.mxu1 %v15209_v25  ;;  %15210 = vst [vmem:[#allocation18_spill] sm:$0xff] %v13307_v39  ;;  %v13318_v25 = vsel %vm12346_vm8, %v5750_v23, %v5751_v60  ;;  %v5124_v27 = vrot.slane %v5123_v44, 4  ;;  %v5134_v41 = vrot.slane %v5133_v33, 4  ;;  %v9279_v11 = vrot.slane %v5617_v13, 9  ;;  %v10995_v60 = vld [vmem:[#allocation3 + $0xa8] sm:$0xff]  }
 0x2ba   : > { %9909 = vmatprep.mubr.bf16.mxu1 %v15213_v0  ;;  %15214 = vst [vmem:[#allocation19_spill] sm:$0xff] %v13318_v25  ;;  %v5758_v37 = vrot.slane %v13293_v3, 5  ;;  %v5143_v9 = vrot.slane %v5141_v34, 4  ;;  %v5146_v5 = vrot.slane %v5144_v15, 5  ;;  %v5138_v50 = vrot.slane %v5136_v54, 5 }
 0x2bb   : > { %v13321_v30 = vrot.slane %v5150_v20, 5  ;;  %v5156_v58 = vrot.slane %v5154_v35, 4  ;;  %v5762_v57 = vrot.slane %v13309_v46, 5  ;;  %v13324_v19 = vcombine.low %v5105_v7, %v5115_v42  ;;  %v5618_v23 = vld [vmem:[#allocation3 + $0xa8] sm:$0xe]  ;;  %v10998_v20 = vld [vmem:[#allocation3 + $0xb4] sm:$0xff]  }
 0x2bc   : > { %v13330_v44 = vsel %vm12346_vm8, %v9279_v11, %v5755_v36  ;;  %v13334_v21 = vsel %vm12346_vm8, %v5757_v18, %v5758_v37  ;;  %v4885_v33 = vld [vmem:[#allocation3 + $0x90] sm:$0xf]  ;;  %v5129_v13 = vsel %vm12048_vm12, %v5124_v27, %v13254_v6  ;;  %v5139_v34 = vsel %vm12048_vm12, %v5134_v41, %v5138_v50  ;;  %v4888_v18 = vld [vmem:[#allocation3 + $0x9c] sm:$0xf]  ;;  %v15218_v50 = vld [vmem:[#allocation23_spill] sm:$0xff] }
 0x2bd   : > { %15215 = vst [vmem:[#allocation20_spill] sm:$0xff] %v13330_v44  ;;  %15216 = vst [vmem:[#allocation21_spill] sm:$0xff] %v13334_v21  ;;  %v13341_v15 = vld [vmem:[#allocation3 + $0xb0] sm:$0x1]  ;;  %v5174_v54 = vshll.u32 %v13220_v17, 16  ;;  %v5178_v36 = vshrl.u32 %v13220_v17, 16  ;;  %v5147_v35 = vor.u32 %v5146_v5, %v5143_v9  ;;  %v5157_v27 = vor.u32 %v5156_v58, %v13321_v30 }
 0x2be   : > { %v5160_v7 = vshll.u32 %v13187_v10, 16  ;;  %v5198_v0 = vshll.u32 %v13256_v47, 16  ;;  %v5202_v42 = vshrl.u32 %v13256_v47, 16  ;;  %9962 = vmatmul.mubr.bf16.gmra.mxu0 %v10995_v60  ;;  %v9280_v41 = vrot.slane %v5618_v23, 9  ;;  %v15217_v37 = vld [vmem:[#allocation22_spill] sm:$0xff]  ;;  %v15221_v47 = vld [vmem:[#allocation24_spill] sm:$0xff] }
 0x2bf   : > { %v5764_v11 = vrot.slane %v5762_v57, 4  ;;  %v15219_v17 = vcombine.low %v15217_v37, %v15218_v50  ;;  %9965 = vmatprep.mubr.bf16.mxu0 %v10998_v20  ;;  %v13354_v9 = vcombine.low %v5129_v13, %v5139_v34  ;;  %v5765_v10 = vrot.slane %v13341_v15, 5  ;;  %v15222_v60 = vld [vmem:[#allocation25_spill] sm:$0xff]  ;;  %v4891_v44 = vld [vmem:[#allocation3 + $0xa8] sm:$0xf] }
 0x2c0   : > { %v5165_v5 = vshrl.u32 %v4885_v33, 16  ;;  %v5168_v1 = vshll.u32 %v4885_v33, 16  ;;  %v15223_v25 = vcombine.low %v15221_v47, %v15222_v60  ;;  %v13360_v6 = vrot.slane %v5174_v54, 5  ;;  %v13366_v13 = vld [vmem:[#allocation3 + $0xb8] sm:$0xf]  ;;  %v11000_v47 = vld [vmem:[#allocation3 + $0xc0] sm:$0xff]  }
 0x2c1   : > { %9910 = vmatmul.mubr.bf16.gmra.mxu1 %v15219_v17  ;;  %15220 = vst [vmem:[#allocation22_spill] sm:$0xff] %v13354_v9  ;;  %v5180_v58 = vrot.slane %v5178_v36, 4  ;;  %v5189_v23 = vshrl.u32 %v4888_v18, 16  ;;  %v5192_v21 = vshll.u32 %v4888_v18, 16  ;;  %v13362_v39 = vrot.slane %v5147_v35, 4 }
 0x2c2   : > { %9913 = vmatprep.mubr.bf16.mxu1 %v15223_v25  ;;  %v13364_v37 = vrot.slane %v5160_v7, 5  ;;  %v13368_v34 = vrot.slane %v5198_v0, 5  ;;  %v5204_v20 = vrot.slane %v5202_v42, 4  ;;  %v13370_v33 = vrot.slane %v5157_v27, 4  ;;  %v13376_v54 = vld [vmem:[#allocation3 + $0xc4] sm:$0xf] }
 0x2c3   : > { %v13374_v25 = vsel %vm12346_vm8, %v5764_v11, %v5765_v10  ;;  %v5222_v36 = vshll.u32 %v13309_v46, 16  ;;  %v5226_v35 = vshrl.u32 %v13309_v46, 16  ;;  %v5167_v18 = vrot.slane %v5165_v5, 4  ;;  %v13403_v46 = vld [vmem:[#allocation3 + $0xbc] sm:$0x1] }
 0x2c4   : > { %15224 = vst [vmem:[#allocation23_spill] sm:$0xff] %v13374_v25  ;;  %v5170_v7 = vrot.slane %v5168_v1, 5  ;;  %v5213_v50 = vshrl.u32 %v4891_v44, 16  ;;  %v5216_v17 = vshll.u32 %v4891_v44, 16  ;;  %v5181_v0 = vor.u32 %v5180_v58, %v13360_v6  ;;  %v15227_v58 = vld [vmem:[#allocation28_spill] sm:$0xff] }
 0x2c5   : > { %v15112_v42 = vrot.slane %v13366_v13, 5  ;;  %v5191_v27 = vrot.slane %v5189_v23, 4  ;;  %v5194_v60 = vrot.slane %v5192_v21, 5  ;;  %v13384_v11 = vsel %vm12346_vm8, %v9280_v41, %v5762_v57  ;;  %v5619_v21 = vld [vmem:[#allocation3 + $0xb4] sm:$0xe]  ;;  %v15228_v23 = vld [vmem:[#allocation26_spill] sm:$0xff] }
 0x2c6   : > { %15225 = vst [vmem:[#allocation24_spill] sm:$0xff] %v13384_v11  ;;  %v5184_v10 = vshll.u32 %v13278_v55, 16  ;;  %v5205_v9 = vor.u32 %v5204_v20, %v13368_v34  ;;  %9966 = vmatmul.mubr.bf16.gmra.mxu0 %v11000_v47  ;;  %v5153_v1 = vsel %vm12048_vm12, %v13362_v39, %v13321_v30  ;;  %v13395_v5 = vrot.slane %v5222_v36, 5  ;;  %v6488_v41 = vld [vmem:[#allocation3 + $0x18] sm:$0xf] }
 0x2c7   : > { %v5228_v57 = vrot.slane %v5226_v35, 4  ;;  %v15226_v55 = vcombine.low %v12837_v43, %v12847_v14  ;;  %v15229_v20 = vcombine.low %v15227_v58, %v15228_v23  ;;  %v5171_v47 = vor.u32 %v5170_v7, %v5167_v18  ;;  %v13415_v7 = vld [vmem:[#allocation3 + $0xc8] sm:$0x1]  ;;  %v5620_v23 = vld [vmem:[#allocation3 + $0xc0] sm:$0xe] }
 0x2c8   : > { %v5208_v30 = vshll.u32 %v13293_v3, 16  ;;  %v5215_v39 = vrot.slane %v5213_v50, 4  ;;  %v5218_v44 = vrot.slane %v5216_v17, 5  ;;  %v15230_v36 = vcombine.low %v12860_v24, %v12866_v29 }
 0x2c9   : > { %9914 = vmatmul.mubr.bf16.gmra.mxu1 %v15226_v55  ;;  %10033 = vmatprep.mubr.bf16.mxu0 %v15229_v20  ;;  %v5163_v43 = vsel %vm12048_vm12, %v13370_v33, %v13364_v37  ;;  %v5182_v14 = vrot.slane %v5181_v0, 4  ;;  %v5771_v35 = vrot.slane %v15112_v42, 4  ;;  %v5195_v18 = vor.u32 %v5194_v60, %v5191_v27  ;;  %v6489_v60 = vld [vmem:[#allocation3 + $0x1c] sm:$0xf]  ;;  %v13422_v42 = vpop.f32.mrf.mxu0 }
 0x2ca   : > { %9917 = vmatprep.mubr.bf16.mxu1 %v15230_v36  ;;  %v5186_v55 = vrot.slane %v5184_v10, 5  ;;  %v5206_v3 = vrot.slane %v5205_v9, 4  ;;  %v15231_v50 = vrot.slane %v13376_v54, 5  ;;  %v6537_v58 = vshrl.u32 %v6488_v41, 16  ;;  %15232 = vst [vmem:[#allocation25_spill] sm:$0xff] %v13422_v42 }
 0x2cb   : > { %v9281_v24 = vrot.slane %v5619_v21, 9  ;;  %v5772_v29 = vrot.slane %v13403_v46, 5  ;;  %v5229_v20 = vor.u32 %v5228_v57, %v13395_v5  ;;  %v6540_v37 = vshll.u32 %v6488_v41, 16  ;;  %v11010_v57 = vld [vmem:[%s15074_s3 + $0x1f0] sm:$0xff]  }
 0x2cc   : > { %v5778_v17 = vrot.slane %v15231_v50, 4  ;;  %v5172_v33 = vrot.slane %v5171_v47, 4  ;;  %v5210_v0 = vrot.slane %v5208_v30, 5  ;;  %v5779_v36 = vrot.slane %v13415_v7, 5  ;;  %v6490_v30 = vld [vmem:[#allocation3 + $0x20] sm:$0x1] }
 0x2cd   : > { %v5219_v27 = vor.u32 %v5218_v44, %v5215_v39  ;;  %v5187_v9 = vsel %vm12048_vm12, %v5182_v14, %v5186_v55  ;;  %v13428_v10 = vsel %vm12346_vm8, %v5771_v35, %v5772_v29  ;;  %v5196_v21 = vrot.slane %v5195_v18, 4  ;;  %v9855_v14 = vpop.f32.mrf.mxu0  ;;  %v15233_v35 = vld [vmem:[#allocation29_spill] sm:$0xff]  ;;  %v15234_v55 = vld [vmem:[#allocation27_spill] sm:$0xff] }
 0x2ce   : > { %v5232_v50 = vshll.u32 %v13341_v15, 16  ;;  %v5211_v44 = vsel %vm12048_vm12, %v5206_v3, %v5210_v0  ;;  %v9282_v41 = vrot.slane %v5620_v23, 9  ;;  %v13438_v47 = vsel %vm12346_vm8, %v5778_v17, %v5779_v36  ;;  %v13460_v0 = vpop.f32.mrf.mxu1 }
 0x2cf   : > { %v6539_v39 = vrot.slane %v6537_v58, 4  ;;  %v15235_v18 = vcombine.low %v15233_v35, %v15234_v55  ;;  %v5230_v15 = vrot.slane %v5229_v20, 4  ;;  %v6542_v29 = vrot.slane %v6540_v37, 5  ;;  %15239 = vst [vmem:[#allocation28_spill] sm:$0xff] %v13460_v0  ;;  %v6491_v35 = vld [vmem:[#allocation3 + $0x24] sm:$0xf] }
 0x2d0   : > { %v6546_v42 = vshll.u32 %v6489_v60, 16  ;;  %v6550_v25 = vshrl.u32 %v6489_v60, 16  ;;  %v15236_v11 = vcombine.low %v12956_v49, %v12960_v31  ;;  %v15237_v3 = vcombine.low %v12812_v2, %v12816_v38  ;;  %v15272_v0 = vld [vmem:[#allocation20_spill] sm:$0xff] }
 0x2d1   : > { %10034 = vmatmul.mubr.bf16.vlgmr.msra.gmra.mxu0 %v15235_v18  ;;  %v13449_v17 = vcombine.low %v5153_v1, %v5163_v43  ;;  %v5177_v58 = vsel %vm12048_vm12, %v5172_v33, %v13360_v6  ;;  %v15238_v23 = vrot.slane %v13366_v13, 5  ;;  %v5220_v37 = vrot.slane %v5219_v27, 4  ;;  %v13484_v43 = vld [vmem:[#allocation3 + $0xb4] sm:$0xf]  ;;  %v3904_v33 = vpop.f32.mrf.mxu0 }
 0x2d2   : > { %9918 = vmatmul.mubr.bf16.gmra.mxu1 %v15236_v11  ;;  %10037 = vmatprep.mubr.bf16.mxu0 %v15237_v3  ;;  %v5201_v2 = vsel %vm12048_vm12, %v5196_v21, %v13368_v34  ;;  %v15240_v38 = vrot.slane %v13376_v54, 5  ;;  %v5234_v31 = vrot.slane %v5232_v50, 5  ;;  %v6556_v6 = vshll.u32 %v6490_v30, 16  ;;  %v11012_v11 = vld [vmem:[%s15074_s3 + $0x1e8] sm:$0xff]   ;;  %v9807_v36 = vpop.f32.mrf.mxu1 }
 0x2d3   : > { %v13458_v20 = vsel %vm12346_vm8, %v9281_v24, %v15238_v23  ;;  %9985 = vmatprep.mubr.bf16.mxu1 %v12934_v51  ;;  %10114 = vmatpush3.bf16.msra.mxu0 %v13210_v53  ;;  %v13476_v51 = vcombine.low %v5177_v58, %v5187_v9  ;;  %v13480_v1 = vcombine.low %v5201_v2, %v5211_v44  ;;  %v6492_v24 = vld [vmem:[#allocation3 + $0x28] sm:$0xf]  ;;  %v13488_v21 = vrot.slane %v6546_v42, 5  ;;  %v9856_v3 = vpop.f32.mrf.mxu0  ;;  %v15243_v23 = vld [vmem:[#allocation33_spill] sm:$0xff] }
 0x2d4   : > { %v13471_v49 = vsel %vm12346_vm8, %v9282_v41, %v15240_v38  ;;  %10115 = vmatprep.subr.bf16.mxu0 %v11010_v57  ;;  %v5235_v27 = vsel %vm12048_vm12, %v5230_v15, %v5234_v31  ;;  %v6543_v60 = vor.u32 %v6542_v29, %v6539_v39  ;;  %v6552_v9 = vrot.slane %v6550_v25, 4  ;;  %v3599_v55 = vpop.f32.mrf.mxu1  ;;  %v4897_v29 = vld [vmem:[#allocation3 + $0xc0] sm:$0xf]  ;;  %v11013_v2 = vld [vmem:[%s15074_s3 + $0x1e0] sm:$0xff]  }
 0x2d5   : > { %v13490_v50 = vadd.f32 %v9855_v14, %v9807_v36  ;;  %v5225_v44 = vsel %vm12048_vm12, %v5220_v37, %v13395_v5  ;;  %v5246_v41 = vshll.u32 %v13366_v13, 16  ;;  %v5250_v30 = vshrl.u32 %v13366_v13, 16  ;;  %v11006_v14 = vld [vmem:[%s15074_s3 + $0x1b0] sm:$0xff]  }
 0x2d6   : > { %v13497_v18 = vrot.slane %v6556_v6, 5  ;;  %v5237_v39 = vshrl.u32 %v13484_v43, 16  ;;  %v6570_v42 = vshll.u32 %v6492_v24, 16  ;;  %v6574_v15 = vshrl.u32 %v6492_v24, 16  ;;  %v9808_v58 = vpop.f32.mrf.mxu1 }
 0x2d7   : > { %15241 = vst [vmem:[#allocation26_spill] sm:$0xff] %v13490_v50  ;;  %10116 = vmatpush3.bf16.msra.mxu0 %v11010_v57  ;;  %v13500_v25 = vadd.f32 %v3904_v33, %v3599_v55  ;;  %v13505_v5 = vcombine.low %v5225_v44, %v5235_v27  ;;  %v5270_v13 = vshll.u32 %v13376_v54, 16  ;;  %v5274_v57 = vshrl.u32 %v13376_v54, 16  ;;  %v6494_v33 = vld [vmem:[#allocation3 + $0x30] sm:$0xf] }
 0x2d8   : > { %10117 = vmatprep.subr.bf16.mxu0 %v11012_v11  ;;  %v15244_v37 = vcombine.low %v12904_v8, %v15243_v23  ;;  %v13515_v38 = vrot.slane %v6543_v60, 4  ;;  %v6553_v31 = vor.u32 %v6552_v9, %v13488_v21  ;;  %v5240_v6 = vshll.u32 %v13484_v43, 16  ;;  %v13529_v44 = vld [vmem:[#allocation3 + $0x34] sm:$0xf]  ;;  %v6497_v23 = vld [vmem:[#allocation3 + $0x3c] sm:$0xf] }
 0x2d9   : > { %15242 = vst [vmem:[#allocation29_spill] sm:$0xff] %v13500_v25  ;;  %v6561_v24 = vshrl.u32 %v6491_v35, 16  ;;  %v13519_v36 = vadd.f32 %v9856_v3, %v9808_v58  ;;  %v15246_v8 = vcombine.low %v12940_v16, %v12944_v40  ;;  %v13525_v54 = vrot.slane %v5246_v41, 5  ;;  %v11007_v16 = vld [vmem:[%s15074_s3 + $0x1a8] sm:$0xff]   ;;  %v13729_v50 = vld [vmem:[#allocation3 + $0x68] sm:$0x1] }
 0x2da   : > { %10038 = vmatmul.mubr.bf16.gmra.mxu0 %v15244_v37  ;;  %9986 = vmatmul.mubr.bf16.vlgmr.msra.gmra.mxu1 %v13000_v32  ;;  %v13527_v27 = vrot.slane %v5250_v30, 4  ;;  %v6564_v60 = vshll.u32 %v6491_v35, 16  ;;  %v13533_v43 = vrot.slane %v6570_v42, 5  ;;  %v6576_v9 = vrot.slane %v6574_v15, 4  ;;  %v6493_v15 = vld [vmem:[#allocation3 + $0x2c] sm:$0x1] }
 0x2db   : > { %15245 = vst [vmem:[#allocation27_spill] sm:$0xff] %v13519_v36  ;;  %10041 = vmatprep.mubr.bf16.mxu0 %v15246_v8  ;;  %10066 = vmatpush3.bf16.msra.mxu1 %v13261_v12  ;;  %v5261_v55 = vshrl.u32 %v4897_v29, 16  ;;  %v5264_v32 = vshll.u32 %v4897_v29, 16  ;;  %v13538_v40 = vrot.slane %v5270_v13, 5  ;;  %v5276_v41 = vrot.slane %v5274_v57, 4 }
 0x2dc   : > { %9989 = vmatprep.mubr.bf16.mxu1 %v13042_v4  ;;  %10067 = vmatprep.subr.bf16.mxu1 %v11006_v14  ;;  %v6585_v30 = vshrl.u32 %v6494_v33, 16  ;;  %v6588_v35 = vshll.u32 %v6494_v33, 16  ;;  %v11015_v4 = vld [vmem:[%s15074_s3 + $0x1d8] sm:$0xff]   ;;  %v6549_v12 = vsel %vm12048_vm12, %v13515_v38, %v13488_v21  ;;  %v5239_v42 = vrot.slane %v5237_v39, 4  ;;  %v13554_v39 = vld [vmem:[#allocation3 + $0x40] sm:$0xf] }
 0x2dd   : > { %10118 = vmatpush3.bf16.msra.mxu0 %v11012_v11  ;;  %v6594_v29 = vshll.u32 %v13529_v44, 16  ;;  %v6598_v11 = vshrl.u32 %v13529_v44, 16  ;;  %v13549_v13 = vrot.slane %v6553_v31, 4  ;;  %v5242_v57 = vrot.slane %v5240_v6, 5  ;;  %v11008_v31 = vld [vmem:[%s15074_s3 + $0x1a0] sm:$0xff]  }
 0x2de   : > { %10119 = vmatprep.subr.bf16.mxu0 %v11013_v2  ;;  %v5256_v3 = vshll.u32 %v13403_v46, 16  ;;  %v6563_v58 = vrot.slane %v6561_v24, 4  ;;  %v5253_v37 = vor.u32 %v13527_v27, %v13525_v54  ;;  %v6566_v33 = vrot.slane %v6564_v60, 5  ;;  %v11016_v60 = vld [vmem:[%s15074_s3 + $0x1d0] sm:$0xff]  }
 0x2df   : > { %10068 = vmatpush3.bf16.msra.mxu1 %v11006_v14  ;;  %v5263_v8 = vrot.slane %v5261_v55, 4  ;;  %v5266_v34 = vrot.slane %v5264_v32, 5  ;;  %v6577_v6 = vor.u32 %v6576_v9, %v13533_v43  ;;  %v5277_v46 = vor.u32 %v5276_v41, %v13538_v40 }
 0x2e0   : > { %10069 = vmatprep.subr.bf16.mxu1 %v11007_v16  ;;  %v6587_v24 = vrot.slane %v6585_v30, 4  ;;  %v6590_v14 = vrot.slane %v6588_v35, 5  ;;  %v15247_v27 = vcombine.low %v13025_v62, %v13013_v59  ;;  %v13567_v55 = vrot.slane %v6594_v29, 5  ;;  %v15249_v35 = vld [vmem:[#allocation41_spill] sm:$0xff] }
 0x2e1   : > { %10120 = vmatpush3.bf16.msra.mxu0 %v11013_v2  ;;  %v6600_v32 = vrot.slane %v6598_v11, 4  ;;  %v6609_v53 = vshrl.u32 %v6497_v23, 16  ;;  %v6612_v2 = vshll.u32 %v6497_v23, 16  ;;  %v15248_v9 = vcombine.low %v13091_v22, %v13109_v48  ;;  %v11011_v22 = vld [vmem:[%s15074_s3 + $0x198] sm:$0xff]  }
 0x2e2   : > { %10042 = vmatmul.mubr.bf16.gmra.mxu0 %v15247_v27  ;;  %10121 = vmatprep.subr.bf16.mxu0 %v11015_v4  ;;  %v5243_v41 = vor.u32 %v5242_v57, %v5239_v42  ;;  %v6580_v30 = vshll.u32 %v6493_v15, 16  ;;  %v6618_v59 = vshll.u32 %v13554_v39, 16  ;;  %v6622_v62 = vshrl.u32 %v13554_v39, 16 }
 0x2e3   : > { %9990 = vmatmul.mubr.bf16.gmra.mxu1 %v13105_v45  ;;  %10045 = vmatprep.mubr.bf16.mxu0 %v15248_v9  ;;  %v5258_v29 = vrot.slane %v5256_v3, 5  ;;  %v6567_v27 = vor.u32 %v6566_v33, %v6563_v58  ;;  %v5267_v11 = vor.u32 %v5266_v34, %v5263_v8  ;;  %v5280_v23 = vshll.u32 %v13415_v7, 16  ;;  %v11018_v7 = vld [vmem:[%s15074_s3 + $0x1c8] sm:$0xff]   ;;  %v13593_v9 = vld [vmem:[#allocation3 + $0x4c] sm:$0xf] }
 0x2e4   : > { %9993 = vmatprep.mubr.bf16.mxu1 %v15249_v35  ;;  %10070 = vmatpush3.bf16.msra.mxu1 %v11007_v16  ;;  %v6559_v45 = vsel %vm12048_vm12, %v13549_v13, %v13497_v18  ;;  %v5254_v48 = vrot.slane %v5253_v37, 4  ;;  %v6578_v42 = vrot.slane %v6577_v6, 4  ;;  %v5278_v15 = vrot.slane %v5277_v46, 4  ;;  %v13584_v16 = vld [vmem:[#allocation3 + $0x38] sm:$0x1] }
 0x2e5   : > { %10071 = vmatprep.subr.bf16.mxu1 %v11008_v31  ;;  %10122 = vmatpush3.bf16.msra.mxu0 %v11015_v4  ;;  %v6591_v34 = vor.u32 %v6590_v14, %v6587_v24  ;;  %v6601_v57 = vor.u32 %v6600_v32, %v13567_v55  ;;  %v6611_v3 = vrot.slane %v6609_v53, 4  ;;  %v6614_v4 = vrot.slane %v6612_v2, 5  ;;  %v11014_v24 = vld [vmem:[%s15074_s3 + $0x190] sm:$0xff]   ;;  %v15254_v35 = vld [vmem:[#allocation42_spill] sm:$0xff] }
 0x2e6   : > { %10123 = vmatprep.subr.bf16.mxu0 %v11016_v60  ;;  %v5244_v58 = vrot.slane %v5243_v41, 4  ;;  %v6582_v33 = vrot.slane %v6580_v30, 5  ;;  %v13590_v8 = vrot.slane %v6618_v59, 5  ;;  %v6624_v18 = vrot.slane %v6622_v62, 4  ;;  %v13609_v32 = vld [vmem:[#allocation3 + $0x44] sm:$0x1] }
 0x2e7   : > { %v6568_v13 = vrot.slane %v6567_v27, 4  ;;  %v5268_v37 = vrot.slane %v5267_v11, 4  ;;  %v5282_v6 = vrot.slane %v5280_v23, 5  ;;  %v6604_v46 = vshll.u32 %v13584_v16, 16  ;;  %v15250_v2 = vld [vmem:[#allocation39_spill] sm:$0xff]  ;;  %v15251_v41 = vld [vmem:[#allocation40_spill] sm:$0xff] }
 0x2e8   : > { %10072 = vmatpush3.bf16.msra.mxu1 %v11008_v31  ;;  %v13603_v53 = vcombine.low %v6549_v12, %v6559_v45  ;;  %v5259_v31 = vsel %vm12048_vm12, %v5254_v48, %v5258_v29  ;;  %v6583_v14 = vsel %vm12048_vm12, %v6578_v42, %v6582_v33  ;;  %v15252_v30 = vcombine.low %v15250_v2, %v15251_v41  ;;  %v15253_v62 = vld [vmem:[#allocation12_spill] sm:$0xff]  ;;  %v15255_v29 = vld [vmem:[#allocation43_spill] sm:$0xff]  ;;  %v11020_v41 = vld [vmem:[%s15074_s3 + $0x180] sm:$0xff]  }
 0x2e9   : > { %10073 = vmatprep.subr.bf16.mxu1 %v11011_v22  ;;  %10124 = vmatpush3.bf16.msra.mxu0 %v11016_v60  ;;  %v11019_v60 = vld [vmem:[%s15074_s3 + $0x1c0] sm:$0xff]   ;;  %v5283_v21 = vsel %vm12048_vm12, %v5278_v15, %v5282_v6  ;;  %v6592_v38 = vrot.slane %v6591_v34, 4  ;;  %v6602_v12 = vrot.slane %v6601_v57, 4  ;;  %v6615_v59 = vor.u32 %v6614_v4, %v6611_v3  ;;  %v6500_v45 = vld [vmem:[#allocation3 + $0x48] sm:$0xf]  ;;  %v11017_v4 = vld [vmem:[%s15074_s3 + $0x188] sm:$0xff]  }
 0x2ea   : > { %10046 = vmatmul.mubr.bf16.gmra.mxu0 %v15252_v30  ;;  %10125 = vmatprep.subr.bf16.mxu0 %v11018_v7  ;;  %v15256_v27 = vcombine.low %v15254_v35, %v15255_v29  ;;  %v5249_v11 = vsel %vm12048_vm12, %v5244_v58, %v13525_v54  ;;  %v6625_v23 = vor.u32 %v6624_v18, %v13590_v8  ;;  %v6642_v48 = vshll.u32 %v13593_v9, 16  ;;  %v13637_v3 = vld [vmem:[#allocation3 + $0x50] sm:$0x1]  ;;  %v13648_v58 = vld [vmem:[#allocation3 + $0x54] sm:$0xf] }
 0x2eb   : > { %9994 = vmatmul.mubr.bf16.gmra.mxu1 %v15253_v62  ;;  %v6646_v42 = vshrl.u32 %v13593_v9, 16  ;;  %v6573_v15 = vsel %vm12048_vm12, %v6568_v13, %v13533_v43  ;;  %v5273_v34 = vsel %vm12048_vm12, %v5268_v37, %v13538_v40  ;;  %v6606_v57 = vrot.slane %v6604_v46, 5  ;;  %v13650_v40 = vld [vmem:[#allocation3 + $0x58] sm:$0xf]  ;;  %v13664_v6 = vld [vmem:[#allocation3 + $0x64] sm:$0xf] }
 0x2ec   : > { %10049 = vmatprep.mubr.bf16.mxu0 %v15256_v27  ;;  %9997 = vmatprep.mubr.bf16.mxu1 %v13263_v52  ;;  %v6628_v54 = vshll.u32 %v13609_v32, 16  ;;  %v13642_v52 = vcombine.low %v5249_v11, %v5259_v31  ;;  %v13646_v43 = vcombine.low %v5273_v34, %v5283_v21  ;;  %v6597_v33 = vsel %vm12048_vm12, %v6592_v38, %v13567_v55  ;;  %v13670_v55 = vpop.f32.mrf.mxu0  ;;  %v6506_v35 = vld [vmem:[#allocation3 + $0x60] sm:$0xf]  ;;  %v15261_v34 = vld [vmem:[#allocation44_spill] sm:$0xff] }
 0x2ed   : > { %10074 = vmatpush3.bf16.msra.mxu1 %v11011_v22  ;;  %10126 = vmatpush3.bf16.msra.mxu0 %v11018_v7  ;;  %v13644_v22 = vcombine.low %v6573_v15, %v6583_v14  ;;  %v6607_v18 = vsel %vm12048_vm12, %v6602_v12, %v6606_v57  ;;  %v13657_v13 = vrot.slane %v6615_v59, 4  ;;  %v13662_v7 = vld [vmem:[%s15074_s3 + $0x238] sm:$0xff]   ;;  %v6633_v37 = vshrl.u32 %v6500_v45, 16  ;;  %15258 = vst [vmem:[#allocation41_spill] sm:$0xff] %v13670_v55  ;;  %v15260_v15 = vld [vmem:[#allocation15_spill] sm:$0xff] }
 0x2ee   : > { %10075 = vmatprep.subr.bf16.mxu1 %v11014_v24  ;;  %10127 = vmatprep.subr.bf16.mxu0 %v11019_v60  ;;  %15257 = vst [vmem:[#allocation33_spill] sm:$0xff] %v13662_v7  ;;  %v13666_v46 = vrot.slane %v6625_v23, 4  ;;  %v6636_v31 = vshll.u32 %v6500_v45, 16  ;;  %v13668_v14 = vrot.slane %v6642_v48, 5  ;;  %v6648_v2 = vrot.slane %v6646_v42, 4  ;;  %v9859_v27 = vpop.f32.mrf.mxu0 }
 0x2ef   : > { %v13675_v30 = vrot.slane %v6628_v54, 5  ;;  %v6666_v38 = vshll.u32 %v13650_v40, 16  ;;  %v6670_v12 = vshrl.u32 %v13650_v40, 16  ;;  %v6652_v62 = vshll.u32 %v13637_v3, 16  ;;  %v6509_v42 = vld [vmem:[#allocation3 + $0x6c] sm:$0xf] }
 0x2f0   : > { %v6690_v29 = vshll.u32 %v13664_v6, 16  ;;  %v15259_v11 = vcombine.low %v13231_v28, %v13235_v26  ;;  %v13687_v23 = vcombine.low %v6597_v33, %v6607_v18  ;;  %v6635_v45 = vrot.slane %v6633_v37, 4  ;;  %v13705_v18 = vld [vmem:[#allocation3 + $0x70] sm:$0xf]  ;;  %v13707_v37 = vpop.f32.mrf.mxu1 }
 0x2f1   : > { %10076 = vmatpush3.bf16.msra.mxu1 %v11014_v24  ;;  %10128 = vmatpush3.bf16.msra.mxu0 %v11019_v60  ;;  %v6657_v24 = vshrl.u32 %v13648_v58, 16  ;;  %v6694_v48 = vshrl.u32 %v13664_v6, 16  ;;  %v15262_v57 = vcombine.low %v15260_v15, %v15261_v34  ;;  %v6631_v28 = vsel %vm12048_vm12, %v13666_v46, %v13675_v30  ;;  %15263 = vst [vmem:[#allocation39_spill] sm:$0xff] %v13705_v18  ;;  %v3920_v30 = vpop.f32.mrf.mxu0 }
 0x2f2   : > { %10077 = vmatprep.subr.bf16.mxu1 %v11017_v4  ;;  %10050 = vmatmul.mubr.bf16.gmra.mxu0 %v15259_v11  ;;  %v6638_v26 = vrot.slane %v6636_v31, 5  ;;  %v6649_v54 = vor.u32 %v6648_v2, %v13668_v14  ;;  %v6660_v33 = vshll.u32 %v13648_v58, 16  ;;  %15264 = vst [vmem:[#allocation40_spill] sm:$0xff] %v13707_v37  ;;  %v13712_v11 = vrot.slane %v6666_v38, 5  ;;  %v9811_v59 = vpop.f32.mrf.mxu1  ;;  %v6512_v38 = vld [vmem:[#allocation3 + $0x78] sm:$0xf] }
 0x2f3   : > { %10161 = vmatprep.subr.bf16.mxu0 %v13662_v7  ;;  %9998 = vmatmul.mubr.bf16.gmra.mxu1 %v13290_v56  ;;  %v13710_v56 = vld [vmem:[#allocation3 + $0x5c] sm:$0x1]  ;;  %v6672_v15 = vrot.slane %v6670_v12, 4  ;;  %v6681_v34 = vshrl.u32 %v6506_v35, 16  ;;  %v13714_v46 = vrot.slane %v6652_v62, 5  ;;  %v6659_v31 = vrot.slane %v6657_v24, 4 }
 0x2f4   : > { %10053 = vmatprep.mubr.bf16.mxu0 %v15262_v57  ;;  %10001 = vmatprep.mubr.bf16.mxu1 %v13324_v19  ;;  %v6684_v57 = vshll.u32 %v6506_v35, 16  ;;  %v13716_v2 = vrot.slane %v6690_v29, 5  ;;  %v6705_v58 = vshrl.u32 %v6509_v42, 16  ;;  %v6696_v21 = vrot.slane %v6694_v48, 4  ;;  %v3615_v55 = vpop.f32.mrf.mxu1  ;;  %v13724_v48 = vld [vmem:[#allocation3 + $0x7c] sm:$0xf] }
 0x2f5   : > { %10078 = vmatpush3.bf16.msra.mxu1 %v11017_v4  ;;  %v6708_v60 = vshll.u32 %v6509_v42, 16  ;;  %v6714_v19 = vshll.u32 %v13705_v18, 16  ;;  %v6718_v4 = vshrl.u32 %v13705_v18, 16  ;;  %v13720_v36 = vadd.f32 %v9859_v27, %v9811_v59 }
 0x2f6   : > { %10079 = vmatprep.subr.bf16.mxu1 %v11020_v41  ;;  %v6639_v12 = vor.u32 %v6638_v26, %v6635_v45  ;;  %v6662_v35 = vrot.slane %v6660_v33, 5  ;;  %v6676_v62 = vshll.u32 %v13710_v56, 16  ;;  %v6650_v24 = vrot.slane %v6649_v54, 4  ;;  %v9860_v26 = vpop.f32.mrf.mxu0  ;;  %v9812_v33 = vpop.f32.mrf.mxu1 }
 0x2f7   : > { %15265 = vst [vmem:[#allocation12_spill] sm:$0xff] %v13720_v36  ;;  %v6673_v29 = vor.u32 %v6672_v15, %v13712_v11  ;;  %v6683_v37 = vrot.slane %v6681_v34, 4  ;;  %v6686_v25 = vrot.slane %v6684_v57, 5  ;;  %v13726_v42 = vadd.f32 %v3920_v30, %v3615_v55  ;;  %v15267_v36 = vld [vmem:[#allocation18_spill] sm:$0xff] }
 0x2f8   : > { %v6707_v59 = vrot.slane %v6705_v58, 4  ;;  %v6729_v27 = vshrl.u32 %v6512_v38, 16  ;;  %v6732_v45 = vshll.u32 %v6512_v38, 16  ;;  %v6697_v15 = vor.u32 %v6696_v21, %v13716_v2  ;;  %v15273_v58 = vld [vmem:[#allocation21_spill] sm:$0xff] }
 0x2f9   : > { %10080 = vmatpush3.bf16.msra.mxu1 %v11020_v41  ;;  %15266 = vst [vmem:[#allocation42_spill] sm:$0xff] %v13726_v42  ;;  %v15268_v41 = vld [vmem:[#allocation19_spill] sm:$0xff]  ;;  %v6710_v34 = vrot.slane %v6708_v60, 5  ;;  %v13735_v57 = vrot.slane %v6714_v19, 5  ;;  %v6720_v55 = vrot.slane %v6718_v4, 4  ;;  %v13737_v30 = vadd.f32 %v9860_v26, %v9812_v33  ;;  %v15271_v42 = vld [vmem:[#allocation22_spill] sm:$0xff] }
 0x2fa   : > { %10209 = vmatprep.subr.bf16.mxu1 %v13662_v7  ;;  %v15269_v54 = vcombine.low %v15267_v36, %v15268_v41  ;;  %v15274_v18 = vcombine.low %v15272_v0, %v15273_v58  ;;  %v6640_v38 = vrot.slane %v6639_v12, 4  ;;  %v6738_v7 = vshll.u32 %v13724_v48, 16  ;;  %v2402_v58 = vld [vmem:[#allocation3 + $0xd4] sm:$0x1] }
 0x2fb   : > { %15270 = vst [vmem:[#allocation43_spill] sm:$0xff] %v13737_v30  ;;  %10002 = vmatmul.mubr.bf16.gmra.mxu1 %v15271_v42  ;;  %v6742_v36 = vshrl.u32 %v13724_v48, 16  ;;  %v15275_v21 = vsel %vm12048_vm12, %v13657_v13, %v13590_v8  ;;  %v15276_v19 = vrot.slane %v13554_v39, 5  ;;  %v6663_v0 = vor.u32 %v6662_v35, %v6659_v31 }
 0x2fc   : > { %10054 = vmatmul.mubr.bf16.gmra.mxu0 %v15269_v54  ;;  %10005 = vmatprep.mubr.bf16.mxu1 %v13449_v17  ;;  %v13751_v60 = vcombine.low %v15275_v21, %v6631_v28  ;;  %v6655_v12 = vsel %vm12048_vm12, %v6650_v24, %v13714_v46  ;;  %v6687_v42 = vor.u32 %v6686_v25, %v6683_v37  ;;  %v13761_v17 = vld [vmem:[#allocation3 + $0x74] sm:$0x1]  ;;  %v6731_v26 = vrot.slane %v6729_v27, 4  ;;  %v2346_v54 = vld [vmem:[#allocation3 + $0xcc] sm:$0x1] }
 0x2fd   : > { %10057 = vmatprep.mubr.bf16.mxu0 %v15274_v18  ;;  %v13755_v4 = vrot.slane %v15276_v19, 4  ;;  %v6700_v18 = vshll.u32 %v13729_v50, 16  ;;  %v6734_v33 = vrot.slane %v6732_v45, 5  ;;  %v6674_v41 = vrot.slane %v6673_v29, 4  ;;  %v13767_v21 = vld [vmem:[#allocation3 + $0x80] sm:$0x1] }
 0x2fe   : > { %v6698_v8 = vrot.slane %v6697_v15, 4  ;;  %v6711_v13 = vor.u32 %v6710_v34, %v6707_v59  ;;  %v6721_v28 = vor.u32 %v6720_v55, %v13735_v57  ;;  %v6645_v31 = vsel %vm12048_vm12, %v6640_v38, %v13668_v14  ;;  %v6515_v27 = vld [vmem:[#allocation3 + $0x84] sm:$0xf]  ;;  %v13774_v34 = vld [vmem:[#allocation3 + $0x88] sm:$0xf] }
 0x2ff   : > { %v6678_v35 = vrot.slane %v6676_v62, 5  ;;  %v13769_v46 = vrot.slane %v6738_v7, 5  ;;  %v6744_v25 = vrot.slane %v6742_v36, 4  ;;  %v13771_v37 = vcombine.low %v6645_v31, %v6655_v12  ;;  %v15279_v7 = vld [vmem:[#allocation24_spill] sm:$0xff]  ;;  %v15280_v19 = vld [vmem:[#allocation23_spill] sm:$0xff] }
 0x300   : > { %v6664_v24 = vrot.slane %v6663_v0, 4  ;;  %v6702_v29 = vrot.slane %v6700_v18, 5  ;;  %v6724_v59 = vshll.u32 %v13761_v17, 16  ;;  %v6688_v45 = vrot.slane %v6687_v42, 4  ;;  %v7243_v55 = vld [vmem:[#allocation3 + $0x30] sm:$0xe] }
 0x301   : > { %v6735_v15 = vor.u32 %v6734_v33, %v6731_v26  ;;  %v2347_v14 = vsel %vm11820_vm14, 0, %v2346_v54  ;;  %v2403_v38 = vsel %vm11839_vm1, 0, %v2402_v58  ;;  %v15281_v36 = vcombine.low %v15279_v7, %v15280_v19  ;;  %v6518_v26 = vld [vmem:[#allocation3 + $0x90] sm:$0xf]  ;;  %v13825_v62 = vld [vmem:[#allocation3 + $0x9c] sm:$0xf] }
 0x302   : > { %v6679_v0 = vsel %vm12048_vm12, %v6674_v41, %v6678_v35  ;;  %v6703_v18 = vsel %vm12048_vm12, %v6698_v8, %v6702_v29  ;;  %v6712_v12 = vrot.slane %v6711_v13, 4  ;;  %v6722_v42 = vrot.slane %v6721_v28, 4  ;;  %2348 = vst [vmem:[#allocation3 + $0xcc] sm:$0x1] %v2347_v14  ;;  %2404 = vst [vmem:[#allocation3 + $0xd4] sm:$0x1] %v2403_v38 }
 0x303   : > { %10006 = vmatmul.mubr.bf16.gmra.mxu1 %v13476_v51  ;;  %v15282_v33 = vcombine.low %v13458_v20, %v13428_v10  ;;  %v6745_v54 = vor.u32 %v6744_v25, %v13769_v46  ;;  %v6748_v58 = vshll.u32 %v13767_v21, 16  ;;  %v6753_v31 = vshrl.u32 %v6515_v27, 16  ;;  %v13806_v25 = vld [vmem:[#allocation3 + $0x94] sm:$0xf] }
 0x304   : > { %10058 = vmatmul.mubr.bf16.gmra.mxu0 %v15281_v36  ;;  %v6756_v41 = vshll.u32 %v6515_v27, 16  ;;  %10009 = vmatprep.mubr.bf16.mxu1 %v13480_v1  ;;  %v6669_v8 = vsel %vm12048_vm12, %v6664_v24, %v13712_v11  ;;  %v6726_v13 = vrot.slane %v6724_v59, 5  ;;  %v6762_v28 = vshll.u32 %v13774_v34, 16  ;;  %v13815_v59 = vld [vmem:[#allocation3 + $0x8c] sm:$0x1] }
 0x305   : > { %10061 = vmatprep.mubr.bf16.mxu0 %v15282_v33  ;;  %v6766_v51 = vshrl.u32 %v13774_v34, 16  ;;  %v13799_v35 = vcombine.low %v6669_v8, %v6679_v0  ;;  %v6693_v10 = vsel %vm12048_vm12, %v6688_v45, %v13716_v2  ;;  %v13804_v20 = vrot.slane %v6735_v15, 4  ;;  %v7244_v36 = vld [vmem:[#allocation3 + $0x3c] sm:$0xe] }
 0x306   : > { %v6777_v1 = vshrl.u32 %v6518_v26, 16  ;;  %v13808_v29 = vcombine.low %v6693_v10, %v6703_v18  ;;  %v6717_v11 = vsel %vm12048_vm12, %v6712_v12, %v13735_v57  ;;  %v6727_v24 = vsel %vm12048_vm12, %v6722_v42, %v6726_v13 }
 0x307   : > { %v6780_v27 = vshll.u32 %v6518_v26, 16  ;;  %v13817_v14 = vrot.slane %v6745_v54, 4  ;;  %v13819_v2 = vrot.slane %v6748_v58, 5  ;;  %v13821_v45 = vrot.slane %v6753_v31, 4 }
 0x308   : > { %v13823_v15 = vrot.slane %v6756_v41, 5  ;;  %v13827_v38 = vrot.slane %v6762_v28, 5  ;;  %v13829_v57 = vrot.slane %v6766_v51, 4  ;;  %v6786_v7 = vshll.u32 %v13806_v25, 16 }
 0x309   : > { %v7321_v19 = vrot.slane %v13529_v44, 5  ;;  %v13833_v0 = vcombine.low %v6717_v11, %v6727_v24  ;;  %v13840_v42 = vrot.slane %v6777_v1, 4  ;;  %v15283_v26 = vcombine.low %v13471_v49, %v13438_v47  ;;  %v7245_v1 = vld [vmem:[#allocation3 + $0x48] sm:$0xe]  ;;  %v7246_v11 = vld [vmem:[#allocation3 + $0x54] sm:$0xe] }
 0x30a   : > { %v13845_v33 = vrot.slane %v6780_v27, 5  ;;  %v6790_v44 = vshrl.u32 %v13806_v25, 16  ;;  %v6801_v54 = vshrl.u32 %v13825_v62, 16  ;;  %v9357_v58 = vrot.slane %v7243_v55, 9  ;;  %v7251_v24 = vld [vmem:[#allocation3 + $0x90] sm:$0xe] }
 0x30b   : > { %10010 = vmatmul.mubr.bf16.gmra.mxu1 %v13505_v5  ;;  %v7323_v31 = vrot.slane %v7321_v19, 4  ;;  %v7324_v41 = vrot.slane %v13584_v16, 5  ;;  %v9358_v8 = vrot.slane %v7244_v36, 9  ;;  %v15284_v13 = vrot.slane %v13609_v32, 5  ;;  %v13870_v32 = vld [vmem:[#allocation3 + $0xa0] sm:$0xf] }
 0x30c   : > { %10062 = vmatmul.mubr.bf16.gmra.mxu0 %v15283_v26  ;;  %10013 = vmatprep.mubr.bf16.mxu1 %v13642_v52  ;;  %v13875_v52 = vsel %vm12346_vm8, %v9357_v58, %v7321_v19  ;;  %v15285_v51 = vrot.slane %v13554_v39, 5  ;;  %v13889_v27 = vrot.slane %v6790_v44, 4  ;;  %v13895_v19 = vrot.slane %v6801_v54, 4  ;;  %v13900_v58 = vpop.f32.mrf.mxu0  ;;  %v13907_v54 = vld [vmem:[%s15074_s3 + $0x230] sm:$0xff]   ;;  %v11024_v16 = vld [vmem:[#allocation3 + $0x30] sm:$0xff]  }
 0x30d   : > { %10129 = vmatprep.mubr.bf16.mxu0 %v13603_v53  ;;  %v13857_v47 = vsel %vm12346_vm8, %v13755_v4, %v15284_v13  ;;  %v13868_v53 = vrot.slane %v6786_v7, 5  ;;  %v6804_v4 = vshll.u32 %v13825_v62, 16  ;;  %v13879_v28 = vsel %vm12346_vm8, %v7323_v31, %v7324_v41  ;;  %v7247_v7 = vld [vmem:[#allocation3 + $0x60] sm:$0xe]  ;;  %15286 = vst [vmem:[#allocation15_spill] sm:$0xff] %v13900_v58 }
 0x30e   : > { %v13885_v10 = vsel %vm12346_vm8, %v9358_v8, %v15285_v51  ;;  %v7335_v36 = vrot.slane %v13593_v9, 5  ;;  %v7342_v26 = vrot.slane %v13650_v40, 5  ;;  %v9359_v31 = vrot.slane %v7245_v1, 9  ;;  %v7248_v13 = vld [vmem:[#allocation3 + $0x6c] sm:$0xe]  ;;  %v9863_v40 = vpop.f32.mrf.mxu0  ;;  %v11021_v1 = vld [vmem:[#allocation3 + $0x18] sm:$0xff]  }
 0x30f   : > { %v7338_v44 = vrot.slane %v13637_v3, 5  ;;  %v9360_v41 = vrot.slane %v7246_v11, 9  ;;  %v7349_v8 = vrot.slane %v13664_v6, 5  ;;  %v7345_v9 = vrot.slane %v13710_v56, 5  ;;  %v13968_v5 = vld [vmem:[#allocation3 + $0x98] sm:$0x1] }
 0x310   : > { %v7337_v51 = vrot.slane %v7335_v36, 4  ;;  %v7344_v62 = vrot.slane %v7342_v26, 4  ;;  %v9361_v55 = vrot.slane %v7247_v7, 9  ;;  %v13913_v3 = vsel %vm12346_vm8, %v9359_v31, %v7335_v36  ;;  %v13934_v31 = vpop.f32.mrf.mxu1  ;;  %v7253_v58 = vld [vmem:[#allocation3 + $0xa8] sm:$0xe] }
 0x311   : > { %v13917_v6 = vsel %vm12346_vm8, %v9360_v41, %v7342_v26  ;;  %v7351_v11 = vrot.slane %v7349_v8, 4  ;;  %v7352_v12 = vrot.slane %v13729_v50, 5  ;;  %v9362_v36 = vrot.slane %v7248_v13, 9  ;;  %v7249_v26 = vld [vmem:[#allocation3 + $0x78] sm:$0xe]  ;;  %15287 = vst [vmem:[#allocation44_spill] sm:$0xff] %v13934_v31 }
 0x312   : > { %v13924_v56 = vsel %vm12346_vm8, %v7337_v51, %v7338_v44  ;;  %v13932_v7 = vsel %vm12346_vm8, %v9361_v55, %v7349_v8  ;;  %v15288_v50 = vld [vmem:[#allocation33_spill] sm:$0xff]  ;;  %v15289_v44 = vld [vmem:[#allocation39_spill] sm:$0xff]  ;;  %v13949_v41 = vld [vmem:[%s15074_s3 + $0x228] sm:$0xff]   ;;  %v13954_v13 = vrot.slane %v6804_v4, 5  ;;  %v9363_v18 = vrot.slane %v7249_v26, 9 }
 0x313   : > { %10014 = vmatmul.mubr.bf16.gmra.mxu1 %v13646_v43  ;;  %v7356_v55 = vrot.slane %v15289_v44, 5  ;;  %v7359_v43 = vrot.slane %v13761_v17, 5  ;;  %v7366_v8 = vrot.slane %v13767_v21, 5  ;;  %v7370_v51 = vrot.slane %v13774_v34, 5  ;;  %v11023_v34 = vld [vmem:[#allocation3 + $0x24] sm:$0xff]  }
 0x314   : > { %10130 = vmatmul.mubr.bf16.vlgmr.msra.gmra.mxu0 %v13644_v22  ;;  %v13928_v22 = vsel %vm12346_vm8, %v7344_v62, %v7345_v9  ;;  %10081 = vmatprep.mubr.bf16.mxu1 %v11021_v1  ;;  %v13943_v62 = vsel %vm12346_vm8, %v7351_v11, %v7352_v12  ;;  %v7363_v12 = vrot.slane %v13724_v48, 5  ;;  %v7250_v9 = vld [vmem:[#allocation3 + $0x84] sm:$0xe]  ;;  %v3936_v1 = vpop.f32.mrf.mxu0  ;;  %v9815_v11 = vpop.f32.mrf.mxu1  ;;  %v7377_v21 = vrot.slane %v13806_v25, 5  ;;  %v13996_v25 = vld [vmem:[%s15074_s3 + $0x220] sm:$0xff]  }
 0x315   : > { %10133 = vmatprep.mubr.bf16.mxu0 %v13687_v23  ;;  %10162 = vmatpush3.bf16.msra.mxu0 %v15288_v50  ;;  %v13961_v44 = vsel %vm12346_vm8, %v9362_v36, %v7356_v55  ;;  %v7358_v23 = vrot.slane %v7356_v55, 4  ;;  %v13964_v49 = vadd.f32 %v9863_v40, %v9815_v11  ;;  %v9364_v40 = vrot.slane %v7250_v9, 9  ;;  %v13983_v55 = vld [vmem:[#allocation3 + $0xac] sm:$0xf] }
 0x316   : > { %10163 = vmatprep.subr.bf16.mxu0 %v13907_v54  ;;  %15290 = vst [vmem:[#allocation18_spill] sm:$0xff] %v13961_v44  ;;  %v7365_v4 = vrot.slane %v7363_v12, 4  ;;  %v3631_v48 = vpop.f32.mrf.mxu1  ;;  %v13977_v17 = vsel %vm12346_vm8, %v9363_v18, %v7363_v12  ;;  %v7373_v18 = vrot.slane %v13815_v59, 5  ;;  %v9864_v12 = vpop.f32.mrf.mxu0  ;;  %v7372_v11 = vrot.slane %v7370_v51, 4 }
 0x317   : > { %15291 = vst [vmem:[#allocation19_spill] sm:$0xff] %v13964_v49  ;;  %v13973_v36 = vsel %vm12346_vm8, %v7358_v23, %v7359_v43  ;;  %15293 = vst [vmem:[#allocation20_spill] sm:$0xff] %v13977_v17  ;;  %v13980_v26 = vadd.f32 %v3936_v1, %v3631_v48  ;;  %v7252_v23 = vld [vmem:[#allocation3 + $0x9c] sm:$0xe]  ;;  %v13998_v1 = vld [vmem:[#allocation3 + $0xa4] sm:$0x1] }
 0x318   : > { %15292 = vst [vmem:[#allocation22_spill] sm:$0xff] %v13973_v36  ;;  %v13989_v43 = vsel %vm12346_vm8, %v7365_v4, %v7366_v8  ;;  %v9816_v9 = vpop.f32.mrf.mxu1  ;;  %v9365_v8 = vrot.slane %v7251_v24, 9  ;;  %v7379_v4 = vrot.slane %v7377_v21, 4  ;;  %v7380_v49 = vrot.slane %v13968_v5, 5  ;;  %v14014_v24 = vld [vmem:[#allocation3 + $0xb8] sm:$0xf] }
 0x319   : > { %10164 = vmatpush3.bf16.msra.mxu0 %v13907_v54  ;;  %15294 = vst [vmem:[#allocation21_spill] sm:$0xff] %v13980_v26  ;;  %15295 = vst [vmem:[#allocation10_spill] sm:$0xff] %v13989_v43  ;;  %v14002_v39 = vadd.f32 %v9864_v12, %v9816_v9  ;;  %v14005_v26 = vld [vmem:[#allocation3 + $0xb0] sm:$0x1]  ;;  %v7384_v30 = vrot.slane %v13870_v32, 5  ;;  %v9367_v48 = vrot.slane %v7253_v58, 9 }
 0x31a   : > { %10165 = vmatprep.subr.bf16.mxu0 %v13949_v41  ;;  %v14016_v12 = vld [vmem:[#allocation3 + $0xbc] sm:$0x1]  ;;  %v7254_v9 = vld [vmem:[#allocation3 + $0xb4] sm:$0xe]  ;;  %v7398_v43 = vrot.slane %v14014_v24, 5  ;;  %vm8857_vm14 = vcmask 1045509  }
 0x31b   : > { %15296 = vst [vmem:[#allocation11_spill] sm:$0xff] %v14002_v39  ;;  %10082 = vmatmul.mubr.bf16.vlgmr.msra.gmra.mxu1 %v11023_v34  ;;  %v7391_v34 = vrot.slane %v13983_v55, 5  ;;  %v7256_v17 = vld [vmem:[#allocation3 + $0xcc] sm:$0xe]  ;;  %v11026_v36 = vld [vmem:[#allocation3 + $0x3c] sm:$0xff]   ;;  %v7401_v58 = vrot.slane %v14016_v12, 5 }
 0x31c   : > { %10134 = vmatmul.mubr.bf16.gmra.mxu0 %v13751_v60  ;;  %v14009_v60 = vsel %vm12346_vm8, %v9364_v40, %v7370_v51  ;;  %10217 = vmatpush3.bf16.msra.mxu1 %v15288_v50  ;;  %v14024_v51 = vsel %vm12346_vm8, %v9365_v8, %v7377_v21  ;;  %v9366_v40 = vrot.slane %v7252_v23, 9  ;;  %v7387_v21 = vrot.slane %v13998_v1, 5  ;;  %v14042_v8 = vld [vmem:[%s15074_s3 + $0x218] sm:$0xff]  }
 0x31d   : > { %10137 = vmatprep.mubr.bf16.mxu0 %v13771_v37  ;;  %15297 = vst [vmem:[#allocation24_spill] sm:$0xff] %v14009_v60  ;;  %10085 = vmatprep.mubr.bf16.mxu1 %v11024_v16  ;;  %v14020_v37 = vsel %vm12346_vm8, %v7372_v11, %v7373_v18  ;;  %15299 = vst [vmem:[#allocation33_spill] sm:$0xff] %v14024_v51  ;;  %v14029_v16 = vld [vmem:[#allocation3 + $0xc4] sm:$0xf]  ;;  %v14035_v11 = vsel %vm12346_vm8, %v7379_v4, %v7380_v49  ;;  %v7386_v18 = vrot.slane %v7384_v30, 4  ;;  %vm8861_vm1 = vcmask 1047559  }
 0x31e   : > { %15298 = vst [vmem:[#allocation23_spill] sm:$0xff] %v14020_v37  ;;  %10210 = vmatprep.subr.bf16.mxu1 %v13907_v54  ;;  %10166 = vmatpush3.bf16.msra.mxu0 %v13949_v41  ;;  %15300 = vst [vmem:[#allocation39_spill] sm:$0xff] %v14035_v11  ;;  %v6814_v23 = vshrl.u32 %v13870_v32, 16  ;;  %v7393_v39 = vrot.slane %v7391_v34, 4  ;;  %v7255_v49 = vld [vmem:[#allocation3 + $0xc0] sm:$0xe]  ;;  %v14051_v31 = vsel %vm12346_vm8, %v9366_v40, %v7384_v30 }
 0x31f   : > { %10167 = vmatprep.subr.bf16.mxu0 %v13996_v25  ;;  %v14047_v4 = vld [vmem:[#allocation3 + $0xc8] sm:$0x1]  ;;  %15301 = vst [vmem:[#allocation46_spill] sm:$0xff] %v14051_v31  ;;  %v14055_v37 = vsel %vm12346_vm8, %v7386_v18, %v7387_v21  ;;  %v7394_v60 = vrot.slane %v14005_v26, 5  ;;  %v14064_v50 = vsel %vm12346_vm8, %v9367_v48, %v7391_v34  ;;  %v9368_v30 = vrot.slane %v7254_v9, 9  ;;  %v14081_v48 = vld [vmem:[%s15074_s3 + $0x210] sm:$0xff]  }
 0x320   : > { %15302 = vst [vmem:[#allocation47_spill] sm:$0xff] %v14055_v37  ;;  %10218 = vmatpush3.bf16.msra.mxu1 %v13907_v54  ;;  %v7405_v40 = vrot.slane %v14029_v16, 5  ;;  %v11027_v18 = vld [vmem:[#allocation3 + $0x48] sm:$0xff]   ;;  %v14069_v21 = vld [vmem:[#allocation3 + $0xd0] sm:$0xf]  ;;  %v7400_v11 = vrot.slane %v7398_v43, 4 }
 0x321   : > { %10211 = vmatprep.subr.bf16.mxu1 %v13949_v41  ;;  %v14073_v54 = vsel %vm12346_vm8, %v7393_v39, %v7394_v60  ;;  %v9369_v37 = vrot.slane %v7255_v49, 9  ;;  %v14083_v34 = vld [vmem:[#allocation3 + $0xd4] sm:$0x1]  ;;  %v7408_v60 = vrot.slane %v14047_v4, 5  ;;  %v9370_v31 = vrot.slane %v7256_v17, 9 }
 0x322   : > { %10168 = vmatpush3.bf16.msra.mxu0 %v13996_v25  ;;  %v9383_v9 = vcombine.low %v14064_v50, %v14073_v54  ;;  %v7407_v39 = vrot.slane %v7405_v40, 4  ;;  %v14095_v49 = vsel %vm12346_vm8, %v7400_v11, %v7401_v58  ;;  %v7412_v51 = vrot.slane %v14069_v21, 5 }
 0x323   : > { %10169 = vmatprep.subr.bf16.mxu0 %v14042_v8  ;;  %10086 = vmatmul.mubr.bf16.gmra.mxu1 %v11026_v36  ;;  %v7415_v44 = vrot.slane %v14083_v34, 5  ;;  %v15303_v17 = vshll.u32 %v13870_v32, 16  ;;  %v6816_v58 = vrot.slane %v6814_v23, 4  ;;  %v6838_v23 = vshrl.u32 %v13983_v55, 16 }
 0x324   : > { %10138 = vmatmul.mubr.bf16.gmra.mxu0 %v13799_v35  ;;  %v14091_v35 = vsel %vm12346_vm8, %v9368_v30, %v7398_v43  ;;  %10089 = vmatprep.mubr.bf16.mxu1 %v11027_v18  ;;  %v14108_v43 = vsel %vm12346_vm8, %v9369_v37, %v7405_v40  ;;  %v14112_v11 = vsel %vm12346_vm8, %v7407_v39, %v7408_v60  ;;  %v6524_v30 = vld [vmem:[#allocation3 + $0xa8] sm:$0xf]  ;;  %v7414_v18 = vrot.slane %v7412_v51, 4 }
 0x325   : > { %10141 = vmatprep.mubr.bf16.mxu0 %v13808_v29  ;;  %10219 = vmatpush3.bf16.msra.mxu1 %v13949_v41  ;;  %v14102_v36 = vrot.slane %v15303_v17, 5  ;;  %v14120_v41 = vsel %vm12346_vm8, %v9370_v31, %v7412_v51  ;;  %v15304_v37 = vor.u32 %v13823_v15, %v13821_v45  ;;  %v6796_v39 = vshll.u32 %v13968_v5, 16  ;;  %v14132_v17 = vld [vmem:[%s15074_s3 + $0x208] sm:$0xff]  }
 0x326   : > { %10212 = vmatprep.subr.bf16.mxu1 %v13996_v25  ;;  %10170 = vmatpush3.bf16.msra.mxu0 %v14042_v8  ;;  %v6834_v60 = vshll.u32 %v13983_v55, 16  ;;  %v15305_v31 = vor.u32 %v13829_v57, %v13827_v38  ;;  %v15306_v45 = vor.u32 %v13845_v33, %v13840_v42  ;;  %v6807_v5 = vor.u32 %v13954_v13, %v13895_v19  ;;  %v11029_v42 = vld [vmem:[#allocation3 + $0x54] sm:$0xff]   ;;  %v11030_v13 = vld [vmem:[#allocation3 + $0x60] sm:$0xff]  }
 0x327   : > { %v6760_v40 = vrot.slane %v15304_v37, 4  ;;  %10171 = vmatprep.subr.bf16.mxu0 %v14081_v48  ;;  %v14144_v55 = vsel %vm12346_vm8, %v7414_v18, %v7415_v44  ;;  %v15307_v37 = vor.u32 %v13889_v27, %v13868_v53  ;;  %v6825_v29 = vshrl.u32 %v6524_v30, 16 }
 0x328   : > { %v6770_v51 = vrot.slane %v15305_v31, 4  ;;  %v6784_v15 = vrot.slane %v15306_v45, 4  ;;  %v6828_v57 = vshll.u32 %v6524_v30, 16  ;;  %v9386_v31 = vcombine.low %v14120_v41, %v14144_v55  ;;  %v6527_v45 = vld [vmem:[#allocation3 + $0xb4] sm:$0xf] }
 0x329   : > { %v6794_v32 = vrot.slane %v15307_v37, 4  ;;  %10220 = vmatpush3.bf16.msra.mxu1 %v13996_v25  ;;  %v15308_v33 = vsel %vm12048_vm12, %v13817_v14, %v13819_v2  ;;  %v15309_v19 = vsel %vm12048_vm12, %v13804_v20, %v13769_v46  ;;  %v15310_v44 = vshll.u32 %v13815_v59, 16  ;;  %v14174_v46 = vld [vmem:[%s15074_s3 + $0x200] sm:$0xff]  }
 0x32a   : > { %v9339_v27 = vcombine.low %v15309_v19, %v15308_v33  ;;  %v6817_v30 = vor.u32 %v6816_v58, %v14102_v36  ;;  %10213 = vmatprep.subr.bf16.mxu1 %v14042_v8  ;;  %10172 = vmatpush3.bf16.msra.mxu0 %v14081_v48  ;;  %v6798_v18 = vrot.slane %v6796_v39, 5  ;;  %v14168_v14 = vrot.slane %v6834_v60, 5 }
 0x32b   : > { %v6774_v25 = vrot.slane %v15310_v44, 5  ;;  %v6840_v2 = vrot.slane %v6838_v23, 4  ;;  %10173 = vmatprep.subr.bf16.mxu0 %v14132_v17  ;;  %10090 = vmatmul.mubr.bf16.gmra.mxu1 %v11029_v42  ;;  %v6765_v20 = vsel %vm12048_vm12, %v6760_v40, %v13827_v38  ;;  %v6820_v58 = vshll.u32 %v13998_v1, 16  ;;  %v6530_v1 = vld [vmem:[#allocation3 + $0xc0] sm:$0xf] }
 0x32c   : > { %10142 = vmatmul.mubr.bf16.gmra.mxu0 %v13833_v0  ;;  %v6808_v0 = vrot.slane %v6807_v5, 4  ;;  %10093 = vmatprep.mubr.bf16.mxu1 %v11030_v13  ;;  %v6789_v39 = vsel %vm12048_vm12, %v6784_v15, %v13868_v53  ;;  %v6799_v60 = vsel %vm12048_vm12, %v6794_v32, %v6798_v18  ;;  %v6827_v23 = vrot.slane %v6825_v29, 4 }
 0x32d   : > { %10145 = vmatprep.mubr.bf16.mxu0 %v9339_v27  ;;  %v6775_v59 = vsel %vm12048_vm12, %v6770_v51, %v6774_v25  ;;  %v6830_v37 = vrot.slane %v6828_v57, 5  ;;  %10221 = vmatpush3.bf16.msra.mxu1 %v14042_v8  ;;  %v6818_v42 = vrot.slane %v6817_v30, 4  ;;  %v6849_v38 = vshrl.u32 %v6527_v45, 16  ;;  %v14196_v8 = vpop.f32.mrf.mxu0  ;;  %v6533_v25 = vld [vmem:[#allocation3 + $0xcc] sm:$0xf] }
 0x32e   : > { %v6858_v40 = vshll.u32 %v14014_v24, 16  ;;  %v6862_v51 = vshrl.u32 %v14014_v24, 16  ;;  %10214 = vmatprep.subr.bf16.mxu1 %v14081_v48  ;;  %10174 = vmatpush3.bf16.msra.mxu0 %v14132_v17  ;;  %v6841_v53 = vor.u32 %v6840_v2, %v14168_v14  ;;  %v6852_v15 = vshll.u32 %v6527_v45, 16  ;;  %v11032_v30 = vld [vmem:[#allocation3 + $0x6c] sm:$0xff]  }
 0x32f   : > { %v6882_v32 = vshll.u32 %v14029_v16, 16  ;;  %v6886_v29 = vshrl.u32 %v14029_v16, 16  ;;  %10175 = vmatprep.subr.bf16.mxu0 %v14174_v46  ;;  %v9340_v5 = vcombine.low %v6765_v20, %v6775_v59  ;;  %v9341_v57 = vcombine.low %v6789_v39, %v6799_v60  ;;  %v9867_v16 = vpop.f32.mrf.mxu0 }
 0x330   : > { %v6813_v24 = vsel %vm12048_vm12, %v6808_v0, %v14102_v36  ;;  %v6822_v33 = vrot.slane %v6820_v58, 5  ;;  %v6831_v19 = vor.u32 %v6830_v37, %v6827_v23  ;;  %v6844_v27 = vshll.u32 %v14005_v26, 16  ;;  %v11033_v26 = vld [vmem:[#allocation3 + $0x78] sm:$0xff]  }
 0x331   : > { %v6873_v13 = vshrl.u32 %v6530_v1, 16  ;;  %v6876_v44 = vshll.u32 %v6530_v1, 16  ;;  %10222 = vmatpush3.bf16.msra.mxu1 %v14081_v48  ;;  %v6851_v2 = vrot.slane %v6849_v38, 4  ;;  %v14205_v45 = vrot.slane %v6858_v40, 5  ;;  %v3952_v1 = vpop.f32.mrf.mxu0 }
 0x332   : > { %v6823_v18 = vsel %vm12048_vm12, %v6818_v42, %v6822_v33  ;;  %v6864_v20 = vrot.slane %v6862_v51, 4  ;;  %10215 = vmatprep.subr.bf16.mxu1 %v14132_v17  ;;  %10176 = vmatpush3.bf16.msra.mxu0 %v14174_v46  ;;  %v6842_v36 = vrot.slane %v6841_v53, 4  ;;  %v6854_v59 = vrot.slane %v6852_v15, 5  ;;  %v14214_v51 = vpop.f32.mrf.mxu1 }
 0x333   : > { %v14209_v0 = vrot.slane %v6882_v32, 5  ;;  %v6888_v48 = vrot.slane %v6886_v29, 4  ;;  %10094 = vmatmul.mubr.bf16.gmra.mxu1 %v11032_v30  ;;  %v6897_v58 = vshrl.u32 %v6533_v25, 16  ;;  %v6900_v39 = vshll.u32 %v6533_v25, 16  ;;  %v9868_v30 = vpop.f32.mrf.mxu0 }
 0x334   : > { %10146 = vmatmul.mubr.bf16.gmra.mxu0 %v9340_v5  ;;  %v6906_v60 = vshll.u32 %v14069_v21, 16  ;;  %v6910_v23 = vshrl.u32 %v14069_v21, 16  ;;  %10097 = vmatprep.mubr.bf16.mxu1 %v11033_v26  ;;  %v6832_v37 = vrot.slane %v6831_v19, 4  ;;  %v6846_v42 = vrot.slane %v6844_v27, 5 }
 0x335   : > { %10149 = vmatprep.mubr.bf16.mxu0 %v9341_v57  ;;  %v6875_v38 = vrot.slane %v6873_v13, 4  ;;  %v6878_v40 = vrot.slane %v6876_v44, 5  ;;  %10223 = vmatpush3.bf16.msra.mxu1 %v14132_v17  ;;  %v9342_v53 = vcombine.low %v6813_v24, %v6823_v18  ;;  %v6865_v15 = vor.u32 %v6864_v20, %v14205_v45  ;;  %v9819_v57 = vpop.f32.mrf.mxu1  ;;  %v11035_v18 = vld [vmem:[#allocation3 + $0x84] sm:$0xff]  }
 0x336   : > { %10216 = vmatprep.subr.bf16.mxu1 %v14174_v46  ;;  %v6847_v32 = vsel %vm12048_vm12, %v6842_v36, %v6846_v42  ;;  %v6855_v29 = vor.u32 %v6854_v59, %v6851_v2  ;;  %v6868_v21 = vshll.u32 %v14016_v12, 16  ;;  %v6889_v5 = vor.u32 %v6888_v48, %v14209_v0  ;;  %v11036_v36 = vld [vmem:[#allocation3 + $0x90] sm:$0xff]  }
 0x337   : > { %v6899_v33 = vrot.slane %v6897_v58, 4  ;;  %v6902_v19 = vrot.slane %v6900_v39, 5  ;;  %v6908_v17 = vrot.slane %v6906_v60, 5  ;;  %v6912_v27 = vrot.slane %v6910_v23, 4  ;;  %v3647_v12 = vpop.f32.mrf.mxu1 }
 0x338   : > { %v14222_v13 = vadd.f32 %v9867_v16, %v9819_v57  ;;  %v6837_v24 = vsel %vm12048_vm12, %v6832_v37, %v14168_v14  ;;  %v6879_v44 = vor.u32 %v6878_v40, %v6875_v38  ;;  %v6892_v25 = vshll.u32 %v14047_v4, 16  ;;  %v3955_v37 = vpop.f32.mrf.mxu0 }
 0x339   : > { %10224 = vmatpush3.bf16.msra.mxu1 %v14174_v46  ;;  %v9343_v2 = vcombine.low %v6837_v24, %v6847_v32  ;;  %v6866_v20 = vrot.slane %v6865_v15, 4  ;;  %v14229_v26 = vadd.f32 %v3952_v1, %v3647_v12  ;;  %v6856_v16 = vrot.slane %v6855_v29, 4  ;;  %v9820_v48 = vpop.f32.mrf.mxu1 }
 0x33a   : > { %v6890_v59 = vrot.slane %v6889_v5, 4  ;;  %v6870_v14 = vrot.slane %v6868_v21, 5  ;;  %v6903_v58 = vor.u32 %v6902_v19, %v6899_v33  ;;  %v6913_v39 = vor.u32 %v6912_v27, %v6908_v17  ;;  %v11038_v33 = vld [vmem:[#allocation3 + $0x9c] sm:$0xff]   ;;  %v11039_v27 = vld [vmem:[#allocation3 + $0xa8] sm:$0xff]  }
 0x33b   : > { %10098 = vmatmul.mubr.bf16.gmra.mxu1 %v11035_v18  ;;  %v6916_v4 = vshll.u32 %v14083_v34, 16  ;;  %v14232_v46 = vadd.f32 %v9868_v30, %v9820_v48  ;;  %v6880_v60 = vrot.slane %v6879_v44, 4  ;;  %v6894_v23 = vrot.slane %v6892_v25, 5  ;;  %v3650_v42 = vpop.f32.mrf.mxu1  ;;  %v7241_v25 = vld [vmem:[#allocation3 + $0x18] sm:$0xe] }
 0x33c   : > { %10150 = vmatmul.mubr.bf16.gmra.mxu0 %v9342_v53  ;;  %10101 = vmatprep.mubr.bf16.mxu1 %v11036_v36  ;;  %v6871_v38 = vsel %vm12048_vm12, %v6866_v20, %v6870_v14  ;;  %v14236_v40 = vadd.f32 %v3955_v37, %v3650_v42  ;;  %v11057_v53 = vld [vmem:[#allocation3 + $0x1c] sm:$0xf]  ;;  %v6861_v34 = vsel %vm12048_vm12, %v6856_v16, %v14205_v45  ;;  %v6904_v32 = vrot.slane %v6903_v58, 4  ;;  %v11058_v30 = vld [vmem:[#allocation3 + $0x20] sm:$0x1] }
 0x33d   : > { %10153 = vmatprep.mubr.bf16.mxu0 %v9343_v2  ;;  %v6895_v1 = vsel %vm12048_vm12, %v6890_v59, %v6894_v23  ;;  %v7307_v15 = vrot.slane %v11057_v53, 5  ;;  %v6914_v29 = vrot.slane %v6913_v39, 4  ;;  %v6918_v21 = vrot.slane %v6916_v4, 5  ;;  %v11059_v18 = vld [vmem:[#allocation3 + $0x28] sm:$0xf]  ;;  %v11041_v59 = vld [vmem:[#allocation3 + $0xb4] sm:$0xff]  }
 0x33e   : > { %v9344_v5 = vcombine.low %v6861_v34, %v6871_v38  ;;  %v6885_v57 = vsel %vm12048_vm12, %v6880_v60, %v14209_v0  ;;  %v6909_v44 = vsel %vm12048_vm12, %v6904_v32, %v6908_v17  ;;  %v7310_v12 = vrot.slane %v11058_v30, 5  ;;  %v7242_v58 = vld [vmem:[#allocation3 + $0x24] sm:$0xe]  ;;  %v11060_v39 = vld [vmem:[#allocation3 + $0x2c] sm:$0x1] }
 0x33f   : > { %v9345_v19 = vcombine.low %v6885_v57, %v6895_v1  ;;  %v7309_v24 = vrot.slane %v7307_v15, 4  ;;  %v6919_v45 = vsel %vm12048_vm12, %v6914_v29, %v6918_v21  ;;  %v7314_v2 = vrot.slane %v11059_v18, 5  ;;  %v11044_v1 = vld [vmem:[#allocation3 + $0xcc] sm:$0xff]   ;;  %v15313_v18 = vld [vmem:[#allocation30_spill] sm:$0xff] }
 0x340   : > { %v9346_v0 = vcombine.low %v6909_v44, %v6919_v45  ;;  %v9355_v20 = vrot.slane %v7241_v25, 9  ;;  %v7317_v4 = vrot.slane %v11060_v39, 5  ;;  %v9356_v23 = vrot.slane %v7242_v58, 9  ;;  %v15318_v58 = vld [vmem:[#allocation32_spill] sm:$0xff] }
 0x341   : > { %v7311_v36 = vsel %vm12346_vm8, %v7309_v24, %v7310_v12  ;;  %v7316_v17 = vrot.slane %v7314_v2, 4  ;;  %v15312_v12 = vcombine.low %v13885_v10, %v13857_v47 }
 0x342   : > { %v7308_v16 = vsel %vm12346_vm8, %v9355_v20, %v7307_v15  ;;  %v7315_v38 = vsel %vm12346_vm8, %v9356_v23, %v7314_v2  ;;  %v15314_v2 = vcombine.low %v13913_v3, %v13924_v56  ;;  %v15315_v20 = vld [vmem:[#allocation31_spill] sm:$0xff] }
 0x343   : > { %10102 = vmatmul.mubr.bf16.gmra.mxu1 %v11038_v33  ;;  %v9371_v48 = vcombine.low %v7308_v16, %v7311_v36  ;;  %v7318_v37 = vsel %vm12346_vm8, %v7316_v17, %v7317_v4  ;;  %v15316_v17 = vld [vmem:[#allocation35_spill] sm:$0xff] }
 0x344   : > { %10154 = vmatmul.mubr.bf16.gmra.mxu0 %v9344_v5  ;;  %10105 = vmatprep.mubr.bf16.mxu1 %v11039_v27  ;;  %v9372_v15 = vcombine.low %v7315_v38, %v7318_v37  ;;  %v15311_v5 = vcombine.low %v13875_v52, %v13879_v28  ;;  %v15319_v37 = vcombine.low %v13917_v6, %v13928_v22  ;;  %v15325_v22 = vld [vmem:[#allocation38_spill] sm:$0xff] }
 0x345   : > { %10157 = vmatprep.mubr.bf16.mxu0 %v9345_v19 }
 0x346   : > { %v9871_v14 = vpop.f32.mrf.mxu0 }
 0x348   : > { %v3968_v60 = vpop.f32.mrf.mxu0 }
 0x34a   : > { %v9872_v42 = vpop.f32.mrf.mxu0 }
 0x34b   : > { %10106 = vmatmul.mubr.bf16.gmra.mxu1 %v11041_v59 }
 0x34c   : > { %10158 = vmatmul.mubr.bf16.gmra.mxu0 %v9346_v0  ;;  %10109 = vmatprep.mubr.bf16.mxu1 %v11042_v61  ;;  %v3971_v53 = vpop.f32.mrf.mxu0 }
 0x34d   : > { %10177 = vmatprep.mubr.bf16.mxu0 %v9371_v48 }
 0x34e   : > { %v9939_v34 = vpop.f32.mrf.mxu0 }
 0x34f   : > { %v9823_v32 = vpop.f32.mrf.mxu1 }
 0x350   : > { %v14258_v29 = vadd.f32 %v9871_v14, %v9823_v32  ;;  %v4693_v21 = vpop.f32.mrf.mxu0  ;;  %v15317_v14 = vld [vmem:[#allocation34_spill] sm:$0xff]  ;;  %v15322_v32 = vld [vmem:[#allocation37_spill] sm:$0xff] }
 0x351   : > { %v3663_v57 = vpop.f32.mrf.mxu1  ;;  %v3860_v61 = vadd.f32 %v15317_v14, %v15316_v17  ;;  %v15330_v14 = vld [vmem:[#allocation20_spill] sm:$0xff] }
 0x352   : > { %v14263_v33 = vadd.f32 %v3968_v60, %v3663_v57  ;;  %v9940_v19 = vpop.f32.mrf.mxu0 }
 0x353   : > { %10110 = vmatmul.mubr.bf16.gmra.mxu1 %v11044_v1  ;;  %v9824_v63 = vpop.f32.mrf.mxu1 }
 0x354   : > { %10178 = vmatmul.mubr.bf16.vlgmr.msra.gmra.mxu0 %v9372_v15  ;;  %10181 = vmatprep.mubr.bf16.mxu1 %v15311_v5  ;;  %v14265_v27 = vadd.f32 %v9872_v42, %v9824_v63  ;;  %v4696_v24 = vpop.f32.mrf.mxu0  ;;  %v15320_v42 = vld [vmem:[#allocation36_spill] sm:$0xff]  ;;  %v15323_v63 = vld [vmem:[#allocation14_spill] sm:$0xff] }
 0x355   : > { %v3666_v44 = vpop.f32.mrf.mxu1 }
 0x356   : > { %v14267_v45 = vadd.f32 %v3971_v53, %v3666_v44  ;;  %v9943_v25 = vpop.f32.mrf.mxu0  ;;  %v15321_v53 = vcombine.low %v13932_v7, %v13943_v62  ;;  %v15324_v44 = vld [vmem:[#allocation13_spill] sm:$0xff] }
 0x357   : > { %v3876_v6 = vadd.f32 %v15324_v44, %v15323_v63 }
 0x358   : > { %v9891_v30 = vpop.f32.mrf.mxu1  ;;  %v4709_v28 = vpop.f32.mrf.mxu0 }
 0x359   : > { %v4437_v52 = vadd.f32 %v9891_v30, %v15313_v18 }
 0x35a   : > { %v4308_v0 = vpop.f32.mrf.mxu1  ;;  %v9944_v16 = vpop.f32.mrf.mxu0 }
 0x35b   : > { %10182 = vmatmul.mubr.bf16.vlgmr.msra.gmra.mxu1 %v15312_v12  ;;  %v4435_v36 = vadd.f32 %v4308_v0, %v15315_v20  ;;  %v14277_v59 = vadd.f32 %v9939_v34, %v4437_v52  ;;  %v15326_v0 = vld [vmem:[#allocation18_spill] sm:$0xff] }
 0x35c   : > { %10185 = vmatprep.mubr.bf16.mxu1 %v15314_v2  ;;  %v9892_v48 = vpop.f32.mrf.mxu1  ;;  %v4712_v10 = vpop.f32.mrf.mxu0  ;;  %v15327_v20 = vld [vmem:[#allocation22_spill] sm:$0xff] }
 0x35d   : > { %v4438_v47 = vadd.f32 %v9892_v48, %v15318_v58  ;;  %v14282_v39 = vadd.f32 %v4693_v21, %v4435_v36  ;;  %v15328_v36 = vcombine.low %v15326_v0, %v15327_v20  ;;  %v15341_v20 = vld [vmem:[#allocation33_spill] sm:$0xff] }
 0x35e   : > { %v4311_v4 = vpop.f32.mrf.mxu1  ;;  %v9947_v23 = vpop.f32.mrf.mxu0 }
 0x35f   : > { %v4436_v60 = vadd.f32 %v4311_v4, %v3860_v61  ;;  %v14284_v3 = vadd.f32 %v9940_v19, %v4438_v47  ;;  %v15331_v61 = vld [vmem:[#allocation10_spill] sm:$0xff]  ;;  %v15333_v4 = vld [vmem:[#allocation17_spill] sm:$0xff] }
 0x360   : > { %v4725_v1 = vpop.f32.mrf.mxu0  ;;  %v15332_v58 = vcombine.low %v15330_v14, %v15331_v61  ;;  %v15344_v14 = vld [vmem:[#allocation29_spill] sm:$0xff] }
 0x361   : > { %v9895_v56 = vpop.f32.mrf.mxu1  ;;  %v14293_v15 = vadd.f32 %v4696_v24, %v4436_v60 }
 0x362   : > { %v4441_v38 = vadd.f32 %v9895_v56, %v15320_v42  ;;  %v9948_v5 = vpop.f32.mrf.mxu0  ;;  %v15334_v42 = vld [vmem:[#allocation28_spill] sm:$0xff] }
 0x363   : > { %10186 = vmatmul.mubr.bf16.gmra.mxu1 %v15319_v37  ;;  %v4324_v34 = vpop.f32.mrf.mxu1 }
 0x364   : > { %10189 = vmatprep.mubr.bf16.mxu1 %v15321_v53  ;;  %v4439_v21 = vadd.f32 %v4324_v34, %v15322_v32  ;;  %v14296_v57 = vadd.f32 %v9943_v25, %v4441_v38  ;;  %v4728_v12 = vpop.f32.mrf.mxu0  ;;  %v15329_v25 = vld [vmem:[#allocation16_spill] sm:$0xff]  ;;  %v15335_v38 = vld [vmem:[#allocation25_spill] sm:$0xff] }
 0x365   : > { %v9896_v19 = vpop.f32.mrf.mxu1  ;;  %v3892_v53 = vadd.f32 %v15335_v38, %v15334_v42  ;;  %v15336_v34 = vld [vmem:[#allocation45_spill] sm:$0xff]  ;;  %v15347_v42 = vld [vmem:[#allocation27_spill] sm:$0xff] }
 0x366   : > { %v4442_v30 = vadd.f32 %v9896_v19, %v15325_v22  ;;  %v14301_v18 = vadd.f32 %v4709_v28, %v4439_v21  ;;  %v9951_v62 = vpop.f32.mrf.mxu0 }
 0x367   : > { %v4327_v52 = vpop.f32.mrf.mxu1 }
 0x368   : > { %v4440_v7 = vadd.f32 %v4327_v52, %v3876_v6  ;;  %v14303_v24 = vadd.f32 %v9944_v16, %v4442_v30  ;;  %v4741_v17 = vpop.f32.mrf.mxu0  ;;  %v15337_v30 = vld [vmem:[#allocation24_spill] sm:$0xff]  ;;  %v15338_v52 = vld [vmem:[#allocation23_spill] sm:$0xff] }
 0x369   : > { %v9899_v2 = vpop.f32.mrf.mxu1 }
 0x36a   : > { %v4445_v48 = vadd.f32 %v9899_v2, %v15329_v25  ;;  %v14312_v47 = vadd.f32 %v4712_v10, %v4440_v7  ;;  %v9952_v56 = vpop.f32.mrf.mxu0  ;;  %v15339_v7 = vcombine.low %v15337_v30, %v15338_v52  ;;  %v15348_v30 = vld [vmem:[#allocation46_spill] sm:$0xff]  ;;  %v15349_v52 = vld [vmem:[#allocation47_spill] sm:$0xff] }
 0x36b   : > { %10190 = vmatmul.mubr.bf16.gmra.mxu1 %v15328_v36  ;;  %v4340_v28 = vpop.f32.mrf.mxu1  ;;  %v15342_v36 = vld [vmem:[#allocation39_spill] sm:$0xff] }
 0x36c   : > { %10193 = vmatprep.mubr.bf16.mxu1 %v15332_v58  ;;  %v4443_v60 = vadd.f32 %v4340_v28, %v15333_v4  ;;  %v14315_v16 = vadd.f32 %v9947_v23, %v4445_v48  ;;  %v4744_v21 = vpop.f32.mrf.mxu0  ;;  %v15340_v23 = vld [vmem:[#allocation26_spill] sm:$0xff]  ;;  %v15343_v25 = vcombine.low %v15341_v20, %v15342_v36  ;;  %v15345_v4 = vld [vmem:[#allocation40_spill] sm:$0xff] }
 0x36d   : > { %v9900_v37 = vpop.f32.mrf.mxu1  ;;  %v15352_v36 = vld [vmem:[#allocation42_spill] sm:$0xff] }
 0x36e   : > { %v4446_v32 = vadd.f32 %v9900_v37, %v15336_v34  ;;  %v14320_v19 = vadd.f32 %v4725_v1, %v4443_v60  ;;  %v9955_v6 = vpop.f32.mrf.mxu0  ;;  %v15346_v60 = vld [vmem:[#allocation41_spill] sm:$0xff] }
 0x36f   : > { %v4343_v63 = vpop.f32.mrf.mxu1  ;;  %v3908_v37 = vadd.f32 %v15346_v60, %v15345_v4  ;;  %v15355_v60 = vld [vmem:[#allocation43_spill] sm:$0xff] }
 0x370   : > { %v4444_v44 = vadd.f32 %v4343_v63, %v3892_v53  ;;  %v14322_v10 = vadd.f32 %v9948_v5, %v4446_v32  ;;  %v4757_v0 = vpop.f32.mrf.mxu0 }
 0x371   : > { %v9903_v22 = vpop.f32.mrf.mxu1 }
 0x372   : > { %v4449_v2 = vadd.f32 %v9903_v22, %v15340_v23  ;;  %v14331_v48 = vadd.f32 %v4728_v12, %v4444_v44  ;;  %v9956_v58 = vpop.f32.mrf.mxu0 }
 0x373   : > { %10194 = vmatmul.mubr.bf16.gmra.mxu1 %v15339_v7  ;;  %v4356_v1 = vpop.f32.mrf.mxu1  ;;  %v15350_v7 = vcombine.low %v15348_v30, %v15349_v52  ;;  %v15358_v52 = vcombine.low %v14108_v43, %v14112_v11 }
 0x374   : > { %10197 = vmatprep.mubr.bf16.mxu1 %v15343_v25  ;;  %v4447_v61 = vadd.f32 %v4356_v1, %v15344_v14  ;;  %v14334_v5 = vadd.f32 %v9951_v62, %v4449_v2  ;;  %v4760_v53 = vpop.f32.mrf.mxu0  ;;  %v15351_v62 = vld [vmem:[#allocation12_spill] sm:$0xff] }
 0x375   : > { %v9904_v28 = vpop.f32.mrf.mxu1 }
 0x376   : > { %v4450_v38 = vadd.f32 %v9904_v28, %v15347_v42  ;;  %v14339_v34 = vadd.f32 %v4741_v17, %v4447_v61  ;;  %v9959_v22 = vpop.f32.mrf.mxu0  ;;  %v15353_v61 = vld [vmem:[#allocation44_spill] sm:$0xff]  ;;  %v15354_v28 = vld [vmem:[#allocation15_spill] sm:$0xff] }
 0x377   : > { %v4359_v32 = vpop.f32.mrf.mxu1  ;;  %v3924_v4 = vadd.f32 %v15354_v28, %v15353_v61 }
 0x378   : > { %v4448_v63 = vadd.f32 %v4359_v32, %v3908_v37  ;;  %v14341_v12 = vadd.f32 %v9952_v56, %v4450_v38  ;;  %v4773_v2 = vpop.f32.mrf.mxu0 }
 0x379   : > { %v9907_v44 = vpop.f32.mrf.mxu1 }
 0x37a   : > { %v4453_v23 = vadd.f32 %v9907_v44, %v15351_v62  ;;  %v14350_v20 = vadd.f32 %v4744_v21, %v4448_v63  ;;  %v9960_v1 = vpop.f32.mrf.mxu0  ;;  %v15356_v63 = vcombine.low %v14091_v35, %v14095_v49  ;;  %v15359_v62 = vld [vmem:[#allocation21_spill] sm:$0xff]  ;;  %v3940_v35 = vadd.f32 %v14196_v8, %v14214_v51  ;;  %v15360_v49 = vld [vmem:[#allocation11_spill] sm:$0xff] }
 0x37b   : > { %10198 = vmatmul.mubr.bf16.gmra.mxu1 %v15350_v7  ;;  %v4372_v17 = vpop.f32.mrf.mxu1 }
 0x37c   : > { %10201 = vmatprep.mubr.bf16.mxu1 %v9383_v9  ;;  %v4451_v25 = vadd.f32 %v4372_v17, %v15352_v36  ;;  %v14353_v56 = vadd.f32 %v9955_v6, %v4453_v23  ;;  %v4776_v42 = vpop.f32.mrf.mxu0  ;;  %v15357_v6 = vld [vmem:[#allocation19_spill] sm:$0xff] }
 0x37d   : > { %v9908_v14 = vpop.f32.mrf.mxu1 }
 0x37e   : > { %v4454_v37 = vadd.f32 %v9908_v14, %v15355_v60  ;;  %v14358_v38 = vadd.f32 %v4757_v0, %v4451_v25  ;;  %v9963_v54 = vpop.f32.mrf.mxu0 }
 0x37f   : > { %v4375_v32 = vpop.f32.mrf.mxu1 }
 0x380   : > { %v4452_v50 = vadd.f32 %v4375_v32, %v3924_v4  ;;  %v14360_v9 = vadd.f32 %v9956_v58, %v4454_v37  ;;  %v4789_v30 = vpop.f32.mrf.mxu0 }
 0x381   : > { %v9911_v21 = vpop.f32.mrf.mxu1 }
 0x382   : > { %v4457_v44 = vadd.f32 %v9911_v21, %v15357_v6  ;;  %v14369_v7 = vadd.f32 %v4760_v53, %v4452_v50  ;;  %v9964_v17 = vpop.f32.mrf.mxu0 }
 0x383   : > { %10202 = vmatmul.mubr.bf16.gmra.mxu1 %v15356_v63  ;;  %v4388_v0 = vpop.f32.mrf.mxu1 }
 0x384   : > { %10205 = vmatprep.mubr.bf16.mxu1 %v15358_v52  ;;  %v4455_v23 = vadd.f32 %v4388_v0, %v15359_v62  ;;  %v14372_v58 = vadd.f32 %v9959_v22, %v4457_v44  ;;  %v4792_v14 = vpop.f32.mrf.mxu0 }
 0x385   : > { %v9912_v36 = vpop.f32.mrf.mxu1 }
 0x386   : > { %v4458_v25 = vadd.f32 %v9912_v36, %v15360_v49  ;;  %v14377_v61 = vadd.f32 %v4773_v2, %v4455_v23  ;;  %v9967_v11 = vpop.f32.mrf.mxu0 }
 0x387   : > { %v4391_v28 = vpop.f32.mrf.mxu1 }
 0x388   : > { %v4456_v43 = vadd.f32 %v4391_v28, %v3940_v35  ;;  %v14379_v53 = vadd.f32 %v9960_v1, %v4458_v25  ;;  %v4805_v60 = vpop.f32.mrf.mxu0 }
 0x389   : > { %v9915_v4 = vpop.f32.mrf.mxu1 }
 0x38a   : > { %v4461_v22 = vadd.f32 %v9915_v4, %v14222_v13  ;;  %v14385_v37 = vadd.f32 %v4776_v42, %v4456_v43  ;;  %v9968_v2 = vpop.f32.mrf.mxu0 }
 0x38b   : > { %10206 = vmatmul.mubr.bf16.gmra.mxu1 %v9386_v31  ;;  %v4404_v8 = vpop.f32.mrf.mxu1 }
 0x38c   : > { %v4459_v51 = vadd.f32 %v4404_v8, %v14229_v26  ;;  %v14388_v32 = vadd.f32 %v9963_v54, %v4461_v22  ;;  %v4808_v21 = vpop.f32.mrf.mxu0 }
 0x38d   : > { %v9916_v50 = vpop.f32.mrf.mxu1 }
 0x38e   : > { %v4462_v1 = vadd.f32 %v9916_v50, %v14232_v46  ;;  %v14391_v63 = vadd.f32 %v4789_v30, %v4459_v51 }
 0x38f   : > { %v4407_v6 = vpop.f32.mrf.mxu1 }
 0x390   : > { %v4460_v41 = vadd.f32 %v4407_v6, %v14236_v40  ;;  %v14394_v31 = vadd.f32 %v9964_v17, %v4462_v1 }
 0x391   : > { %v10035_v55 = vpop.f32.mrf.mxu0 }
 0x392   : > { %v9919_v13 = vpop.f32.mrf.mxu1  ;;  %v14397_v26 = vadd.f32 %v4792_v14, %v4460_v41 }
 0x393   : > { %v4465_v42 = vadd.f32 %v9919_v13, %v14258_v29  ;;  %v5943_v44 = vpop.f32.mrf.mxu0 }
 0x394   : > { %v4420_v54 = vpop.f32.mrf.mxu1 }
 0x395   : > { %v4463_v52 = vadd.f32 %v4420_v54, %v14263_v33  ;;  %v10036_v0 = vpop.f32.mrf.mxu0  ;;  %v14400_v46 = vadd.f32 %v9967_v11, %v4465_v42 }
 0x396   : > { %v9920_v30 = vpop.f32.mrf.mxu1 }
 0x397   : > { %v4466_v62 = vadd.f32 %v9920_v30, %v14265_v27  ;;  %v5946_v23 = vpop.f32.mrf.mxu0  ;;  %v14403_v40 = vadd.f32 %v4805_v60, %v4463_v52 }
 0x398   : > { %v4423_v17 = vpop.f32.mrf.mxu1 }
 0x399   : > { %v4464_v36 = vadd.f32 %v4423_v17, %v14267_v45  ;;  %v14406_v29 = vadd.f32 %v9968_v2, %v4466_v62 }
 0x39a   : > { %v10039_v35 = vpop.f32.mrf.mxu0  ;;  %v9987_v49 = vpop.f32.mrf.mxu1 }
 0x39b   : > { %v5575_v25 = vadd.f32 %v9987_v49, %v14277_v59  ;;  %v14409_v33 = vadd.f32 %v4808_v21, %v4464_v36 }
 0x39c   : > { %v5959_v14 = vpop.f32.mrf.mxu0  ;;  %v5446_v28 = vpop.f32.mrf.mxu1 }
 0x39d   : > { %v5573_v43 = vadd.f32 %v5446_v28, %v14282_v39  ;;  %v14412_v27 = vadd.f32 %v10035_v55, %v5575_v25 }
 0x39e   : > { %v10040_v11 = vpop.f32.mrf.mxu0  ;;  %v9988_v4 = vpop.f32.mrf.mxu1 }
 0x39f   : > { %v5576_v22 = vadd.f32 %v9988_v4, %v14284_v3  ;;  %v14415_v45 = vadd.f32 %v5943_v44, %v5573_v43 }
 0x3a0   : > { %v5962_v60 = vpop.f32.mrf.mxu0  ;;  %v5449_v8 = vpop.f32.mrf.mxu1 }
 0x3a1   : > { %v5574_v51 = vadd.f32 %v5449_v8, %v14293_v15  ;;  %v14418_v59 = vadd.f32 %v10036_v0, %v5576_v22 }
 0x3a2   : > { %v10043_v2 = vpop.f32.mrf.mxu0 }
 0x3a3   : > { %v9991_v50 = vpop.f32.mrf.mxu1  ;;  %v14421_v39 = vadd.f32 %v5946_v23, %v5574_v51 }
 0x3a4   : > { %v5579_v1 = vadd.f32 %v9991_v50, %v14296_v57  ;;  %v5975_v21 = vpop.f32.mrf.mxu0 }
 0x3a5   : > { %v5462_v6 = vpop.f32.mrf.mxu1 }
 0x3a6   : > { %v5577_v41 = vadd.f32 %v5462_v6, %v14301_v18  ;;  %v10044_v55 = vpop.f32.mrf.mxu0  ;;  %v14424_v3 = vadd.f32 %v10039_v35, %v5579_v1 }
 0x3a7   : > { %v9992_v13 = vpop.f32.mrf.mxu1 }
 0x3a8   : > { %v5580_v42 = vadd.f32 %v9992_v13, %v14303_v24  ;;  %v5978_v44 = vpop.f32.mrf.mxu0  ;;  %v14427_v15 = vadd.f32 %v5959_v14, %v5577_v41 }
 0x3a9   : > { %v5465_v54 = vpop.f32.mrf.mxu1 }
 0x3aa   : > { %v5578_v52 = vadd.f32 %v5465_v54, %v14312_v47  ;;  %v10047_v0 = vpop.f32.mrf.mxu0  ;;  %v14430_v57 = vadd.f32 %v10040_v11, %v5580_v42 }
 0x3ab   : > { %v9995_v30 = vpop.f32.mrf.mxu1 }
 0x3ac   : > { %v5583_v62 = vadd.f32 %v9995_v30, %v14315_v16  ;;  %v5991_v23 = vpop.f32.mrf.mxu0  ;;  %v14433_v18 = vadd.f32 %v5962_v60, %v5578_v52 }
 0x3ad   : > { %v5478_v17 = vpop.f32.mrf.mxu1 }
 0x3ae   : > { %v5581_v36 = vadd.f32 %v5478_v17, %v14320_v19  ;;  %v10048_v35 = vpop.f32.mrf.mxu0  ;;  %v14436_v24 = vadd.f32 %v10043_v2, %v5583_v62 }
 0x3af   : > { %v9996_v49 = vpop.f32.mrf.mxu1 }
 0x3b0   : > { %v5584_v25 = vadd.f32 %v9996_v49, %v14322_v10  ;;  %v5994_v14 = vpop.f32.mrf.mxu0  ;;  %v14439_v47 = vadd.f32 %v5975_v21, %v5581_v36 }
 0x3b1   : > { %v5481_v28 = vpop.f32.mrf.mxu1 }
 0x3b2   : > { %v5582_v43 = vadd.f32 %v5481_v28, %v14331_v48  ;;  %v10051_v11 = vpop.f32.mrf.mxu0  ;;  %v14442_v16 = vadd.f32 %v10044_v55, %v5584_v25 }
 0x3b3   : > { %v9999_v4 = vpop.f32.mrf.mxu1 }
 0x3b4   : > { %v5587_v22 = vadd.f32 %v9999_v4, %v14334_v5  ;;  %v6007_v60 = vpop.f32.mrf.mxu0  ;;  %v14445_v19 = vadd.f32 %v5978_v44, %v5582_v43 }
 0x3b5   : > { %v5494_v8 = vpop.f32.mrf.mxu1 }
 0x3b6   : > { %v5585_v51 = vadd.f32 %v5494_v8, %v14339_v34  ;;  %v10052_v2 = vpop.f32.mrf.mxu0  ;;  %v14448_v10 = vadd.f32 %v10047_v0, %v5587_v22 }
 0x3b7   : > { %v10000_v50 = vpop.f32.mrf.mxu1 }
 0x3b8   : > { %v5588_v1 = vadd.f32 %v10000_v50, %v14341_v12  ;;  %v6010_v21 = vpop.f32.mrf.mxu0  ;;  %v14451_v48 = vadd.f32 %v5991_v23, %v5585_v51 }
 0x3b9   : > { %v5497_v6 = vpop.f32.mrf.mxu1 }
 0x3ba   : > { %v5586_v41 = vadd.f32 %v5497_v6, %v14350_v20  ;;  %v14454_v5 = vadd.f32 %v10048_v35, %v5588_v1 }
 0x3bb   : > { %v10003_v13 = vpop.f32.mrf.mxu1 }
 0x3bc   : > { %v10055_v55 = vpop.f32.mrf.mxu0  ;;  %v5591_v42 = vadd.f32 %v10003_v13, %v14353_v56  ;;  %v14457_v34 = vadd.f32 %v5994_v14, %v5586_v41 }
 0x3bd   : > { %v5510_v54 = vpop.f32.mrf.mxu1 }
 0x3be   : > { %v6023_v44 = vpop.f32.mrf.mxu0  ;;  %v5589_v52 = vadd.f32 %v5510_v54, %v14358_v38  ;;  %v14460_v12 = vadd.f32 %v10051_v11, %v5591_v42 }
 0x3bf   : > { %v10004_v30 = vpop.f32.mrf.mxu1 }
 0x3c0   : > { %v10056_v0 = vpop.f32.mrf.mxu0  ;;  %v5592_v62 = vadd.f32 %v10004_v30, %v14360_v9  ;;  %v14463_v20 = vadd.f32 %v6007_v60, %v5589_v52 }
 0x3c1   : > { %v5513_v17 = vpop.f32.mrf.mxu1 }
 0x3c2   : > { %v6026_v23 = vpop.f32.mrf.mxu0  ;;  %v5590_v36 = vadd.f32 %v5513_v17, %v14369_v7  ;;  %v14466_v56 = vadd.f32 %v10052_v2, %v5592_v62 }
 0x3c3   : > { %v10007_v49 = vpop.f32.mrf.mxu1 }
 0x3c4   : > { %v10059_v35 = vpop.f32.mrf.mxu0  ;;  %v5595_v25 = vadd.f32 %v10007_v49, %v14372_v58  ;;  %v14469_v38 = vadd.f32 %v6010_v21, %v5590_v36 }
 0x3c5   : > { %v5526_v28 = vpop.f32.mrf.mxu1 }
 0x3c6   : > { %v6039_v14 = vpop.f32.mrf.mxu0  ;;  %v5593_v43 = vadd.f32 %v5526_v28, %v14377_v61  ;;  %v14472_v9 = vadd.f32 %v10055_v55, %v5595_v25 }
 0x3c7   : > { %v10008_v4 = vpop.f32.mrf.mxu1 }
 0x3c8   : > { %v10060_v11 = vpop.f32.mrf.mxu0  ;;  %v5596_v22 = vadd.f32 %v10008_v4, %v14379_v53  ;;  %v14475_v7 = vadd.f32 %v6023_v44, %v5593_v43 }
 0x3c9   : > { %v5529_v8 = vpop.f32.mrf.mxu1 }
 0x3ca   : > { %v6042_v60 = vpop.f32.mrf.mxu0  ;;  %v5594_v51 = vadd.f32 %v5529_v8, %v14385_v37  ;;  %v14478_v58 = vadd.f32 %v10056_v0, %v5596_v22 }
 0x3cb   : > { %v10011_v50 = vpop.f32.mrf.mxu1 }
 0x3cc   : > { %v10063_v2 = vpop.f32.mrf.mxu0  ;;  %v5599_v1 = vadd.f32 %v10011_v50, %v14388_v32  ;;  %v14481_v61 = vadd.f32 %v6026_v23, %v5594_v51 }
 0x3cd   : > { %v5542_v6 = vpop.f32.mrf.mxu1 }
 0x3ce   : > { %v6055_v21 = vpop.f32.mrf.mxu0  ;;  %v5597_v41 = vadd.f32 %v5542_v6, %v14391_v63  ;;  %v14484_v53 = vadd.f32 %v10059_v35, %v5599_v1 }
 0x3cf   : > { %v10012_v13 = vpop.f32.mrf.mxu1 }
 0x3d0   : > { %v10064_v55 = vpop.f32.mrf.mxu0  ;;  %v5600_v42 = vadd.f32 %v10012_v13, %v14394_v31  ;;  %v14487_v37 = vadd.f32 %v6039_v14, %v5597_v41 }
 0x3d1   : > { %v5545_v54 = vpop.f32.mrf.mxu1 }
 0x3d2   : > { %v6058_v44 = vpop.f32.mrf.mxu0  ;;  %v5598_v52 = vadd.f32 %v5545_v54, %v14397_v26  ;;  %v14492_v32 = vadd.f32 %v10060_v11, %v5600_v42 }
 0x3d3   : > { %v10015_v30 = vpop.f32.mrf.mxu1 }
 0x3d4   : > { %v14490_v0 = vpop.f32.mrf.mxu0  ;;  %v5603_v62 = vadd.f32 %v10015_v30, %v14400_v46  ;;  %v14497_v23 = vadd.f32 %v6042_v60, %v5598_v52 }
 0x3d5   : > { %v5558_v17 = vpop.f32.mrf.mxu1 }
 0x3d6   : > { %v14495_v63 = vpop.f32.mrf.mxu0  ;;  %v5601_v31 = vadd.f32 %v5558_v17, %v14403_v40  ;;  %v14502_v35 = vadd.f32 %v10063_v2, %v5603_v62 }
 0x3d7   : > { %v10016_v49 = vpop.f32.mrf.mxu1 }
 0x3d8   : > { %v14500_v36 = vpop.f32.mrf.mxu0  ;;  %v5604_v26 = vadd.f32 %v10016_v49, %v14406_v29  ;;  %v14507_v14 = vadd.f32 %v6055_v21, %v5601_v31 }
 0x3d9   : > { %v5561_v28 = vpop.f32.mrf.mxu1 }
 0x3da   : > { %v14505_v25 = vpop.f32.mrf.mxu0  ;;  %v5602_v46 = vadd.f32 %v5561_v28, %v14409_v33  ;;  %v14512_v11 = vadd.f32 %v10064_v55, %v5604_v26 }
 0x3db   : > { %v14514_v4 = vpop.f32.mrf.mxu1 }
 0x3dc   : > { %v14510_v43 = vpop.f32.mrf.mxu0  ;;  %v14518_v22 = vadd.f32 %v6058_v44, %v5602_v46 }
 0x3dd   : > { %v14520_v60 = vpop.f32.mrf.mxu1 }
 0x3de   : > { %v14516_v40 = vpop.f32.mrf.mxu0 }
 0x3df   : > { %15361 = vst [vmem:[#allocation30_spill] sm:$0xff] %v14516_v40  ;;  %v14522_v8 = vpop.f32.mrf.mxu1 }
 0x3e0   : > { %v10136_v29 = vpop.f32.mrf.mxu0 }
 0x3e1   : > { %v14524_v2 = vpop.f32.mrf.mxu1 }
 0x3e2   : > { %v7101_v51 = vpop.f32.mrf.mxu0 }
 0x3e3   : > { %v14526_v33 = vpop.f32.mrf.mxu1 }
 0x3e4   : > { %v10139_v50 = vpop.f32.mrf.mxu0 }
 0x3e5   : > { %v14528_v21 = vpop.f32.mrf.mxu1 }
 0x3e6   : > { %v7114_v1 = vpop.f32.mrf.mxu0 }
 0x3e7   : > { %v10088_v41 = vpop.f32.mrf.mxu1 }
 0x3e8   : > { %v10140_v6 = vpop.f32.mrf.mxu0  ;;  %v6463_v55 = vadd.f32 %v10088_v41, %v14430_v57 }
 0x3e9   : > { %v6348_v42 = vpop.f32.mrf.mxu1 }
 0x3ea   : > { %v7117_v13 = vpop.f32.mrf.mxu0  ;;  %v6461_v44 = vadd.f32 %v6348_v42, %v14433_v18  ;;  %v14532_v52 = vadd.f32 %v10136_v29, %v6463_v55 }
 0x3eb   : > { %v10091_v30 = vpop.f32.mrf.mxu1 }
 0x3ec   : > { %v10143_v54 = vpop.f32.mrf.mxu0  ;;  %v6466_v62 = vadd.f32 %v10091_v30, %v14436_v24  ;;  %v14535_v31 = vadd.f32 %v7101_v51, %v6461_v44 }
 0x3ed   : > { %v6361_v49 = vpop.f32.mrf.mxu1 }
 0x3ee   : > { %v7130_v17 = vpop.f32.mrf.mxu0  ;;  %v6464_v26 = vadd.f32 %v6361_v49, %v14439_v47  ;;  %v14538_v46 = vadd.f32 %v10139_v50, %v6466_v62 }
 0x3ef   : > { %v10092_v57 = vpop.f32.mrf.mxu1 }
 0x3f0   : > { %v10144_v28 = vpop.f32.mrf.mxu0  ;;  %v6467_v41 = vadd.f32 %v10092_v57, %v14442_v16  ;;  %v14541_v18 = vadd.f32 %v7114_v1, %v6464_v26 }
 0x3f1   : > { %v6364_v29 = vpop.f32.mrf.mxu1 }
 0x3f2   : > { %v7133_v40 = vpop.f32.mrf.mxu0  ;;  %v6465_v55 = vadd.f32 %v6364_v29, %v14445_v19  ;;  %v14544_v24 = vadd.f32 %v10140_v6, %v6467_v41 }
 0x3f3   : > { %v10095_v51 = vpop.f32.mrf.mxu1 }
 0x3f4   : > { %v10147_v42 = vpop.f32.mrf.mxu0  ;;  %v6470_v44 = vadd.f32 %v10095_v51, %v14448_v10  ;;  %v14547_v47 = vadd.f32 %v7117_v13, %v6465_v55 }
 0x3f5   : > { %v6377_v50 = vpop.f32.mrf.mxu1 }
 0x3f6   : > { %v7146_v30 = vpop.f32.mrf.mxu0  ;;  %v6468_v62 = vadd.f32 %v6377_v50, %v14451_v48  ;;  %v14550_v16 = vadd.f32 %v10143_v54, %v6470_v44 }
 0x3f7   : > { %v10096_v1 = vpop.f32.mrf.mxu1 }
 0x3f8   : > { %v10148_v49 = vpop.f32.mrf.mxu0  ;;  %v6471_v26 = vadd.f32 %v10096_v1, %v14454_v5  ;;  %v14553_v19 = vadd.f32 %v7130_v17, %v6468_v62 }
 0x3f9   : > { %v6380_v6 = vpop.f32.mrf.mxu1 }
 0x3fa   : > { %v7149_v57 = vpop.f32.mrf.mxu0  ;;  %v6469_v41 = vadd.f32 %v6380_v6, %v14457_v34  ;;  %v14556_v10 = vadd.f32 %v10144_v28, %v6471_v26 }
 0x3fb   : > { %v10099_v13 = vpop.f32.mrf.mxu1 }
 0x3fc   : > { %v10151_v29 = vpop.f32.mrf.mxu0  ;;  %v6474_v55 = vadd.f32 %v10099_v13, %v14460_v12  ;;  %v14559_v48 = vadd.f32 %v7133_v40, %v6469_v41 }
 0x3fd   : > { %v6393_v54 = vpop.f32.mrf.mxu1 }
 0x3fe   : > { %v7162_v51 = vpop.f32.mrf.mxu0  ;;  %v6472_v44 = vadd.f32 %v6393_v54, %v14463_v20  ;;  %v14562_v5 = vadd.f32 %v10147_v42, %v6474_v55 }
 0x3ff   : > { %v10100_v17 = vpop.f32.mrf.mxu1 }
 0x400   : > { %v10152_v50 = vpop.f32.mrf.mxu0  ;;  %v6475_v62 = vadd.f32 %v10100_v17, %v14466_v56  ;;  %v14565_v34 = vadd.f32 %v7146_v30, %v6472_v44 }
 0x401   : > { %v6396_v28 = vpop.f32.mrf.mxu1 }
 0x402   : > { %v7165_v1 = vpop.f32.mrf.mxu0  ;;  %v6473_v26 = vadd.f32 %v6396_v28, %v14469_v38  ;;  %v14568_v12 = vadd.f32 %v10148_v49, %v6475_v62 }
 0x403   : > { %v10103_v40 = vpop.f32.mrf.mxu1 }
 0x404   : > { %v10155_v6 = vpop.f32.mrf.mxu0  ;;  %v6478_v41 = vadd.f32 %v10103_v40, %v14472_v9  ;;  %v14571_v20 = vadd.f32 %v7149_v57, %v6473_v26 }
 0x405   : > { %v6409_v42 = vpop.f32.mrf.mxu1 }
 0x406   : > { %v7178_v13 = vpop.f32.mrf.mxu0  ;;  %v6476_v55 = vadd.f32 %v6409_v42, %v14475_v7  ;;  %v14574_v56 = vadd.f32 %v10151_v29, %v6478_v41  ;;  %v6458_v29 = vadd.f32 %v14514_v4, %v14412_v27 }
 0x407   : > { %v10104_v30 = vpop.f32.mrf.mxu1 }
 0x408   : > { %v10156_v54 = vpop.f32.mrf.mxu0  ;;  %v6479_v44 = vadd.f32 %v10104_v30, %v14478_v58  ;;  %v14577_v38 = vadd.f32 %v7162_v51, %v6476_v55  ;;  %v6459_v30 = vadd.f32 %v14522_v8, %v14418_v59  ;;  %v7211_v4 = vadd.f32 %v14490_v0, %v6458_v29 }
 0x409   : > { %v6412_v49 = vpop.f32.mrf.mxu1  ;;  %v6457_v59 = vadd.f32 %v14524_v2, %v14421_v39 }
 0x40a   : > { %v7181_v17 = vpop.f32.mrf.mxu0  ;;  %v6477_v62 = vadd.f32 %v6412_v49, %v14481_v61  ;;  %v14580_v9 = vadd.f32 %v10152_v50, %v6479_v44  ;;  %v6456_v61 = vadd.f32 %v14520_v60, %v14415_v45  ;;  %v11164_v60 = vmov 1983009808  }
 0x40b   : > { %v10107_v57 = vpop.f32.mrf.mxu1  ;;  %v7212_v29 = vadd.f32 %v14500_v36, %v6459_v30  ;;  %v6460_v36 = vadd.f32 %v14528_v21, %v14427_v15 }
 0x40c   : > { %v10159_v28 = vpop.f32.mrf.mxu0  ;;  %v6482_v26 = vadd.f32 %v10107_v57, %v14484_v53  ;;  %v14583_v7 = vadd.f32 %v7165_v1, %v6477_v62  ;;  %v7209_v8 = vadd.f32 %v14495_v63, %v6456_v61 }
 0x40d   : > { %v6425_v58 = vpop.f32.mrf.mxu1 }
 0x40e   : > { %v7194_v40 = vpop.f32.mrf.mxu0  ;;  %v6480_v51 = vadd.f32 %v6425_v58, %v14487_v37  ;;  %v14588_v42 = vadd.f32 %v10155_v6, %v6482_v26  ;;  %v7941_v37 = vlaneseq  ;;  %v6462_v58 = vadd.f32 %v14526_v33, %v14424_v3  ;;  %v7809_v3 = vld [vmem:[%s14616_s18] sm:$0xff] }
 0x40f   : > { %v10108_v50 = vpop.f32.mrf.mxu1 }
 0x410   : > { %v10160_v41 = vpop.f32.mrf.mxu0  ;;  %v6483_v53 = vadd.f32 %v10108_v50, %v14492_v32  ;;  %v14593_v1 = vadd.f32 %v7178_v13, %v6480_v51  ;;  %v14605_v32 = vld [vmem:[%s15075_s4] ss:$0 sm:$0xff]  ;;  %v7939_v13 = vunpack.c.l.s4 %v11164_v60  ;;  %v7942_v2 = vshrl.u32 %v7941_v37, 7  ;;  %v7811_v51 = vld [vmem:[%s14616_s18 + $0x10] sm:$0xff] }
 0x411   : > { %v6428_v27 = vpop.f32.mrf.mxu1  ;;  %v7210_v37 = vadd.f32 %v14505_v25, %v6457_v59  ;;  %v7215_v25 = vadd.f32 %v14510_v43, %v6462_v58 }
 0x412   : > { %v7197_v55 = vpop.f32.mrf.mxu0  ;;  %v6481_v6 = vadd.f32 %v6428_v27, %v14497_v23  ;;  %v14607_v44 = vadd.f32 %v10156_v54, %v6483_v53  ;;  %v7940_v50 = vunpack.c.0.s8 %v7939_v13  ;;  %v14658_v58 = vsub.s32 0, %v7942_v2 }
 0x413   : > { %v10111_v23 = vpop.f32.mrf.mxu1 }
 0x414   : > { %v10179_v45 = vpop.f32.mrf.mxu0  ;;  %v6486_v49 = vadd.f32 %v10111_v23, %v14502_v35  ;;  %v14620_v57 = vadd.f32 %v7181_v17, %v6481_v6 }
 0x415   : > { %v7708_v0 = vadd.f32 %v10179_v45, %v7211_v4  ;;  %v6441_v26 = vpop.f32.mrf.mxu1 }
 0x416   : > { %v7579_v62 = vpop.f32.mrf.mxu0  ;;  %v6484_v63 = vadd.f32 %v6441_v26, %v14507_v14  ;;  %v14629_v61 = vadd.f32 %v10159_v28, %v6486_v49  ;;  %v7810_v49 = vld [vmem:[%s14616_s18 + $0x8] sm:$0xff] }
 0x417   : > { %v7747_v54 = vadd.f32 %v14605_v32, %v7708_v0  ;;  %v7706_v39 = vadd.f32 %v7579_v62, %v7209_v8  ;;  %v10112_v4 = vpop.f32.mrf.mxu1  ;;  %v7812_v0 = vld [vmem:[%s14616_s18 + $0x18] sm:$0xff]  ;;  %v15362_v62 = vld [vmem:[#allocation30_spill] sm:$0xff] }
 0x418   : > { %v10180_v35 = vpop.f32.mrf.mxu0  ;;  %v6487_v33 = vadd.f32 %v10112_v4, %v14512_v11  ;;  %v14637_v14 = vadd.f32 %v7194_v40, %v6484_v63  ;;  %v14650_v11 = vsub.s32 %v7940_v50, %v7942_v2  ;;  %v7213_v43 = vadd.f32 %v15362_v62, %v6460_v36 }
 0x419   : > { %v7779_v17 = vmax.f32 %v7747_v54, 0.0  ;;  %v7745_v53 = vadd.f32 %v14605_v32, %v7706_v39  ;;  %v7709_v27 = vadd.f32 %v10180_v35, %v7212_v29  ;;  %v6444_v13 = vpop.f32.mrf.mxu1 }
 0x41a   : > { %v7582_v30 = vpop.f32.mrf.mxu0  ;;  %v6485_v23 = vadd.f32 %v6444_v13, %v14518_v22  ;;  %v14643_v59 = vadd.f32 %v10160_v41, %v6487_v33 }
 0x41b   : > { %v7843_v28 = vadd.f32 %v7811_v51, %v7779_v17  ;;  %v7777_v6 = vmax.f32 %v7745_v53, 0.0  ;;  %v7748_v45 = vadd.f32 %v14605_v32, %v7709_v27  ;;  %v7707_v60 = vadd.f32 %v7582_v30, %v7210_v37  ;;  %v10183_v8 = vpop.f32.mrf.mxu1  ;;  %v7815_v17 = vld [vmem:[%s14616_s18 + $0x30] sm:$0xff]  ;;  %v7813_v30 = vld [vmem:[%s14616_s18 + $0x20] sm:$0xff] }
 0x41c   : > { %v7712_v22 = vadd.f32 %v10183_v8, %v7215_v25  ;;  %v14655_v41 = vadd.f32 %v7197_v55, %v6485_v23 }
 0x41d   : > { %7875 = vst [vmem:[%s14647_s13 + $0x10] sm:$0xff] %v7843_v28  ;;  %v7841_v15 = vadd.f32 %v7809_v3, %v7777_v6  ;;  %v7780_v21 = vmax.f32 %v7748_v45, 0.0  ;;  %v7746_v40 = vadd.f32 %v14605_v32, %v7707_v60  ;;  %v7595_v29 = vpop.f32.mrf.mxu1 }
 0x41e   : > { %v7751_v51 = vadd.f32 %v14605_v32, %v7712_v22  ;;  %v7710_v50 = vadd.f32 %v7595_v29, %v7213_v43  ;;  %v7816_v22 = vld [vmem:[%s14616_s18 + $0x38] sm:$0xff] }
 0x41f   : > { %7873 = vst [vmem:[%s14647_s13] sm:$0xff] %v7841_v15  ;;  %v7905_v54 = vmax.f32 %v7841_v15, %v7843_v28  ;;  %v7844_v39 = vadd.f32 %v7812_v0, %v7780_v21  ;;  %v7778_v26 = vmax.f32 %v7746_v40, 0.0  ;;  %v10184_v53 = vpop.f32.mrf.mxu1 }
 0x420   : > { %v7783_v27 = vmax.f32 %v7751_v51, 0.0  ;;  %v7749_v4 = vadd.f32 %v14605_v32, %v7710_v50  ;;  %v7713_v2 = vadd.f32 %v10184_v53, %v14532_v52 }
 0x421   : > { %v7937_v63 = vcombine.high %v7905_v54, %v7905_v54  ;;  %v7944_v35 = vrot.slane %v7905_v54, %v14650_v11  ;;  %7876 = vst [vmem:[%s14647_s13 + $0x18] sm:$0xff] %v7844_v39  ;;  %v7842_v55 = vadd.f32 %v7810_v49, %v7778_v26  ;;  %v7598_v28 = vpop.f32.mrf.mxu1 }
 0x422   : > { %v7847_v6 = vadd.f32 %v7815_v17, %v7783_v27  ;;  %v7781_v45 = vmax.f32 %v7749_v4, 0.0  ;;  %v7752_v60 = vadd.f32 %v14605_v32, %v7713_v2  ;;  %v7711_v13 = vadd.f32 %v7598_v28, %v14535_v31 }
 0x423   : > { %v7951_v37 = vrot.slane %v7937_v63, %v14650_v11  ;;  %v7952_v36 = vcombine.high %v7944_v35, %v7944_v35  ;;  %v9396_v3 = vrot.slane %v7944_v35, 9  ;;  %7874 = vst [vmem:[%s14647_s13 + $0x8] sm:$0xff] %v7842_v55  ;;  %v7906_v33 = vmax.f32 %v7842_v55, %v7844_v39  ;;  %v14671_v15 = vpop.f32.mrf.mxu1 }
 0x424   : > { %7879 = vst [vmem:[%s14647_s13 + $0x30] sm:$0xff] %v7847_v6  ;;  %v7845_v8 = vadd.f32 %v7813_v30, %v7781_v45  ;;  %v7784_v49 = vmax.f32 %v7752_v60, 0.0 }
 0x425   : > { %v7953_v0 = vcombine.high %v7951_v37, %v7951_v37  ;;  %v9397_v23 = vrot.slane %v7952_v36, 9  ;;  %v9398_v52 = vrot.slane %v7951_v37, 9  ;;  %v8465_v25 = vmax.f32 %v7944_v35, %v9396_v3  ;;  %v7611_v39 = vpop.f32.mrf.mxu1 }
 0x426   : > { %v7954_v21 = vcombine.high %v7906_v33, %v7906_v33  ;;  %v7961_v40 = vrot.slane %v7906_v33, %v14650_v11  ;;  %7877 = vst [vmem:[%s14647_s13 + $0x20] sm:$0xff] %v7845_v8  ;;  %v7907_v50 = vmax.f32 %v7845_v8, %v7847_v6  ;;  %v14681_v17 = vadd.f32 %v7816_v22, %v7784_v49 }
 0x427   : > { %v9399_v62 = vrot.slane %v7953_v0, 9  ;;  %v8466_v43 = vmax.f32 %v7952_v36, %v9397_v23  ;;  %v8467_v54 = vmax.f32 %v7951_v37, %v9398_v52  ;;  %v8596_v31 = vrot.slane %v8465_v25, %v14658_v58  ;;  %v10188_v53 = vpop.f32.mrf.mxu1 }
 0x428   : > { %v7968_v26 = vrot.slane %v7954_v21, %v14650_v11  ;;  %v7969_v29 = vcombine.high %v7961_v40, %v7961_v40  ;;  %v9400_v51 = vrot.slane %v7961_v40, 9  ;;  %v7971_v33 = vcombine.high %v7907_v50, %v7907_v50  ;;  %7880 = vst [vmem:[%s14647_s13 + $0x38] sm:$0xff] %v14681_v17 }
 0x429   : > { %v8468_v63 = vmax.f32 %v7953_v0, %v9399_v62  ;;  %v8600_v35 = vrot.slane %v8466_v43, %v14658_v58  ;;  %v8604_v55 = vrot.slane %v8467_v54, %v14658_v58  ;;  %v7978_v30 = vrot.slane %v7907_v50, %v14650_v11  ;;  %v7614_v28 = vpop.f32.mrf.mxu1 }
 0x42a   : > { %v7970_v27 = vcombine.high %v7968_v26, %v7968_v26  ;;  %v9401_v4 = vrot.slane %v7969_v29, 9  ;;  %v9402_v2 = vrot.slane %v7968_v26, 9  ;;  %v8469_v37 = vmax.f32 %v7961_v40, %v9400_v51 }
 0x42b   : > { %v8608_v36 = vrot.slane %v8468_v63, %v14658_v58  ;;  %v8850_v3 = vsel %vm8849_vm9, %v8600_v35, %v8596_v31  ;;  %v7985_v25 = vrot.slane %v7971_v33, %v14650_v11  ;;  %v7986_v21 = vcombine.high %v7978_v30, %v7978_v30  ;;  %v10191_v40 = vpop.f32.mrf.mxu1 }
 0x42c   : > { %v8852_v6 = vsel %vm8851_vm10, %v8604_v55, %v8850_v3  ;;  %v9403_v45 = vrot.slane %v7970_v27, 9  ;;  %v8470_v60 = vmax.f32 %v7969_v29, %v9401_v4  ;;  %v8471_v0 = vmax.f32 %v7968_v26, %v9402_v2 }
 0x42d   : > { %v8612_v23 = vrot.slane %v8469_v37, %v14658_v58  ;;  %v8854_v52 = vsel %vm8853_vm11, %v8608_v36, %v8852_v6  ;;  %v9404_v62 = vrot.slane %v7978_v30, 9  ;;  %v7987_v54 = vcombine.high %v7985_v25, %v7985_v25  ;;  %v7627_v29 = vpop.f32.mrf.mxu1  ;;  %v7814_v37 = vld [vmem:[%s14616_s18 + $0x28] sm:$0xff] }
 0x42e   : > { %v8472_v8 = vmax.f32 %v7970_v27, %v9403_v45  ;;  %v8616_v49 = vrot.slane %v8470_v60, %v14658_v58  ;;  %v8620_v22 = vrot.slane %v8471_v0, %v14658_v58  ;;  %v9405_v31 = vrot.slane %v7986_v21, 9 }
 0x42f   : > { %v8856_v43 = vsel %vm8855_vm13, %v8612_v23, %v8854_v52  ;;  %v9406_v26 = vrot.slane %v7985_v25, 9  ;;  %v8473_v63 = vmax.f32 %v7978_v30, %v9404_v62  ;;  %v7750_v35 = vadd.f32 %v14605_v32, %v7711_v13  ;;  %v14701_v36 = vpop.f32.mrf.mxu1 }
 0x430   : > { %v8624_v51 = vrot.slane %v8472_v8, %v14658_v58  ;;  %v8858_v50 = vsel %vm8857_vm14, %v8616_v49, %v8856_v43  ;;  %v9407_v27 = vrot.slane %v7987_v54, 9  ;;  %v8474_v4 = vmax.f32 %v7986_v21, %v9405_v31  ;;  %v7819_v8 = vld [vmem:[%s14616_s18 + $0x50] sm:$0xff] }
 0x431   : > { %v8860_v55 = vsel %vm8859_vm15, %v8620_v22, %v8858_v50  ;;  %v8475_v2 = vmax.f32 %v7985_v25, %v9406_v26  ;;  %v8628_v33 = vrot.slane %v8473_v63, %v14658_v58  ;;  %v7782_v6 = vmax.f32 %v7750_v35, 0.0  ;;  %v14721_v62 = vpop.f32.mrf.mxu1  ;;  %v7823_v63 = vld [vmem:[%s14616_s18 + $0x70] sm:$0xff] }
 0x432   : > { %v8862_v3 = vsel %vm8861_vm1, %v8624_v51, %v8860_v55  ;;  %v7716_v45 = vadd.f32 %v14671_v15, %v14538_v46  ;;  %v8476_v13 = vmax.f32 %v7987_v54, %v9407_v27  ;;  %v8632_v30 = vrot.slane %v8474_v4, %v14658_v58  ;;  %v7820_v54 = vld [vmem:[%s14616_s18 + $0x58] sm:$0xff] }
 0x433   : > { %8920 = vst [vmem:[%s14707_s17] sm:$0xff] %v8862_v3  ;;  %v8636_v60 = vrot.slane %v8475_v2, %v14658_v58  ;;  %v7714_v0 = vadd.f32 %v7611_v39, %v14541_v18  ;;  %v7846_v23 = vadd.f32 %v7814_v37, %v7782_v6  ;;  %v7717_v25 = vadd.f32 %v10188_v53, %v14544_v24  ;;  %v14736_v2 = vpop.f32.mrf.mxu1 }
 0x434   : > { %v7755_v52 = vadd.f32 %v14605_v32, %v7716_v45  ;;  %v7715_v46 = vadd.f32 %v7614_v28, %v14547_v47  ;;  %v8640_v15 = vrot.slane %v8476_v13, %v14658_v58  ;;  %v8863_v21 = vsel %vm8849_vm9, %v8632_v30, %v8628_v33  ;;  %v7817_v47 = vld [vmem:[%s14616_s18 + $0x40] sm:$0xff] }
 0x435   : > { %v7753_v49 = vadd.f32 %v14605_v32, %v7714_v0  ;;  %v7720_v22 = vadd.f32 %v10191_v40, %v14550_v16  ;;  %v8864_v18 = vsel %vm8851_vm10, %v8636_v60, %v8863_v21  ;;  %7878 = vst [vmem:[%s14647_s13 + $0x28] sm:$0xff] %v7846_v23  ;;  %v7908_v24 = vmax.f32 %v7846_v23, %v14681_v17  ;;  %v7818_v17 = vld [vmem:[%s14616_s18 + $0x48] sm:$0xff]  ;;  %v14749_v21 = vpop.f32.mrf.mxu1 }
 0x436   : > { %v7787_v39 = vmax.f32 %v7755_v52, 0.0  ;;  %v7756_v53 = vadd.f32 %v14605_v32, %v7717_v25  ;;  %v8865_v28 = vsel %vm8853_vm11, %v8640_v15, %v8864_v18  ;;  %v7754_v31 = vadd.f32 %v14605_v32, %v7715_v46 }
 0x437   : > { %v7785_v43 = vmax.f32 %v7753_v49, 0.0  ;;  %v7759_v16 = vadd.f32 %v14605_v32, %v7720_v22  ;;  %v7988_v40 = vcombine.high %v7908_v24, %v7908_v24  ;;  %v7995_v26 = vrot.slane %v7908_v24, %v14650_v11 }
 0x438   : > { %v7851_v51 = vadd.f32 %v7819_v8, %v7787_v39  ;;  %v7788_v50 = vmax.f32 %v7756_v53, 0.0  ;;  %v7786_v55 = vmax.f32 %v7754_v31, 0.0  ;;  %v7718_v4 = vadd.f32 %v7627_v29, %v14553_v19 }
 0x439   : > { %v7849_v35 = vadd.f32 %v7817_v47, %v7785_v43  ;;  %v7791_v27 = vmax.f32 %v7759_v16, 0.0  ;;  %v8002_v37 = vrot.slane %v7988_v40, %v14650_v11  ;;  %v8003_v3 = vcombine.high %v7995_v26, %v7995_v26 }
 0x43a   : > { %v9408_v33 = vrot.slane %v7995_v26, 9  ;;  %7883 = vst [vmem:[%s14647_s13 + $0x50] sm:$0xff] %v7851_v51  ;;  %v7852_v6 = vadd.f32 %v7820_v54, %v7788_v50  ;;  %v7850_v13 = vadd.f32 %v7818_v17, %v7786_v55  ;;  %v7757_v60 = vadd.f32 %v14605_v32, %v7718_v4  ;;  %v14756_v17 = vpop.f32.mrf.mxu1 }
 0x43b   : > { %7881 = vst [vmem:[%s14647_s13 + $0x40] sm:$0xff] %v7849_v35  ;;  %v7909_v45 = vmax.f32 %v7849_v35, %v7851_v51  ;;  %v14741_v30 = vadd.f32 %v7823_v63, %v7791_v27  ;;  %v8004_v0 = vcombine.high %v8002_v37, %v8002_v37  ;;  %v9409_v19 = vrot.slane %v8003_v3, 9 }
 0x43c   : > { %v9410_v29 = vrot.slane %v8002_v37, 9  ;;  %v8477_v23 = vmax.f32 %v7995_v26, %v9408_v33  ;;  %7884 = vst [vmem:[%s14647_s13 + $0x58] sm:$0xff] %v7852_v6  ;;  %7882 = vst [vmem:[%s14647_s13 + $0x48] sm:$0xff] %v7850_v13  ;;  %v7910_v46 = vmax.f32 %v7850_v13, %v7852_v6  ;;  %v7789_v15 = vmax.f32 %v7757_v60, 0.0  ;;  %v7821_v33 = vld [vmem:[%s14616_s18 + $0x60] sm:$0xff] }
 0x43d   : > { %v8005_v52 = vcombine.high %v7909_v45, %v7909_v45  ;;  %v8012_v25 = vrot.slane %v7909_v45, %v14650_v11  ;;  %7887 = vst [vmem:[%s14647_s13 + $0x70] sm:$0xff] %v14741_v30  ;;  %v9411_v8 = vrot.slane %v8004_v0, 9  ;;  %v8478_v49 = vmax.f32 %v8003_v3, %v9409_v19 }
 0x43e   : > { %v8479_v22 = vmax.f32 %v8002_v37, %v9410_v29  ;;  %v8644_v18 = vrot.slane %v8477_v23, %v14658_v58  ;;  %v8022_v53 = vcombine.high %v7910_v46, %v7910_v46  ;;  %v8029_v55 = vrot.slane %v7910_v46, %v14650_v11 }
 0x43f   : > { %v8019_v24 = vrot.slane %v8005_v52, %v14650_v11  ;;  %v8020_v39 = vcombine.high %v8012_v25, %v8012_v25  ;;  %v9412_v47 = vrot.slane %v8012_v25, 9  ;;  %v8480_v43 = vmax.f32 %v8004_v0, %v9411_v8  ;;  %v14769_v52 = vpop.f32.mrf.mxu1 }
 0x440   : > { %v8648_v54 = vrot.slane %v8478_v49, %v14658_v58  ;;  %v8652_v31 = vrot.slane %v8479_v22, %v14658_v58  ;;  %v8866_v16 = vsel %vm8855_vm13, %v8644_v18, %v8865_v28  ;;  %v8036_v27 = vrot.slane %v8022_v53, %v14650_v11 }
 0x441   : > { %v8021_v40 = vcombine.high %v8019_v24, %v8019_v24  ;;  %v9413_v26 = vrot.slane %v8020_v39, 9  ;;  %v9414_v51 = vrot.slane %v8019_v24, 9  ;;  %v8481_v50 = vmax.f32 %v8012_v25, %v9412_v47 }
 0x442   : > { %v8656_v63 = vrot.slane %v8480_v43, %v14658_v58  ;;  %v8867_v35 = vsel %vm8857_vm14, %v8648_v54, %v8866_v16  ;;  %v8037_v13 = vcombine.high %v8029_v55, %v8029_v55  ;;  %v8038_v60 = vcombine.high %v8036_v27, %v8036_v27 }
 0x443   : > { %v8868_v4 = vsel %vm8859_vm15, %v8652_v31, %v8867_v35  ;;  %v9415_v37 = vrot.slane %v8021_v40, 9  ;;  %v8482_v3 = vmax.f32 %v8020_v39, %v9413_v26  ;;  %v8483_v28 = vmax.f32 %v8019_v24, %v9414_v51  ;;  %v10199_v26 = vpop.f32.mrf.mxu1 }
 0x444   : > { %v8869_v6 = vsel %vm8861_vm1, %v8656_v63, %v8868_v4  ;;  %v8660_v45 = vrot.slane %v8481_v50, %v14658_v58  ;;  %v9416_v23 = vrot.slane %v8029_v55, 9  ;;  %v9417_v25 = vrot.slane %v8037_v13, 9 }
 0x445   : > { %8921 = vst [vmem:[%s14707_s17 + $0x8] sm:$0xff] %v8869_v6  ;;  %v8484_v0 = vmax.f32 %v8021_v40, %v9415_v37  ;;  %v8664_v19 = vrot.slane %v8482_v3, %v14658_v58  ;;  %v8668_v29 = vrot.slane %v8483_v28, %v14658_v58  ;;  %v9418_v46 = vrot.slane %v8036_v27, 9 }
 0x446   : > { %v9419_v8 = vrot.slane %v8038_v60, 9  ;;  %v7853_v49 = vadd.f32 %v7821_v33, %v7789_v15  ;;  %v8485_v24 = vmax.f32 %v8029_v55, %v9416_v23  ;;  %v7721_v39 = vadd.f32 %v14701_v36, %v14556_v10  ;;  %v7827_v23 = vld [vmem:[%s14616_s18 + $0x90] sm:$0xff] }
 0x447   : > { %v8672_v22 = vrot.slane %v8484_v0, %v14658_v58  ;;  %v8870_v18 = vsel %vm8849_vm9, %v8664_v19, %v8660_v45  ;;  %v8486_v53 = vmax.f32 %v8037_v13, %v9417_v25  ;;  %v8487_v43 = vmax.f32 %v8036_v27, %v9418_v46  ;;  %v7822_v45 = vld [vmem:[%s14616_s18 + $0x68] sm:$0xff]  ;;  %v14798_v13 = vpop.f32.mrf.mxu1 }
 0x448   : > { %v8871_v47 = vsel %vm8851_vm10, %v8668_v29, %v8870_v18  ;;  %v8488_v54 = vmax.f32 %v8038_v60, %v9419_v8  ;;  %7885 = vst [vmem:[%s14647_s13 + $0x60] sm:$0xff] %v7853_v49  ;;  %v8676_v31 = vrot.slane %v8485_v24, %v14658_v58  ;;  %v7911_v15 = vmax.f32 %v7853_v49, %v14741_v30  ;;  %v7824_v30 = vld [vmem:[%s14616_s18 + $0x78] sm:$0xff] }
 0x449   : > { %v8872_v16 = vsel %vm8853_vm11, %v8672_v22, %v8871_v47  ;;  %v7760_v40 = vadd.f32 %v14605_v32, %v7721_v39  ;;  %v8680_v51 = vrot.slane %v8486_v53, %v14658_v58  ;;  %v8684_v10 = vrot.slane %v8487_v43, %v14658_v58  ;;  %v7825_v47 = vld [vmem:[%s14616_s18 + $0x80] sm:$0xff]  ;;  %v14810_v53 = vpop.f32.mrf.mxu1 }
 0x44a   : > { %v8688_v36 = vrot.slane %v8488_v54, %v14658_v58  ;;  %v7719_v50 = vadd.f32 %v14721_v62, %v14559_v48  ;;  %v8873_v63 = vsel %vm8855_vm13, %v8676_v31, %v8872_v16  ;;  %v8039_v35 = vcombine.high %v7911_v15, %v7911_v15 }
 0x44b   : > { %v8046_v55 = vrot.slane %v7911_v15, %v14650_v11  ;;  %v7792_v27 = vmax.f32 %v7760_v40, 0.0  ;;  %v8874_v4 = vsel %vm8857_vm14, %v8680_v51, %v8873_v63  ;;  %v7724_v3 = vadd.f32 %v14736_v2, %v14562_v5  ;;  %v7828_v63 = vld [vmem:[%s14616_s18 + $0x98] sm:$0xff] }
 0x44c   : > { %v7758_v37 = vadd.f32 %v14605_v32, %v7719_v50  ;;  %v7722_v28 = vadd.f32 %v14749_v21, %v14565_v34  ;;  %v8875_v48 = vsel %vm8859_vm15, %v8684_v10, %v8874_v4  ;;  %v8053_v62 = vrot.slane %v8039_v35, %v14650_v11  ;;  %v14825_v4 = vpop.f32.mrf.mxu1 }
 0x44d   : > { %v8054_v33 = vcombine.high %v8046_v55, %v8046_v55  ;;  %v9420_v6 = vrot.slane %v8046_v55, 9  ;;  %v8876_v60 = vsel %vm8861_vm1, %v8688_v36, %v8875_v48  ;;  %v7856_v0 = vadd.f32 %v7824_v30, %v7792_v27 }
 0x44e   : > { %v7790_v19 = vmax.f32 %v7758_v37, 0.0  ;;  %v7763_v5 = vadd.f32 %v14605_v32, %v7724_v3  ;;  %8922 = vst [vmem:[%s14707_s17 + $0x10] sm:$0xff] %v8876_v60  ;;  %v8055_v34 = vcombine.high %v8053_v62, %v8053_v62  ;;  %v9422_v21 = vrot.slane %v8053_v62, 9 }
 0x44f   : > { %v9421_v2 = vrot.slane %v8054_v33, 9  ;;  %v8489_v29 = vmax.f32 %v8046_v55, %v9420_v6  ;;  %7888 = vst [vmem:[%s14647_s13 + $0x78] sm:$0xff] %v7856_v0  ;;  %v7761_v8 = vadd.f32 %v14605_v32, %v7722_v28  ;;  %v7725_v49 = vadd.f32 %v14756_v17, %v14568_v12  ;;  %v7826_v28 = vld [vmem:[%s14616_s18 + $0x88] sm:$0xff] }
 0x450   : > { %v7854_v25 = vadd.f32 %v7822_v45, %v7790_v19  ;;  %v7795_v46 = vmax.f32 %v7763_v5, 0.0  ;;  %v9423_v22 = vrot.slane %v8055_v34, 9  ;;  %v8491_v24 = vmax.f32 %v8053_v62, %v9422_v21 }
 0x451   : > { %v8490_v18 = vmax.f32 %v8054_v33, %v9421_v2  ;;  %v8692_v39 = vrot.slane %v8489_v29, %v14658_v58  ;;  %v7793_v31 = vmax.f32 %v7761_v8, 0.0  ;;  %v7764_v16 = vadd.f32 %v14605_v32, %v7725_v49  ;;  %v14835_v2 = vpop.f32.mrf.mxu1 }
 0x452   : > { %7886 = vst [vmem:[%s14647_s13 + $0x68] sm:$0xff] %v7854_v25  ;;  %v7912_v43 = vmax.f32 %v7854_v25, %v7856_v0  ;;  %v7859_v54 = vadd.f32 %v7827_v23, %v7795_v46  ;;  %v8492_v15 = vmax.f32 %v8055_v34, %v9423_v22  ;;  %v8700_v12 = vrot.slane %v8491_v24, %v14658_v58 }
 0x453   : > { %v8696_v40 = vrot.slane %v8490_v18, %v14658_v58  ;;  %v7723_v17 = vadd.f32 %v14769_v52, %v14571_v20  ;;  %v7857_v36 = vadd.f32 %v7825_v47, %v7793_v31  ;;  %v7796_v50 = vmax.f32 %v7764_v16, 0.0 }
 0x454   : > { %v8056_v51 = vcombine.high %v7912_v43, %v7912_v43  ;;  %v8063_v10 = vrot.slane %v7912_v43, %v14650_v11  ;;  %7891 = vst [vmem:[%s14647_s13 + $0x90] sm:$0xff] %v7859_v54  ;;  %v8704_v35 = vrot.slane %v8492_v15, %v14658_v58  ;;  %v7728_v30 = vadd.f32 %v10199_v26, %v14574_v56  ;;  %v7675_v15 = vpop.f32.mrf.mxu1 }
 0x455   : > { %v8877_v55 = vsel %vm8849_vm9, %v8696_v40, %v8692_v39  ;;  %v7762_v27 = vadd.f32 %v14605_v32, %v7723_v17  ;;  %7889 = vst [vmem:[%s14647_s13 + $0x80] sm:$0xff] %v7857_v36  ;;  %v7913_v62 = vmax.f32 %v7857_v36, %v7859_v54  ;;  %v7860_v33 = vadd.f32 %v7828_v63, %v7796_v50 }
 0x456   : > { %v8878_v20 = vsel %vm8851_vm10, %v8700_v12, %v8877_v55  ;;  %v8070_v52 = vrot.slane %v8056_v51, %v14650_v11  ;;  %v8071_v37 = vcombine.high %v8063_v10, %v8063_v10  ;;  %v9424_v3 = vrot.slane %v8063_v10, 9 }
 0x457   : > { %v8879_v48 = vsel %vm8853_vm11, %v8704_v35, %v8878_v20  ;;  %v7794_v6 = vmax.f32 %v7762_v27, 0.0  ;;  %v8073_v0 = vcombine.high %v7913_v62, %v7913_v62  ;;  %v8080_v19 = vrot.slane %v7913_v62, %v14650_v11  ;;  %7892 = vst [vmem:[%s14647_s13 + $0x98] sm:$0xff] %v7860_v33 }
 0x458   : > { %v8072_v45 = vcombine.high %v8070_v52, %v8070_v52  ;;  %v9425_v60 = vrot.slane %v8071_v37, 9  ;;  %v9426_v56 = vrot.slane %v8070_v52, 9  ;;  %v8493_v26 = vmax.f32 %v8063_v10, %v9424_v3 }
 0x459   : > { %v7858_v5 = vadd.f32 %v7826_v28, %v7794_v6  ;;  %v7767_v34 = vadd.f32 %v14605_v32, %v7728_v30  ;;  %v8087_v46 = vrot.slane %v8073_v0, %v14650_v11  ;;  %v8088_v8 = vcombine.high %v8080_v19, %v8080_v19  ;;  %v10204_v28 = vpop.f32.mrf.mxu1 }
 0x45a   : > { %v9427_v21 = vrot.slane %v8072_v45, 9  ;;  %v8494_v29 = vmax.f32 %v8071_v37, %v9425_v60  ;;  %v8495_v23 = vmax.f32 %v8070_v52, %v9426_v56  ;;  %v8708_v25 = vrot.slane %v8493_v26, %v14658_v58 }
 0x45b   : > { %v9428_v49 = vrot.slane %v8080_v19, 9  ;;  %7890 = vst [vmem:[%s14647_s13 + $0x88] sm:$0xff] %v7858_v5  ;;  %v7914_v22 = vmax.f32 %v7858_v5, %v7860_v33  ;;  %v8089_v43 = vcombine.high %v8087_v46, %v8087_v46  ;;  %v9429_v54 = vrot.slane %v8088_v8, 9 }
 0x45c   : > { %v8496_v18 = vmax.f32 %v8072_v45, %v9427_v21  ;;  %v8712_v24 = vrot.slane %v8494_v29, %v14658_v58  ;;  %v8716_v39 = vrot.slane %v8495_v23, %v14658_v58  ;;  %v8880_v47 = vsel %vm8855_vm13, %v8708_v25, %v8879_v48  ;;  %v7831_v45 = vld [vmem:[%s14616_s18 + $0xb0] sm:$0xff] }
 0x45d   : > { %v9430_v31 = vrot.slane %v8087_v46, 9  ;;  %v8497_v16 = vmax.f32 %v8080_v19, %v9428_v49  ;;  %v8090_v17 = vcombine.high %v7914_v22, %v7914_v22  ;;  %v8097_v51 = vrot.slane %v7914_v22, %v14650_v11 }
 0x45e   : > { %v8720_v40 = vrot.slane %v8496_v18, %v14658_v58  ;;  %v8881_v12 = vsel %vm8857_vm14, %v8712_v24, %v8880_v47  ;;  %v9431_v36 = vrot.slane %v8089_v43, 9  ;;  %v8498_v50 = vmax.f32 %v8088_v8, %v9429_v54  ;;  %v7678_v8 = vpop.f32.mrf.mxu1 }
 0x45f   : > { %v8882_v10 = vsel %vm8859_vm15, %v8716_v39, %v8881_v12  ;;  %v8499_v63 = vmax.f32 %v8087_v46, %v9430_v31  ;;  %v8724_v55 = vrot.slane %v8497_v16, %v14658_v58  ;;  %v8104_v27 = vrot.slane %v8090_v17, %v14650_v11  ;;  %v7832_v12 = vld [vmem:[%s14616_s18 + $0xb8] sm:$0xff] }
 0x460   : > { %v8883_v35 = vsel %vm8861_vm1, %v8720_v40, %v8882_v10  ;;  %v8105_v30 = vcombine.high %v8097_v51, %v8097_v51  ;;  %v8500_v20 = vmax.f32 %v8089_v43, %v9431_v36  ;;  %v8728_v52 = vrot.slane %v8498_v50, %v14658_v58  ;;  %v7835_v10 = vld [vmem:[%s14616_s18 + $0xd0] sm:$0xff] }
 0x461   : > { %8923 = vst [vmem:[%s14707_s17 + $0x18] sm:$0xff] %v8883_v35  ;;  %v8732_v37 = vrot.slane %v8499_v63, %v14658_v58  ;;  %v9432_v3 = vrot.slane %v8097_v51, 9  ;;  %v8106_v48 = vcombine.high %v8104_v27, %v8104_v27  ;;  %v9434_v33 = vrot.slane %v8104_v27, 9  ;;  %v7833_v35 = vld [vmem:[%s14616_s18 + $0xc0] sm:$0xff] }
 0x462   : > { %v9433_v62 = vrot.slane %v8105_v30, 9  ;;  %v7799_v6 = vmax.f32 %v7767_v34, 0.0  ;;  %v8736_v60 = vrot.slane %v8500_v20, %v14658_v58  ;;  %v8884_v56 = vsel %vm8849_vm9, %v8728_v52, %v8724_v55 }
 0x463   : > { %v8501_v26 = vmax.f32 %v8097_v51, %v9432_v3  ;;  %v7726_v0 = vadd.f32 %v14798_v13, %v14577_v38  ;;  %v8885_v19 = vsel %vm8851_vm10, %v8732_v37, %v8884_v56  ;;  %v9435_v5 = vrot.slane %v8106_v48, 9  ;;  %v7829_v13 = vld [vmem:[%s14616_s18 + $0xa0] sm:$0xff]  ;;  %v7830_v51 = vld [vmem:[%s14616_s18 + $0xa8] sm:$0xff] }
 0x464   : > { %v8502_v21 = vmax.f32 %v8105_v30, %v9433_v62  ;;  %v8503_v29 = vmax.f32 %v8104_v27, %v9434_v33  ;;  %v8886_v34 = vsel %vm8853_vm11, %v8736_v60, %v8885_v19  ;;  %v7863_v25 = vadd.f32 %v7831_v45, %v7799_v6 }
 0x465   : > { %v8740_v23 = vrot.slane %v8501_v26, %v14658_v58  ;;  %v7765_v46 = vadd.f32 %v14605_v32, %v7726_v0  ;;  %v8504_v49 = vmax.f32 %v8106_v48, %v9435_v5  ;;  %v7729_v18 = vadd.f32 %v14810_v53, %v14580_v9  ;;  %v7836_v48 = vld [vmem:[%s14616_s18 + $0xd8] sm:$0xff] }
 0x466   : > { %v8744_v22 = vrot.slane %v8502_v21, %v14658_v58  ;;  %v8748_v38 = vrot.slane %v8503_v29, %v14658_v58  ;;  %7895 = vst [vmem:[%s14647_s13 + $0xb0] sm:$0xff] %v7863_v25  ;;  %v7727_v47 = vadd.f32 %v14825_v4, %v14583_v7  ;;  %v7732_v43 = vadd.f32 %v14835_v2, %v14588_v42  ;;  %v10207_v42 = vpop.f32.mrf.mxu1 }
 0x467   : > { %v8887_v24 = vsel %vm8855_vm13, %v8740_v23, %v8886_v34  ;;  %v7797_v39 = vmax.f32 %v7765_v46, 0.0  ;;  %v8752_v54 = vrot.slane %v8504_v49, %v14658_v58  ;;  %v7768_v9 = vadd.f32 %v14605_v32, %v7729_v18 }
 0x468   : > { %v8888_v31 = vsel %vm8857_vm14, %v8744_v22, %v8887_v24  ;;  %v7730_v53 = vadd.f32 %v7675_v15, %v14593_v1  ;;  %v7766_v7 = vadd.f32 %v14605_v32, %v7727_v47  ;;  %v7771_v4 = vadd.f32 %v14605_v32, %v7732_v43  ;;  %v7691_v43 = vpop.f32.mrf.mxu1 }
 0x469   : > { %v8889_v16 = vsel %vm8859_vm15, %v8748_v38, %v8888_v31  ;;  %v7861_v40 = vadd.f32 %v7829_v13, %v7797_v39  ;;  %v7800_v17 = vmax.f32 %v7768_v9, 0.0  ;;  %v7733_v50 = vadd.f32 %v10204_v28, %v14607_v44 }
 0x46a   : > { %v8890_v2 = vsel %vm8861_vm1, %v8752_v54, %v8889_v16  ;;  %v7769_v36 = vadd.f32 %v14605_v32, %v7730_v53  ;;  %v7798_v15 = vmax.f32 %v7766_v7, 0.0  ;;  %v7803_v63 = vmax.f32 %v7771_v4, 0.0 }
 0x46b   : > { %8924 = vst [vmem:[%s14707_s17 + $0x20] sm:$0xff] %v8890_v2  ;;  %7893 = vst [vmem:[%s14647_s13 + $0xa0] sm:$0xff] %v7861_v40  ;;  %v7915_v1 = vmax.f32 %v7861_v40, %v7863_v25  ;;  %v7731_v55 = vadd.f32 %v7678_v8, %v14620_v57  ;;  %v7864_v27 = vadd.f32 %v7832_v12, %v7800_v17 }
 0x46c   : > { %v7801_v30 = vmax.f32 %v7769_v36, 0.0  ;;  %v7772_v20 = vadd.f32 %v14605_v32, %v7733_v50  ;;  %v7736_v52 = vadd.f32 %v10207_v42, %v14629_v61  ;;  %v7862_v3 = vadd.f32 %v7830_v51, %v7798_v15 }
 0x46d   : > { %v8107_v37 = vcombine.high %v7915_v1, %v7915_v1  ;;  %v8114_v44 = vrot.slane %v7915_v1, %v14650_v11  ;;  %v7867_v28 = vadd.f32 %v7835_v10, %v7803_v63  ;;  %7896 = vst [vmem:[%s14647_s13 + $0xb8] sm:$0xff] %v7864_v27  ;;  %v14896_v57 = vadd.f32 %v14605_v32, %v7731_v55  ;;  %v10208_v1 = vpop.f32.mrf.mxu1 }
 0x46e   : > { %v7865_v62 = vadd.f32 %v7833_v35, %v7801_v30  ;;  %v7804_v33 = vmax.f32 %v7772_v20, 0.0  ;;  %v14899_v6 = vadd.f32 %v14605_v32, %v7736_v52  ;;  %7894 = vst [vmem:[%s14647_s13 + $0xa8] sm:$0xff] %v7862_v3  ;;  %v7916_v56 = vmax.f32 %v7862_v3, %v7864_v27  ;;  %v7834_v27 = vld [vmem:[%s14616_s18 + $0xc8] sm:$0xff] }
 0x46f   : > { %v8121_v45 = vrot.slane %v8107_v37, %v14650_v11  ;;  %v8122_v61 = vcombine.high %v8114_v44, %v8114_v44  ;;  %v9436_v60 = vrot.slane %v8114_v44, 9  ;;  %7899 = vst [vmem:[%s14647_s13 + $0xd0] sm:$0xff] %v7867_v28  ;;  %v7802_v19 = vmax.f32 %v14896_v57, 0.0 }
 0x470   : > { %7897 = vst [vmem:[%s14647_s13 + $0xc0] sm:$0xff] %v7865_v62  ;;  %v7917_v26 = vmax.f32 %v7865_v62, %v7867_v28  ;;  %v14905_v0 = vadd.f32 %v7836_v48, %v7804_v33  ;;  %v7807_v5 = vmax.f32 %v14899_v6, 0.0  ;;  %v8124_v34 = vcombine.high %v7916_v56, %v7916_v56  ;;  %v7839_v62 = vld [vmem:[%s14616_s18 + $0xf0] sm:$0xff] }
 0x471   : > { %v8123_v21 = vcombine.high %v8121_v45, %v8121_v45  ;;  %v9437_v29 = vrot.slane %v8122_v61, 9  ;;  %v9438_v32 = vrot.slane %v8121_v45, 9  ;;  %v8505_v23 = vmax.f32 %v8114_v44, %v9436_v60 }
 0x472   : > { %v8131_v25 = vrot.slane %v7916_v56, %v14650_v11  ;;  %v8141_v46 = vcombine.high %v7917_v26, %v7917_v26  ;;  %v8148_v8 = vrot.slane %v7917_v26, %v14650_v11  ;;  %7900 = vst [vmem:[%s14647_s13 + $0xd8] sm:$0xff] %v14905_v0  ;;  %v8138_v18 = vrot.slane %v8124_v34, %v14650_v11 }
 0x473   : > { %v9439_v49 = vrot.slane %v8123_v21, 9  ;;  %v8506_v22 = vmax.f32 %v8122_v61, %v9437_v29  ;;  %v8507_v38 = vmax.f32 %v8121_v45, %v9438_v32  ;;  %v8756_v13 = vrot.slane %v8505_v23, %v14658_v58  ;;  %v7694_v45 = vpop.f32.mrf.mxu1 }
 0x474   : > { %v8139_v24 = vcombine.high %v8131_v25, %v8131_v25  ;;  %v9440_v39 = vrot.slane %v8131_v25, 9  ;;  %v8155_v47 = vrot.slane %v8141_v46, %v14650_v11  ;;  %v8156_v53 = vcombine.high %v8148_v8, %v8148_v8 }
 0x475   : > { %v8508_v54 = vmax.f32 %v8123_v21, %v9439_v49  ;;  %v8760_v31 = vrot.slane %v8506_v22, %v14658_v58  ;;  %v8764_v9 = vrot.slane %v8507_v38, %v14658_v58  ;;  %v8140_v16 = vcombine.high %v8138_v18, %v8138_v18 }
 0x476   : > { %v9441_v40 = vrot.slane %v8139_v24, 9  ;;  %v9442_v12 = vrot.slane %v8138_v18, 9  ;;  %v8509_v7 = vmax.f32 %v8131_v25, %v9440_v39  ;;  %v8157_v2 = vcombine.high %v8155_v47, %v8155_v47  ;;  %v7840_v39 = vld [vmem:[%s14616_s18 + $0xf8] sm:$0xff] }
 0x477   : > { %v8768_v4 = vrot.slane %v8508_v54, %v14658_v58  ;;  %v8891_v42 = vsel %vm8849_vm9, %v8760_v31, %v8756_v13  ;;  %v9444_v17 = vrot.slane %v8148_v8, 9  ;;  %v9443_v10 = vrot.slane %v8140_v16, 9 }
 0x478   : > { %v8892_v51 = vsel %vm8851_vm10, %v8764_v9, %v8891_v42  ;;  %v8510_v36 = vmax.f32 %v8139_v24, %v9441_v40  ;;  %v8511_v50 = vmax.f32 %v8138_v18, %v9442_v12  ;;  %v8772_v15 = vrot.slane %v8509_v7, %v14658_v58  ;;  %v7837_v24 = vld [vmem:[%s14616_s18 + $0xe0] sm:$0xff] }
 0x479   : > { %v8893_v63 = vsel %vm8853_vm11, %v8768_v4, %v8892_v51  ;;  %v9445_v35 = vrot.slane %v8156_v53, 9  ;;  %v9446_v55 = vrot.slane %v8155_v47, 9  ;;  %v8512_v30 = vmax.f32 %v8140_v16, %v9443_v10 }
 0x47a   : > { %v8776_v20 = vrot.slane %v8510_v36, %v14658_v58  ;;  %v8780_v52 = vrot.slane %v8511_v50, %v14658_v58  ;;  %v9447_v37 = vrot.slane %v8157_v2, 9  ;;  %v8894_v44 = vsel %vm8855_vm13, %v8772_v15, %v8893_v63 }
 0x47b   : > { %v8513_v3 = vmax.f32 %v8148_v8, %v9444_v17  ;;  %v8514_v28 = vmax.f32 %v8156_v53, %v9445_v35  ;;  %v8515_v48 = vmax.f32 %v8155_v47, %v9446_v55  ;;  %v8784_v33 = vrot.slane %v8512_v30, %v14658_v58  ;;  %v7838_v47 = vld [vmem:[%s14616_s18 + $0xe8] sm:$0xff] }
 0x47c   : > { %v8895_v57 = vsel %vm8857_vm14, %v8776_v20, %v8894_v44  ;;  %v7866_v6 = vadd.f32 %v7834_v27, %v7802_v19  ;;  %v8516_v60 = vmax.f32 %v8157_v2, %v9447_v37  ;;  %v7871_v23 = vadd.f32 %v7839_v62, %v7807_v5  ;;  %v11061_v5 = vld [vmem:[%s15075_s4] ss:$0 sm:$0xff] }
 0x47d   : > { %v8896_v61 = vsel %vm8859_vm15, %v8780_v52, %v8895_v57  ;;  %v8788_v56 = vrot.slane %v8513_v3, %v14658_v58  ;;  %v8792_v26 = vrot.slane %v8514_v28, %v14658_v58  ;;  %v8796_v29 = vrot.slane %v8515_v48, %v14658_v58 }
 0x47e   : > { %v8897_v21 = vsel %vm8861_vm1, %v8784_v33, %v8896_v61  ;;  %7898 = vst [vmem:[%s14647_s13 + $0xc8] sm:$0xff] %v7866_v6  ;;  %v7918_v32 = vmax.f32 %v7866_v6, %v14905_v0  ;;  %v7734_v34 = vadd.f32 %v7691_v43, %v14637_v14  ;;  %v7737_v25 = vadd.f32 %v10208_v1, %v14643_v59 }
 0x47f   : > { %8925 = vst [vmem:[%s14707_s17 + $0x28] sm:$0xff] %v8897_v21  ;;  %v8898_v19 = vsel %vm8849_vm9, %v8792_v26, %v8788_v56  ;;  %v7735_v46 = vadd.f32 %v7694_v45, %v14655_v41  ;;  %7903 = vst [vmem:[%s14647_s13 + $0xf0] sm:$0xff] %v7871_v23  ;;  %v8800_v0 = vrot.slane %v8516_v60, %v14658_v58 }
 0x480   : > { %v8158_v8 = vcombine.high %v7918_v32, %v7918_v32  ;;  %v8165_v49 = vrot.slane %v7918_v32, %v14650_v11  ;;  %v7773_v22 = vadd.f32 %v11061_v5, %v7734_v34  ;;  %v7776_v14 = vadd.f32 %v11061_v5, %v7737_v25 }
 0x481   : > { %v7774_v38 = vadd.f32 %v11061_v5, %v7735_v46  ;;  %v8899_v59 = vsel %vm8851_vm10, %v8796_v29, %v8898_v19 }
 0x482   : > { %v8172_v41 = vrot.slane %v8158_v8, %v14650_v11  ;;  %v8173_v13 = vcombine.high %v8165_v49, %v8165_v49  ;;  %v9448_v18 = vrot.slane %v8165_v49, 9  ;;  %v7805_v43 = vmax.f32 %v7773_v22, 0.0 }
 0x483   : > { %v7808_v54 = vmax.f32 %v7776_v14, 0.0  ;;  %v7806_v31 = vmax.f32 %v7774_v38, 0.0  ;;  %v8900_v12 = vsel %vm8853_vm11, %v8800_v0, %v8899_v59 }
 0x484   : > { %v8174_v9 = vcombine.high %v8172_v41, %v8172_v41  ;;  %v9449_v53 = vrot.slane %v8173_v13, 9  ;;  %v9450_v16 = vrot.slane %v8172_v41, 9  ;;  %v8517_v40 = vmax.f32 %v8165_v49, %v9448_v18 }
 0x485   : > { %v7869_v7 = vadd.f32 %v7837_v24, %v7805_v43  ;;  %v7872_v4 = vadd.f32 %v7840_v39, %v7808_v54  ;;  %v7870_v42 = vadd.f32 %v7838_v47, %v7806_v31 }
 0x486   : > { %v9451_v2 = vrot.slane %v8174_v9, 9  ;;  %v8518_v17 = vmax.f32 %v8173_v13, %v9449_v53  ;;  %v8519_v51 = vmax.f32 %v8172_v41, %v9450_v16  ;;  %v8804_v10 = vrot.slane %v8517_v40, %v14658_v58 }
 0x487   : > { %7901 = vst [vmem:[%s14647_s13 + $0xe0] sm:$0xff] %v7869_v7  ;;  %v7919_v36 = vmax.f32 %v7869_v7, %v7871_v23  ;;  %7904 = vst [vmem:[%s14647_s13 + $0xf8] sm:$0xff] %v7872_v4  ;;  %v7920_v50 = vmax.f32 %v7870_v42, %v7872_v4 }
 0x488   : > { %7902 = vst [vmem:[%s14647_s13 + $0xe8] sm:$0xff] %v7870_v42  ;;  %v8520_v1 = vmax.f32 %v8174_v9, %v9451_v2  ;;  %v8808_v15 = vrot.slane %v8518_v17, %v14658_v58  ;;  %v8812_v63 = vrot.slane %v8519_v51, %v14658_v58  ;;  %v8901_v35 = vsel %vm8855_vm13, %v8804_v10, %v8900_v12 }
 0x489   : > { %11075 = shalt.err (!%p11072_p3)
}
 0x48a   : > { %s11076_s13 = scalar_lea.hbm %s14958_s23, 4096  ;;  %s11080_s9 = scalar_lea.hbm %s15077_s6, 8192 }
 0x48b   : > { %p11077_p4 = scmp.ne.s32.totalorder %s14958_s23, %s11076_s13  ;;  %p11081_p9 = scmp.lt.s32.totalorder %s14958_s23, %s15077_s6 }
 0x48c   : > { %p11082_p10 = scmp.lt.s32.totalorder %s11080_s9, %s11076_s13 }
 0x48d   : > { %p11078_p7 = pnand %p11077_p4, %p11246_p5 }
 0x48e   : > { %p11083_p11 = por %p11082_p10, %p11081_p9 }
 0x48f   : > { %p11079_p8 = pneg %p11078_p7 }
 0x491   : > { %p11084_p12 = pnand %p11083_p11, %p11079_p8 }
 0x493   : > { %11087 = shalt.err (!%p11084_p12)
}
 0x494   : > { %s11166_s21 = smov 128   ;;  %s15363_s8 = scalar_lea.sflag [#allocation5], %s14600_s20  ;;  %v8175_v55 = vcombine.high %v7919_v36, %v7919_v36  ;;  %v8182_v27 = vrot.slane %v7919_v36, %v14650_v11  ;;  %v8192_v30 = vcombine.high %v7920_v50, %v7920_v50  ;;  %v8199_v20 = vrot.slane %v7920_v50, %v14650_v11 }
 0x495   : > { %10226 = dma.vmem_to_hbm [thread:$0]  (%p11246_p5), %s14961_s22, 4096, %s14958_s23, %s15363_s8, %s11166_s21, %s11166_s21, %s11156_s19   ;;  %v8816_v52 = vrot.slane %v8520_v1, %v14658_v58  ;;  %v8902_v37 = vsel %vm8857_vm14, %v8808_v15, %v8901_v35 }
 0x496   : > { %v8903_v44 = vsel %vm8859_vm15, %v8812_v63, %v8902_v37  ;;  %v8189_v3 = vrot.slane %v8175_v55, %v14650_v11  ;;  %v8190_v28 = vcombine.high %v8182_v27, %v8182_v27  ;;  %v9452_v48 = vrot.slane %v8182_v27, 9  ;;  %s9503_s22 = sshll.u32 %s11229_s28, 10  ;;  %s8963_s23 = sshll.u32 %s14707_s17, 4  ;;  %s15026_s23 = int_to_ptr.vmem [resolvable:$true] %s8963_s23 }
 0x497   : > { %v8904_v62 = vsel %vm8861_vm1, %v8816_v52, %v8903_v44  ;;  %v8206_v33 = vrot.slane %v8192_v30, %v14650_v11  ;;  %v8207_v57 = vcombine.high %v8199_v20, %v8199_v20  ;;  %v9456_v6 = vrot.slane %v8199_v20, 9  ;;  %s15024_s13 = scalar_lea.hbm %s15078_s7, %s9503_s22  ;;  %s8934_s28 = scalar_lea.sflag [#allocation7], %s14600_s20 }
 0x498   : > { %8926 = vst [vmem:[%s14707_s17 + $0x30] sm:$0xff] %v8904_v62  ;;  %v8191_v45 = vcombine.high %v8189_v3, %v8189_v3  ;;  %v9453_v61 = vrot.slane %v8190_v28, 9  ;;  %v9454_v60 = vrot.slane %v8189_v3, 9  ;;  %v8521_v56 = vmax.f32 %v8182_v27, %v9452_v48  ;;  %s11088_s29 = scalar_lea.vmem %s15026_s23, 1024  ;;  %s11167_s16 = smov [#allocation6]  }
 0x499   : > { %v8208_v26 = vcombine.high %v8206_v33, %v8206_v33  ;;  %v9457_v21 = vrot.slane %v8207_v57, 9  ;;  %v9458_v29 = vrot.slane %v8206_v33, 9  ;;  %v8525_v32 = vmax.f32 %v8199_v20, %v9456_v6  ;;  %p11089_p13 = scmp.ne.s32.totalorder %s15026_s23, %s11088_s29  ;;  %s11092_s9 = sshll.u32 %s11167_s16, 4  ;;  %s11093_s9 = int_to_ptr.vmem [resolvable:$false] %s11092_s9 }
 0x49a   : > { %v9455_v23 = vrot.slane %v8191_v45, 9  ;;  %v8522_v19 = vmax.f32 %v8190_v28, %v9453_v61  ;;  %v8523_v34 = vmax.f32 %v8189_v3, %v9454_v60  ;;  %v8820_v49 = vrot.slane %v8521_v56, %v14658_v58  ;;  %s11094_s14 = scalar_lea.vmem %s11093_s9, 2048  ;;  %p11095_p2 = scmp.lt.s32.totalorder %s15026_s23, %s11093_s9 }
 0x49b   : > { %v9459_v25 = vrot.slane %v8208_v26, 9  ;;  %v8526_v46 = vmax.f32 %v8207_v57, %v9457_v21  ;;  %v8527_v8 = vmax.f32 %v8206_v33, %v9458_v29  ;;  %v8836_v14 = vrot.slane %v8525_v32, %v14658_v58  ;;  %p11090_p0 = pnand %p11089_p13, %p11246_p5  ;;  %p11096_p3 = scmp.lt.s32.totalorder %s11094_s14, %s11088_s29 }
 0x49c   : > { %v8524_v11 = vmax.f32 %v8191_v45, %v9455_v23  ;;  %v8824_v0 = vrot.slane %v8522_v19, %v14658_v58  ;;  %v8828_v5 = vrot.slane %v8523_v34, %v14658_v58 }
 0x49d   : > { %v8528_v22 = vmax.f32 %v8208_v26, %v9459_v25  ;;  %v8840_v41 = vrot.slane %v8526_v46, %v14658_v58  ;;  %v8844_v18 = vrot.slane %v8527_v8, %v14658_v58  ;;  %p11091_p1 = pneg %p11090_p0  ;;  %p11097_p4 = por %p11096_p3, %p11095_p2 }
 0x49e   : > { %v8832_v38 = vrot.slane %v8524_v11, %v14658_v58  ;;  %v8905_v59 = vsel %vm8849_vm9, %v8824_v0, %v8820_v49 }
 0x49f   : > { %v8906_v13 = vsel %vm8851_vm10, %v8828_v5, %v8905_v59  ;;  %v8848_v24 = vrot.slane %v8528_v22, %v14658_v58  ;;  %p11098_p7 = pnand %p11097_p4, %p11091_p1 }
 0x4a0   : > { %v8907_v39 = vsel %vm8853_vm11, %v8832_v38, %v8906_v13 }
 0x4a1   : > { %v8908_v47 = vsel %vm8855_vm13, %v8836_v14, %v8907_v39 }
 0x4a2   : > { %v8909_v43 = vsel %vm8857_vm14, %v8840_v41, %v8908_v47 }
 0x4a3   : > { %v8910_v54 = vsel %vm8859_vm15, %v8844_v18, %v8909_v43 }
 0x4a4   : > { %v8911_v58 = vsel %vm8861_vm1, %v8848_v24, %v8910_v54 }
 0x4a5   : > { %8927 = vst [vmem:[%s14707_s17 + $0x38] sm:$0xff] %v8911_v58 }
 0x4a6   : > { %11101 = shalt.err (!%p11098_p7)
}
 0x4a7   : > { %s11102_s17 = scalar_lea.hbm %s15024_s13, 1024  ;;  %s11106_s22 = scalar_lea.hbm %s15078_s7, 2048 }
 0x4a8   : > { %p11103_p8 = scmp.ne.s32.totalorder %s15024_s13, %s11102_s17  ;;  %p11107_p11 = scmp.lt.s32.totalorder %s15024_s13, %s15078_s7 }
 0x4a9   : > { %p11108_p12 = scmp.lt.s32.totalorder %s11106_s22, %s11102_s17 }
 0x4aa   : > { %p11104_p9 = pnand %p11103_p8, %p11246_p5 }
 0x4ab   : > { %p11109_p13 = por %p11108_p12, %p11107_p11 }
 0x4ac   : > { %p11105_p10 = pneg %p11104_p9 }
 0x4ae   : > { %p11110_p0 = pnand %p11109_p13, %p11105_p10 }
 0x4b0   : > { %11113 = shalt.err (!%p11110_p0)
}
 0x4b1   : > { %10227 = dma.vmem_to_hbm [thread:$0]  (%p11246_p5), %s15026_s23, 1024, %s15024_s13, %s8934_s28, %s11166_s21, %s11166_s21, %s11156_s19  }
 0x4b2 PF: > { %p10237_p1 = scmp.ge.s32.totalorder %s11152_s27, 2  ;;  %s8978_s29 = sand.u32 1, %s11140_s24  }
 0x4b3   : > { %s8979_s16 = scalar_lea.sflag [#allocation5], %s8978_s29 }
 0x4b4   : > { %p10231_p2 = pnand %p10237_p1, %p11250_p6 }
 0x4b6   : > { %p10232_p3 = pneg %p10231_p2 }
 0x4b8   : > { %11131 = dma.done.wait (%p10232_p3), %s8979_s16, 4096  }
 0x4b9   : > { %11133 = vsyncadd (%p10232_p3), %s8979_s16, 4294963200  ;;  %s8988_s9 = scalar_lea.sflag [#allocation7], %s8978_s29 }
 0x4ba   : > { %11135 = dma.done.wait (%p10232_p3), %s8988_s9, 1024  }
 0x4bb   : > { %11137 = vsyncadd (%p10232_p3), %s8988_s9, 4294966272  ;;  %p21_p5 = scmp.ge.s32.totalorder %s11233_s30, 4   ;;  %s15364_s24 = smov %s11144_s25 }
 0x4bc   : > { %s15365_s25 = smov %s11148_s26  ;;  %s15366_s26 = smov %s11244_s10 }
 0x4bd   : > { %s15367_s27 = smov %s11233_s30  ;;  %23 = sbr.rel (!%p21_p5) target bundleno = 5 (0x5), region = 105 }
 0x4c2   :  { %8993 = vsyncpa [#allocation5], 1 }
 0x4c3   :  { %8995 = vsyncpa [#allocation5 + $0x1], 1 }
 0x4c4   :  { %8996 = vsyncpa [#allocation7], 1 }
 0x4c5   :  { %8998 = vsyncpa [#allocation7 + $0x1], 1 }

</bundles_post_ra>
